<compile_context>
chip_gen: v7x
topology: tpu7x:2x2x1
jax: 0.10.0
libtpu: 0.0.40
codegen_flags: <defaults>
</compile_context>

<pallas_src>
import jax
import jax.numpy as jnp
from jax.experimental import pallas as pl
from jax.experimental.pallas import tpu as pltpu

_EPS = 1e-5


# --------------------------- hardware detection -----------------------------

def _detect_hw():
    """(vmem_limit_bytes, two_tensorcores): generation-aware defaults.

    v7x-class parts have ~64 MiB VMEM per TensorCore and 2 TCs per chip, so we
    cap the scoped-VMEM request at 32 MiB and expose >= 2 parallel M blocks.
    128-MiB parts (v5e / v6e) get a 96 MiB limit so K stays fully resident.
    """
    kind = ""
    vmem_cap = 0
    try:
        kind = jax.devices()[0].device_kind.lower()
    except Exception:
        pass
    try:
        vmem_cap = int(getattr(pltpu.get_tpu_info(), "vmem_capacity_bytes", 0))
    except Exception:
        vmem_cap = 0
    small_vmem = ("v7" in kind) or ("7x" in kind) or (0 < vmem_cap <= 80 * 2**20)
    two_cores = small_vmem or any(t in kind for t in ("v4", "v5p"))
    vmem_limit = (32 if small_vmem else 96) * 2**20
    return vmem_limit, two_cores


_VMEM_LIMIT, _TWO_CORES = _detect_hw()


# ----------------------------- tiling helpers -------------------------------

def _round_up(x, m):
    return ((x + m - 1) // m) * m


def _largest_divisor(m, step, cap):
    cap = min(cap, m)
    best = None
    for t in range(step, cap + 1, step):
        if m % t == 0:
            best = t
    return best


def _pick_row_tile(m, cap, dtype):
    """Row (sublane) tile: multiple of 16 for bf16 (16 rows/vreg), else 8.
    Only halve to expose >= 2 parallel blocks on 2-TensorCore parts."""
    step = 16 if dtype == jnp.bfloat16 else 8
    if _TWO_CORES and m >= 2 * step:
        cap = min(cap, m // 2)
    t = _largest_divisor(m, step, cap)
    if t is None and step == 16:
        t = _largest_divisor(m, 8, cap)
    return t if t is not None else m


def _pick_lane_tile(m, cap):
    """Lane tile: multiple of 128 so stores stay lane-dense."""
    if _TWO_CORES and m >= 256:
        cap = min(cap, m // 2)
    t = _largest_divisor(m, 128, cap)
    return t if t is not None else m


# ----------------------------- Pallas kernels -------------------------------

def _mm_stats_kernel(a_ref, b_ref, o_ref, ssum_ref, ssq_ref):
    """K-resident GEMM tile: bf16 x bf16 -> f32 accumulate -> bf16 store.
    BatchNorm per-tile column sum / sum-of-squares are emitted from the f32
    result (no extra read of the activation, no scratch accumulator)."""
    r = jnp.dot(a_ref[...], b_ref[...], preferred_element_type=jnp.float32)
    o_ref[...] = r.astype(o_ref.dtype)
    ssum_ref[0] = jnp.sum(r, axis=0, keepdims=True)
    ssq_ref[0] = jnp.sum(r * r, axis=0, keepdims=True)


def _mm_stats_acc_kernel(a_ref, b_ref, o_ref, ssum_ref, ssq_ref, acc_ref):
    """Fallback when K must be split: classic accumulator over the K grid."""
    @pl.when(pl.program_id(1) == 0)
    def _():
        acc_ref[...] = jnp.zeros_like(acc_ref)

    acc_ref[...] += jnp.dot(a_ref[...], b_ref[...],
                            preferred_element_type=jnp.float32)

    @pl.when(pl.program_id(1) == pl.num_programs(1) - 1)
    def _():
        r = acc_ref[...]
        o_ref[...] = r.astype(o_ref.dtype)
        ssum_ref[0] = jnp.sum(r, axis=0, keepdims=True)
        ssq_ref[0] = jnp.sum(r * r, axis=0, keepdims=True)


def pallas_matmul_bn_stats(a, b, *, tm_cap=512):
    """(M, K) bf16 @ (K, n_cols) bf16 -> bf16 (M, n_cols) plus per-row-tile
    f32 column sum / sum-sq partials, each (M_tiles, 1, n_cols)."""
    M, K = a.shape
    K2, n_cols = b.shape
    assert K == K2 and K % 128 == 0
    tm = _pick_row_tile(M, tm_cap, a.dtype)
    grid_m = M // tm
    budget = int(0.7 * _VMEM_LIMIT)

    def working_set(tk):
        return (2 * tm * tk * 2 + 2 * tk * n_cols * 2      # A / B double buffers
                + 2 * tm * n_cols * 2                       # bf16 out buffers
                + tm * n_cols * 4 + 4 * n_cols * 4)         # acc + stats

    out_shape = (jax.ShapeDtypeStruct((M, n_cols), jnp.bfloat16),
                 jax.ShapeDtypeStruct((grid_m, 1, n_cols), jnp.float32),
                 jax.ShapeDtypeStruct((grid_m, 1, n_cols), jnp.float32))

    if working_set(K) <= budget:
        # K fully resident: one dot per tile, no scratch accumulator.
        out, ssum, ssq = pl.pallas_call(
            _mm_stats_kernel,
            out_shape=out_shape,
            grid_spec=pltpu.PrefetchScalarGridSpec(
                num_scalar_prefetch=0,
                grid=(grid_m,),
                in_specs=[pl.BlockSpec((tm, K), lambda i: (i, 0)),
                          pl.BlockSpec((K, n_cols), lambda i: (0, 0))],
                out_specs=[pl.BlockSpec((tm, n_cols), lambda i: (i, 0)),
                           pl.BlockSpec((1, 1, n_cols), lambda i: (i, 0, 0)),
                           pl.BlockSpec((1, 1, n_cols), lambda i: (i, 0, 0))]),
            compiler_params=pltpu.CompilerParams(
                dimension_semantics=("parallel",),
                vmem_limit_bytes=_VMEM_LIMIT),
        )(a, b)
    else:
        tk = None
        for t in range(128, K, 128):
            if K % t == 0 and working_set(t) <= budget:
                tk = t
        if tk is None:
            tk = 128
        out, ssum, ssq = pl.pallas_call(
            _mm_stats_acc_kernel,
            out_shape=out_shape,
            grid_spec=pltpu.PrefetchScalarGridSpec(
                num_scalar_prefetch=0,
                grid=(grid_m, K // tk),
                in_specs=[pl.BlockSpec((tm, tk), lambda i, k: (i, k)),
                          pl.BlockSpec((tk, n_cols), lambda i, k: (k, 0))],
                out_specs=[pl.BlockSpec((tm, n_cols), lambda i, k: (i, 0)),
                           pl.BlockSpec((1, 1, n_cols), lambda i, k: (i, 0, 0)),
                           pl.BlockSpec((1, 1, n_cols), lambda i, k: (i, 0, 0))],
                scratch_shapes=[pltpu.VMEM((tm, n_cols), jnp.float32)]),
            compiler_params=pltpu.CompilerParams(
                dimension_semantics=("parallel", "arbitrary"),
                vmem_limit_bytes=_VMEM_LIMIT),
        )(a, b)
    return out, ssum, ssq


def _mm_sigmoid_t_kernel(a_ref, b_ref, o_ref):
    r = jnp.dot(a_ref[...], b_ref[...], preferred_element_type=jnp.float32)
    # Exact sigmoid: the epilogue is not EUP-bound and this avoids injecting
    # approximation error into the network output.
    o_ref[...] = (1.0 / (1.0 + jnp.exp(-r))).astype(o_ref.dtype)


def pallas_matmul_sigmoid_t(a, b, *, tn_cap=2048):
    """(P, K) bf16 @ (K, M) bf16 -> (P, M) f32 with fused (exact) sigmoid.
    Transposed orientation: the big voxel axis M is the lane dimension, so
    stores stay lane-dense even when P = 8*nc is tiny.  No stats epilogue."""
    P, K = a.shape
    K2, M = b.shape
    assert K == K2
    tn = _pick_lane_tile(M, tn_cap)
    return pl.pallas_call(
        _mm_sigmoid_t_kernel,
        out_shape=jax.ShapeDtypeStruct((P, M), jnp.float32),
        grid_spec=pltpu.PrefetchScalarGridSpec(
            num_scalar_prefetch=0,
            grid=(M // tn,),
            in_specs=[pl.BlockSpec((P, K), lambda i: (0, 0)),
                      pl.BlockSpec((K, tn), lambda i: (0, i))],
            out_specs=pl.BlockSpec((P, tn), lambda i: (0, i))),
        compiler_params=pltpu.CompilerParams(
            dimension_semantics=("parallel",),
            vmem_limit_bytes=_VMEM_LIMIT),
    )(a, b)


def _scale_shift_relu_kernel(x_ref, sc_ref, sh_ref, o_ref):
    y = x_ref[...].astype(jnp.float32) * sc_ref[...] + sh_ref[...]
    o_ref[...] = jnp.maximum(y, 0.0).astype(o_ref.dtype)


def pallas_scale_shift_relu(x, scale, shift, *, tm_cap=1024):
    """Per-column scale/shift + ReLU, tiled & pipelined over rows, bf16 out.
    (BatchNorm statistics are folded into `scale`/`shift` by the caller.)"""
    M, C = x.shape
    tm = _pick_row_tile(M, tm_cap, x.dtype)
    return pl.pallas_call(
        _scale_shift_relu_kernel,
        out_shape=jax.ShapeDtypeStruct((M, C), jnp.bfloat16),
        grid_spec=pltpu.PrefetchScalarGridSpec(
            num_scalar_prefetch=0,
            grid=(M // tm,),
            in_specs=[pl.BlockSpec((tm, C), lambda i: (i, 0)),
                      pl.BlockSpec((1, C), lambda i: (0, 0)),
                      pl.BlockSpec((1, C), lambda i: (0, 0))],
            out_specs=pl.BlockSpec((tm, C), lambda i: (i, 0))),
        compiler_params=pltpu.CompilerParams(
            dimension_semantics=("parallel",),
            vmem_limit_bytes=_VMEM_LIMIT),
    )(x, scale.astype(jnp.float32), shift.astype(jnp.float32))


# ------------------- sub-pixel ConvTranspose3d formulation ------------------

def _subpixel_weight_matrix(w, k_pad):
    """PyTorch ConvTranspose3d(k=4, s=2, p=1) weight (Cin, Cout, 4, 4, 4) ->
    (k_pad, 8*Cout).  Row block s = a*9+b*3+c is the padded-input tap at
    offset (a, b, c) of the 3x3x3 neighbourhood; column block p = pd*4+ph*2+pw
    is the output parity class.  Per axis a tap offset `a` contributes to
    parity `p` iff a - p in {0, 1}, with kernel index 3 + p - 2a.  Rows are
    zero-padded to a 128-aligned K."""
    cin, cout = w.shape[0], w.shape[1]
    zero = jnp.zeros((cin, cout), w.dtype)
    rows = []
    for a in range(3):
        for b in range(3):
            for c in range(3):
                cols = []
                for pd in range(2):
                    for ph in range(2):
                        for pw in range(2):
                            if (0 <= a - pd <= 1 and 0 <= b - ph <= 1
                                    and 0 <= c - pw <= 1):
                                blk = w[:, :, 3 + pd - 2 * a,
                                              3 + ph - 2 * b,
                                              3 + pw - 2 * c]
                            else:
                                blk = zero
                            cols.append(blk)
                rows.append(jnp.concatenate(cols, axis=1))   # (Cin, 8*Cout)
    m = jnp.concatenate(rows, axis=0)                        # (27*Cin, 8*Cout)
    if k_pad > m.shape[0]:
        m = jnp.pad(m, ((0, k_pad - m.shape[0]), (0, 0)))
    return m


def _tap_views(x):
    N, D, H, W, _ = x.shape
    xp = jnp.pad(x, ((0, 0), (1, 1), (1, 1), (1, 1), (0, 0)))
    return [xp[:, a:a + D, b:b + H, c:c + W, :]
            for a in range(3) for b in range(3) for c in range(3)]


def _neighborhood_patches(x, k_pad):
    """(N,D,H,W,Cin) -> (N*D*H*W, k_pad): zero-padded 3x3x3 neighbourhood of
    every input voxel, tap-major / channel-minor columns, 128-aligned K."""
    N, D, H, W, Cin = x.shape
    x27 = jnp.stack(_tap_views(x), axis=-2)          # (N,D,H,W,27,Cin)
    x27 = x27.reshape(N * D * H * W, 27 * Cin)
    if k_pad > 27 * Cin:
        x27 = jnp.pad(x27, ((0, 0), (0, k_pad - 27 * Cin)))
    return x27


def _neighborhood_patches_t(x, k_pad):
    """(N,D,H,W,Cin) -> (k_pad, N*D*H*W): transposed patches (voxels on the
    lane axis) for the lane-dense final layer."""
    N, D, H, W, Cin = x.shape
    x27 = jnp.stack(_tap_views(x), axis=0)           # (27,N,D,H,W,Cin)
    x27 = jnp.moveaxis(x27, -1, 1)                   # (27,Cin,N,D,H,W)
    x27 = x27.reshape(27 * Cin, N * D * H * W)
    if k_pad > 27 * Cin:
        x27 = jnp.pad(x27, ((0, k_pad - 27 * Cin), (0, 0)))
    return x27


def _upconv_bn_relu(x, w, gamma, beta):
    """ConvTranspose3d(4,2,1) + BatchNorm3d (batch stats) + ReLU, bf16 out,
    channel-last (N, 2D, 2H, 2W, Cout)."""
    N, D, H, W, Cin = x.shape
    Cout = w.shape[1]
    k_pad = _round_up(27 * Cin, 128)
    # TODO(synk): the 27x tap slab below is still materialised by XLA; an
    # in-kernel tap gather would remove ~54x activation bytes of HBM traffic.
    a = _neighborhood_patches(x.astype(jnp.bfloat16), k_pad)
    bmat = _subpixel_weight_matrix(w, k_pad).astype(jnp.bfloat16)
    y, ssum, ssq = pallas_matmul_bn_stats(a, bmat)

    cnt = float(N * D * H * W * 8)                   # output voxels / channel
    s = ssum.reshape(-1, 8, Cout).sum(axis=(0, 1))
    q = ssq.reshape(-1, 8, Cout).sum(axis=(0, 1))
    mean = s / cnt
    # clamp: E[x^2] - E[x]^2 in f32 can go slightly negative from cancellation
    var = jnp.maximum(q / cnt - mean * mean, 0.0)
    scale = gamma * jax.lax.rsqrt(var + _EPS)
    shift = beta - mean * scale
    yb = pallas_scale_shift_relu(y, jnp.tile(scale, 8)[None, :],
                                 jnp.tile(shift, 8)[None, :])
    # TODO(synk): parity interleave is an XLA transpose (~2x activation bytes)
    # that only exists to feed the next layer's patch gather.
    yb = yb.reshape(N, D, H, W, 2, 2, 2, Cout)
    yb = jnp.transpose(yb, (0, 1, 4, 2, 5, 3, 6, 7))
    return yb.reshape(N, 2 * D, 2 * H, 2 * W, Cout)


def _upconv_sigmoid(x, w):
    """Final ConvTranspose3d(4,2,1) + Sigmoid as a transposed GEMM so the
    stored last dim is the (large) voxel axis instead of 8*nc.  NCDHW f32."""
    N, D, H, W, Cin = x.shape
    nc = w.shape[1]
    k_pad = _round_up(27 * Cin, 128)
    bmat = _neighborhood_patches_t(x.astype(jnp.bfloat16), k_pad)     # (K, M)
    amat = jnp.transpose(_subpixel_weight_matrix(w, k_pad)).astype(jnp.bfloat16)
    y = pallas_matmul_sigmoid_t(amat, bmat)                           # (8nc, M)
    y = y.reshape(2, 2, 2, nc, N, D, H, W)
    y = jnp.transpose(y, (4, 3, 5, 0, 6, 1, 7, 2))   # (N, nc, D,pd, H,ph, W,pw)
    return y.reshape(N, nc, 2 * D, 2 * H, 2 * W)


# ------------------------------- forward pass -------------------------------

def generator_forward(params, z):
    (w1, g1, b1), (w2, g2, b2), (w3, g3, b3), w4 = params
    N, nz = z.shape[0], z.shape[1]
    zf = z.reshape(N, nz).astype(jnp.float32)

    # Layer 1: ConvTranspose3d(nz, 8*ngf, 4, 1, 0) on a 1x1x1 input == a tiny
    # dense matmul; left to XLA (Pallas only adds launch overhead here).
    C1 = w1.shape[1]
    w1m = jnp.transpose(w1, (0, 2, 3, 4, 1)).reshape(nz, 64 * C1)
    x = jnp.dot(zf, w1m, preferred_element_type=jnp.float32)   # (N, 64*C1)
    x = x.reshape(N * 64, C1)
    mean = jnp.mean(x, axis=0)
    var = jnp.mean(jnp.square(x - mean), axis=0)   # centered -> no cancellation
    scale = g1 * jax.lax.rsqrt(var + _EPS)
    shift = b1 - mean * scale
    x = pallas_scale_shift_relu(x, scale[None, :], shift[None, :])   # bf16
    x = x.reshape(N, 4, 4, 4, C1)

    x = _upconv_bn_relu(x, w2, g2, b2)      # (N,  8,  8,  8, 4*ngf) bf16
    x = _upconv_bn_relu(x, w3, g3, b3)      # (N, 16, 16, 16, 2*ngf) bf16
    return _upconv_sigmoid(x, w4)           # (N, nc, 32, 32, 32)    f32


# ----------------- independent reference (lax conv, f32) --------------------

def _ref_convtranspose3d(x, w, stride, pad):
    k = w.shape[2]
    wf = jnp.transpose(jnp.flip(w, axis=(2, 3, 4)), (1, 0, 2, 3, 4))
    return jax.lax.conv_general_dilated(
        x, wf, window_strides=(1, 1, 1),
        padding=[(k - 1 - pad, k - 1 - pad)] * 3,
        lhs_dilation=(stride, stride, stride),
        dimension_numbers=("NCDHW", "OIDHW", "NCDHW"))


def _ref_bn_relu(x, gamma, beta):
    mean = jnp.mean(x, axis=(0, 2, 3, 4), keepdims=True)
    var = jnp.mean(jnp.square(x - mean), axis=(0, 2, 3, 4), keepdims=True)
    y = (x - mean) * jax.lax.rsqrt(var + _EPS)
    return jnp.maximum(y * gamma.reshape(1, -1, 1, 1, 1)
                       + beta.reshape(1, -1, 1, 1, 1), 0.0)


def _ref_generator(params, z):
    (w1, g1, b1), (w2, g2, b2), (w3, g3, b3), w4 = params
    x = _ref_convtranspose3d(z, w1, 1, 0)
    x = _ref_bn_relu(x, g1, b1)
    x = _ref_convtranspose3d(x, w2, 2, 1)
    x = _ref_bn_relu(x, g2, b2)
    x = _ref_convtranspose3d(x, w3, 2, 1)
    x = _ref_bn_relu(x, g3, b3)
    x = _ref_convtranspose3d(x, w4, 2, 1)
    return jax.nn.sigmoid(x)


# ----------------------------------- main ------------------------------------

if __name__ == "__main__":
    # Small instantiation of Generator(ngpu=1, nz=8, ngf=4, nc=1), batch=2.
    N, nz, ngf, nc = 2, 8, 4, 1
    ks = jax.random.split(jax.random.PRNGKey(0), 11)

    def nrm(k, shape, s=0.02):
        return (s * jax.random.normal(k, shape)).astype(jnp.float32)

    w1 = nrm(ks[0], (nz, ngf * 8, 4, 4, 4))
    g1 = 1.0 + nrm(ks[1], (ngf * 8,)); b1 = nrm(ks[2], (ngf * 8,))
    w2 = nrm(ks[3], (ngf * 8, ngf * 4, 4, 4, 4))
    g2 = 1.0 + nrm(ks[4], (ngf * 4,)); b2 = nrm(ks[5], (ngf * 4,))
    w3 = nrm(ks[6], (ngf * 4, ngf * 2, 4, 4, 4))
    g3 = 1.0 + nrm(ks[7], (ngf * 2,)); b3 = nrm(ks[8], (ngf * 2,))
    w4 = nrm(ks[9], (ngf * 2, nc, 4, 4, 4))
    params = ((w1, g1, b1), (w2, g2, b2), (w3, g3, b3), w4)

    z = jax.random.normal(ks[10], (N, nz, 1, 1, 1), dtype=jnp.float32)

    fwd = jax.jit(generator_forward)
    out = jax.block_until_ready(fwd(params, z))
    assert out.shape == (N, nc, 32, 32, 32), out.shape
    assert bool(jnp.isfinite(out).all())

    ref = jax.block_until_ready(_ref_generator(params, z))
    err = float(jnp.max(jnp.abs(out - ref)))
    # bf16 MXU operands / bf16 intermediates vs a pure-f32 reference.
    assert err < 2e-2, err

    print("KERNEL_OK")
</pallas_src>

<mosaic_0001>
module attributes {stable_mosaic.version = 11 : i64} {
  func.func @_scale_shift_relu_kernel(%arg0: i32, %arg1: memref<128x32xf32, #tpu.memory_space<vmem>>, %arg2: memref<1x32xf32, #tpu.memory_space<vmem>>, %arg3: memref<1x32xf32, #tpu.memory_space<vmem>>, %arg4: memref<128x32xbf16, #tpu.memory_space<vmem>>) attributes {dimension_semantics = [#tpu.dimension_semantics<parallel>], iteration_bounds = array<i64: 1>, scalar_prefetch = 0 : i64, scratch_operands = 0 : i64, tpu.core_type = #tpu.core_type<tc>, window_params = [{transform_indices = @transform_0, window_bounds = array<i64: 128, 32>}, {pipeline_mode = #tpu.pipeline_mode<synchronous>, transform_indices = @transform_1, window_bounds = array<i64: 1, 32>}, {pipeline_mode = #tpu.pipeline_mode<synchronous>, transform_indices = @transform_2, window_bounds = array<i64: 1, 32>}, {transform_indices = @transform_3, window_bounds = array<i64: 128, 32>}]} {
    %c0 = arith.constant 0 : index
    %c0_0 = arith.constant 0 : index
    %0 = vector.load %arg1[%c0, %c0_0] : memref<128x32xf32, #tpu.memory_space<vmem>>, vector<128x32xf32>
    %c0_1 = arith.constant 0 : index
    %c0_2 = arith.constant 0 : index
    %1 = vector.load %arg2[%c0_1, %c0_2] : memref<1x32xf32, #tpu.memory_space<vmem>>, vector<1x32xf32>
    %2 = vector.broadcast %1 : vector<1x32xf32> to vector<128x32xf32>
    %3 = arith.mulf %0, %2 : vector<128x32xf32>
    %c0_3 = arith.constant 0 : index
    %c0_4 = arith.constant 0 : index
    %4 = vector.load %arg3[%c0_3, %c0_4] : memref<1x32xf32, #tpu.memory_space<vmem>>, vector<1x32xf32>
    %5 = vector.broadcast %4 : vector<1x32xf32> to vector<128x32xf32>
    %6 = arith.addf %3, %5 : vector<128x32xf32>
    %cst = arith.constant 0.000000e+00 : f32
    %7 = vector.broadcast %cst : f32 to vector<128x32xf32>
    %8 = arith.maximumf %6, %7 : vector<128x32xf32>
    %9 = arith.truncf %8 : vector<128x32xf32> to vector<128x32xbf16>
    %c0_5 = arith.constant 0 : index
    %c0_6 = arith.constant 0 : index
    %10 = vector.load %arg4[%c0_5, %c0_6] : memref<128x32xbf16, #tpu.memory_space<vmem>>, vector<128x32xbf16>
    tpu.vector_store %arg4[%c0_5, %c0_6], %9 {strides = array<i32>} : memref<128x32xbf16, #tpu.memory_space<vmem>>, vector<128x32xbf16>,
    return
  }
  func.func @transform_0(%arg0: i32) -> (i32, i32) {
    %c0_i32 = arith.constant 0 : i32
    %c0_i32_0 = arith.constant 0 : i32
    return %arg0, %c0_i32 : i32, i32
  }
  func.func @transform_1(%arg0: i32) -> (i32, i32) {
    %c0_i32 = arith.constant 0 : i32
    %c0_i32_0 = arith.constant 0 : i32
    %c0_i32_1 = arith.constant 0 : i32
    return %c0_i32, %c0_i32_0 : i32, i32
  }
  func.func @transform_2(%arg0: i32) -> (i32, i32) {
    %c0_i32 = arith.constant 0 : i32
    %c0_i32_0 = arith.constant 0 : i32
    %c0_i32_1 = arith.constant 0 : i32
    return %c0_i32, %c0_i32_0 : i32, i32
  }
  func.func @transform_3(%arg0: i32) -> (i32, i32) {
    %c0_i32 = arith.constant 0 : i32
    %c0_i32_0 = arith.constant 0 : i32
    return %arg0, %c0_i32 : i32, i32
  }
}

module attributes {stable_mosaic.version = 11 : i64} {
  func.func @_mm_stats_kernel(%arg0: i32, %arg1: memref<128x896xbf16, #tpu.memory_space<vmem>>, %arg2: memref<896x128xbf16, #tpu.memory_space<vmem>>, %arg3: memref<128x128xbf16, #tpu.memory_space<vmem>>, %arg4: memref<1x1x128xf32, #tpu.memory_space<vmem>>, %arg5: memref<1x1x128xf32, #tpu.memory_space<vmem>>) attributes {dimension_semantics = [#tpu.dimension_semantics<parallel>], iteration_bounds = array<i64: 1>, scalar_prefetch = 0 : i64, scratch_operands = 0 : i64, tpu.core_type = #tpu.core_type<tc>, window_params = [{transform_indices = @transform_0, window_bounds = array<i64: 128, 896>}, {pipeline_mode = #tpu.pipeline_mode<synchronous>, transform_indices = @transform_1, window_bounds = array<i64: 896, 128>}, {transform_indices = @transform_2, window_bounds = array<i64: 128, 128>}, {transform_indices = @transform_3, window_bounds = array<i64: 1, 1, 128>}, {transform_indices = @transform_4, window_bounds = array<i64: 1, 1, 128>}]} {
    %c0 = arith.constant 0 : index
    %c0_0 = arith.constant 0 : index
    %0 = vector.load %arg1[%c0, %c0_0] : memref<128x896xbf16, #tpu.memory_space<vmem>>, vector<128x896xbf16>
    %c0_1 = arith.constant 0 : index
    %c0_2 = arith.constant 0 : index
    %1 = vector.load %arg2[%c0_1, %c0_2] : memref<896x128xbf16, #tpu.memory_space<vmem>>, vector<896x128xbf16>
    %cst = arith.constant dense<0.000000e+00> : vector<128x128xf32>
    %2 = tpu.matmul %0, %1, %cst {dimension_numbers = #tpu.dot_dimension_numbers<[1], [0], [0], [1], [0, 0, 1, 1], [], []>} : vector<128x896xbf16>, vector<896x128xbf16>, vector<128x128xf32> -> vector<128x128xf32>
    %3 = arith.truncf %2 : vector<128x128xf32> to vector<128x128xbf16>
    %c0_3 = arith.constant 0 : index
    %c0_4 = arith.constant 0 : index
    %4 = vector.load %arg3[%c0_3, %c0_4] : memref<128x128xbf16, #tpu.memory_space<vmem>>, vector<128x128xbf16>
    tpu.vector_store %arg3[%c0_3, %c0_4], %3 {strides = array<i32>} : memref<128x128xbf16, #tpu.memory_space<vmem>>, vector<128x128xbf16>,
    %cst_5 = arith.constant dense<0.000000e+00> : vector<128xf32>
    %5 = vector.multi_reduction <add>, %2, %cst_5 [0] : vector<128x128xf32> to vector<128xf32>
    %6 = vector.shape_cast %5 : vector<128xf32> to vector<1x128xf32>
    %c0_6 = arith.constant 0 : index
    %c0_7 = arith.constant 0 : index
    %c0_8 = arith.constant 0 : index
    %7 = vector.load %arg4[%c0_6, %c0_7, %c0_8] : memref<1x1x128xf32, #tpu.memory_space<vmem>>, vector<1x1x128xf32>
    %8 = vector.shape_cast %7 : vector<1x1x128xf32> to vector<1x128xf32>
    %9 = vector.shape_cast %6 : vector<1x128xf32> to vector<1x1x128xf32>
    tpu.vector_store %arg4[%c0_6, %c0_7, %c0_8], %9 {strides = array<i32>} : memref<1x1x128xf32, #tpu.memory_space<vmem>>, vector<1x1x128xf32>,
    %10 = arith.mulf %2, %2 : vector<128x128xf32>
    %cst_9 = arith.constant dense<0.000000e+00> : vector<128xf32>
    %11 = vector.multi_reduction <add>, %10, %cst_9 [0] : vector<128x128xf32> to vector<128xf32>
    %12 = vector.shape_cast %11 : vector<128xf32> to vector<1x128xf32>
    %c0_10 = arith.constant 0 : index
    %c0_11 = arith.constant 0 : index
    %c0_12 = arith.constant 0 : index
    %13 = vector.load %arg5[%c0_10, %c0_11, %c0_12] : memref<1x1x128xf32, #tpu.memory_space<vmem>>, vector<1x1x128xf32>
    %14 = vector.shape_cast %13 : vector<1x1x128xf32> to vector<1x128xf32>
    %15 = vector.shape_cast %12 : vector<1x128xf32> to vector<1x1x128xf32>
    tpu.vector_store %arg5[%c0_10, %c0_11, %c0_12], %15 {strides = array<i32>} : memref<1x1x128xf32, #tpu.memory_space<vmem>>, vector<1x1x128xf32>,
    return
  }
  func.func @transform_0(%arg0: i32) -> (i32, i32) {
    %c0_i32 = arith.constant 0 : i32
    %c0_i32_0 = arith.constant 0 : i32
    return %arg0, %c0_i32 : i32, i32
  }
  func.func @transform_1(%arg0: i32) -> (i32, i32) {
    %c0_i32 = arith.constant 0 : i32
    %c0_i32_0 = arith.constant 0 : i32
    %c0_i32_1 = arith.constant 0 : i32
    return %c0_i32, %c0_i32_0 : i32, i32
  }
  func.func @transform_2(%arg0: i32) -> (i32, i32) {
    %c0_i32 = arith.constant 0 : i32
    %c0_i32_0 = arith.constant 0 : i32
    return %arg0, %c0_i32 : i32, i32
  }
  func.func @transform_3(%arg0: i32) -> (i32, i32, i32) {
    %c0_i32 = arith.constant 0 : i32
    %c0_i32_0 = arith.constant 0 : i32
    %c0_i32_1 = arith.constant 0 : i32
    return %arg0, %c0_i32, %c0_i32_0 : i32, i32, i32
  }
  func.func @transform_4(%arg0: i32) -> (i32, i32, i32) {
    %c0_i32 = arith.constant 0 : i32
    %c0_i32_0 = arith.constant 0 : i32
    %c0_i32_1 = arith.constant 0 : i32
    return %arg0, %c0_i32, %c0_i32_0 : i32, i32, i32
  }
}

module attributes {stable_mosaic.version = 11 : i64} {
  func.func @_scale_shift_relu_kernel(%arg0: i32, %arg1: memref<128x128xbf16, #tpu.memory_space<vmem>>, %arg2: memref<1x128xf32, #tpu.memory_space<vmem>>, %arg3: memref<1x128xf32, #tpu.memory_space<vmem>>, %arg4: memref<128x128xbf16, #tpu.memory_space<vmem>>) attributes {dimension_semantics = [#tpu.dimension_semantics<parallel>], iteration_bounds = array<i64: 1>, scalar_prefetch = 0 : i64, scratch_operands = 0 : i64, tpu.core_type = #tpu.core_type<tc>, window_params = [{transform_indices = @transform_0, window_bounds = array<i64: 128, 128>}, {pipeline_mode = #tpu.pipeline_mode<synchronous>, transform_indices = @transform_1, window_bounds = array<i64: 1, 128>}, {pipeline_mode = #tpu.pipeline_mode<synchronous>, transform_indices = @transform_2, window_bounds = array<i64: 1, 128>}, {transform_indices = @transform_3, window_bounds = array<i64: 128, 128>}]} {
    %c0 = arith.constant 0 : index
    %c0_0 = arith.constant 0 : index
    %0 = vector.load %arg1[%c0, %c0_0] : memref<128x128xbf16, #tpu.memory_space<vmem>>, vector<128x128xbf16>
    %1 = arith.extf %0 : vector<128x128xbf16> to vector<128x128xf32>
    %c0_1 = arith.constant 0 : index
    %c0_2 = arith.constant 0 : index
    %2 = vector.load %arg2[%c0_1, %c0_2] : memref<1x128xf32, #tpu.memory_space<vmem>>, vector<1x128xf32>
    %3 = vector.broadcast %2 : vector<1x128xf32> to vector<128x128xf32>
    %4 = arith.mulf %1, %3 : vector<128x128xf32>
    %c0_3 = arith.constant 0 : index
    %c0_4 = arith.constant 0 : index
    %5 = vector.load %arg3[%c0_3, %c0_4] : memref<1x128xf32, #tpu.memory_space<vmem>>, vector<1x128xf32>
    %6 = vector.broadcast %5 : vector<1x128xf32> to vector<128x128xf32>
    %7 = arith.addf %4, %6 : vector<128x128xf32>
    %cst = arith.constant 0.000000e+00 : f32
    %8 = vector.broadcast %cst : f32 to vector<128x128xf32>
    %9 = arith.maximumf %7, %8 : vector<128x128xf32>
    %10 = arith.truncf %9 : vector<128x128xf32> to vector<128x128xbf16>
    %c0_5 = arith.constant 0 : index
    %c0_6 = arith.constant 0 : index
    %11 = vector.load %arg4[%c0_5, %c0_6] : memref<128x128xbf16, #tpu.memory_space<vmem>>, vector<128x128xbf16>
    tpu.vector_store %arg4[%c0_5, %c0_6], %10 {strides = array<i32>} : memref<128x128xbf16, #tpu.memory_space<vmem>>, vector<128x128xbf16>,
    return
  }
  func.func @transform_0(%arg0: i32) -> (i32, i32) {
    %c0_i32 = arith.constant 0 : i32
    %c0_i32_0 = arith.constant 0 : i32
    return %arg0, %c0_i32 : i32, i32
  }
  func.func @transform_1(%arg0: i32) -> (i32, i32) {
    %c0_i32 = arith.constant 0 : i32
    %c0_i32_0 = arith.constant 0 : i32
    %c0_i32_1 = arith.constant 0 : i32
    return %c0_i32, %c0_i32_0 : i32, i32
  }
  func.func @transform_2(%arg0: i32) -> (i32, i32) {
    %c0_i32 = arith.constant 0 : i32
    %c0_i32_0 = arith.constant 0 : i32
    %c0_i32_1 = arith.constant 0 : i32
    return %c0_i32, %c0_i32_0 : i32, i32
  }
  func.func @transform_3(%arg0: i32) -> (i32, i32) {
    %c0_i32 = arith.constant 0 : i32
    %c0_i32_0 = arith.constant 0 : i32
    return %arg0, %c0_i32 : i32, i32
  }
}

module attributes {stable_mosaic.version = 11 : i64} {
  func.func @_mm_stats_kernel(%arg0: i32, %arg1: memref<512x512xbf16, #tpu.memory_space<vmem>>, %arg2: memref<512x64xbf16, #tpu.memory_space<vmem>>, %arg3: memref<512x64xbf16, #tpu.memory_space<vmem>>, %arg4: memref<1x1x64xf32, #tpu.memory_space<vmem>>, %arg5: memref<1x1x64xf32, #tpu.memory_space<vmem>>) attributes {dimension_semantics = [#tpu.dimension_semantics<parallel>], iteration_bounds = array<i64: 2>, scalar_prefetch = 0 : i64, scratch_operands = 0 : i64, tpu.core_type = #tpu.core_type<tc>, window_params = [{transform_indices = @transform_0, window_bounds = array<i64: 512, 512>}, {pipeline_mode = #tpu.pipeline_mode<synchronous>, transform_indices = @transform_1, window_bounds = array<i64: 512, 64>}, {transform_indices = @transform_2, window_bounds = array<i64: 512, 64>}, {transform_indices = @transform_3, window_bounds = array<i64: 1, 1, 64>}, {transform_indices = @transform_4, window_bounds = array<i64: 1, 1, 64>}]} {
    %c0 = arith.constant 0 : index
    %c0_0 = arith.constant 0 : index
    %0 = vector.load %arg1[%c0, %c0_0] : memref<512x512xbf16, #tpu.memory_space<vmem>>, vector<512x512xbf16>
    %c0_1 = arith.constant 0 : index
    %c0_2 = arith.constant 0 : index
    %1 = vector.load %arg2[%c0_1, %c0_2] : memref<512x64xbf16, #tpu.memory_space<vmem>>, vector<512x64xbf16>
    %cst = arith.constant dense<0.000000e+00> : vector<512x64xf32>
    %2 = tpu.matmul %0, %1, %cst {dimension_numbers = #tpu.dot_dimension_numbers<[1], [0], [0], [1], [0, 0, 1, 1], [], []>} : vector<512x512xbf16>, vector<512x64xbf16>, vector<512x64xf32> -> vector<512x64xf32>
    %3 = arith.truncf %2 : vector<512x64xf32> to vector<512x64xbf16>
    %c0_3 = arith.constant 0 : index
    %c0_4 = arith.constant 0 : index
    %4 = vector.load %arg3[%c0_3, %c0_4] : memref<512x64xbf16, #tpu.memory_space<vmem>>, vector<512x64xbf16>
    tpu.vector_store %arg3[%c0_3, %c0_4], %3 {strides = array<i32>} : memref<512x64xbf16, #tpu.memory_space<vmem>>, vector<512x64xbf16>,
    %cst_5 = arith.constant dense<0.000000e+00> : vector<64xf32>
    %5 = vector.multi_reduction <add>, %2, %cst_5 [0] : vector<512x64xf32> to vector<64xf32>
    %6 = vector.shape_cast %5 : vector<64xf32> to vector<1x64xf32>
    %c0_6 = arith.constant 0 : index
    %c0_7 = arith.constant 0 : index
    %c0_8 = arith.constant 0 : index
    %7 = vector.load %arg4[%c0_6, %c0_7, %c0_8] : memref<1x1x64xf32, #tpu.memory_space<vmem>>, vector<1x1x64xf32>
    %8 = vector.shape_cast %7 : vector<1x1x64xf32> to vector<1x64xf32>
    %9 = vector.shape_cast %6 : vector<1x64xf32> to vector<1x1x64xf32>
    tpu.vector_store %arg4[%c0_6, %c0_7, %c0_8], %9 {strides = array<i32>} : memref<1x1x64xf32, #tpu.memory_space<vmem>>, vector<1x1x64xf32>,
    %10 = arith.mulf %2, %2 : vector<512x64xf32>
    %cst_9 = arith.constant dense<0.000000e+00> : vector<64xf32>
    %11 = vector.multi_reduction <add>, %10, %cst_9 [0] : vector<512x64xf32> to vector<64xf32>
    %12 = vector.shape_cast %11 : vector<64xf32> to vector<1x64xf32>
    %c0_10 = arith.constant 0 : index
    %c0_11 = arith.constant 0 : index
    %c0_12 = arith.constant 0 : index
    %13 = vector.load %arg5[%c0_10, %c0_11, %c0_12] : memref<1x1x64xf32, #tpu.memory_space<vmem>>, vector<1x1x64xf32>
    %14 = vector.shape_cast %13 : vector<1x1x64xf32> to vector<1x64xf32>
    %15 = vector.shape_cast %12 : vector<1x64xf32> to vector<1x1x64xf32>
    tpu.vector_store %arg5[%c0_10, %c0_11, %c0_12], %15 {strides = array<i32>} : memref<1x1x64xf32, #tpu.memory_space<vmem>>, vector<1x1x64xf32>,
    return
  }
  func.func @transform_0(%arg0: i32) -> (i32, i32) {
    %c0_i32 = arith.constant 0 : i32
    %c0_i32_0 = arith.constant 0 : i32
    return %arg0, %c0_i32 : i32, i32
  }
  func.func @transform_1(%arg0: i32) -> (i32, i32) {
    %c0_i32 = arith.constant 0 : i32
    %c0_i32_0 = arith.constant 0 : i32
    %c0_i32_1 = arith.constant 0 : i32
    return %c0_i32, %c0_i32_0 : i32, i32
  }
  func.func @transform_2(%arg0: i32) -> (i32, i32) {
    %c0_i32 = arith.constant 0 : i32
    %c0_i32_0 = arith.constant 0 : i32
    return %arg0, %c0_i32 : i32, i32
  }
  func.func @transform_3(%arg0: i32) -> (i32, i32, i32) {
    %c0_i32 = arith.constant 0 : i32
    %c0_i32_0 = arith.constant 0 : i32
    %c0_i32_1 = arith.constant 0 : i32
    return %arg0, %c0_i32, %c0_i32_0 : i32, i32, i32
  }
  func.func @transform_4(%arg0: i32) -> (i32, i32, i32) {
    %c0_i32 = arith.constant 0 : i32
    %c0_i32_0 = arith.constant 0 : i32
    %c0_i32_1 = arith.constant 0 : i32
    return %arg0, %c0_i32, %c0_i32_0 : i32, i32, i32
  }
}

module attributes {stable_mosaic.version = 11 : i64} {
  func.func @_scale_shift_relu_kernel(%arg0: i32, %arg1: memref<1024x64xbf16, #tpu.memory_space<vmem>>, %arg2: memref<1x64xf32, #tpu.memory_space<vmem>>, %arg3: memref<1x64xf32, #tpu.memory_space<vmem>>, %arg4: memref<1024x64xbf16, #tpu.memory_space<vmem>>) attributes {dimension_semantics = [#tpu.dimension_semantics<parallel>], iteration_bounds = array<i64: 1>, scalar_prefetch = 0 : i64, scratch_operands = 0 : i64, tpu.core_type = #tpu.core_type<tc>, window_params = [{transform_indices = @transform_0, window_bounds = array<i64: 1024, 64>}, {pipeline_mode = #tpu.pipeline_mode<synchronous>, transform_indices = @transform_1, window_bounds = array<i64: 1, 64>}, {pipeline_mode = #tpu.pipeline_mode<synchronous>, transform_indices = @transform_2, window_bounds = array<i64: 1, 64>}, {transform_indices = @transform_3, window_bounds = array<i64: 1024, 64>}]} {
    %c0 = arith.constant 0 : index
    %c0_0 = arith.constant 0 : index
    %0 = vector.load %arg1[%c0, %c0_0] : memref<1024x64xbf16, #tpu.memory_space<vmem>>, vector<1024x64xbf16>
    %1 = arith.extf %0 : vector<1024x64xbf16> to vector<1024x64xf32>
    %c0_1 = arith.constant 0 : index
    %c0_2 = arith.constant 0 : index
    %2 = vector.load %arg2[%c0_1, %c0_2] : memref<1x64xf32, #tpu.memory_space<vmem>>, vector<1x64xf32>
    %3 = vector.broadcast %2 : vector<1x64xf32> to vector<1024x64xf32>
    %4 = arith.mulf %1, %3 : vector<1024x64xf32>
    %c0_3 = arith.constant 0 : index
    %c0_4 = arith.constant 0 : index
    %5 = vector.load %arg3[%c0_3, %c0_4] : memref<1x64xf32, #tpu.memory_space<vmem>>, vector<1x64xf32>
    %6 = vector.broadcast %5 : vector<1x64xf32> to vector<1024x64xf32>
    %7 = arith.addf %4, %6 : vector<1024x64xf32>
    %cst = arith.constant 0.000000e+00 : f32
    %8 = vector.broadcast %cst : f32 to vector<1024x64xf32>
    %9 = arith.maximumf %7, %8 : vector<1024x64xf32>
    %10 = arith.truncf %9 : vector<1024x64xf32> to vector<1024x64xbf16>
    %c0_5 = arith.constant 0 : index
    %c0_6 = arith.constant 0 : index
    %11 = vector.load %arg4[%c0_5, %c0_6] : memref<1024x64xbf16, #tpu.memory_space<vmem>>, vector<1024x64xbf16>
    tpu.vector_store %arg4[%c0_5, %c0_6], %10 {strides = array<i32>} : memref<1024x64xbf16, #tpu.memory_space<vmem>>, vector<1024x64xbf16>,
    return
  }
  func.func @transform_0(%arg0: i32) -> (i32, i32) {
    %c0_i32 = arith.constant 0 : i32
    %c0_i32_0 = arith.constant 0 : i32
    return %arg0, %c0_i32 : i32, i32
  }
  func.func @transform_1(%arg0: i32) -> (i32, i32) {
    %c0_i32 = arith.constant 0 : i32
    %c0_i32_0 = arith.constant 0 : i32
    %c0_i32_1 = arith.constant 0 : i32
    return %c0_i32, %c0_i32_0 : i32, i32
  }
  func.func @transform_2(%arg0: i32) -> (i32, i32) {
    %c0_i32 = arith.constant 0 : i32
    %c0_i32_0 = arith.constant 0 : i32
    %c0_i32_1 = arith.constant 0 : i32
    return %c0_i32, %c0_i32_0 : i32, i32
  }
  func.func @transform_3(%arg0: i32) -> (i32, i32) {
    %c0_i32 = arith.constant 0 : i32
    %c0_i32_0 = arith.constant 0 : i32
    return %arg0, %c0_i32 : i32, i32
  }
}

module attributes {stable_mosaic.version = 11 : i64} {
  func.func @_mm_sigmoid_t_kernel(%arg0: i32, %arg1: memref<8x256xbf16, #tpu.memory_space<vmem>>, %arg2: memref<256x2048xbf16, #tpu.memory_space<vmem>>, %arg3: memref<8x2048xf32, #tpu.memory_space<vmem>>) attributes {dimension_semantics = [#tpu.dimension_semantics<parallel>], iteration_bounds = array<i64: 4>, scalar_prefetch = 0 : i64, scratch_operands = 0 : i64, tpu.core_type = #tpu.core_type<tc>, window_params = [{pipeline_mode = #tpu.pipeline_mode<synchronous>, transform_indices = @transform_0, window_bounds = array<i64: 8, 256>}, {transform_indices = @transform_1, window_bounds = array<i64: 256, 2048>}, {transform_indices = @transform_2, window_bounds = array<i64: 8, 2048>}]} {
    %c0 = arith.constant 0 : index
    %c0_0 = arith.constant 0 : index
    %0 = vector.load %arg1[%c0, %c0_0] : memref<8x256xbf16, #tpu.memory_space<vmem>>, vector<8x256xbf16>
    %c0_1 = arith.constant 0 : index
    %c0_2 = arith.constant 0 : index
    %1 = vector.load %arg2[%c0_1, %c0_2] : memref<256x2048xbf16, #tpu.memory_space<vmem>>, vector<256x2048xbf16>
    %cst = arith.constant dense<0.000000e+00> : vector<8x2048xf32>
    %2 = tpu.matmul %0, %1, %cst {dimension_numbers = #tpu.dot_dimension_numbers<[1], [0], [0], [1], [0, 0, 1, 1], [], []>} : vector<8x256xbf16>, vector<256x2048xbf16>, vector<8x2048xf32> -> vector<8x2048xf32>
    %cst_3 = arith.constant 0.000000e+00 : f32
    %3 = vector.broadcast %cst_3 : f32 to vector<8x2048xf32>
    %4 = arith.subf %3, %2 : vector<8x2048xf32>
    %5 = math.exp %4 : vector<8x2048xf32>
    %cst_4 = arith.constant 1.000000e+00 : f32
    %6 = vector.broadcast %cst_4 : f32 to vector<8x2048xf32>
    %7 = arith.addf %6, %5 : vector<8x2048xf32>
    %cst_5 = arith.constant 1.000000e+00 : f32
    %8 = vector.broadcast %cst_5 : f32 to vector<8x2048xf32>
    %9 = arith.divf %8, %7 : vector<8x2048xf32>
    %c0_6 = arith.constant 0 : index
    %c0_7 = arith.constant 0 : index
    %10 = vector.load %arg3[%c0_6, %c0_7] : memref<8x2048xf32, #tpu.memory_space<vmem>>, vector<8x2048xf32>
    tpu.vector_store %arg3[%c0_6, %c0_7], %9 {strides = array<i32>} : memref<8x2048xf32, #tpu.memory_space<vmem>>, vector<8x2048xf32>,
    return
  }
  func.func @transform_0(%arg0: i32) -> (i32, i32) {
    %c0_i32 = arith.constant 0 : i32
    %c0_i32_0 = arith.constant 0 : i32
    %c0_i32_1 = arith.constant 0 : i32
    return %c0_i32, %c0_i32_0 : i32, i32
  }
  func.func @transform_1(%arg0: i32) -> (i32, i32) {
    %c0_i32 = arith.constant 0 : i32
    %c0_i32_0 = arith.constant 0 : i32
    return %c0_i32, %arg0 : i32, i32
  }
  func.func @transform_2(%arg0: i32) -> (i32, i32) {
    %c0_i32 = arith.constant 0 : i32
    %c0_i32_0 = arith.constant 0 : i32
    return %c0_i32, %arg0 : i32, i32
  }
}

</mosaic_0001>

<bundles_post_ra>
// kernel: generator_forward.6
= control target key start
LH: loop header
LB: loop body
LE: loop exit
PB: predicated region body
PF: predicated region fallthrough
CT: control target
= control target key end

     0   :  { %8 = vsyncpa [#allocation3], 0  ;;  %s500_s0 = inlined_call_operand.hbm [shape: f32[128,32], index: 0, kind: input, shape index: {}]   ;;  %s501_s1 = inlined_call_operand.hbm [shape: f32[1,32], index: 1, kind: input, shape index: {}]   ;;  %s502_s2 = inlined_call_operand.hbm [shape: f32[1,32], index: 2, kind: input, shape index: {}]   ;;  %s503_s3 = inlined_call_operand.hbm [shape: bf16[128,32], index: 3, kind: output, shape index: {}]  }
   0x1   :  { %9 = vsyncpa [#allocation6], 0 }
   0x2   :  { %10 = vsyncpa [#allocation4], 0  ;;  %s365_s12 = smov [#allocation5]   ;;  %s366_s14 = smov [#allocation2]  }
   0x3   :  { %s29_s13 = sshll.u32 %s365_s12, 4  ;;  %s16_s15 = sshll.u32 %s366_s14, 4  ;;  %s30_s13 = int_to_ptr.vmem [resolvable:$true] %s29_s13  ;;  %s393_s15 = int_to_ptr.vmem [resolvable:$true] %s16_s15 }
   0x4   :  { %s271_s18 = scalar_lea.hbm %s501_s1, 16 }
   0x5   :  { %p272_p0 = scmp.ne.s32.totalorder %s501_s1, %s271_s18  ;;  %p275_p1 = scmp.lt.u32.totalorder %s271_s18, %s501_s1 }
   0x7   :  { %p277_p2 = pnand %p275_p1, %p272_p0 }
   0x9   :  { %280 = shalt.err (!%p277_p2)
}
   0xa   :  { %s281_s23 = scalar_lea.vmem %s30_s13, 16  ;;  %s285_s24 = scalar_lea.vmem %s30_s13, 32 }
   0xb   :  { %p282_p3 = scmp.ne.s32.totalorder %s30_s13, %s281_s23  ;;  %p286_p4 = scmp.lt.s32.totalorder %s30_s13, %s30_s13 }
   0xc   :  { %p287_p5 = scmp.lt.s32.totalorder %s285_s24, %s281_s23 }
   0xe   :  { %p288_p6 = por %p287_p5, %p286_p4 }
  0x10   :  { %p289_p7 = pnand %p288_p6, %p282_p3 }
  0x12   :  { %292 = shalt.err (!%p289_p7)
}
  0x13   :  { %32 = dma.hbm_to_vmem [thread:$0]  %s501_s1, 16, %s30_s13, [#allocation6]  }
  0x14   :  { %s293_s29 = scalar_lea.hbm %s500_s0, 2048 }
  0x15   :  { %p294_p8 = scmp.ne.s32.totalorder %s500_s0, %s293_s29  ;;  %p297_p9 = scmp.lt.u32.totalorder %s293_s29, %s500_s0 }
  0x17   :  { %p299_p10 = pnand %p297_p9, %p294_p8 }
  0x19   :  { %302 = shalt.err (!%p299_p10)
}
  0x1a   :  { %s303_s7 = scalar_lea.vmem %s393_s15, 2048  ;;  %p308_p12 = scmp.lt.s32.totalorder %s393_s15, %s393_s15 }
  0x1b   :  { %p304_p11 = scmp.ne.s32.totalorder %s393_s15, %s303_s7  ;;  %p309_p13 = scmp.lt.s32.totalorder %s303_s7, %s303_s7 }
  0x1d   :  { %p310_p0 = por %p309_p13, %p308_p12 }
  0x1f   :  { %p311_p1 = pnand %p310_p0, %p304_p11 }
  0x21   :  { %314 = shalt.err (!%p311_p1)
}
  0x22   :  { %s367_s1 = smov 128   ;;  %s368_s8 = smov 8  }
  0x23   :  { %22 = dma.hbm_to_vmem [thread:$0]  %s500_s0, 2048, %s393_s15, [#allocation3], %s367_s1, %s367_s1, %s368_s8  }
  0x24   :  { %s369_s11 = smov [#allocation7]   ;;  %s315_s16 = scalar_lea.hbm %s502_s2, 16 }
  0x25   :  { %s39_s12 = sshll.u32 %s369_s11, 4  ;;  %p316_p2 = scmp.ne.s32.totalorder %s502_s2, %s315_s16  ;;  %s40_s12 = int_to_ptr.vmem [resolvable:$true] %s39_s12 }
  0x26   :  { %p319_p3 = scmp.lt.u32.totalorder %s315_s16, %s502_s2 }
  0x28   :  { %p321_p4 = pnand %p319_p3, %p316_p2 }
  0x2a   :  { %324 = shalt.err (!%p321_p4)
}
  0x2b   :  { %s325_s21 = scalar_lea.vmem %s40_s12, 16  ;;  %s329_s0 = scalar_lea.vmem %s40_s12, 32 }
  0x2c   :  { %p326_p5 = scmp.ne.s32.totalorder %s40_s12, %s325_s21  ;;  %p330_p6 = scmp.lt.s32.totalorder %s40_s12, %s40_s12 }
  0x2d   :  { %p331_p7 = scmp.lt.s32.totalorder %s329_s0, %s325_s21 }
  0x2f   :  { %p332_p8 = por %p331_p7, %p330_p6 }
  0x31   :  { %p333_p9 = pnand %p332_p8, %p326_p5 }
  0x33   :  { %336 = shalt.err (!%p333_p9)
}
  0x34   :  { %42 = dma.hbm_to_vmem [thread:$0]  %s502_s2, 16, %s40_s12, [#allocation6]  }
  0x35   :  { %359 = dma.done.wait [#allocation3], 2048  }
  0x36   :  { %360 = vsyncadd [#allocation3], 4294965248 }
  0x37   :  { %361 = dma.done.wait [#allocation6], 32  }
  0x38   :  { %362 = vsyncadd [#allocation6], 4294967264  ;;  %v52_v0 = vld [vmem:[#allocation2] sm:$0xff]  ;;  %v53_v4 = vld [vmem:[#allocation2 + $0x8] sm:$0xff]  ;;  %vm194_vm0 = vcmask 257024   ;;  %s370_s2 = smov [#allocation8]  }
  0x39   :  { %v436_v1 = vld [vmem:[#allocation5] ss:$0 sm:$0xff]  ;;  %v438_v2 = vld [vmem:[#allocation7] ss:$0 sm:$0xff]  ;;  %v54_v5 = vld [vmem:[#allocation2 + $0x10] sm:$0xff]  ;;  %s216_s23 = sshll.u32 %s370_s2, 4  ;;  %s217_s23 = int_to_ptr.vmem [resolvable:$true] %s216_s23 }
  0x3a   :  { %v75_v3 = vmul.f32 %v436_v1, %v52_v0  ;;  %v55_v6 = vld [vmem:[#allocation2 + $0x18] sm:$0xff]  ;;  %v76_v7 = vmul.f32 %v436_v1, %v53_v4  ;;  %v77_v8 = vmul.f32 %v436_v1, %v54_v5  ;;  %v56_v10 = vld [vmem:[#allocation2 + $0x20] sm:$0xff]  ;;  %v57_v11 = vld [vmem:[#allocation2 + $0x28] sm:$0xff]  ;;  %s337_s24 = scalar_lea.vmem %s217_s23, 1024  ;;  %p342_p11 = scmp.lt.s32.totalorder %s217_s23, %s217_s23 }
  0x3b   :  { %v78_v9 = vmul.f32 %v436_v1, %v55_v6  ;;  %v58_v12 = vld [vmem:[#allocation2 + $0x30] sm:$0xff]  ;;  %v79_v14 = vmul.f32 %v436_v1, %v56_v10  ;;  %v80_v15 = vmul.f32 %v436_v1, %v57_v11  ;;  %v59_v17 = vld [vmem:[#allocation2 + $0x38] sm:$0xff]  ;;  %v60_v30 = vld [vmem:[#allocation2 + $0x40] sm:$0xff]  ;;  %p338_p10 = scmp.ne.s32.totalorder %s217_s23, %s337_s24  ;;  %p343_p12 = scmp.lt.s32.totalorder %s337_s24, %s337_s24 }
  0x3c   :  { %v98_v13 = vadd.f32 %v438_v2, %v75_v3  ;;  %v81_v16 = vmul.f32 %v436_v1, %v58_v12  ;;  %v99_v18 = vadd.f32 %v438_v2, %v76_v7  ;;  %v100_v19 = vadd.f32 %v438_v2, %v77_v8  ;;  %v61_v35 = vld [vmem:[#allocation2 + $0x48] sm:$0xff]  ;;  %v62_v36 = vld [vmem:[#allocation2 + $0x50] sm:$0xff]  ;;  %v63_v37 = vld [vmem:[#allocation2 + $0x58] sm:$0xff] }
  0x3d   :  { %v101_v20 = vadd.f32 %v438_v2, %v78_v9  ;;  %v82_v21 = vmul.f32 %v436_v1, %v59_v17  ;;  %v102_v23 = vadd.f32 %v438_v2, %v79_v14  ;;  %v103_v24 = vadd.f32 %v438_v2, %v80_v15  ;;  %v64_v42 = vld [vmem:[#allocation2 + $0x60] sm:$0xff]  ;;  %v65_v43 = vld [vmem:[#allocation2 + $0x68] sm:$0xff]  ;;  %v66_v44 = vld [vmem:[#allocation2 + $0x70] sm:$0xff]  ;;  %p344_p13 = por %p343_p12, %p342_p11 }
  0x3e   :  { %v114_v22 = vmax.f32 %v98_v13, 0.0  ;;  %v104_v25 = vadd.f32 %v438_v2, %v81_v16  ;;  %v115_v26 = vmax.f32 %v99_v18, 0.0  ;;  %v116_v27 = vmax.f32 %v100_v19, 0.0  ;;  %v67_v49 = vld [vmem:[#allocation2 + $0x78] sm:$0xff] }
  0x3f   :  { %v117_v28 = vmax.f32 %v101_v20, 0.0  ;;  %v105_v29 = vadd.f32 %v438_v2, %v82_v21  ;;  %v118_v32 = vmax.f32 %v102_v23, 0.0  ;;  %v119_v33 = vmax.f32 %v103_v24, 0.0  ;;  %p345_p0 = pnand %p344_p13, %p338_p10 }
  0x40   :  { %v247_v31 = vpack.c.bf16 %v114_v22, %v114_v22  ;;  %v120_v34 = vmax.f32 %v104_v25, 0.0  ;;  %v248_v38 = vpack.c.bf16 %v115_v26, %v115_v26  ;;  %v249_v39 = vpack.c.bf16 %v116_v27, %v116_v27 }
  0x41   :  { %v250_v40 = vpack.c.bf16 %v117_v28, %v117_v28  ;;  %v121_v41 = vmax.f32 %v105_v29, 0.0  ;;  %v251_v45 = vpack.c.bf16 %v118_v32, %v118_v32  ;;  %v252_v46 = vpack.c.bf16 %v119_v33, %v119_v33 }
  0x42   :  { %195 = vst.msk [vmem:[#allocation8] sm:$0xf] %vm194_vm0, %v247_v31  ;;  %v253_v47 = vpack.c.bf16 %v120_v34, %v120_v34  ;;  %v83_v48 = vmul.f32 %v436_v1, %v60_v30  ;;  %196 = vst.msk [vmem:[#allocation8 + $0x4] sm:$0xf] %vm194_vm0, %v248_v38  ;;  %v84_v51 = vmul.f32 %v436_v1, %v61_v35 }
  0x43   :  { %197 = vst.msk [vmem:[#allocation8 + $0x8] sm:$0xf] %vm194_vm0, %v249_v39  ;;  %198 = vst.msk [vmem:[#allocation8 + $0xc] sm:$0xf] %vm194_vm0, %v250_v40  ;;  %v254_v50 = vpack.c.bf16 %v121_v41, %v121_v41  ;;  %v85_v52 = vmul.f32 %v436_v1, %v62_v36  ;;  %v86_v53 = vmul.f32 %v436_v1, %v63_v37 }
  0x44   :  { %199 = vst.msk [vmem:[#allocation8 + $0x10] sm:$0xf] %vm194_vm0, %v251_v45  ;;  %200 = vst.msk [vmem:[#allocation8 + $0x14] sm:$0xf] %vm194_vm0, %v252_v46  ;;  %v106_v54 = vadd.f32 %v438_v2, %v83_v48  ;;  %v87_v55 = vmul.f32 %v436_v1, %v64_v42  ;;  %v88_v56 = vmul.f32 %v436_v1, %v65_v43 }
  0x45   :  { %201 = vst.msk [vmem:[#allocation8 + $0x18] sm:$0xf] %vm194_vm0, %v253_v47  ;;  %v89_v57 = vmul.f32 %v436_v1, %v66_v44  ;;  %202 = vst.msk [vmem:[#allocation8 + $0x1c] sm:$0xf] %vm194_vm0, %v254_v50  ;;  %v107_v58 = vadd.f32 %v438_v2, %v84_v51  ;;  %v108_v59 = vadd.f32 %v438_v2, %v85_v52 }
  0x46   :  { %v109_v60 = vadd.f32 %v438_v2, %v86_v53  ;;  %v90_v61 = vmul.f32 %v436_v1, %v67_v49  ;;  %v122_v62 = vmax.f32 %v106_v54, 0.0  ;;  %v110_v63 = vadd.f32 %v438_v2, %v87_v55 }
  0x47   :  { %v111_v0 = vadd.f32 %v438_v2, %v88_v56  ;;  %v112_v3 = vadd.f32 %v438_v2, %v89_v57  ;;  %v123_v4 = vmax.f32 %v107_v58, 0.0  ;;  %v124_v5 = vmax.f32 %v108_v59, 0.0 }
  0x48   :  { %v125_v6 = vmax.f32 %v109_v60, 0.0  ;;  %v113_v7 = vadd.f32 %v438_v2, %v90_v61  ;;  %v255_v8 = vpack.c.bf16 %v122_v62, %v122_v62  ;;  %v126_v9 = vmax.f32 %v110_v63, 0.0 }
  0x49   :  { %v127_v10 = vmax.f32 %v111_v0, 0.0  ;;  %v128_v11 = vmax.f32 %v112_v3, 0.0  ;;  %v256_v12 = vpack.c.bf16 %v123_v4, %v123_v4  ;;  %v257_v1 = vpack.c.bf16 %v124_v5, %v124_v5 }
  0x4a   :  { %v258_v13 = vpack.c.bf16 %v125_v6, %v125_v6  ;;  %v129_v14 = vmax.f32 %v113_v7, 0.0  ;;  %203 = vst.msk [vmem:[#allocation8 + $0x20] sm:$0xf] %vm194_vm0, %v255_v8  ;;  %v259_v15 = vpack.c.bf16 %v126_v9, %v126_v9 }
  0x4b   :  { %v260_v16 = vpack.c.bf16 %v127_v10, %v127_v10  ;;  %v261_v17 = vpack.c.bf16 %v128_v11, %v128_v11  ;;  %204 = vst.msk [vmem:[#allocation8 + $0x24] sm:$0xf] %vm194_vm0, %v256_v12  ;;  %205 = vst.msk [vmem:[#allocation8 + $0x28] sm:$0xf] %vm194_vm0, %v257_v1 }
  0x4c   :  { %206 = vst.msk [vmem:[#allocation8 + $0x2c] sm:$0xf] %vm194_vm0, %v258_v13  ;;  %v262_v2 = vpack.c.bf16 %v129_v14, %v129_v14  ;;  %207 = vst.msk [vmem:[#allocation8 + $0x30] sm:$0xf] %vm194_vm0, %v259_v15 }
  0x4d   :  { %208 = vst.msk [vmem:[#allocation8 + $0x34] sm:$0xf] %vm194_vm0, %v260_v16  ;;  %209 = vst.msk [vmem:[#allocation8 + $0x38] sm:$0xf] %vm194_vm0, %v261_v17 }
  0x4e   :  { %210 = vst.msk [vmem:[#allocation8 + $0x3c] sm:$0xf] %vm194_vm0, %v262_v2 }
  0x4f   :  { %348 = shalt.err (!%p345_p0)
}
  0x50   :  { %s349_s27 = scalar_lea.hbm %s503_s3, 1024 }
  0x51   :  { %p350_p1 = scmp.ne.s32.totalorder %s503_s3, %s349_s27  ;;  %p353_p2 = scmp.lt.u32.totalorder %s349_s27, %s503_s3 }
  0x53   :  { %p355_p3 = pnand %p353_p2, %p350_p1 }
  0x55   :  { %358 = shalt.err (!%p355_p3)
}
  0x56   :  { %s371_s5 = smov 64   ;;  %s372_s6 = smov 4  }
  0x57   :  { %222 = dma.vmem_to_hbm [thread:$0]  %s217_s23, 1024, %s503_s3, [#allocation4], %s371_s5, %s371_s5, %s372_s6  }
  0x58   :  { %363 = dma.done.wait [#allocation4], 1024  }
  0x59   :  { %364 = vsyncadd [#allocation4], 4294966272 }
  0x5a   :  { %226 = vsyncpa [#allocation3], 1 }
  0x5b   :  { %227 = vsyncpa [#allocation6], 1 }
  0x5c   :  { %228 = vsyncpa [#allocation4], 1 }

// kernel: tile.23
= control target key start
LH: loop header
LB: loop body
LE: loop exit
PB: predicated region body
PF: predicated region fallthrough
CT: control target
= control target key end

     0   :  { %s22_s0 = inlined_call_operand.vmem [shape: f32[16], index: 0, kind: input, shape index: {}]   ;;  %s23_s1 = inlined_call_operand.vmem [shape: f32[8,16], index: 1, kind: output, shape index: {}]  }
   0x1   :  { %v4_v0 = vld [vmem:[%s22_s0] ss:$0 sm:$0xff] }
   0x2   :  { %5 = vst [vmem:[%s23_s1] sm:$0xff] %v4_v0 }

// kernel: tile.24
= control target key start
LH: loop header
LB: loop body
LE: loop exit
PB: predicated region body
PF: predicated region fallthrough
CT: control target
= control target key end

     0   :  { %s103_s10 = smov 112   ;;  %s104_s11 = smov 80   ;;  %vm4_vm0 = vcmask 130048   ;;  %s157_s0 = inlined_call_operand.vmem [shape: f32[8,16], index: 0, kind: input, shape index: {}]   ;;  %s158_s1 = inlined_call_operand.hbm [shape: f32[1,128], index: 1, kind: output, shape index: {}]  }
   0x1   :  { %v64_v0 = vld [vmem:[%s157_s0 + $0x7] sm:$0x1]   ;;  %v66_v1 = vld [vmem:[%s157_s0 + $0x5] sm:$0x1]   ;;  %v65_v2 = vld [vmem:[%s157_s0 + $0x6] sm:$0x1]  }
   0x2   :  { %8 = vrot.lane.b32.xlu0 %v64_v0, %s103_s10  ;;  %20 = vrot.lane.b32.xlu1 %v66_v1, %s104_s11  ;;  %v67_v3 = vld [vmem:[%s157_s0 + $0x4] sm:$0x1]   ;;  %v3_v4 = vld [vmem:[%s157_s0] sm:$0x1]  }
   0x3   :  { %2 = vsyncpa [#allocation1], 0  ;;  %s105_s18 = smov 96   ;;  %s106_s19 = smov 64   ;;  %5 = vst.msk [vmem:[#allocation2] sm:$0x1] %vm4_vm0, %v3_v4  }
   0x4   :  { %v68_v5 = vld [vmem:[%s157_s0 + $0x3] sm:$0x1]   ;;  %v69_v6 = vld [vmem:[%s157_s0 + $0x2] sm:$0x1]   ;;  %s107_s24 = smov 48   ;;  %s108_s25 = smov 32  }
   0x5   :  { %v70_v7 = vld [vmem:[%s157_s0 + $0x1] sm:$0x1]   ;;  %s109_s0 = smov 16   ;;  %vm10_vm1 = vcmask 1048448   ;;  %vm16_vm2 = vcmask 917248   ;;  %vm22_vm3 = vcmask 786048  }
   0x6   :  { %14 = vrot.lane.b32.xlu0 %v65_v2, %s105_s18  ;;  %26 = vrot.lane.b32.xlu1 %v67_v3, %s106_s19  ;;  %vm28_vm4 = vcmask 654848   ;;  %vm34_vm5 = vcmask 523648   ;;  %vm40_vm6 = vcmask 392448   ;;  %vm46_vm7 = vcmask 261248   ;;  %s110_s28 = smov [#allocation0]  }
   0x7   :  { %s58_s29 = sshll.u32 %s110_s28, 4  ;;  %s59_s29 = int_to_ptr.vmem [resolvable:$true] %s58_s29 }
   0x8   :  { %s79_s30 = scalar_lea.vmem %s59_s29, 16  ;;  %s83_s2 = scalar_lea.vmem %s59_s29, 32 }
   0x9   :  { %p80_p0 = scmp.ne.s32.totalorder %s59_s29, %s79_s30  ;;  %p84_p1 = scmp.lt.s32.totalorder %s59_s29, %s59_s29 }
   0xa   :  { %32 = vrot.lane.b32.xlu0 %v68_v5, %s107_s24  ;;  %38 = vrot.lane.b32.xlu1 %v69_v6, %s108_s25  ;;  %p85_p2 = scmp.lt.s32.totalorder %s83_s2, %s79_s30 }
   0xc   :  { %p86_p3 = por %p85_p2, %p84_p1 }
   0xe   :  { %44 = vrot.lane.b32.xlu0 %v70_v7, %s109_s0  ;;  %p87_p4 = pnand %p86_p3, %p80_p0 }
  0x74   :  { %v9_v8 = vpop.permute.xlu0 %8   ;;  %v21_v9 = vpop.permute.xlu1 %20  }
  0x75   :  { %11 = vst.msk [vmem:[#allocation2] sm:$0x1] %vm10_vm1, %v9_v8  }
  0x78   :  { %v15_v10 = vpop.permute.xlu0 %14   ;;  %v27_v11 = vpop.permute.xlu1 %26  }
  0x79   :  { %17 = vst.msk [vmem:[#allocation2] sm:$0x1] %vm16_vm2, %v15_v10  }
  0x7a   :  { %23 = vst.msk [vmem:[#allocation2] sm:$0x1] %vm22_vm3, %v21_v9  }
  0x7b   :  { %29 = vst.msk [vmem:[#allocation2] sm:$0x1] %vm28_vm4, %v27_v11  }
  0x7c   :  { %v33_v12 = vpop.permute.xlu0 %32   ;;  %v39_v13 = vpop.permute.xlu1 %38  }
  0x7d   :  { %35 = vst.msk [vmem:[#allocation2] sm:$0x1] %vm34_vm5, %v33_v12  }
  0x7e   :  { %41 = vst.msk [vmem:[#allocation2] sm:$0x1] %vm40_vm6, %v39_v13  }
  0x80   :  { %v45_v14 = vpop.permute.xlu0 %44  }
  0x81   :  { %47 = vst.msk [vmem:[#allocation2] sm:$0x1] %vm46_vm7, %v45_v14  }
  0x88   :  { %v51_v15 = vld [vmem:[#allocation2] sm:$0x1] }
  0x89   :  { %53 = vst [vmem:[#allocation0] sm:$0x1] %v51_v15 }
  0x8a   :  { %90 = shalt.err (!%p87_p4)
}
  0x8b   :  { %s91_s5 = scalar_lea.hbm %s158_s1, 16 }
  0x8c   :  { %p92_p5 = scmp.ne.s32.totalorder %s158_s1, %s91_s5  ;;  %p95_p6 = scmp.lt.u32.totalorder %s91_s5, %s158_s1 }
  0x8e   :  { %p97_p7 = pnand %p95_p6, %p92_p5 }
  0x90   :  { %100 = shalt.err (!%p97_p7)
}
  0x91   :  { %61 = dma.vmem_to_hbm [thread:$0]  %s59_s29, 16, %s158_s1, [#allocation1]  }
  0x92   :  { %101 = dma.done.wait [#allocation1], 16  }
  0x93   :  { %102 = vsyncadd [#allocation1], 4294967280 }
  0x94   :  { %63 = vsyncpa [#allocation1], 1 }

// kernel: generator_forward.8
= control target key start
LH: loop header
LB: loop body
LE: loop exit
PB: predicated region body
PF: predicated region fallthrough
CT: control target
= control target key end

     0   :  { %8 = vsyncpa [#allocation3], 0  ;;  %s587_s0 = inlined_call_operand.hbm [shape: bf16[128,128], index: 0, kind: input, shape index: {}]   ;;  %s588_s1 = inlined_call_operand.hbm [shape: f32[1,128], index: 1, kind: input, shape index: {}]   ;;  %s589_s2 = inlined_call_operand.hbm [shape: f32[1,128], index: 2, kind: input, shape index: {}]   ;;  %s590_s3 = inlined_call_operand.hbm [shape: bf16[128,128], index: 3, kind: output, shape index: {}]  }
   0x1   :  { %9 = vsyncpa [#allocation6], 0 }
   0x2   :  { %10 = vsyncpa [#allocation4], 0  ;;  %s464_s12 = smov [#allocation5]   ;;  %s465_s14 = smov [#allocation2]  }
   0x3   :  { %s29_s13 = sshll.u32 %s464_s12, 4  ;;  %s16_s15 = sshll.u32 %s465_s14, 4  ;;  %s30_s13 = int_to_ptr.vmem [resolvable:$true] %s29_s13  ;;  %s490_s15 = int_to_ptr.vmem [resolvable:$true] %s16_s15 }
   0x4   :  { %s370_s18 = scalar_lea.hbm %s588_s1, 16 }
   0x5   :  { %p371_p0 = scmp.ne.s32.totalorder %s588_s1, %s370_s18  ;;  %p374_p1 = scmp.lt.u32.totalorder %s370_s18, %s588_s1 }
   0x7   :  { %p376_p2 = pnand %p374_p1, %p371_p0 }
   0x9   :  { %379 = shalt.err (!%p376_p2)
}
   0xa   :  { %s380_s23 = scalar_lea.vmem %s30_s13, 16  ;;  %s384_s24 = scalar_lea.vmem %s30_s13, 32 }
   0xb   :  { %p381_p3 = scmp.ne.s32.totalorder %s30_s13, %s380_s23  ;;  %p385_p4 = scmp.lt.s32.totalorder %s30_s13, %s30_s13 }
   0xc   :  { %p386_p5 = scmp.lt.s32.totalorder %s384_s24, %s380_s23 }
   0xe   :  { %p387_p6 = por %p386_p5, %p385_p4 }
  0x10   :  { %p388_p7 = pnand %p387_p6, %p381_p3 }
  0x12   :  { %391 = shalt.err (!%p388_p7)
}
  0x13   :  { %32 = dma.hbm_to_vmem [thread:$0]  %s588_s1, 16, %s30_s13, [#allocation6]  }
  0x14   :  { %s392_s29 = scalar_lea.hbm %s587_s0, 1024 }
  0x15   :  { %p393_p8 = scmp.ne.s32.totalorder %s587_s0, %s392_s29  ;;  %p396_p9 = scmp.lt.u32.totalorder %s392_s29, %s587_s0 }
  0x17   :  { %p398_p10 = pnand %p396_p9, %p393_p8 }
  0x19   :  { %401 = shalt.err (!%p398_p10)
}
  0x1a   :  { %s402_s7 = scalar_lea.vmem %s490_s15, 1024  ;;  %p407_p12 = scmp.lt.s32.totalorder %s490_s15, %s490_s15 }
  0x1b   :  { %p403_p11 = scmp.ne.s32.totalorder %s490_s15, %s402_s7  ;;  %p408_p13 = scmp.lt.s32.totalorder %s402_s7, %s402_s7 }
  0x1d   :  { %p409_p0 = por %p408_p13, %p407_p12 }
  0x1f   :  { %p410_p1 = pnand %p409_p0, %p403_p11 }
  0x21   :  { %413 = shalt.err (!%p410_p1)
}
  0x22   :  { %s466_s1 = smov 64   ;;  %s467_s8 = smov 4  }
  0x23   :  { %22 = dma.hbm_to_vmem [thread:$0]  %s587_s0, 1024, %s490_s15, [#allocation3], %s466_s1, %s466_s1, %s467_s8  }
  0x24   :  { %s468_s11 = smov [#allocation7]   ;;  %s414_s16 = scalar_lea.hbm %s589_s2, 16 }
  0x25   :  { %s39_s12 = sshll.u32 %s468_s11, 4  ;;  %p415_p2 = scmp.ne.s32.totalorder %s589_s2, %s414_s16  ;;  %s40_s12 = int_to_ptr.vmem [resolvable:$true] %s39_s12 }
  0x26   :  { %p418_p3 = scmp.lt.u32.totalorder %s414_s16, %s589_s2 }
  0x28   :  { %p420_p4 = pnand %p418_p3, %p415_p2 }
  0x2a   :  { %423 = shalt.err (!%p420_p4)
}
  0x2b   :  { %s424_s21 = scalar_lea.vmem %s40_s12, 16  ;;  %s428_s0 = scalar_lea.vmem %s40_s12, 32 }
  0x2c   :  { %p425_p5 = scmp.ne.s32.totalorder %s40_s12, %s424_s21  ;;  %p429_p6 = scmp.lt.s32.totalorder %s40_s12, %s40_s12 }
  0x2d   :  { %p430_p7 = scmp.lt.s32.totalorder %s428_s0, %s424_s21 }
  0x2f   :  { %p431_p8 = por %p430_p7, %p429_p6 }
  0x31   :  { %p432_p9 = pnand %p431_p8, %p425_p5 }
  0x33   :  { %435 = shalt.err (!%p432_p9)
}
  0x34   :  { %42 = dma.hbm_to_vmem [thread:$0]  %s589_s2, 16, %s40_s12, [#allocation6]  }
  0x35   :  { %458 = dma.done.wait [#allocation3], 1024  }
  0x36   :  { %459 = vsyncadd [#allocation3], 4294966272 }
  0x37   :  { %460 = dma.done.wait [#allocation6], 32  }
  0x38   :  { %461 = vsyncadd [#allocation6], 4294967264  ;;  %v279_v0 = vld [vmem:[#allocation2] sm:$0xff]   ;;  %v350_v4 = vld [vmem:[#allocation2 + $0x8] sm:$0xff]   ;;  %s469_s2 = smov [#allocation8]  }
  0x39   :  { %v536_v1 = vld [vmem:[#allocation5] ss:$0 sm:$0xff]  ;;  %v280_v2 = vunpack.c.l.bf16 %v279_v0  ;;  %v281_v3 = vunpack.c.h.bf16 %v279_v0  ;;  %v351_v5 = vld [vmem:[#allocation2 + $0x10] sm:$0xff]   ;;  %v352_v6 = vld [vmem:[#allocation2 + $0x18] sm:$0xff]   ;;  %v284_v8 = vunpack.c.l.bf16 %v350_v4  ;;  %v285_v9 = vunpack.c.h.bf16 %v350_v4  ;;  %s231_s23 = sshll.u32 %s469_s2, 4  ;;  %s232_s23 = int_to_ptr.vmem [resolvable:$true] %s231_s23 }
  0x3a   :  { %v538_v7 = vld [vmem:[#allocation7] ss:$0 sm:$0xff]  ;;  %v288_v10 = vunpack.c.l.bf16 %v351_v5  ;;  %v289_v11 = vunpack.c.h.bf16 %v351_v5  ;;  %v292_v14 = vunpack.c.l.bf16 %v352_v6  ;;  %v293_v15 = vunpack.c.h.bf16 %v352_v6  ;;  %v354_v33 = vld [vmem:[#allocation2 + $0x28] sm:$0xff]   ;;  %v355_v38 = vld [vmem:[#allocation2 + $0x30] sm:$0xff]   ;;  %s436_s24 = scalar_lea.vmem %s232_s23, 1024  ;;  %p441_p11 = scmp.lt.s32.totalorder %s232_s23, %s232_s23 }
  0x3b   :  { %v91_v12 = vmul.f32 %v280_v2, %v536_v1  ;;  %v92_v13 = vmul.f32 %v281_v3, %v536_v1  ;;  %v93_v16 = vmul.f32 %v284_v8, %v536_v1  ;;  %v94_v17 = vmul.f32 %v285_v9, %v536_v1  ;;  %v353_v28 = vld [vmem:[#allocation2 + $0x20] sm:$0xff]   ;;  %v356_v43 = vld [vmem:[#allocation2 + $0x38] sm:$0xff]   ;;  %p437_p10 = scmp.ne.s32.totalorder %s232_s23, %s436_s24  ;;  %p442_p12 = scmp.lt.s32.totalorder %s436_s24, %s436_s24 }
  0x3c   :  { %v95_v18 = vmul.f32 %v288_v10, %v536_v1  ;;  %v96_v19 = vmul.f32 %v289_v11, %v536_v1  ;;  %v97_v22 = vmul.f32 %v292_v14, %v536_v1  ;;  %v98_v23 = vmul.f32 %v293_v15, %v536_v1 }
  0x3d   :  { %v114_v20 = vadd.f32 %v538_v7, %v91_v12  ;;  %v115_v21 = vadd.f32 %v538_v7, %v92_v13  ;;  %v116_v24 = vadd.f32 %v538_v7, %v93_v16  ;;  %v117_v25 = vadd.f32 %v538_v7, %v94_v17  ;;  %p443_p13 = por %p442_p12, %p441_p11 }
  0x3e   :  { %v118_v26 = vadd.f32 %v538_v7, %v95_v18  ;;  %v119_v27 = vadd.f32 %v538_v7, %v96_v19  ;;  %v120_v31 = vadd.f32 %v538_v7, %v97_v22  ;;  %v121_v32 = vadd.f32 %v538_v7, %v98_v23 }
  0x3f   :  { %v130_v29 = vmax.f32 %v114_v20, 0.0  ;;  %v131_v30 = vmax.f32 %v115_v21, 0.0  ;;  %v132_v34 = vmax.f32 %v116_v24, 0.0  ;;  %v133_v35 = vmax.f32 %v117_v25, 0.0  ;;  %p444_p0 = pnand %p443_p13, %p437_p10 }
  0x40   :  { %v134_v36 = vmax.f32 %v118_v26, 0.0  ;;  %v135_v37 = vmax.f32 %v119_v27, 0.0  ;;  %v136_v40 = vmax.f32 %v120_v31, 0.0  ;;  %v137_v41 = vmax.f32 %v121_v32, 0.0 }
  0x41   :  { %v313_v39 = vpack.c.bf16 %v131_v30, %v130_v29  ;;  %v296_v42 = vunpack.c.l.bf16 %v353_v28  ;;  %v318_v44 = vpack.c.bf16 %v133_v35, %v132_v34  ;;  %v297_v46 = vunpack.c.h.bf16 %v353_v28 }
  0x42   :  { %v323_v45 = vpack.c.bf16 %v135_v37, %v134_v36  ;;  %v300_v47 = vunpack.c.l.bf16 %v354_v33  ;;  %v328_v48 = vpack.c.bf16 %v137_v41, %v136_v40  ;;  %v301_v50 = vunpack.c.h.bf16 %v354_v33 }
  0x43   :  { %314 = vst [vmem:[#allocation8] sm:$0xff] %v313_v39   ;;  %v99_v49 = vmul.f32 %v296_v42, %v536_v1  ;;  %v304_v51 = vunpack.c.l.bf16 %v355_v38  ;;  %357 = vst [vmem:[#allocation8 + $0x8] sm:$0xff] %v318_v44   ;;  %v100_v52 = vmul.f32 %v297_v46, %v536_v1  ;;  %v305_v54 = vunpack.c.h.bf16 %v355_v38 }
  0x44   :  { %358 = vst [vmem:[#allocation8 + $0x10] sm:$0xff] %v323_v45   ;;  %v101_v53 = vmul.f32 %v300_v47, %v536_v1  ;;  %v308_v55 = vunpack.c.l.bf16 %v356_v43  ;;  %359 = vst [vmem:[#allocation8 + $0x18] sm:$0xff] %v328_v48   ;;  %v102_v57 = vmul.f32 %v301_v50, %v536_v1  ;;  %v309_v59 = vunpack.c.h.bf16 %v356_v43 }
  0x45   :  { %v122_v56 = vadd.f32 %v538_v7, %v99_v49  ;;  %v103_v58 = vmul.f32 %v304_v51, %v536_v1  ;;  %v123_v60 = vadd.f32 %v538_v7, %v100_v52  ;;  %v104_v62 = vmul.f32 %v305_v54, %v536_v1 }
  0x46   :  { %v124_v61 = vadd.f32 %v538_v7, %v101_v53  ;;  %v105_v63 = vmul.f32 %v308_v55, %v536_v1  ;;  %v125_v2 = vadd.f32 %v538_v7, %v102_v57  ;;  %v106_v4 = vmul.f32 %v309_v59, %v536_v1 }
  0x47   :  { %v138_v0 = vmax.f32 %v122_v56, 0.0  ;;  %v126_v3 = vadd.f32 %v538_v7, %v103_v58  ;;  %v139_v5 = vmax.f32 %v123_v60, 0.0  ;;  %v127_v8 = vadd.f32 %v538_v7, %v104_v62 }
  0x48   :  { %v140_v6 = vmax.f32 %v124_v61, 0.0  ;;  %v128_v9 = vadd.f32 %v538_v7, %v105_v63  ;;  %v141_v10 = vmax.f32 %v125_v2, 0.0  ;;  %v129_v12 = vadd.f32 %v538_v7, %v106_v4 }
  0x49   :  { %v142_v11 = vmax.f32 %v126_v3, 0.0  ;;  %v333_v13 = vpack.c.bf16 %v139_v5, %v138_v0  ;;  %v143_v14 = vmax.f32 %v127_v8, 0.0 }
  0x4a   :  { %v144_v15 = vmax.f32 %v128_v9, 0.0  ;;  %v338_v16 = vpack.c.bf16 %v141_v10, %v140_v6  ;;  %v145_v17 = vmax.f32 %v129_v12, 0.0 }
  0x4b   :  { %360 = vst [vmem:[#allocation8 + $0x20] sm:$0xff] %v333_v13   ;;  %v343_v18 = vpack.c.bf16 %v143_v14, %v142_v11 }
  0x4c   :  { %361 = vst [vmem:[#allocation8 + $0x28] sm:$0xff] %v338_v16   ;;  %v348_v1 = vpack.c.bf16 %v145_v17, %v144_v15 }
  0x4d   :  { %362 = vst [vmem:[#allocation8 + $0x30] sm:$0xff] %v343_v18  }
  0x4e   :  { %363 = vst [vmem:[#allocation8 + $0x38] sm:$0xff] %v348_v1  }
  0x4f   :  { %447 = shalt.err (!%p444_p0)
}
  0x50   :  { %s448_s27 = scalar_lea.hbm %s590_s3, 1024 }
  0x51   :  { %p449_p1 = scmp.ne.s32.totalorder %s590_s3, %s448_s27  ;;  %p452_p2 = scmp.lt.u32.totalorder %s448_s27, %s590_s3 }
  0x53   :  { %p454_p3 = pnand %p452_p2, %p449_p1 }
  0x55   :  { %457 = shalt.err (!%p454_p3)
}
  0x56   :  { %237 = dma.vmem_to_hbm [thread:$0]  %s232_s23, 1024, %s590_s3, [#allocation4], %s466_s1, %s466_s1, %s467_s8  }
  0x57   :  { %462 = dma.done.wait [#allocation4], 1024  }
  0x58   :  { %463 = vsyncadd [#allocation4], 4294966272 }
  0x59   :  { %241 = vsyncpa [#allocation3], 1 }
  0x5a   :  { %242 = vsyncpa [#allocation6], 1 }
  0x5b   :  { %243 = vsyncpa [#allocation4], 1 }

// kernel: generator_forward.7
= control target key start
LH: loop header
LB: loop body
LE: loop exit
PB: predicated region body
PF: predicated region fallthrough
CT: control target
= control target key end

     0   :  { %10 = vsyncpa [#allocation3], 0  ;;  %s2283_s0 = inlined_call_operand.hbm [shape: bf16[128,896], index: 0, kind: input, shape index: {}]   ;;  %s2284_s1 = inlined_call_operand.hbm [shape: bf16[896,128], index: 1, kind: input, shape index: {}]   ;;  %s2285_s2 = inlined_call_operand.hbm [shape: bf16[128,128], index: 2, kind: output, shape index: {0}]   ;;  %s2286_s3 = inlined_call_operand.hbm [shape: f32[1,1,128], index: 3, kind: output, shape index: {1}]   ;;  %s2287_s4 = inlined_call_operand.hbm [shape: f32[1,1,128], index: 4, kind: output, shape index: {2}]  }
   0x1   :  { %11 = vsyncpa [#allocation6], 0 }
   0x2   :  { %12 = vsyncpa [#allocation4], 0 }
   0x3   :  { %13 = vsyncpa [#allocation9], 0  ;;  %s2112_s15 = smov [#allocation2]   ;;  %s1994_s19 = scalar_lea.hbm %s2283_s0, 7168 }
   0x4   :  { %s19_s16 = sshll.u32 %s2112_s15, 4  ;;  %p1995_p0 = scmp.ne.s32.totalorder %s2283_s0, %s1994_s19  ;;  %s20_s16 = int_to_ptr.vmem [resolvable:$true] %s19_s16 }
   0x5   :  { %p1998_p1 = scmp.lt.u32.totalorder %s1994_s19, %s2283_s0 }
   0x7   :  { %p2000_p2 = pnand %p1998_p1, %p1995_p0 }
   0x9   :  { %2003 = shalt.err (!%p2000_p2)
}
   0xa   :  { %s2004_s24 = scalar_lea.vmem %s20_s16, 7168  ;;  %p2009_p4 = scmp.lt.s32.totalorder %s20_s16, %s20_s16 }
   0xb   :  { %p2005_p3 = scmp.ne.s32.totalorder %s20_s16, %s2004_s24  ;;  %p2010_p5 = scmp.lt.s32.totalorder %s2004_s24, %s2004_s24 }
   0xd   :  { %p2011_p6 = por %p2010_p5, %p2009_p4 }
   0xf   :  { %p2012_p7 = pnand %p2011_p6, %p2005_p3 }
  0x11   :  { %2015 = shalt.err (!%p2012_p7)
}
  0x12   :  { %s2113_s25 = smov 448   ;;  %s2114_s26 = smov 28  }
  0x13   :  { %25 = dma.hbm_to_vmem [thread:$0]  %s2283_s0, 7168, %s20_s16, [#allocation3], %s2113_s25, %s2113_s25, %s2114_s26  }
  0x14   :  { %s2115_s29 = smov [#allocation5]   ;;  %s2016_s7 = scalar_lea.hbm %s2284_s1, 7168 }
  0x15   :  { %s31_s30 = sshll.u32 %s2115_s29, 4  ;;  %p2017_p8 = scmp.ne.s32.totalorder %s2284_s1, %s2016_s7  ;;  %s32_s30 = int_to_ptr.vmem [resolvable:$true] %s31_s30 }
  0x16   :  { %p2020_p9 = scmp.lt.u32.totalorder %s2016_s7, %s2284_s1 }
  0x18   :  { %p2022_p10 = pnand %p2020_p9, %p2017_p8 }
  0x1a   :  { %2025 = shalt.err (!%p2022_p10)
}
  0x1b   :  { %s2026_s12 = scalar_lea.vmem %s32_s30, 7168  ;;  %p2031_p12 = scmp.lt.s32.totalorder %s32_s30, %s32_s30 }
  0x1c   :  { %p2027_p11 = scmp.ne.s32.totalorder %s32_s30, %s2026_s12  ;;  %p2032_p13 = scmp.lt.s32.totalorder %s2026_s12, %s2026_s12 }
  0x1e   :  { %p2033_p0 = por %p2032_p13, %p2031_p12 }
  0x20   :  { %p2034_p1 = pnand %p2033_p0, %p2027_p11 }
  0x22   :  { %2037 = shalt.err (!%p2034_p1)
}
  0x23   :  { %s2116_s0 = smov 64   ;;  %s2117_s13 = smov 4  }
  0x24   :  { %37 = dma.hbm_to_vmem [thread:$0]  %s2284_s1, 7168, %s32_s30, [#allocation6], %s2116_s0, %s2116_s0, %s2117_s13  }
  0x25   :  { %2104 = dma.done.wait [#allocation3], 7168  }
  0x26   :  { %2105 = vsyncadd [#allocation3], 4294960128 }
  0x27   :  { %2106 = dma.done.wait [#allocation6], 7168  }
  0x28   :  { %2107 = vsyncadd [#allocation6], 4294960128  ;;  %v1858_v0 = vld [vmem:[#allocation5 + $0x40] sm:$0xff]   ;;  %v1862_v4 = vld [vmem:[#allocation5 + $0x48] sm:$0xff]   ;;  %s2118_s1 = smov [#allocation7]  }
  0x29   :  { %v1859_v1 = vld [vmem:[#allocation5 + $0xc0] sm:$0xff]   ;;  %1609 = vmatprep.subr.bf16.mxu0 %v1858_v0  ;;  %v1863_v5 = vld [vmem:[#allocation5 + $0xc8] sm:$0xff]   ;;  %v1866_v8 = vld [vmem:[#allocation5 + $0x50] sm:$0xff]   ;;  %s1378_s16 = sshll.u32 %s2118_s1, 4  ;;  %s1379_s16 = int_to_ptr.vmem [resolvable:$true] %s1378_s16 }
  0x2a   :  { %v1860_v2 = vld [vmem:[#allocation5] sm:$0xff]   ;;  %1673 = vmatprep.subr.bf16.mxu1 %v1859_v1  ;;  %v1864_v6 = vld [vmem:[#allocation5 + $0x8] sm:$0xff]   ;;  %v1867_v9 = vld [vmem:[#allocation5 + $0xd0] sm:$0xff]   ;;  %s2038_s17 = scalar_lea.vmem %s1379_s16, 1024  ;;  %p2043_p3 = scmp.lt.s32.totalorder %s1379_s16, %s1379_s16 }
  0x2b   :  { %v1861_v3 = vld [vmem:[#allocation5 + $0x80] sm:$0xff]   ;;  %1610 = vmatpush3.bf16.msra.mxu0 %v1860_v2  ;;  %v1865_v7 = vld [vmem:[#allocation5 + $0x88] sm:$0xff]   ;;  %v1868_v10 = vld [vmem:[#allocation5 + $0x10] sm:$0xff]   ;;  %p2039_p2 = scmp.ne.s32.totalorder %s1379_s16, %s2038_s17  ;;  %p2044_p4 = scmp.lt.s32.totalorder %s2038_s17, %s2038_s17 }
  0x2c   :  { %1674 = vmatpush3.bf16.msra.mxu1 %v1861_v3  ;;  %1611 = vmatprep.subr.bf16.mxu0 %v1862_v4  ;;  %v1869_v11 = vld [vmem:[#allocation5 + $0x90] sm:$0xff]   ;;  %v1870_v12 = vld [vmem:[#allocation5 + $0x58] sm:$0xff]   ;;  %v1874_v16 = vld [vmem:[#allocation5 + $0x60] sm:$0xff]  }
  0x2d   :  { %1675 = vmatprep.subr.bf16.mxu1 %v1863_v5  ;;  %v1871_v13 = vld [vmem:[#allocation5 + $0xd8] sm:$0xff]   ;;  %v1875_v17 = vld [vmem:[#allocation5 + $0xe0] sm:$0xff]   ;;  %v1878_v20 = vld [vmem:[#allocation5 + $0x68] sm:$0xff]   ;;  %p2045_p5 = por %p2044_p4, %p2043_p3 }
  0x2e   :  { %v1872_v14 = vld [vmem:[#allocation5 + $0x18] sm:$0xff]   ;;  %v1876_v18 = vld [vmem:[#allocation5 + $0x20] sm:$0xff]   ;;  %v1879_v21 = vld [vmem:[#allocation5 + $0xe8] sm:$0xff]  }
  0x2f   :  { %1612 = vmatpush3.bf16.msra.mxu0 %v1864_v6  ;;  %v1873_v15 = vld [vmem:[#allocation5 + $0x98] sm:$0xff]   ;;  %v1877_v19 = vld [vmem:[#allocation5 + $0xa0] sm:$0xff]   ;;  %v1880_v22 = vld [vmem:[#allocation5 + $0x28] sm:$0xff]   ;;  %p2046_p6 = pnand %p2045_p5, %p2039_p2 }
  0x30   :  { %1676 = vmatpush3.bf16.msra.mxu1 %v1865_v7  ;;  %1613 = vmatprep.subr.bf16.mxu0 %v1866_v8  ;;  %v1881_v23 = vld [vmem:[#allocation5 + $0xa8] sm:$0xff]   ;;  %v1882_v24 = vld [vmem:[#allocation5 + $0x70] sm:$0xff]   ;;  %v1886_v28 = vld [vmem:[#allocation5 + $0x78] sm:$0xff]  }
  0x31   :  { %1677 = vmatprep.subr.bf16.mxu1 %v1867_v9  ;;  %v1883_v25 = vld [vmem:[#allocation5 + $0xf0] sm:$0xff]   ;;  %v1887_v29 = vld [vmem:[#allocation5 + $0xf8] sm:$0xff]   ;;  %v1892_v33 = vld [vmem:[#allocation2 + $0x4] ss:$28 sps:$4 sm:$0xff]  }
  0x32   :  { %v1884_v26 = vld [vmem:[#allocation5 + $0x30] sm:$0xff]   ;;  %v1888_v30 = vld [vmem:[#allocation5 + $0x38] sm:$0xff]   ;;  %v1893_v34 = vld [vmem:[#allocation2 + $0x8] ss:$28 sps:$4 sm:$0xff]   ;;  %877 = vmatprep.mubr.bf16.mxu0 %v1892_v33 }
  0x33   :  { %1614 = vmatpush3.bf16.msra.mxu0 %v1868_v10  ;;  %v1885_v27 = vld [vmem:[#allocation5 + $0xb0] sm:$0xff]   ;;  %v1889_v31 = vld [vmem:[#allocation5 + $0xb8] sm:$0xff]   ;;  %v1895_v35 = vld [vmem:[#allocation2 + $0xc] ss:$28 sps:$4 sm:$0xff]  }
  0x34   :  { %1678 = vmatpush3.bf16.msra.mxu1 %v1869_v11  ;;  %1615 = vmatprep.subr.bf16.mxu0 %v1870_v12  ;;  %v1890_v32 = vld [vmem:[#allocation2] ss:$28 sps:$4 sm:$0xff]   ;;  %v1902_v40 = vld [vmem:[#allocation2 + $0x38] ss:$28 sps:$4 sm:$0xff]   ;;  %v1904_v42 = vld [vmem:[#allocation5 + $0x148] sm:$0xff]  }
  0x35   :  { %1679 = vmatprep.subr.bf16.mxu1 %v1871_v13  ;;  %v1896_v36 = vld [vmem:[#allocation5 + $0x140] sm:$0xff]   ;;  %974 = vmatprep.mubr.bf16.mxu1 %v1895_v35  ;;  %v1898_v38 = vld [vmem:[#allocation2 + $0x3c] ss:$28 sps:$4 sm:$0xff]   ;;  %v1905_v43 = vld [vmem:[#allocation5 + $0x108] sm:$0xff]  }
  0x36   :  { %v1897_v37 = vld [vmem:[#allocation5 + $0x100] sm:$0xff]   ;;  %v1906_v44 = vld [vmem:[#allocation2 + $0x74] ss:$28 sps:$4 sm:$0xff]   ;;  %v1908_v45 = vld [vmem:[#allocation2 + $0x7c] ss:$28 sps:$4 sm:$0xff]  }
  0x37   :  { %1616 = vmatpush3.bf16.msra.mxu0 %v1872_v14  ;;  %v1900_v39 = vld [vmem:[#allocation2 + $0x44] ss:$28 sps:$4 sm:$0xff]   ;;  %v1912_v46 = vld [vmem:[#allocation5 + $0x150] sm:$0xff]   ;;  %v1914_v50 = vld [vmem:[#allocation2 + $0xac] ss:$28 sps:$4 sm:$0xff]  }
  0x38   :  { %1680 = vmatpush3.bf16.msra.mxu1 %v1873_v15  ;;  %1617 = vmatprep.subr.bf16.mxu0 %v1874_v16  ;;  %v1903_v41 = vld [vmem:[#allocation2 + $0x40] ss:$28 sps:$4 sm:$0xff]   ;;  %v1913_v47 = vld [vmem:[#allocation5 + $0x110] sm:$0xff]   ;;  %v1918_v54 = vld [vmem:[#allocation2 + $0xa8] ss:$28 sps:$4 sm:$0xff]  }
  0x39   :  { %1681 = vmatprep.subr.bf16.mxu1 %v1875_v17  ;;  %v1910_v48 = vld [vmem:[#allocation2 + $0x70] ss:$28 sps:$4 sm:$0xff]   ;;  %v1911_v49 = vld [vmem:[#allocation2 + $0x78] ss:$28 sps:$4 sm:$0xff]   ;;  %v1928_v55 = vld [vmem:[#allocation5 + $0x160] sm:$0xff]  }
  0x3a   :  { %v1916_v51 = vld [vmem:[#allocation2 + $0xb4] ss:$28 sps:$4 sm:$0xff]   ;;  %v1920_v52 = vld [vmem:[#allocation5 + $0x158] sm:$0xff]   ;;  %v1929_v57 = vld [vmem:[#allocation5 + $0x180] sm:$0xff]  }
  0x3b   :  { %1618 = vmatpush3.bf16.msra.mxu0 %v1876_v18  ;;  %v1921_v53 = vld [vmem:[#allocation5 + $0x118] sm:$0xff]   ;;  %v1919_v56 = vld [vmem:[#allocation2 + $0xb0] ss:$28 sps:$4 sm:$0xff]   ;;  %v1930_v58 = vld [vmem:[#allocation5 + $0x120] sm:$0xff]  }
  0x3c   :  { %1682 = vmatpush3.bf16.msra.mxu1 %v1877_v19  ;;  %1619 = vmatprep.subr.bf16.mxu0 %v1878_v20  ;;  %v1922_v59 = vld [vmem:[#allocation2 + $0xe4] ss:$28 sps:$4 sm:$0xff]   ;;  %v1924_v60 = vld [vmem:[#allocation2 + $0xec] ss:$28 sps:$4 sm:$0xff]   ;;  %v1940_v0 = vld [vmem:[#allocation5 + $0x190] sm:$0xff]  }
  0x3d   :  { %1683 = vmatprep.subr.bf16.mxu1 %v1879_v21  ;;  %v1937_v61 = vld [vmem:[#allocation5 + $0x168] sm:$0xff]   ;;  %v1926_v1 = vld [vmem:[#allocation2 + $0xe0] ss:$28 sps:$4 sm:$0xff]   ;;  %v1947_v5 = vld [vmem:[#allocation5 + $0x170] sm:$0xff]  }
  0x3e   :  { %v1938_v62 = vld [vmem:[#allocation5 + $0x188] sm:$0xff]   ;;  %v1931_v3 = vld [vmem:[#allocation2 + $0x11c] ss:$28 sps:$4 sm:$0xff]   ;;  %v1933_v4 = vld [vmem:[#allocation2 + $0x124] ss:$28 sps:$4 sm:$0xff]  }
  0x3f   :  { %1620 = vmatpush3.bf16.msra.mxu0 %v1880_v22  ;;  %v1939_v63 = vld [vmem:[#allocation5 + $0x128] sm:$0xff]   ;;  %v1948_v6 = vld [vmem:[#allocation5 + $0x198] sm:$0xff]   ;;  %v1949_v7 = vld [vmem:[#allocation5 + $0x130] sm:$0xff]  }
  0x40   :  { %1684 = vmatpush3.bf16.msra.mxu1 %v1881_v23  ;;  %1621 = vmatprep.subr.bf16.mxu0 %v1882_v24  ;;  %v1927_v2 = vld [vmem:[#allocation2 + $0xe8] ss:$28 sps:$4 sm:$0xff]   ;;  %v1935_v9 = vld [vmem:[#allocation2 + $0x118] ss:$28 sps:$4 sm:$0xff]   ;;  %v1936_v10 = vld [vmem:[#allocation2 + $0x120] ss:$28 sps:$4 sm:$0xff]  }
  0x41   :  { %1685 = vmatprep.subr.bf16.mxu1 %v1883_v25  ;;  %v1950_v8 = vld [vmem:[#allocation5 + $0x1a0] sm:$0xff]   ;;  %v1941_v11 = vld [vmem:[#allocation2 + $0x154] ss:$28 sps:$4 sm:$0xff]   ;;  %v1943_v12 = vld [vmem:[#allocation2 + $0x15c] ss:$28 sps:$4 sm:$0xff]  }
  0x42   :  { %v1957_v13 = vld [vmem:[#allocation5 + $0x178] sm:$0xff]   ;;  %v1958_v14 = vld [vmem:[#allocation5 + $0x1a8] sm:$0xff]   ;;  %v1960_v16 = vld [vmem:[#allocation5 + $0x1b0] sm:$0xff]  }
  0x43   :  { %1622 = vmatpush3.bf16.msra.mxu0 %v1884_v26  ;;  %v1959_v15 = vld [vmem:[#allocation5 + $0x138] sm:$0xff]   ;;  %v1945_v17 = vld [vmem:[#allocation2 + $0x150] ss:$28 sps:$4 sm:$0xff]   ;;  %v1955_v22 = vld [vmem:[#allocation2 + $0x188] ss:$28 sps:$4 sm:$0xff]  }
  0x44   :  { %1686 = vmatpush3.bf16.msra.mxu1 %v1885_v27  ;;  %1623 = vmatprep.subr.bf16.mxu0 %v1886_v28  ;;  %v1946_v18 = vld [vmem:[#allocation2 + $0x158] ss:$28 sps:$4 sm:$0xff]   ;;  %v1951_v19 = vld [vmem:[#allocation2 + $0x18c] ss:$28 sps:$4 sm:$0xff]  }
  0x45   :  { %1687 = vmatprep.subr.bf16.mxu1 %v1887_v29  ;;  %v1953_v20 = vld [vmem:[#allocation2 + $0x194] ss:$28 sps:$4 sm:$0xff]   ;;  %v1964_v21 = vld [vmem:[#allocation5 + $0x1b8] sm:$0xff]   ;;  %v1967_v28 = vld [vmem:[#allocation2 + $0x4c] ss:$28 sps:$4 sm:$0xff]  }
  0x46   :  { %v1956_v23 = vld [vmem:[#allocation2 + $0x190] ss:$28 sps:$4 sm:$0xff]   ;;  %v1965_v25 = vld [vmem:[#allocation2 + $0x18] ss:$28 sps:$4 sm:$0xff]   ;;  %v1973_v29 = vld [vmem:[#allocation2 + $0x88] ss:$28 sps:$4 sm:$0xff]  }
  0x47   :  { %1624 = vmatpush3.bf16.msra.mxu0 %v1888_v30  ;;  %v1963_v24 = vld [vmem:[#allocation2 + $0x14] ss:$28 sps:$4 sm:$0xff]   ;;  %v1969_v30 = vld [vmem:[#allocation2 + $0x48] ss:$28 sps:$4 sm:$0xff]   ;;  %v1975_v35 = vld [vmem:[#allocation2 + $0xbc] ss:$28 sps:$4 sm:$0xff]  }
  0x48   :  { %1688 = vmatpush3.bf16.msra.mxu1 %v1889_v31  ;;  %1737 = vmatprep.subr.bf16.mxu0 %v1896_v36  ;;  %v1961_v26 = vld [vmem:[#allocation2 + $0x10] ss:$28 sps:$4 sm:$0xff]   ;;  %v1970_v31 = vld [vmem:[#allocation2 + $0x84] ss:$28 sps:$4 sm:$0xff]   ;;  %v1981_v33 = vld [vmem:[#allocation2 + $0xf8] ss:$28 sps:$4 sm:$0xff]  }
  0x49   :  { %1817 = vmatprep.subr.bf16.mxu1 %v1929_v57  ;;  %v1966_v27 = vld [vmem:[#allocation2 + $0x50] ss:$28 sps:$4 sm:$0xff]  }
  0x4a   :  { %878 = vmatmul.mubr.bf16.vlgmr.msra.gmra.mrb[0].mxu0 %v1890_v32  ;;  %v1974_v32 = vld [vmem:[#allocation2 + $0xc0] ss:$28 sps:$4 sm:$0xff]   ;;  %v1982_v36 = vld [vmem:[#allocation2 + $0x130] ss:$28 sps:$4 sm:$0xff]  }
  0x4b   :  { %975 = vmatmul.mubr.bf16.vlgmr.msra.gmra.mrb[0].mxu1 %v1893_v34  ;;  %1738 = vmatpush3.bf16.msra.mxu0 %v1897_v37  ;;  %v1972_v34 = vld [vmem:[#allocation2 + $0x80] ss:$28 sps:$4 sm:$0xff]   ;;  %v1989_v37 = vld [vmem:[#allocation2 + $0x168] ss:$28 sps:$4 sm:$0xff]  }
  0x4c   :  { %885 = vmatprep.mubr.bf16.mxu0 %v1898_v38  ;;  %982 = vmatprep.mubr.bf16.mxu1 %v1900_v39  ;;  %v1977_v38 = vld [vmem:[#allocation2 + $0xb8] ss:$28 sps:$4 sm:$0xff]  }
  0x4d   :  { %1739 = vmatprep.subr.bf16.mxu0 %v1904_v42  ;;  %1818 = vmatpush3.bf16.msra.mxu1 %v1929_v57  ;;  %v1978_v39 = vld [vmem:[#allocation2 + $0xf4] ss:$28 sps:$4 sm:$0xff]   ;;  %v1983_v42 = vld [vmem:[#allocation2 + $0x12c] ss:$28 sps:$4 sm:$0xff]  }
  0x4e   :  { %1819 = vmatprep.subr.bf16.mxu1 %v1938_v62 }
  0x4f   :  { %1740 = vmatpush3.bf16.msra.mxu0 %v1905_v43  ;;  %v1985_v43 = vld [vmem:[#allocation2 + $0x128] ss:$28 sps:$4 sm:$0xff]  }
  0x50   :  { %1741 = vmatprep.subr.bf16.mxu0 %v1912_v46  ;;  %v1991_v46 = vld [vmem:[#allocation2 + $0x19c] ss:$28 sps:$4 sm:$0xff]  }
  0x51   :  { %1820 = vmatpush3.bf16.msra.mxu1 %v1938_v62 }
  0x52   :  { %886 = vmatmul.mubr.bf16.gmra.mrb[4].mxu0 %v1902_v40  ;;  %1821 = vmatprep.subr.bf16.mxu1 %v1940_v0  ;;  %v1990_v40 = vld [vmem:[#allocation2 + $0x1a0] ss:$28 sps:$4 sm:$0xff]  }
  0x53   :  { %983 = vmatmul.mubr.bf16.gmra.mrb[4].mxu1 %v1903_v41  ;;  %893 = vmatprep.mubr.bf16.mxu0 %v1906_v44  ;;  %v1980_v41 = vld [vmem:[#allocation2 + $0xf0] ss:$28 sps:$4 sm:$0xff]   ;;  %v1986_v44 = vld [vmem:[#allocation2 + $0x164] ss:$28 sps:$4 sm:$0xff]  }
  0x54   :  { %990 = vmatprep.mubr.bf16.mxu1 %v1908_v45  ;;  %1742 = vmatpush3.bf16.msra.mxu0 %v1913_v47  ;;  %v1988_v45 = vld [vmem:[#allocation2 + $0x160] ss:$28 sps:$4 sm:$0xff]   ;;  %v1993_v47 = vld [vmem:[#allocation2 + $0x198] ss:$28 sps:$4 sm:$0xff]  }
  0x55   :  { %1743 = vmatprep.subr.bf16.mxu0 %v1920_v52  ;;  %1822 = vmatpush3.bf16.msra.mxu1 %v1940_v0 }
  0x56   :  { %1823 = vmatprep.subr.bf16.mxu1 %v1948_v6 }
  0x58   :  { %1744 = vmatpush3.bf16.msra.mxu0 %v1921_v53 }
  0x59   :  { %1745 = vmatprep.subr.bf16.mxu0 %v1928_v55  ;;  %1824 = vmatpush3.bf16.msra.mxu1 %v1948_v6 }
  0x5a   :  { %894 = vmatmul.mubr.bf16.gmra.mrb[8].mxu0 %v1910_v48  ;;  %1825 = vmatprep.subr.bf16.mxu1 %v1950_v8 }
  0x5b   :  { %991 = vmatmul.mubr.bf16.gmra.mrb[8].mxu1 %v1911_v49  ;;  %901 = vmatprep.mubr.bf16.mxu0 %v1914_v50 }
  0x5c   :  { %998 = vmatprep.mubr.bf16.mxu1 %v1916_v51  ;;  %1746 = vmatpush3.bf16.msra.mxu0 %v1930_v58 }
  0x5d   :  { %1747 = vmatprep.subr.bf16.mxu0 %v1937_v61  ;;  %1826 = vmatpush3.bf16.msra.mxu1 %v1950_v8 }
  0x5e   :  { %1827 = vmatprep.subr.bf16.mxu1 %v1958_v14 }
  0x60   :  { %1748 = vmatpush3.bf16.msra.mxu0 %v1939_v63 }
  0x61   :  { %1749 = vmatprep.subr.bf16.mxu0 %v1947_v5  ;;  %1828 = vmatpush3.bf16.msra.mxu1 %v1958_v14 }
  0x62   :  { %902 = vmatmul.mubr.bf16.gmra.mrb[12].mxu0 %v1918_v54  ;;  %1829 = vmatprep.subr.bf16.mxu1 %v1960_v16 }
  0x63   :  { %999 = vmatmul.mubr.bf16.gmra.mrb[12].mxu1 %v1919_v56  ;;  %909 = vmatprep.mubr.bf16.mxu0 %v1922_v59 }
  0x64   :  { %1006 = vmatprep.mubr.bf16.mxu1 %v1924_v60  ;;  %1750 = vmatpush3.bf16.msra.mxu0 %v1949_v7 }
  0x65   :  { %1751 = vmatprep.subr.bf16.mxu0 %v1957_v13  ;;  %1830 = vmatpush3.bf16.msra.mxu1 %v1960_v16 }
  0x66   :  { %1831 = vmatprep.subr.bf16.mxu1 %v1964_v21 }
  0x68   :  { %1752 = vmatpush3.bf16.msra.mxu0 %v1959_v15 }
  0x69   :  { %1832 = vmatpush3.bf16.msra.mxu1 %v1964_v21 }
  0x6a   :  { %910 = vmatmul.mubr.bf16.gmra.mrb[16].mxu0 %v1926_v1 }
  0x6b   :  { %1007 = vmatmul.mubr.bf16.gmra.mrb[16].mxu1 %v1927_v2  ;;  %917 = vmatprep.mubr.bf16.mxu0 %v1931_v3 }
  0x6c   :  { %1014 = vmatprep.mubr.bf16.mxu1 %v1933_v4 }
  0x72   :  { %918 = vmatmul.mubr.bf16.gmra.mrb[20].mxu0 %v1935_v9 }
  0x73   :  { %1015 = vmatmul.mubr.bf16.gmra.mrb[20].mxu1 %v1936_v10  ;;  %925 = vmatprep.mubr.bf16.mxu0 %v1941_v11 }
  0x74   :  { %1022 = vmatprep.mubr.bf16.mxu1 %v1943_v12 }
  0x7a   :  { %926 = vmatmul.mubr.bf16.gmra.mrb[24].mxu0 %v1945_v17 }
  0x7b   :  { %1023 = vmatmul.mubr.bf16.gmra.mrb[24].mxu1 %v1946_v18  ;;  %933 = vmatprep.mubr.bf16.mxu0 %v1951_v19 }
  0x7c   :  { %1030 = vmatprep.mubr.bf16.mxu1 %v1953_v20 }
  0x82   :  { %934 = vmatmul.mubr.bf16.gmra.mrb[28].mxu0 %v1955_v22 }
  0x83   :  { %1031 = vmatmul.mubr.bf16.gmra.mrb[28].mxu1 %v1956_v23  ;;  %1071 = vmatprep.mubr.bf16.mxu0 %v1963_v24 }
  0x84   :  { %1833 = vmatprep.mubr.bf16.mxu1 %v1965_v25 }
  0x8a   :  { %1072 = vmatmul.mubr.bf16.vlgmr.msra.gmra.mrb[32].mxu0 %v1961_v26 }
  0x8b   :  { %1834 = vmatmul.mubr.bf16.vlgmr.msra.gmra.mrb[32].mxu1 %v1966_v27  ;;  %1079 = vmatprep.mubr.bf16.mxu0 %v1967_v28 }
  0x8c   :  { %1837 = vmatprep.mubr.bf16.mxu1 %v1973_v29 }
  0x92   :  { %1080 = vmatmul.mubr.bf16.gmra.mrb[36].mxu0 %v1969_v30 }
  0x93   :  { %1087 = vmatprep.mubr.bf16.mxu0 %v1970_v31  ;;  %1838 = vmatmul.mubr.bf16.gmra.mrb[36].mxu1 %v1974_v32 }
  0x94   :  { %1841 = vmatprep.mubr.bf16.mxu1 %v1981_v33 }
  0x9a   :  { %1088 = vmatmul.mubr.bf16.gmra.mrb[40].mxu0 %v1972_v34 }
  0x9b   :  { %1095 = vmatprep.mubr.bf16.mxu0 %v1975_v35  ;;  %1842 = vmatmul.mubr.bf16.gmra.mrb[40].mxu1 %v1982_v36 }
  0x9c   :  { %1845 = vmatprep.mubr.bf16.mxu1 %v1989_v37 }
  0xa2   :  { %1096 = vmatmul.mubr.bf16.gmra.mrb[44].mxu0 %v1977_v38 }
  0xa3   :  { %1103 = vmatprep.mubr.bf16.mxu0 %v1978_v39  ;;  %1846 = vmatmul.mubr.bf16.gmra.mrb[44].mxu1 %v1990_v40 }
  0xaa   :  { %1104 = vmatmul.mubr.bf16.gmra.mrb[48].mxu0 %v1980_v41 }
  0xab   :  { %1111 = vmatprep.mubr.bf16.mxu0 %v1983_v42 }
  0xb2   :  { %1112 = vmatmul.mubr.bf16.gmra.mrb[52].mxu0 %v1985_v43 }
  0xb3   :  { %1119 = vmatprep.mubr.bf16.mxu0 %v1986_v44 }
  0xba   :  { %1120 = vmatmul.mubr.bf16.gmra.mrb[56].mxu0 %v1988_v45 }
  0xbb   :  { %1127 = vmatprep.mubr.bf16.mxu0 %v1991_v46 }
  0xc2   :  { %1128 = vmatmul.mubr.bf16.gmra.mrb[60].mxu0 %v1993_v47 }
 0x11d   :  { %v1625_v48 = vpop.f32.mrb[0].mxu0 }
 0x11e   :  { %v1689_v49 = vpop.f32.mrb[0].mxu1  ;;  %v1626_v50 = vpop.f32.mrb[1].mxu0 }
 0x11f   :  { %v1627_v51 = vadd.f32 %v1626_v50, %v1625_v48  ;;  %v1690_v52 = vpop.f32.mrb[1].mxu1  ;;  %v1628_v53 = vpop.f32.mrb[2].mxu0 }
 0x120   :  { %v1691_v54 = vadd.f32 %v1690_v52, %v1689_v49  ;;  %v1692_v55 = vpop.f32.mrb[2].mxu1  ;;  %v1629_v56 = vpop.f32.mrb[3].mxu0 }
 0x121   :  { %v1630_v57 = vadd.f32 %v1629_v56, %v1628_v53  ;;  %v1693_v58 = vpop.f32.mrb[3].mxu1 }
 0x122   :  { %v2173_v59 = vadd.f32 %v1691_v54, %v1627_v51  ;;  %v1694_v60 = vadd.f32 %v1693_v58, %v1692_v55 }
 0x124   :  { %v2175_v61 = vadd.f32 %v1694_v60, %v1630_v57 }
 0x125   :  { %v1631_v62 = vpop.f32.mrb[4].mxu0 }
 0x126   :  { %v1695_v63 = vpop.f32.mrb[4].mxu1  ;;  %v1632_v0 = vpop.f32.mrb[5].mxu0 }
 0x127   :  { %v1633_v1 = vadd.f32 %v1632_v0, %v1631_v62  ;;  %v1696_v2 = vpop.f32.mrb[5].mxu1  ;;  %v1634_v3 = vpop.f32.mrb[6].mxu0 }
 0x128   :  { %v1697_v4 = vadd.f32 %v1696_v2, %v1695_v63  ;;  %v1698_v5 = vpop.f32.mrb[6].mxu1  ;;  %v1635_v6 = vpop.f32.mrb[7].mxu0 }
 0x129   :  { %v1636_v7 = vadd.f32 %v1635_v6, %v1634_v3  ;;  %v1699_v8 = vpop.f32.mrb[7].mxu1 }
 0x12a   :  { %v2177_v9 = vadd.f32 %v1697_v4, %v1633_v1  ;;  %v1700_v10 = vadd.f32 %v1699_v8, %v1698_v5 }
 0x12c   :  { %v2179_v11 = vadd.f32 %v1700_v10, %v1636_v7 }
 0x12d   :  { %v1637_v12 = vpop.f32.mrb[8].mxu0 }
 0x12e   :  { %v1701_v13 = vpop.f32.mrb[8].mxu1  ;;  %v1638_v14 = vpop.f32.mrb[9].mxu0 }
 0x12f   :  { %v1639_v15 = vadd.f32 %v1638_v14, %v1637_v12  ;;  %v1702_v16 = vpop.f32.mrb[9].mxu1  ;;  %v1640_v17 = vpop.f32.mrb[10].mxu0 }
 0x130   :  { %v1703_v18 = vadd.f32 %v1702_v16, %v1701_v13  ;;  %v1704_v19 = vpop.f32.mrb[10].mxu1  ;;  %v1641_v20 = vpop.f32.mrb[11].mxu0 }
 0x131   :  { %v1642_v21 = vadd.f32 %v1641_v20, %v1640_v17  ;;  %v1705_v22 = vpop.f32.mrb[11].mxu1 }
 0x132   :  { %v2181_v23 = vadd.f32 %v1703_v18, %v1639_v15  ;;  %v1706_v24 = vadd.f32 %v1705_v22, %v1704_v19 }
 0x134   :  { %v2183_v25 = vadd.f32 %v1706_v24, %v1642_v21 }
 0x135   :  { %v1643_v26 = vpop.f32.mrb[12].mxu0 }
 0x136   :  { %v1707_v27 = vpop.f32.mrb[12].mxu1  ;;  %v1644_v28 = vpop.f32.mrb[13].mxu0 }
 0x137   :  { %v1645_v29 = vadd.f32 %v1644_v28, %v1643_v26  ;;  %v1708_v30 = vpop.f32.mrb[13].mxu1  ;;  %v1646_v31 = vpop.f32.mrb[14].mxu0 }
 0x138   :  { %v1709_v32 = vadd.f32 %v1708_v30, %v1707_v27  ;;  %v1710_v33 = vpop.f32.mrb[14].mxu1  ;;  %v1647_v34 = vpop.f32.mrb[15].mxu0 }
 0x139   :  { %v1648_v35 = vadd.f32 %v1647_v34, %v1646_v31  ;;  %v1711_v36 = vpop.f32.mrb[15].mxu1 }
 0x13a   :  { %v2185_v37 = vadd.f32 %v1709_v32, %v1645_v29  ;;  %v1712_v38 = vadd.f32 %v1711_v36, %v1710_v33 }
 0x13c   :  { %v2187_v39 = vadd.f32 %v1712_v38, %v1648_v35 }
 0x13d   :  { %v1649_v40 = vpop.f32.mrb[16].mxu0 }
 0x13e   :  { %v1713_v41 = vpop.f32.mrb[16].mxu1  ;;  %v1650_v42 = vpop.f32.mrb[17].mxu0 }
 0x13f   :  { %v1651_v43 = vadd.f32 %v1650_v42, %v1649_v40  ;;  %v1714_v44 = vpop.f32.mrb[17].mxu1  ;;  %v1652_v45 = vpop.f32.mrb[18].mxu0 }
 0x140   :  { %v1715_v46 = vadd.f32 %v1714_v44, %v1713_v41  ;;  %v1716_v47 = vpop.f32.mrb[18].mxu1  ;;  %v1653_v48 = vpop.f32.mrb[19].mxu0 }
 0x141   :  { %v1654_v49 = vadd.f32 %v1653_v48, %v1652_v45  ;;  %v1717_v50 = vpop.f32.mrb[19].mxu1 }
 0x142   :  { %v2189_v51 = vadd.f32 %v1715_v46, %v1651_v43  ;;  %v1718_v52 = vadd.f32 %v1717_v50, %v1716_v47 }
 0x144   :  { %v2191_v53 = vadd.f32 %v1718_v52, %v1654_v49 }
 0x145   :  { %v1655_v54 = vpop.f32.mrb[20].mxu0 }
 0x146   :  { %v1719_v55 = vpop.f32.mrb[20].mxu1  ;;  %v1656_v56 = vpop.f32.mrb[21].mxu0 }
 0x147   :  { %v1657_v57 = vadd.f32 %v1656_v56, %v1655_v54  ;;  %v1720_v58 = vpop.f32.mrb[21].mxu1  ;;  %v1658_v60 = vpop.f32.mrb[22].mxu0 }
 0x148   :  { %v1721_v62 = vadd.f32 %v1720_v58, %v1719_v55  ;;  %v1722_v63 = vpop.f32.mrb[22].mxu1  ;;  %v1659_v0 = vpop.f32.mrb[23].mxu0 }
 0x149   :  { %v1660_v1 = vadd.f32 %v1659_v0, %v1658_v60  ;;  %v1723_v2 = vpop.f32.mrb[23].mxu1 }
 0x14a   :  { %v2193_v3 = vadd.f32 %v1721_v62, %v1657_v57  ;;  %v1724_v4 = vadd.f32 %v1723_v2, %v1722_v63 }
 0x14c   :  { %v2195_v5 = vadd.f32 %v1724_v4, %v1660_v1 }
 0x14d   :  { %v1661_v6 = vpop.f32.mrb[24].mxu0 }
 0x14e   :  { %v1725_v7 = vpop.f32.mrb[24].mxu1  ;;  %v1662_v8 = vpop.f32.mrb[25].mxu0 }
 0x14f   :  { %v1663_v10 = vadd.f32 %v1662_v8, %v1661_v6  ;;  %v1726_v12 = vpop.f32.mrb[25].mxu1  ;;  %v1664_v13 = vpop.f32.mrb[26].mxu0 }
 0x150   :  { %v1727_v14 = vadd.f32 %v1726_v12, %v1725_v7  ;;  %v1728_v15 = vpop.f32.mrb[26].mxu1  ;;  %v1665_v16 = vpop.f32.mrb[27].mxu0 }
 0x151   :  { %v1666_v17 = vadd.f32 %v1665_v16, %v1664_v13  ;;  %v1729_v18 = vpop.f32.mrb[27].mxu1 }
 0x152   :  { %v2197_v19 = vadd.f32 %v1727_v14, %v1663_v10  ;;  %v1730_v20 = vadd.f32 %v1729_v18, %v1728_v15 }
 0x154   :  { %v2199_v21 = vadd.f32 %v1730_v20, %v1666_v17 }
 0x155   :  { %v1667_v22 = vpop.f32.mrb[28].mxu0 }
 0x156   :  { %v1731_v24 = vpop.f32.mrb[28].mxu1  ;;  %v1668_v26 = vpop.f32.mrb[29].mxu0 }
 0x157   :  { %v1669_v27 = vadd.f32 %v1668_v26, %v1667_v22  ;;  %v1732_v28 = vpop.f32.mrb[29].mxu1  ;;  %v1670_v29 = vpop.f32.mrb[30].mxu0 }
 0x158   :  { %v1733_v30 = vadd.f32 %v1732_v28, %v1731_v24  ;;  %v1734_v31 = vpop.f32.mrb[30].mxu1  ;;  %v1671_v32 = vpop.f32.mrb[31].mxu0 }
 0x159   :  { %v1672_v33 = vadd.f32 %v1671_v32, %v1670_v29  ;;  %v1735_v34 = vpop.f32.mrb[31].mxu1 }
 0x15a   :  { %v2201_v35 = vadd.f32 %v1733_v30, %v1669_v27  ;;  %v1736_v36 = vadd.f32 %v1735_v34, %v1734_v31 }
 0x15c   :  { %v2203_v38 = vadd.f32 %v1736_v36, %v1672_v33 }
 0x15d   :  { %v1753_v40 = vpop.f32.mrb[32].mxu0 }
 0x15e   :  { %v1754_v41 = vpop.f32.mrb[33].mxu0  ;;  %v1835_v42 = vpop.f32.mrb[32].mxu1 }
 0x15f   :  { %v1755_v43 = vadd.f32 %v1754_v41, %v1753_v40  ;;  %v1756_v44 = vpop.f32.mrb[34].mxu0  ;;  %v1170_v45 = vpop.f32.mrb[33].mxu1 }
 0x160   :  { %v1757_v46 = vpop.f32.mrb[35].mxu0  ;;  %v1836_v47 = vpop.f32.mrb[34].mxu1 }
 0x161   :  { %v1758_v48 = vadd.f32 %v1757_v46, %v1756_v44  ;;  %v1074_v49 = vadd.f32 %v1755_v43, %v2173_v59  ;;  %v1173_v50 = vpop.f32.mrb[35].mxu1 }
 0x163   :  { %v1171_v52 = vadd.f32 %v1170_v45, %v1074_v49  ;;  %v1077_v54 = vadd.f32 %v1758_v48, %v2175_v61 }
 0x165   :  { %v1174_v55 = vadd.f32 %v1173_v50, %v1077_v54  ;;  %v1759_v56 = vpop.f32.mrb[36].mxu0  ;;  %v1335_v57 = vmul.f32 %v1171_v52, %v1171_v52 }
 0x166   :  { %v1760_v58 = vpop.f32.mrb[37].mxu0  ;;  %v1839_v60 = vpop.f32.mrb[36].mxu1 }
 0x167   :  { %v1565_v62 = vpack.c.bf16 %v1174_v55, %v1171_v52  ;;  %v1313_v63 = vadd.f32 %v1174_v55, %v1171_v52  ;;  %v1336_v0 = vmul.f32 %v1174_v55, %v1174_v55  ;;  %v1761_v1 = vadd.f32 %v1760_v58, %v1759_v56  ;;  %v1762_v2 = vpop.f32.mrb[38].mxu0  ;;  %v1186_v4 = vpop.f32.mrb[37].mxu1 }
 0x168   :  { %v1763_v6 = vpop.f32.mrb[39].mxu0  ;;  %v1840_v7 = vpop.f32.mrb[38].mxu1 }
 0x169   :  { %1566 = vst [vmem:[#allocation7] sm:$0xff] %v1565_v62   ;;  %v1351_v8 = vadd.f32 %v1336_v0, %v1335_v57  ;;  %v1082_v59 = vadd.f32 %v1761_v1, %v2177_v9  ;;  %v1764_v10 = vadd.f32 %v1763_v6, %v1762_v2  ;;  %v1189_v12 = vpop.f32.mrb[39].mxu1 }
 0x16b   :  { %v1179_v61 = vadd.f32 %v1835_v42, %v1082_v59  ;;  %v1085_v13 = vadd.f32 %v1764_v10, %v2179_v11 }
 0x16d   :  { %v1337_v14 = vmul.f32 %v1179_v61, %v1179_v61  ;;  %v1182_v15 = vadd.f32 %v1836_v47, %v1085_v13  ;;  %v1765_v16 = vpop.f32.mrb[40].mxu0  ;;  %v1314_v17 = vadd.f32 %v1313_v63, %v1179_v61 }
 0x16e   :  { %v1766_v18 = vpop.f32.mrb[41].mxu0  ;;  %v2209_v20 = vpop.f32.mrb[40].mxu1 }
 0x16f   :  { %v1570_v22 = vpack.c.bf16 %v1182_v15, %v1179_v61  ;;  %v1338_v24 = vmul.f32 %v1182_v15, %v1182_v15  ;;  %v1767_v26 = vadd.f32 %v1766_v18, %v1765_v16  ;;  %v1768_v27 = vpop.f32.mrb[42].mxu0  ;;  %v1315_v28 = vadd.f32 %v1314_v17, %v1182_v15  ;;  %v1202_v29 = vpop.f32.mrb[41].mxu1 }
 0x170   :  { %v1769_v30 = vpop.f32.mrb[43].mxu0  ;;  %v1352_v9 = vadd.f32 %v1351_v8, %v1337_v14  ;;  %v2211_v31 = vpop.f32.mrb[42].mxu1 }
 0x171   :  { %1602 = vst [vmem:[#allocation7 + $0x8] sm:$0xff] %v1570_v22   ;;  %v1770_v32 = vadd.f32 %v1769_v30, %v1768_v27  ;;  %v1090_v11 = vadd.f32 %v1767_v26, %v2181_v23  ;;  %v1205_v33 = vpop.f32.mrb[43].mxu1 }
 0x172   :  { %v1353_v34 = vadd.f32 %v1352_v9, %v1338_v24 }
 0x173   :  { %v1187_v36 = vadd.f32 %v1186_v4, %v1090_v11  ;;  %v1093_v40 = vadd.f32 %v1770_v32, %v2183_v25 }
 0x175   :  { %v1316_v41 = vadd.f32 %v1315_v28, %v1187_v36  ;;  %v1339_v42 = vmul.f32 %v1187_v36, %v1187_v36  ;;  %v1190_v43 = vadd.f32 %v1189_v12, %v1093_v40  ;;  %v1771_v44 = vpop.f32.mrb[44].mxu0 }
 0x176   :  { %v1772_v45 = vpop.f32.mrb[45].mxu0  ;;  %v2215_v46 = vpop.f32.mrb[44].mxu1 }
 0x177   :  { %v1354_v47 = vadd.f32 %v1353_v34, %v1339_v42  ;;  %v1575_v48 = vpack.c.bf16 %v1190_v43, %v1187_v36  ;;  %v1317_v49 = vadd.f32 %v1316_v41, %v1190_v43  ;;  %v1340_v50 = vmul.f32 %v1190_v43, %v1190_v43  ;;  %v1774_v52 = vpop.f32.mrb[46].mxu0  ;;  %v2217_v54 = vpop.f32.mrb[45].mxu1 }
 0x178   :  { %v1773_v23 = vadd.f32 %v1772_v45, %v1771_v44  ;;  %v1775_v55 = vpop.f32.mrb[47].mxu0  ;;  %v2219_v56 = vpop.f32.mrb[46].mxu1 }
 0x179   :  { %1603 = vst [vmem:[#allocation7 + $0x10] sm:$0xff] %v1575_v48   ;;  %v1355_v25 = vadd.f32 %v1354_v47, %v1340_v50  ;;  %v1776_v57 = vadd.f32 %v1775_v55, %v1774_v52  ;;  %v1221_v58 = vpop.f32.mrb[47].mxu1 }
 0x17a   :  { %v1098_v62 = vadd.f32 %v1773_v23, %v2185_v37 }
 0x17b   :  { %v1101_v63 = vadd.f32 %v1776_v57, %v2187_v39 }
 0x17c   :  { %v1195_v0 = vadd.f32 %v1839_v60, %v1098_v62 }
 0x17d   :  { %v1198_v1 = vadd.f32 %v1840_v7, %v1101_v63  ;;  %v1777_v2 = vpop.f32.mrb[48].mxu0 }
 0x17e   :  { %v1341_v4 = vmul.f32 %v1195_v0, %v1195_v0  ;;  %v1778_v6 = vpop.f32.mrb[49].mxu0  ;;  %v1318_v8 = vadd.f32 %v1317_v49, %v1195_v0 }
 0x17f   :  { %v1580_v59 = vpack.c.bf16 %v1198_v1, %v1195_v0  ;;  %v1342_v10 = vmul.f32 %v1198_v1, %v1198_v1  ;;  %v1779_v12 = vadd.f32 %v1778_v6, %v1777_v2  ;;  %v1780_v61 = vpop.f32.mrb[50].mxu0 }
 0x180   :  { %v1781_v13 = vpop.f32.mrb[51].mxu0  ;;  %v1319_v14 = vadd.f32 %v1318_v8, %v1198_v1  ;;  %v1356_v15 = vadd.f32 %v1355_v25, %v1341_v4 }
 0x181   :  { %1604 = vst [vmem:[#allocation7 + $0x18] sm:$0xff] %v1580_v59   ;;  %v1782_v16 = vadd.f32 %v1781_v13, %v1780_v61  ;;  %v1106_v17 = vadd.f32 %v1779_v12, %v2189_v51 }
 0x182   :  { %v1357_v37 = vadd.f32 %v1356_v15, %v1342_v10 }
 0x183   :  { %v1203_v18 = vadd.f32 %v1202_v29, %v1106_v17  ;;  %v1109_v39 = vadd.f32 %v1782_v16, %v2191_v53 }
 0x185   :  { %v1320_v60 = vadd.f32 %v1319_v14, %v1203_v18  ;;  %v1343_v7 = vmul.f32 %v1203_v18, %v1203_v18  ;;  %v1206_v22 = vadd.f32 %v1205_v33, %v1109_v39  ;;  %v1783_v24 = vpop.f32.mrb[52].mxu0 }
 0x186   :  { %v1784_v26 = vpop.f32.mrb[53].mxu0 }
 0x187   :  { %v1358_v27 = vadd.f32 %v1357_v37, %v1343_v7  ;;  %v1585_v28 = vpack.c.bf16 %v1206_v22, %v1203_v18  ;;  %v1321_v30 = vadd.f32 %v1320_v60, %v1206_v22  ;;  %v1344_v9 = vmul.f32 %v1206_v22, %v1206_v22  ;;  %v1786_v32 = vpop.f32.mrb[54].mxu0 }
 0x188   :  { %v1785_v11 = vadd.f32 %v1784_v26, %v1783_v24  ;;  %v1787_v34 = vpop.f32.mrb[55].mxu0 }
 0x189   :  { %1605 = vst [vmem:[#allocation7 + $0x20] sm:$0xff] %v1585_v28   ;;  %v1359_v36 = vadd.f32 %v1358_v27, %v1344_v9  ;;  %v1788_v40 = vadd.f32 %v1787_v34, %v1786_v32 }
 0x18a   :  { %v1114_v51 = vadd.f32 %v1785_v11, %v2193_v3 }
 0x18b   :  { %v1117_v29 = vadd.f32 %v1788_v40, %v2195_v5 }
 0x18c   :  { %v1211_v53 = vadd.f32 %v2209_v20, %v1114_v51 }
 0x18d   :  { %v1214_v33 = vadd.f32 %v2211_v31, %v1117_v29  ;;  %v1789_v41 = vpop.f32.mrb[56].mxu0 }
 0x18e   :  { %v1345_v42 = vmul.f32 %v1211_v53, %v1211_v53  ;;  %v1790_v43 = vpop.f32.mrb[57].mxu0  ;;  %v1322_v44 = vadd.f32 %v1321_v30, %v1211_v53 }
 0x18f   :  { %v1590_v45 = vpack.c.bf16 %v1214_v33, %v1211_v53  ;;  %v1346_v47 = vmul.f32 %v1214_v33, %v1214_v33  ;;  %v1791_v48 = vadd.f32 %v1790_v43, %v1789_v41  ;;  %v1792_v49 = vpop.f32.mrb[58].mxu0 }
 0x190   :  { %v1793_v50 = vpop.f32.mrb[59].mxu0  ;;  %v1323_v52 = vadd.f32 %v1322_v44, %v1214_v33  ;;  %v1360_v23 = vadd.f32 %v1359_v36, %v1345_v42 }
 0x191   :  { %1606 = vst [vmem:[#allocation7 + $0x28] sm:$0xff] %v1590_v45   ;;  %v1794_v55 = vadd.f32 %v1793_v50, %v1792_v49  ;;  %v1122_v3 = vadd.f32 %v1791_v48, %v2197_v19 }
 0x192   :  { %v1361_v5 = vadd.f32 %v1360_v23, %v1346_v47 }
 0x193   :  { %v1219_v20 = vadd.f32 %v2217_v54, %v1122_v3  ;;  %v1125_v31 = vadd.f32 %v1794_v55, %v2199_v21 }
 0x195   :  { %v1324_v25 = vadd.f32 %v1323_v52, %v1219_v20  ;;  %v1347_v57 = vmul.f32 %v1219_v20, %v1219_v20  ;;  %v1222_v62 = vadd.f32 %v1221_v58, %v1125_v31  ;;  %v1795_v63 = vpop.f32.mrb[60].mxu0 }
 0x196   :  { %v1796_v0 = vpop.f32.mrb[61].mxu0 }
 0x197   :  { %v1362_v1 = vadd.f32 %v1361_v5, %v1347_v57  ;;  %v1595_v2 = vpack.c.bf16 %v1222_v62, %v1219_v20  ;;  %v1325_v4 = vadd.f32 %v1324_v25, %v1222_v62  ;;  %v1348_v6 = vmul.f32 %v1222_v62, %v1222_v62  ;;  %v1798_v8 = vpop.f32.mrb[62].mxu0 }
 0x198   :  { %v1797_v59 = vadd.f32 %v1796_v0, %v1795_v63  ;;  %v1799_v10 = vpop.f32.mrb[63].mxu0 }
 0x199   :  { %1607 = vst [vmem:[#allocation7 + $0x30] sm:$0xff] %v1595_v2   ;;  %v1363_v12 = vadd.f32 %v1362_v1, %v1348_v6  ;;  %v1800_v19 = vadd.f32 %v1799_v10, %v1798_v8 }
 0x19a   :  { %v1130_v61 = vadd.f32 %v1797_v59, %v2201_v35 }
 0x19b   :  { %v1133_v54 = vadd.f32 %v1800_v19, %v2203_v38 }
 0x19c   :  { %v1227_v21 = vadd.f32 %v2215_v46, %v1130_v61 }
 0x19d   :  { %v1230_v58 = vadd.f32 %v2219_v56, %v1133_v54 }
 0x19e   :  { %v1326_v13 = vadd.f32 %v1325_v4, %v1227_v21  ;;  %v1349_v14 = vmul.f32 %v1227_v21, %v1227_v21 }
 0x19f   :  { %v1600_v15 = vpack.c.bf16 %v1230_v58, %v1227_v21  ;;  %v1350_v16 = vmul.f32 %v1230_v58, %v1230_v58 }
 0x1a0   :  { %v1364_v17 = vadd.f32 %v1363_v12, %v1349_v14  ;;  %v1327_v37 = vadd.f32 %v1326_v13, %v1230_v58 }
 0x1a1   :  { %1608 = vst [vmem:[#allocation7 + $0x38] sm:$0xff] %v1600_v15  }
 0x1a2   :  { %v1365_v18 = vadd.f32 %v1364_v17, %v1350_v16  ;;  %v1328_v39 = vrot.slane %v1327_v37, 4 }
 0x1a3   :  { %2049 = shalt.err (!%p2046_p6)
}
 0x1a4   :  { %s2050_s20 = scalar_lea.hbm %s2285_s2, 1024 }
 0x1a5   :  { %p2051_p7 = scmp.ne.s32.totalorder %s2285_s2, %s2050_s20  ;;  %p2054_p8 = scmp.lt.u32.totalorder %s2050_s20, %s2285_s2 }
 0x1a7   :  { %p2056_p9 = pnand %p2054_p8, %p2051_p7 }
 0x1a9   :  { %2059 = shalt.err (!%p2056_p9)
}
 0x1aa   :  { %1384 = dma.vmem_to_hbm [thread:$0]  %s1379_s16, 1024, %s2285_s2, [#allocation4], %s2116_s0, %s2116_s0, %s2117_s13   ;;  %v1329_v35 = vadd.f32 %v1328_v39, %v1327_v37  ;;  %v1366_v38 = vrot.slane %v1365_v18, 4 }
 0x1ab   :  { %s2119_s27 = smov [#allocation8]   ;;  %s2120_s29 = smov [#allocation10]  }
 0x1ac   :  { %v1330_v46 = vrot.slane %v1329_v35, 2  ;;  %v1367_v56 = vadd.f32 %v1366_v38, %v1365_v18  ;;  %s1391_s28 = sshll.u32 %s2119_s27, 4  ;;  %s1401_s30 = sshll.u32 %s2120_s29, 4  ;;  %s1392_s28 = int_to_ptr.vmem [resolvable:$true] %s1391_s28  ;;  %s2251_s30 = int_to_ptr.vmem [resolvable:$true] %s1401_s30 }
 0x1ad   :  { %s2060_s2 = scalar_lea.vmem %s1392_s28, 16  ;;  %s2064_s5 = scalar_lea.vmem %s1392_s28, 32 }
 0x1ae   :  { %v1331_v60 = vadd.f32 %v1330_v46, %v1329_v35  ;;  %v1368_v7 = vrot.slane %v1367_v56, 2  ;;  %p2061_p10 = scmp.ne.s32.totalorder %s1392_s28, %s2060_s2  ;;  %p2065_p11 = scmp.lt.s32.totalorder %s1392_s28, %s1392_s28 }
 0x1af   :  { %p2066_p12 = scmp.lt.s32.totalorder %s2064_s5, %s2060_s2 }
 0x1b0   :  { %v1332_v22 = vrot.slane %v1331_v60, 1  ;;  %v1369_v24 = vadd.f32 %v1368_v7, %v1367_v56 }
 0x1b1   :  { %p2067_p13 = por %p2066_p12, %p2065_p11 }
 0x1b2   :  { %v1333_v26 = vadd.f32 %v1332_v22, %v1331_v60  ;;  %v1370_v27 = vrot.slane %v1369_v24, 1 }
 0x1b3   :  { %p2068_p0 = pnand %p2067_p13, %p2061_p10 }
 0x1b4   :  { %1334 = vst [vmem:[#allocation8] sm:$0x1] %v1333_v26  ;;  %v1371_v28 = vadd.f32 %v1370_v27, %v1369_v24 }
 0x1b5   :  { %2071 = shalt.err (!%p2068_p0)
}
 0x1b6   :  { %s2072_s8 = scalar_lea.hbm %s2286_s3, 16 }
 0x1b7   :  { %p2073_p1 = scmp.ne.s32.totalorder %s2286_s3, %s2072_s8  ;;  %p2076_p2 = scmp.lt.u32.totalorder %s2072_s8, %s2286_s3 }
 0x1b9   :  { %p2078_p3 = pnand %p2076_p2, %p2073_p1 }
 0x1bb   :  { %2081 = shalt.err (!%p2078_p3)
}
 0x1bc   :  { %1394 = dma.vmem_to_hbm [thread:$0]  %s1392_s28, 16, %s2286_s3, [#allocation9]   ;;  %1372 = vst [vmem:[#allocation10] sm:$0x1] %v1371_v28 }
 0x1bd   :  { %s2082_s14 = scalar_lea.vmem %s2251_s30, 16  ;;  %s2086_s15 = scalar_lea.vmem %s2251_s30, 32 }
 0x1be   :  { %p2083_p4 = scmp.ne.s32.totalorder %s2251_s30, %s2082_s14  ;;  %p2087_p5 = scmp.lt.s32.totalorder %s2251_s30, %s2251_s30 }
 0x1bf   :  { %p2088_p6 = scmp.lt.s32.totalorder %s2086_s15, %s2082_s14 }
 0x1c1   :  { %p2089_p7 = por %p2088_p6, %p2087_p5 }
 0x1c3   :  { %p2090_p8 = pnand %p2089_p7, %p2083_p4 }
 0x1c5   :  { %2093 = shalt.err (!%p2090_p8)
}
 0x1c6   :  { %s2094_s17 = scalar_lea.hbm %s2287_s4, 16 }
 0x1c7   :  { %p2095_p9 = scmp.ne.s32.totalorder %s2287_s4, %s2094_s17  ;;  %p2098_p10 = scmp.lt.u32.totalorder %s2094_s17, %s2287_s4 }
 0x1c9   :  { %p2100_p11 = pnand %p2098_p10, %p2095_p9 }
 0x1cb   :  { %2103 = shalt.err (!%p2100_p11)
}
 0x1cc   :  { %1404 = dma.vmem_to_hbm [thread:$0]  %s2251_s30, 16, %s2287_s4, [#allocation9]  }
 0x1cd   :  { %2108 = dma.done.wait [#allocation4], 1024  }
 0x1ce   :  { %2109 = vsyncadd [#allocation4], 4294966272 }
 0x1cf   :  { %2110 = dma.done.wait [#allocation9], 32  }
 0x1d0   :  { %2111 = vsyncadd [#allocation9], 4294967264 }
 0x1d1   :  { %1414 = vsyncpa [#allocation3], 1 }
 0x1d2   :  { %1415 = vsyncpa [#allocation6], 1 }
 0x1d3   :  { %1416 = vsyncpa [#allocation4], 1 }
 0x1d4   :  { %1417 = vsyncpa [#allocation9], 1 }

// kernel: tile.33
= control target key start
LH: loop header
LB: loop body
LE: loop exit
PB: predicated region body
PF: predicated region fallthrough
CT: control target
= control target key end

     0   :  { %s22_s0 = inlined_call_operand.vmem [shape: f32[8], index: 0, kind: input, shape index: {}]   ;;  %s23_s1 = inlined_call_operand.vmem [shape: f32[8,8], index: 1, kind: output, shape index: {}]  }
   0x1   :  { %v4_v0 = vld [vmem:[%s22_s0] ss:$0 sm:$0xff] }
   0x2   :  { %5 = vst [vmem:[%s23_s1] sm:$0xff] %v4_v0 }

// kernel: tile.34
= control target key start
LH: loop header
LB: loop body
LE: loop exit
PB: predicated region body
PF: predicated region fallthrough
CT: control target
= control target key end

     0   :  { %s103_s10 = smov 56   ;;  %s104_s11 = smov 40   ;;  %vm4_vm0 = vcmask 64512   ;;  %s157_s0 = inlined_call_operand.vmem [shape: f32[8,8], index: 0, kind: input, shape index: {}]   ;;  %s158_s1 = inlined_call_operand.hbm [shape: f32[1,64], index: 1, kind: output, shape index: {}]  }
   0x1   :  { %v64_v0 = vld [vmem:[%s157_s0 + $0x7] sm:$0x1]   ;;  %v66_v1 = vld [vmem:[%s157_s0 + $0x5] sm:$0x1]   ;;  %v65_v2 = vld [vmem:[%s157_s0 + $0x6] sm:$0x1]  }
   0x2   :  { %8 = vrot.lane.b32.xlu0 %v64_v0, %s103_s10  ;;  %20 = vrot.lane.b32.xlu1 %v66_v1, %s104_s11  ;;  %v67_v3 = vld [vmem:[%s157_s0 + $0x4] sm:$0x1]   ;;  %v3_v4 = vld [vmem:[%s157_s0] sm:$0x1]  }
   0x3   :  { %2 = vsyncpa [#allocation1], 0  ;;  %s105_s18 = smov 48   ;;  %s106_s19 = smov 32   ;;  %5 = vst.msk [vmem:[#allocation2] sm:$0x1] %vm4_vm0, %v3_v4  }
   0x4   :  { %v68_v5 = vld [vmem:[%s157_s0 + $0x3] sm:$0x1]   ;;  %v69_v6 = vld [vmem:[%s157_s0 + $0x2] sm:$0x1]   ;;  %s107_s24 = smov 24   ;;  %s108_s25 = smov 16  }
   0x5   :  { %v70_v7 = vld [vmem:[%s157_s0 + $0x1] sm:$0x1]   ;;  %s109_s0 = smov 8   ;;  %vm10_vm1 = vcmask 523712   ;;  %vm16_vm2 = vcmask 458112   ;;  %vm22_vm3 = vcmask 392512  }
   0x6   :  { %14 = vrot.lane.b32.xlu0 %v65_v2, %s105_s18  ;;  %26 = vrot.lane.b32.xlu1 %v67_v3, %s106_s19  ;;  %vm28_vm4 = vcmask 326912   ;;  %vm34_vm5 = vcmask 261312   ;;  %vm40_vm6 = vcmask 195712   ;;  %vm46_vm7 = vcmask 130112   ;;  %s110_s28 = smov [#allocation0]  }
   0x7   :  { %s58_s29 = sshll.u32 %s110_s28, 4  ;;  %s59_s29 = int_to_ptr.vmem [resolvable:$true] %s58_s29 }
   0x8   :  { %s79_s30 = scalar_lea.vmem %s59_s29, 16  ;;  %s83_s2 = scalar_lea.vmem %s59_s29, 32 }
   0x9   :  { %p80_p0 = scmp.ne.s32.totalorder %s59_s29, %s79_s30  ;;  %p84_p1 = scmp.lt.s32.totalorder %s59_s29, %s59_s29 }
   0xa   :  { %32 = vrot.lane.b32.xlu0 %v68_v5, %s107_s24  ;;  %38 = vrot.lane.b32.xlu1 %v69_v6, %s108_s25  ;;  %p85_p2 = scmp.lt.s32.totalorder %s83_s2, %s79_s30 }
   0xc   :  { %p86_p3 = por %p85_p2, %p84_p1 }
   0xe   :  { %44 = vrot.lane.b32.xlu0 %v70_v7, %s109_s0  ;;  %p87_p4 = pnand %p86_p3, %p80_p0 }
  0x74   :  { %v9_v8 = vpop.permute.xlu0 %8   ;;  %v21_v9 = vpop.permute.xlu1 %20  }
  0x75   :  { %11 = vst.msk [vmem:[#allocation2] sm:$0x1] %vm10_vm1, %v9_v8  }
  0x78   :  { %v15_v10 = vpop.permute.xlu0 %14   ;;  %v27_v11 = vpop.permute.xlu1 %26  }
  0x79   :  { %17 = vst.msk [vmem:[#allocation2] sm:$0x1] %vm16_vm2, %v15_v10  }
  0x7a   :  { %23 = vst.msk [vmem:[#allocation2] sm:$0x1] %vm22_vm3, %v21_v9  }
  0x7b   :  { %29 = vst.msk [vmem:[#allocation2] sm:$0x1] %vm28_vm4, %v27_v11  }
  0x7c   :  { %v33_v12 = vpop.permute.xlu0 %32   ;;  %v39_v13 = vpop.permute.xlu1 %38  }
  0x7d   :  { %35 = vst.msk [vmem:[#allocation2] sm:$0x1] %vm34_vm5, %v33_v12  }
  0x7e   :  { %41 = vst.msk [vmem:[#allocation2] sm:$0x1] %vm40_vm6, %v39_v13  }
  0x80   :  { %v45_v14 = vpop.permute.xlu0 %44  }
  0x81   :  { %47 = vst.msk [vmem:[#allocation2] sm:$0x1] %vm46_vm7, %v45_v14  }
  0x88   :  { %v51_v15 = vld [vmem:[#allocation2] sm:$0x1] }
  0x89   :  { %53 = vst [vmem:[#allocation0] sm:$0x1] %v51_v15 }
  0x8a   :  { %90 = shalt.err (!%p87_p4)
}
  0x8b   :  { %s91_s5 = scalar_lea.hbm %s158_s1, 16 }
  0x8c   :  { %p92_p5 = scmp.ne.s32.totalorder %s158_s1, %s91_s5  ;;  %p95_p6 = scmp.lt.u32.totalorder %s91_s5, %s158_s1 }
  0x8e   :  { %p97_p7 = pnand %p95_p6, %p92_p5 }
  0x90   :  { %100 = shalt.err (!%p97_p7)
}
  0x91   :  { %61 = dma.vmem_to_hbm [thread:$0]  %s59_s29, 16, %s158_s1, [#allocation1]  }
  0x92   :  { %101 = dma.done.wait [#allocation1], 16  }
  0x93   :  { %102 = vsyncadd [#allocation1], 4294967280 }
  0x94   :  { %63 = vsyncpa [#allocation1], 1 }

// kernel: generator_forward.10
= control target key start
LH: loop header
LB: loop body
LE: loop exit
PB: predicated region body
PF: predicated region fallthrough
CT: control target
= control target key end

     0   :  { %8 = vsyncpa [#allocation3], 0  ;;  %s2523_s0 = inlined_call_operand.hbm [shape: bf16[1024,64], index: 0, kind: input, shape index: {}]   ;;  %s2524_s1 = inlined_call_operand.hbm [shape: f32[1,64], index: 1, kind: input, shape index: {}]   ;;  %s2525_s2 = inlined_call_operand.hbm [shape: f32[1,64], index: 2, kind: input, shape index: {}]   ;;  %s2526_s3 = inlined_call_operand.hbm [shape: bf16[1024,64], index: 3, kind: output, shape index: {}]  }
   0x1   :  { %9 = vsyncpa [#allocation6], 0 }
   0x2   :  { %10 = vsyncpa [#allocation4], 0  ;;  %s2044_s12 = smov [#allocation5]   ;;  %s2045_s14 = smov [#allocation2]  }
   0x3   :  { %s29_s13 = sshll.u32 %s2044_s12, 4  ;;  %s16_s15 = sshll.u32 %s2045_s14, 4  ;;  %s30_s13 = int_to_ptr.vmem [resolvable:$true] %s29_s13  ;;  %s2070_s15 = int_to_ptr.vmem [resolvable:$true] %s16_s15 }
   0x4   :  { %s1950_s18 = scalar_lea.hbm %s2524_s1, 16 }
   0x5   :  { %p1951_p0 = scmp.ne.s32.totalorder %s2524_s1, %s1950_s18  ;;  %p1954_p1 = scmp.lt.u32.totalorder %s1950_s18, %s2524_s1 }
   0x7   :  { %p1956_p2 = pnand %p1954_p1, %p1951_p0 }
   0x9   :  { %1959 = shalt.err (!%p1956_p2)
}
   0xa   :  { %s1960_s23 = scalar_lea.vmem %s30_s13, 16  ;;  %s1964_s24 = scalar_lea.vmem %s30_s13, 32 }
   0xb   :  { %p1961_p3 = scmp.ne.s32.totalorder %s30_s13, %s1960_s23  ;;  %p1965_p4 = scmp.lt.s32.totalorder %s30_s13, %s30_s13 }
   0xc   :  { %p1966_p5 = scmp.lt.s32.totalorder %s1964_s24, %s1960_s23 }
   0xe   :  { %p1967_p6 = por %p1966_p5, %p1965_p4 }
  0x10   :  { %p1968_p7 = pnand %p1967_p6, %p1961_p3 }
  0x12   :  { %1971 = shalt.err (!%p1968_p7)
}
  0x13   :  { %32 = dma.hbm_to_vmem [thread:$0]  %s2524_s1, 16, %s30_s13, [#allocation6]  }
  0x14   :  { %s1972_s29 = scalar_lea.hbm %s2523_s0, 8192 }
  0x15   :  { %p1973_p8 = scmp.ne.s32.totalorder %s2523_s0, %s1972_s29  ;;  %p1976_p9 = scmp.lt.u32.totalorder %s1972_s29, %s2523_s0 }
  0x17   :  { %p1978_p10 = pnand %p1976_p9, %p1973_p8 }
  0x19   :  { %1981 = shalt.err (!%p1978_p10)
}
  0x1a   :  { %s1982_s7 = scalar_lea.vmem %s2070_s15, 8192  ;;  %p1987_p12 = scmp.lt.s32.totalorder %s2070_s15, %s2070_s15 }
  0x1b   :  { %p1983_p11 = scmp.ne.s32.totalorder %s2070_s15, %s1982_s7  ;;  %p1988_p13 = scmp.lt.s32.totalorder %s1982_s7, %s1982_s7 }
  0x1d   :  { %p1989_p0 = por %p1988_p13, %p1987_p12 }
  0x1f   :  { %p1990_p1 = pnand %p1989_p0, %p1983_p11 }
  0x21   :  { %1993 = shalt.err (!%p1990_p1)
}
  0x22   :  { %s2046_s1 = smov 64   ;;  %s2047_s8 = smov 4  }
  0x23   :  { %22 = dma.hbm_to_vmem [thread:$0]  %s2523_s0, 8192, %s2070_s15, [#allocation3], %s2046_s1, %s2046_s1, %s2047_s8  }
  0x24   :  { %s2048_s11 = smov [#allocation7]   ;;  %s1994_s16 = scalar_lea.hbm %s2525_s2, 16 }
  0x25   :  { %s39_s12 = sshll.u32 %s2048_s11, 4  ;;  %p1995_p2 = scmp.ne.s32.totalorder %s2525_s2, %s1994_s16  ;;  %s40_s12 = int_to_ptr.vmem [resolvable:$true] %s39_s12 }
  0x26   :  { %p1998_p3 = scmp.lt.u32.totalorder %s1994_s16, %s2525_s2 }
  0x28   :  { %p2000_p4 = pnand %p1998_p3, %p1995_p2 }
  0x2a   :  { %2003 = shalt.err (!%p2000_p4)
}
  0x2b   :  { %s2004_s21 = scalar_lea.vmem %s40_s12, 16  ;;  %s2008_s0 = scalar_lea.vmem %s40_s12, 32 }
  0x2c   :  { %p2005_p5 = scmp.ne.s32.totalorder %s40_s12, %s2004_s21  ;;  %p2009_p6 = scmp.lt.s32.totalorder %s40_s12, %s40_s12 }
  0x2d   :  { %p2010_p7 = scmp.lt.s32.totalorder %s2008_s0, %s2004_s21 }
  0x2f   :  { %p2011_p8 = por %p2010_p7, %p2009_p6 }
  0x31   :  { %p2012_p9 = pnand %p2011_p8, %p2005_p5 }
  0x33   :  { %2015 = shalt.err (!%p2012_p9)
}
  0x34   :  { %42 = dma.hbm_to_vmem [thread:$0]  %s2525_s2, 16, %s40_s12, [#allocation6]  }
  0x35   :  { %2038 = dma.done.wait [#allocation3], 8192  }
  0x36   :  { %2039 = vsyncadd [#allocation3], 4294959104 }
  0x37   :  { %2040 = dma.done.wait [#allocation6], 32  }
  0x38   :  { %2041 = vsyncadd [#allocation6], 4294967264  ;;  %v1624_v0 = vld [vmem:[#allocation2] sm:$0xff]   ;;  %vm1218_vm0 = vcmask 519168   ;;  %v1879_v4 = vld [vmem:[#allocation2 + $0x8] sm:$0xff]   ;;  %s2049_s2 = smov [#allocation8]  }
  0x39   :  { %v2116_v1 = vld [vmem:[#allocation5] ss:$0 sm:$0xff]  ;;  %v1625_v2 = vunpack.c.l.bf16 %v1624_v0  ;;  %v1626_v3 = vunpack.c.h.bf16 %v1624_v0  ;;  %v1880_v5 = vld [vmem:[#allocation2 + $0x10] sm:$0xff]   ;;  %v1881_v6 = vld [vmem:[#allocation2 + $0x18] sm:$0xff]   ;;  %v1629_v8 = vunpack.c.l.bf16 %v1879_v4  ;;  %v1630_v9 = vunpack.c.h.bf16 %v1879_v4  ;;  %s1352_s23 = sshll.u32 %s2049_s2, 4  ;;  %s1353_s23 = int_to_ptr.vmem [resolvable:$true] %s1352_s23 }
  0x3a   :  { %v2118_v7 = vld [vmem:[#allocation7] ss:$0 sm:$0xff]  ;;  %v1633_v10 = vunpack.c.l.bf16 %v1880_v5  ;;  %v1634_v11 = vunpack.c.h.bf16 %v1880_v5  ;;  %v1637_v14 = vunpack.c.l.bf16 %v1881_v6  ;;  %v1638_v15 = vunpack.c.h.bf16 %v1881_v6  ;;  %v1883_v41 = vld [vmem:[#allocation2 + $0x28] sm:$0xff]   ;;  %v1884_v42 = vld [vmem:[#allocation2 + $0x30] sm:$0xff]   ;;  %s2016_s24 = scalar_lea.vmem %s1353_s23, 8192  ;;  %p2021_p11 = scmp.lt.s32.totalorder %s1353_s23, %s1353_s23 }
  0x3b   :  { %v315_v12 = vmul.f32 %v1625_v2, %v2116_v1  ;;  %v316_v13 = vmul.f32 %v1626_v3, %v2116_v1  ;;  %v317_v16 = vmul.f32 %v1629_v8, %v2116_v1  ;;  %v318_v17 = vmul.f32 %v1630_v9, %v2116_v1  ;;  %v1882_v36 = vld [vmem:[#allocation2 + $0x20] sm:$0xff]   ;;  %v1885_v47 = vld [vmem:[#allocation2 + $0x38] sm:$0xff]   ;;  %p2017_p10 = scmp.ne.s32.totalorder %s1353_s23, %s2016_s24  ;;  %p2022_p12 = scmp.lt.s32.totalorder %s2016_s24, %s2016_s24 }
  0x3c   :  { %v319_v18 = vmul.f32 %v1633_v10, %v2116_v1  ;;  %v320_v19 = vmul.f32 %v1634_v11, %v2116_v1  ;;  %v321_v22 = vmul.f32 %v1637_v14, %v2116_v1  ;;  %v322_v23 = vmul.f32 %v1638_v15, %v2116_v1 }
  0x3d   :  { %v450_v20 = vadd.f32 %v2118_v7, %v315_v12  ;;  %v451_v21 = vadd.f32 %v2118_v7, %v316_v13  ;;  %v452_v24 = vadd.f32 %v2118_v7, %v317_v16  ;;  %v453_v25 = vadd.f32 %v2118_v7, %v318_v17  ;;  %p2023_p13 = por %p2022_p12, %p2021_p11 }
  0x3e   :  { %v454_v26 = vadd.f32 %v2118_v7, %v319_v18  ;;  %v455_v27 = vadd.f32 %v2118_v7, %v320_v19  ;;  %v456_v30 = vadd.f32 %v2118_v7, %v321_v22  ;;  %v457_v31 = vadd.f32 %v2118_v7, %v322_v23  ;;  %v1886_v18 = vld [vmem:[#allocation2 + $0x40] sm:$0xff]   ;;  %v1887_v23 = vld [vmem:[#allocation2 + $0x48] sm:$0xff]  }
  0x3f   :  { %v578_v28 = vmax.f32 %v450_v20, 0.0  ;;  %v579_v29 = vmax.f32 %v451_v21, 0.0  ;;  %v580_v32 = vmax.f32 %v452_v24, 0.0  ;;  %v581_v33 = vmax.f32 %v453_v25, 0.0  ;;  %v1888_v24 = vld [vmem:[#allocation2 + $0x50] sm:$0xff]   ;;  %p2024_p0 = pnand %p2023_p13, %p2017_p10 }
  0x40   :  { %v582_v34 = vmax.f32 %v454_v26, 0.0  ;;  %v583_v35 = vmax.f32 %v455_v27, 0.0  ;;  %v584_v39 = vmax.f32 %v456_v30, 0.0  ;;  %v585_v40 = vmax.f32 %v457_v31, 0.0 }
  0x41   :  { %v1495_v37 = vpack.c.bf16 %v578_v28, %v578_v28  ;;  %v1496_v38 = vpack.c.bf16 %v579_v29, %v579_v29  ;;  %v1497_v43 = vpack.c.bf16 %v580_v32, %v580_v32  ;;  %v1498_v44 = vpack.c.bf16 %v581_v33, %v581_v33  ;;  %v1889_v29 = vld [vmem:[#allocation2 + $0x58] sm:$0xff]  }
  0x42   :  { %v1499_v45 = vpack.c.bf16 %v582_v34, %v582_v34  ;;  %v1500_v46 = vpack.c.bf16 %v583_v35, %v583_v35  ;;  %v1501_v48 = vpack.c.bf16 %v584_v39, %v584_v39  ;;  %v1502_v49 = vpack.c.bf16 %v585_v40, %v585_v40 }
  0x43   :  { %1219 = vst.msk [vmem:[#allocation8] sm:$0xf] %vm1218_vm0, %v1495_v37  ;;  %1220 = vst.msk [vmem:[#allocation8 + $0x4] sm:$0xf] %vm1218_vm0, %v1496_v38  ;;  %v1641_v50 = vunpack.c.l.bf16 %v1882_v36  ;;  %v1642_v51 = vunpack.c.h.bf16 %v1882_v36  ;;  %v1645_v52 = vunpack.c.l.bf16 %v1883_v41  ;;  %v1646_v53 = vunpack.c.h.bf16 %v1883_v41 }
  0x44   :  { %1221 = vst.msk [vmem:[#allocation8 + $0x8] sm:$0xf] %vm1218_vm0, %v1497_v43  ;;  %1222 = vst.msk [vmem:[#allocation8 + $0xc] sm:$0xf] %vm1218_vm0, %v1498_v44  ;;  %v1649_v54 = vunpack.c.l.bf16 %v1884_v42  ;;  %v1650_v55 = vunpack.c.h.bf16 %v1884_v42  ;;  %v1653_v58 = vunpack.c.l.bf16 %v1885_v47  ;;  %v1654_v59 = vunpack.c.h.bf16 %v1885_v47 }
  0x45   :  { %1223 = vst.msk [vmem:[#allocation8 + $0x10] sm:$0xf] %vm1218_vm0, %v1499_v45  ;;  %1224 = vst.msk [vmem:[#allocation8 + $0x14] sm:$0xf] %vm1218_vm0, %v1500_v46  ;;  %v323_v56 = vmul.f32 %v1641_v50, %v2116_v1  ;;  %v324_v57 = vmul.f32 %v1642_v51, %v2116_v1  ;;  %v325_v60 = vmul.f32 %v1645_v52, %v2116_v1  ;;  %v1657_v32 = vunpack.c.l.bf16 %v1886_v18 }
  0x46   :  { %1225 = vst.msk [vmem:[#allocation8 + $0x18] sm:$0xf] %vm1218_vm0, %v1501_v48  ;;  %1226 = vst.msk [vmem:[#allocation8 + $0x1c] sm:$0xf] %vm1218_vm0, %v1502_v49  ;;  %v326_v61 = vmul.f32 %v1646_v53, %v2116_v1  ;;  %v327_v62 = vmul.f32 %v1649_v54, %v2116_v1  ;;  %v328_v63 = vmul.f32 %v1650_v55, %v2116_v1  ;;  %v1658_v33 = vunpack.c.h.bf16 %v1886_v18 }
  0x47   :  { %v458_v0 = vadd.f32 %v2118_v7, %v323_v56  ;;  %v459_v2 = vadd.f32 %v2118_v7, %v324_v57  ;;  %v329_v3 = vmul.f32 %v1653_v58, %v2116_v1  ;;  %v330_v4 = vmul.f32 %v1654_v59, %v2116_v1 }
  0x48   :  { %v460_v5 = vadd.f32 %v2118_v7, %v325_v60  ;;  %v461_v6 = vadd.f32 %v2118_v7, %v326_v61  ;;  %v462_v8 = vadd.f32 %v2118_v7, %v327_v62  ;;  %v463_v9 = vadd.f32 %v2118_v7, %v328_v63  ;;  %v1890_v62 = vld [vmem:[#allocation2 + $0x60] sm:$0xff]  }
  0x49   :  { %v586_v10 = vmax.f32 %v458_v0, 0.0  ;;  %v587_v11 = vmax.f32 %v459_v2, 0.0  ;;  %v464_v12 = vadd.f32 %v2118_v7, %v329_v3  ;;  %v465_v13 = vadd.f32 %v2118_v7, %v330_v4  ;;  %v1891_v4 = vld [vmem:[#allocation2 + $0x68] sm:$0xff]  }
  0x4a   :  { %v588_v14 = vmax.f32 %v460_v5, 0.0  ;;  %v589_v15 = vmax.f32 %v461_v6, 0.0  ;;  %v590_v16 = vmax.f32 %v462_v8, 0.0  ;;  %v591_v17 = vmax.f32 %v463_v9, 0.0  ;;  %v1892_v5 = vld [vmem:[#allocation2 + $0x70] sm:$0xff]  }
  0x4b   :  { %v1503_v19 = vpack.c.bf16 %v586_v10, %v586_v10  ;;  %v1504_v20 = vpack.c.bf16 %v587_v11, %v587_v11  ;;  %v592_v21 = vmax.f32 %v464_v12, 0.0  ;;  %v593_v22 = vmax.f32 %v465_v13, 0.0  ;;  %v1893_v11 = vld [vmem:[#allocation2 + $0x78] sm:$0xff]  }
  0x4c   :  { %v1505_v25 = vpack.c.bf16 %v588_v14, %v588_v14  ;;  %v1506_v26 = vpack.c.bf16 %v589_v15, %v589_v15  ;;  %v1507_v27 = vpack.c.bf16 %v590_v16, %v590_v16  ;;  %v1508_v28 = vpack.c.bf16 %v591_v17, %v591_v17 }
  0x4d   :  { %1227 = vst.msk [vmem:[#allocation8 + $0x20] sm:$0xf] %vm1218_vm0, %v1503_v19  ;;  %1228 = vst.msk [vmem:[#allocation8 + $0x24] sm:$0xf] %vm1218_vm0, %v1504_v20  ;;  %v1509_v30 = vpack.c.bf16 %v592_v21, %v592_v21  ;;  %v1510_v31 = vpack.c.bf16 %v593_v22, %v593_v22  ;;  %v1661_v34 = vunpack.c.l.bf16 %v1887_v23  ;;  %v1662_v35 = vunpack.c.h.bf16 %v1887_v23 }
  0x4e   :  { %1229 = vst.msk [vmem:[#allocation8 + $0x28] sm:$0xf] %vm1218_vm0, %v1505_v25  ;;  %1230 = vst.msk [vmem:[#allocation8 + $0x2c] sm:$0xf] %vm1218_vm0, %v1506_v26  ;;  %v1665_v36 = vunpack.c.l.bf16 %v1888_v24  ;;  %v1666_v37 = vunpack.c.h.bf16 %v1888_v24  ;;  %v331_v38 = vmul.f32 %v1657_v32, %v2116_v1  ;;  %v332_v39 = vmul.f32 %v1658_v33, %v2116_v1 }
  0x4f   :  { %1231 = vst.msk [vmem:[#allocation8 + $0x30] sm:$0xf] %vm1218_vm0, %v1507_v27  ;;  %1232 = vst.msk [vmem:[#allocation8 + $0x34] sm:$0xf] %vm1218_vm0, %v1508_v28  ;;  %v1669_v40 = vunpack.c.l.bf16 %v1889_v29  ;;  %v1670_v41 = vunpack.c.h.bf16 %v1889_v29  ;;  %v333_v42 = vmul.f32 %v1661_v34, %v2116_v1  ;;  %v334_v43 = vmul.f32 %v1662_v35, %v2116_v1 }
  0x50   :  { %1233 = vst.msk [vmem:[#allocation8 + $0x38] sm:$0xf] %vm1218_vm0, %v1509_v30  ;;  %1234 = vst.msk [vmem:[#allocation8 + $0x3c] sm:$0xf] %vm1218_vm0, %v1510_v31  ;;  %v335_v44 = vmul.f32 %v1665_v36, %v2116_v1  ;;  %v336_v45 = vmul.f32 %v1666_v37, %v2116_v1  ;;  %v466_v46 = vadd.f32 %v2118_v7, %v331_v38  ;;  %v1673_v14 = vunpack.c.l.bf16 %v1890_v62 }
  0x51   :  { %v467_v47 = vadd.f32 %v2118_v7, %v332_v39  ;;  %v337_v48 = vmul.f32 %v1669_v40, %v2116_v1  ;;  %v338_v49 = vmul.f32 %v1670_v41, %v2116_v1  ;;  %v468_v50 = vadd.f32 %v2118_v7, %v333_v42 }
  0x52   :  { %v469_v51 = vadd.f32 %v2118_v7, %v334_v43  ;;  %v470_v52 = vadd.f32 %v2118_v7, %v335_v44  ;;  %v471_v53 = vadd.f32 %v2118_v7, %v336_v45  ;;  %v594_v54 = vmax.f32 %v466_v46, 0.0  ;;  %v1894_v44 = vld [vmem:[#allocation2 + $0x80] sm:$0xff]  }
  0x53   :  { %v595_v55 = vmax.f32 %v467_v47, 0.0  ;;  %v472_v56 = vadd.f32 %v2118_v7, %v337_v48  ;;  %v473_v57 = vadd.f32 %v2118_v7, %v338_v49  ;;  %v596_v58 = vmax.f32 %v468_v50, 0.0  ;;  %v1895_v49 = vld [vmem:[#allocation2 + $0x88] sm:$0xff]   ;;  %v1896_v50 = vld [vmem:[#allocation2 + $0x90] sm:$0xff]  }
  0x54   :  { %v597_v59 = vmax.f32 %v469_v51, 0.0  ;;  %v598_v60 = vmax.f32 %v470_v52, 0.0  ;;  %v599_v61 = vmax.f32 %v471_v53, 0.0  ;;  %v1511_v63 = vpack.c.bf16 %v594_v54, %v594_v54 }
  0x55   :  { %v1512_v0 = vpack.c.bf16 %v595_v55, %v595_v55  ;;  %v600_v2 = vmax.f32 %v472_v56, 0.0  ;;  %v601_v3 = vmax.f32 %v473_v57, 0.0  ;;  %v1513_v6 = vpack.c.bf16 %v596_v58, %v596_v58  ;;  %v1897_v55 = vld [vmem:[#allocation2 + $0x98] sm:$0xff]  }
  0x56   :  { %v1514_v8 = vpack.c.bf16 %v597_v59, %v597_v59  ;;  %v1515_v9 = vpack.c.bf16 %v598_v60, %v598_v60  ;;  %v1516_v10 = vpack.c.bf16 %v599_v61, %v599_v61  ;;  %1235 = vst.msk [vmem:[#allocation8 + $0x40] sm:$0xf] %vm1218_vm0, %v1511_v63  ;;  %v1674_v15 = vunpack.c.h.bf16 %v1890_v62 }
  0x57   :  { %1236 = vst.msk [vmem:[#allocation8 + $0x44] sm:$0xf] %vm1218_vm0, %v1512_v0  ;;  %v1517_v12 = vpack.c.bf16 %v600_v2, %v600_v2  ;;  %v1518_v13 = vpack.c.bf16 %v601_v3, %v601_v3  ;;  %1237 = vst.msk [vmem:[#allocation8 + $0x48] sm:$0xf] %vm1218_vm0, %v1513_v6  ;;  %v1677_v16 = vunpack.c.l.bf16 %v1891_v4  ;;  %v1678_v17 = vunpack.c.h.bf16 %v1891_v4 }
  0x58   :  { %1238 = vst.msk [vmem:[#allocation8 + $0x4c] sm:$0xf] %vm1218_vm0, %v1514_v8  ;;  %1239 = vst.msk [vmem:[#allocation8 + $0x50] sm:$0xf] %vm1218_vm0, %v1515_v9  ;;  %v1681_v18 = vunpack.c.l.bf16 %v1892_v5  ;;  %v1682_v19 = vunpack.c.h.bf16 %v1892_v5  ;;  %v339_v20 = vmul.f32 %v1673_v14, %v2116_v1  ;;  %v340_v21 = vmul.f32 %v1674_v15, %v2116_v1 }
  0x59   :  { %1240 = vst.msk [vmem:[#allocation8 + $0x54] sm:$0xf] %vm1218_vm0, %v1516_v10  ;;  %1241 = vst.msk [vmem:[#allocation8 + $0x58] sm:$0xf] %vm1218_vm0, %v1517_v12  ;;  %v1685_v22 = vunpack.c.l.bf16 %v1893_v11  ;;  %v1686_v23 = vunpack.c.h.bf16 %v1893_v11  ;;  %v341_v24 = vmul.f32 %v1677_v16, %v2116_v1  ;;  %v342_v25 = vmul.f32 %v1678_v17, %v2116_v1 }
  0x5a   :  { %1242 = vst.msk [vmem:[#allocation8 + $0x5c] sm:$0xf] %vm1218_vm0, %v1518_v13  ;;  %v343_v26 = vmul.f32 %v1681_v18, %v2116_v1  ;;  %v344_v27 = vmul.f32 %v1682_v19, %v2116_v1  ;;  %v474_v28 = vadd.f32 %v2118_v7, %v339_v20  ;;  %v475_v29 = vadd.f32 %v2118_v7, %v340_v21 }
  0x5b   :  { %v345_v30 = vmul.f32 %v1685_v22, %v2116_v1  ;;  %v346_v31 = vmul.f32 %v1686_v23, %v2116_v1  ;;  %v476_v32 = vadd.f32 %v2118_v7, %v341_v24  ;;  %v477_v33 = vadd.f32 %v2118_v7, %v342_v25 }
  0x5c   :  { %v478_v34 = vadd.f32 %v2118_v7, %v343_v26  ;;  %v479_v35 = vadd.f32 %v2118_v7, %v344_v27  ;;  %v602_v36 = vmax.f32 %v474_v28, 0.0  ;;  %v603_v37 = vmax.f32 %v475_v29, 0.0  ;;  %v1898_v26 = vld [vmem:[#allocation2 + $0xa0] sm:$0xff]  }
  0x5d   :  { %v480_v38 = vadd.f32 %v2118_v7, %v345_v30  ;;  %v481_v39 = vadd.f32 %v2118_v7, %v346_v31  ;;  %v604_v40 = vmax.f32 %v476_v32, 0.0  ;;  %v605_v41 = vmax.f32 %v477_v33, 0.0  ;;  %v1899_v31 = vld [vmem:[#allocation2 + $0xa8] sm:$0xff]   ;;  %v1900_v32 = vld [vmem:[#allocation2 + $0xb0] sm:$0xff]  }
  0x5e   :  { %v606_v42 = vmax.f32 %v478_v34, 0.0  ;;  %v607_v43 = vmax.f32 %v479_v35, 0.0  ;;  %v1519_v45 = vpack.c.bf16 %v602_v36, %v602_v36  ;;  %v1520_v46 = vpack.c.bf16 %v603_v37, %v603_v37  ;;  %v1901_v37 = vld [vmem:[#allocation2 + $0xb8] sm:$0xff]  }
  0x5f   :  { %v608_v47 = vmax.f32 %v480_v38, 0.0  ;;  %v609_v48 = vmax.f32 %v481_v39, 0.0  ;;  %v1521_v51 = vpack.c.bf16 %v604_v40, %v604_v40  ;;  %v1522_v52 = vpack.c.bf16 %v605_v41, %v605_v41 }
  0x60   :  { %v1523_v53 = vpack.c.bf16 %v606_v42, %v606_v42  ;;  %v1524_v54 = vpack.c.bf16 %v607_v43, %v607_v43  ;;  %1243 = vst.msk [vmem:[#allocation8 + $0x60] sm:$0xf] %vm1218_vm0, %v1519_v45  ;;  %1244 = vst.msk [vmem:[#allocation8 + $0x64] sm:$0xf] %vm1218_vm0, %v1520_v46  ;;  %v1689_v58 = vunpack.c.l.bf16 %v1894_v44  ;;  %v1690_v59 = vunpack.c.h.bf16 %v1894_v44 }
  0x61   :  { %v1525_v56 = vpack.c.bf16 %v608_v47, %v608_v47  ;;  %v1526_v57 = vpack.c.bf16 %v609_v48, %v609_v48  ;;  %1245 = vst.msk [vmem:[#allocation8 + $0x68] sm:$0xf] %vm1218_vm0, %v1521_v51  ;;  %1246 = vst.msk [vmem:[#allocation8 + $0x6c] sm:$0xf] %vm1218_vm0, %v1522_v52  ;;  %v1693_v60 = vunpack.c.l.bf16 %v1895_v49  ;;  %v1694_v61 = vunpack.c.h.bf16 %v1895_v49 }
  0x62   :  { %1247 = vst.msk [vmem:[#allocation8 + $0x70] sm:$0xf] %vm1218_vm0, %v1523_v53  ;;  %1248 = vst.msk [vmem:[#allocation8 + $0x74] sm:$0xf] %vm1218_vm0, %v1524_v54  ;;  %v1697_v62 = vunpack.c.l.bf16 %v1896_v50  ;;  %v1698_v63 = vunpack.c.h.bf16 %v1896_v50  ;;  %v347_v0 = vmul.f32 %v1689_v58, %v2116_v1  ;;  %v348_v2 = vmul.f32 %v1690_v59, %v2116_v1 }
  0x63   :  { %1249 = vst.msk [vmem:[#allocation8 + $0x78] sm:$0xf] %vm1218_vm0, %v1525_v56  ;;  %1250 = vst.msk [vmem:[#allocation8 + $0x7c] sm:$0xf] %vm1218_vm0, %v1526_v57  ;;  %v1701_v3 = vunpack.c.l.bf16 %v1897_v55  ;;  %v1702_v4 = vunpack.c.h.bf16 %v1897_v55  ;;  %v349_v5 = vmul.f32 %v1693_v60, %v2116_v1  ;;  %v350_v6 = vmul.f32 %v1694_v61, %v2116_v1 }
  0x64   :  { %v351_v8 = vmul.f32 %v1697_v62, %v2116_v1  ;;  %v352_v9 = vmul.f32 %v1698_v63, %v2116_v1  ;;  %v482_v10 = vadd.f32 %v2118_v7, %v347_v0  ;;  %v483_v11 = vadd.f32 %v2118_v7, %v348_v2 }
  0x65   :  { %v353_v12 = vmul.f32 %v1701_v3, %v2116_v1  ;;  %v354_v13 = vmul.f32 %v1702_v4, %v2116_v1  ;;  %v484_v14 = vadd.f32 %v2118_v7, %v349_v5  ;;  %v485_v15 = vadd.f32 %v2118_v7, %v350_v6 }
  0x66   :  { %v486_v16 = vadd.f32 %v2118_v7, %v351_v8  ;;  %v487_v17 = vadd.f32 %v2118_v7, %v352_v9  ;;  %v610_v18 = vmax.f32 %v482_v10, 0.0  ;;  %v611_v19 = vmax.f32 %v483_v11, 0.0  ;;  %v1902_v8 = vld [vmem:[#allocation2 + $0xc0] sm:$0xff]  }
  0x67   :  { %v488_v20 = vadd.f32 %v2118_v7, %v353_v12  ;;  %v489_v21 = vadd.f32 %v2118_v7, %v354_v13  ;;  %v612_v22 = vmax.f32 %v484_v14, 0.0  ;;  %v613_v23 = vmax.f32 %v485_v15, 0.0  ;;  %v1903_v13 = vld [vmem:[#allocation2 + $0xc8] sm:$0xff]   ;;  %v1904_v14 = vld [vmem:[#allocation2 + $0xd0] sm:$0xff]  }
  0x68   :  { %v614_v24 = vmax.f32 %v486_v16, 0.0  ;;  %v615_v25 = vmax.f32 %v487_v17, 0.0  ;;  %v1527_v27 = vpack.c.bf16 %v610_v18, %v610_v18  ;;  %v1528_v28 = vpack.c.bf16 %v611_v19, %v611_v19  ;;  %v1905_v19 = vld [vmem:[#allocation2 + $0xd8] sm:$0xff]  }
  0x69   :  { %v616_v29 = vmax.f32 %v488_v20, 0.0  ;;  %v617_v30 = vmax.f32 %v489_v21, 0.0  ;;  %v1529_v33 = vpack.c.bf16 %v612_v22, %v612_v22  ;;  %v1530_v34 = vpack.c.bf16 %v613_v23, %v613_v23 }
  0x6a   :  { %v1531_v35 = vpack.c.bf16 %v614_v24, %v614_v24  ;;  %v1532_v36 = vpack.c.bf16 %v615_v25, %v615_v25  ;;  %1251 = vst.msk [vmem:[#allocation8 + $0x80] sm:$0xf] %vm1218_vm0, %v1527_v27  ;;  %1252 = vst.msk [vmem:[#allocation8 + $0x84] sm:$0xf] %vm1218_vm0, %v1528_v28  ;;  %v1705_v40 = vunpack.c.l.bf16 %v1898_v26  ;;  %v1706_v41 = vunpack.c.h.bf16 %v1898_v26 }
  0x6b   :  { %v1533_v38 = vpack.c.bf16 %v616_v29, %v616_v29  ;;  %v1534_v39 = vpack.c.bf16 %v617_v30, %v617_v30  ;;  %1253 = vst.msk [vmem:[#allocation8 + $0x88] sm:$0xf] %vm1218_vm0, %v1529_v33  ;;  %1254 = vst.msk [vmem:[#allocation8 + $0x8c] sm:$0xf] %vm1218_vm0, %v1530_v34  ;;  %v1709_v42 = vunpack.c.l.bf16 %v1899_v31  ;;  %v1710_v43 = vunpack.c.h.bf16 %v1899_v31 }
  0x6c   :  { %1255 = vst.msk [vmem:[#allocation8 + $0x90] sm:$0xf] %vm1218_vm0, %v1531_v35  ;;  %1256 = vst.msk [vmem:[#allocation8 + $0x94] sm:$0xf] %vm1218_vm0, %v1532_v36  ;;  %v1713_v44 = vunpack.c.l.bf16 %v1900_v32  ;;  %v1714_v45 = vunpack.c.h.bf16 %v1900_v32  ;;  %v355_v46 = vmul.f32 %v1705_v40, %v2116_v1  ;;  %v356_v47 = vmul.f32 %v1706_v41, %v2116_v1 }
  0x6d   :  { %1257 = vst.msk [vmem:[#allocation8 + $0x98] sm:$0xf] %vm1218_vm0, %v1533_v38  ;;  %1258 = vst.msk [vmem:[#allocation8 + $0x9c] sm:$0xf] %vm1218_vm0, %v1534_v39  ;;  %v1717_v48 = vunpack.c.l.bf16 %v1901_v37  ;;  %v1718_v49 = vunpack.c.h.bf16 %v1901_v37  ;;  %v357_v50 = vmul.f32 %v1709_v42, %v2116_v1  ;;  %v358_v51 = vmul.f32 %v1710_v43, %v2116_v1 }
  0x6e   :  { %v359_v52 = vmul.f32 %v1713_v44, %v2116_v1  ;;  %v360_v53 = vmul.f32 %v1714_v45, %v2116_v1  ;;  %v490_v54 = vadd.f32 %v2118_v7, %v355_v46  ;;  %v491_v55 = vadd.f32 %v2118_v7, %v356_v47 }
  0x6f   :  { %v361_v56 = vmul.f32 %v1717_v48, %v2116_v1  ;;  %v362_v57 = vmul.f32 %v1718_v49, %v2116_v1  ;;  %v492_v58 = vadd.f32 %v2118_v7, %v357_v50  ;;  %v493_v59 = vadd.f32 %v2118_v7, %v358_v51 }
  0x70   :  { %v494_v60 = vadd.f32 %v2118_v7, %v359_v52  ;;  %v495_v61 = vadd.f32 %v2118_v7, %v360_v53  ;;  %v618_v62 = vmax.f32 %v490_v54, 0.0  ;;  %v619_v63 = vmax.f32 %v491_v55, 0.0  ;;  %v1906_v52 = vld [vmem:[#allocation2 + $0xe0] sm:$0xff]  }
  0x71   :  { %v496_v0 = vadd.f32 %v2118_v7, %v361_v56  ;;  %v497_v2 = vadd.f32 %v2118_v7, %v362_v57  ;;  %v620_v3 = vmax.f32 %v492_v58, 0.0  ;;  %v621_v4 = vmax.f32 %v493_v59, 0.0  ;;  %v1907_v57 = vld [vmem:[#allocation2 + $0xe8] sm:$0xff]   ;;  %v1908_v58 = vld [vmem:[#allocation2 + $0xf0] sm:$0xff]  }
  0x72   :  { %v622_v5 = vmax.f32 %v494_v60, 0.0  ;;  %v623_v6 = vmax.f32 %v495_v61, 0.0  ;;  %v1535_v9 = vpack.c.bf16 %v618_v62, %v618_v62  ;;  %v1536_v10 = vpack.c.bf16 %v619_v63, %v619_v63  ;;  %v1909_v63 = vld [vmem:[#allocation2 + $0xf8] sm:$0xff]  }
  0x73   :  { %v624_v11 = vmax.f32 %v496_v0, 0.0  ;;  %v625_v12 = vmax.f32 %v497_v2, 0.0  ;;  %v1537_v15 = vpack.c.bf16 %v620_v3, %v620_v3  ;;  %v1538_v16 = vpack.c.bf16 %v621_v4, %v621_v4 }
  0x74   :  { %v1539_v17 = vpack.c.bf16 %v622_v5, %v622_v5  ;;  %v1540_v18 = vpack.c.bf16 %v623_v6, %v623_v6  ;;  %1259 = vst.msk [vmem:[#allocation8 + $0xa0] sm:$0xf] %vm1218_vm0, %v1535_v9  ;;  %1260 = vst.msk [vmem:[#allocation8 + $0xa4] sm:$0xf] %vm1218_vm0, %v1536_v10  ;;  %v1721_v22 = vunpack.c.l.bf16 %v1902_v8  ;;  %v1722_v23 = vunpack.c.h.bf16 %v1902_v8 }
  0x75   :  { %v1541_v20 = vpack.c.bf16 %v624_v11, %v624_v11  ;;  %v1542_v21 = vpack.c.bf16 %v625_v12, %v625_v12  ;;  %1261 = vst.msk [vmem:[#allocation8 + $0xa8] sm:$0xf] %vm1218_vm0, %v1537_v15  ;;  %1262 = vst.msk [vmem:[#allocation8 + $0xac] sm:$0xf] %vm1218_vm0, %v1538_v16  ;;  %v1725_v24 = vunpack.c.l.bf16 %v1903_v13  ;;  %v1726_v25 = vunpack.c.h.bf16 %v1903_v13 }
  0x76   :  { %1263 = vst.msk [vmem:[#allocation8 + $0xb0] sm:$0xf] %vm1218_vm0, %v1539_v17  ;;  %1264 = vst.msk [vmem:[#allocation8 + $0xb4] sm:$0xf] %vm1218_vm0, %v1540_v18  ;;  %v1729_v26 = vunpack.c.l.bf16 %v1904_v14  ;;  %v1730_v27 = vunpack.c.h.bf16 %v1904_v14  ;;  %v363_v28 = vmul.f32 %v1721_v22, %v2116_v1  ;;  %v364_v29 = vmul.f32 %v1722_v23, %v2116_v1 }
  0x77   :  { %1265 = vst.msk [vmem:[#allocation8 + $0xb8] sm:$0xf] %vm1218_vm0, %v1541_v20  ;;  %1266 = vst.msk [vmem:[#allocation8 + $0xbc] sm:$0xf] %vm1218_vm0, %v1542_v21  ;;  %v1733_v30 = vunpack.c.l.bf16 %v1905_v19  ;;  %v1734_v31 = vunpack.c.h.bf16 %v1905_v19  ;;  %v365_v32 = vmul.f32 %v1725_v24, %v2116_v1  ;;  %v366_v33 = vmul.f32 %v1726_v25, %v2116_v1 }
  0x78   :  { %v367_v34 = vmul.f32 %v1729_v26, %v2116_v1  ;;  %v368_v35 = vmul.f32 %v1730_v27, %v2116_v1  ;;  %v498_v36 = vadd.f32 %v2118_v7, %v363_v28  ;;  %v499_v37 = vadd.f32 %v2118_v7, %v364_v29 }
  0x79   :  { %v369_v38 = vmul.f32 %v1733_v30, %v2116_v1  ;;  %v370_v39 = vmul.f32 %v1734_v31, %v2116_v1  ;;  %v500_v40 = vadd.f32 %v2118_v7, %v365_v32  ;;  %v501_v41 = vadd.f32 %v2118_v7, %v366_v33 }
  0x7a   :  { %v502_v42 = vadd.f32 %v2118_v7, %v367_v34  ;;  %v503_v43 = vadd.f32 %v2118_v7, %v368_v35  ;;  %v626_v44 = vmax.f32 %v498_v36, 0.0  ;;  %v627_v45 = vmax.f32 %v499_v37, 0.0  ;;  %v1910_v34 = vld [vmem:[#allocation2 + $0x100] sm:$0xff]  }
  0x7b   :  { %v504_v46 = vadd.f32 %v2118_v7, %v369_v38  ;;  %v505_v47 = vadd.f32 %v2118_v7, %v370_v39  ;;  %v628_v48 = vmax.f32 %v500_v40, 0.0  ;;  %v629_v49 = vmax.f32 %v501_v41, 0.0  ;;  %v1911_v39 = vld [vmem:[#allocation2 + $0x108] sm:$0xff]   ;;  %v1912_v40 = vld [vmem:[#allocation2 + $0x110] sm:$0xff]  }
  0x7c   :  { %v630_v50 = vmax.f32 %v502_v42, 0.0  ;;  %v631_v51 = vmax.f32 %v503_v43, 0.0  ;;  %v1543_v53 = vpack.c.bf16 %v626_v44, %v626_v44  ;;  %v1544_v54 = vpack.c.bf16 %v627_v45, %v627_v45  ;;  %v1913_v45 = vld [vmem:[#allocation2 + $0x118] sm:$0xff]  }
  0x7d   :  { %v632_v55 = vmax.f32 %v504_v46, 0.0  ;;  %v633_v56 = vmax.f32 %v505_v47, 0.0  ;;  %v1545_v59 = vpack.c.bf16 %v628_v48, %v628_v48  ;;  %v1546_v60 = vpack.c.bf16 %v629_v49, %v629_v49 }
  0x7e   :  { %v1547_v61 = vpack.c.bf16 %v630_v50, %v630_v50  ;;  %v1548_v62 = vpack.c.bf16 %v631_v51, %v631_v51  ;;  %1267 = vst.msk [vmem:[#allocation8 + $0xc0] sm:$0xf] %vm1218_vm0, %v1543_v53  ;;  %1268 = vst.msk [vmem:[#allocation8 + $0xc4] sm:$0xf] %vm1218_vm0, %v1544_v54  ;;  %v1737_v3 = vunpack.c.l.bf16 %v1906_v52  ;;  %v1738_v4 = vunpack.c.h.bf16 %v1906_v52 }
  0x7f   :  { %v1549_v0 = vpack.c.bf16 %v632_v55, %v632_v55  ;;  %v1550_v2 = vpack.c.bf16 %v633_v56, %v633_v56  ;;  %1269 = vst.msk [vmem:[#allocation8 + $0xc8] sm:$0xf] %vm1218_vm0, %v1545_v59  ;;  %1270 = vst.msk [vmem:[#allocation8 + $0xcc] sm:$0xf] %vm1218_vm0, %v1546_v60  ;;  %v1741_v5 = vunpack.c.l.bf16 %v1907_v57  ;;  %v1742_v6 = vunpack.c.h.bf16 %v1907_v57 }
  0x80   :  { %1271 = vst.msk [vmem:[#allocation8 + $0xd0] sm:$0xf] %vm1218_vm0, %v1547_v61  ;;  %1272 = vst.msk [vmem:[#allocation8 + $0xd4] sm:$0xf] %vm1218_vm0, %v1548_v62  ;;  %v1745_v8 = vunpack.c.l.bf16 %v1908_v58  ;;  %v1746_v9 = vunpack.c.h.bf16 %v1908_v58  ;;  %v371_v10 = vmul.f32 %v1737_v3, %v2116_v1  ;;  %v372_v11 = vmul.f32 %v1738_v4, %v2116_v1 }
  0x81   :  { %1273 = vst.msk [vmem:[#allocation8 + $0xd8] sm:$0xf] %vm1218_vm0, %v1549_v0  ;;  %1274 = vst.msk [vmem:[#allocation8 + $0xdc] sm:$0xf] %vm1218_vm0, %v1550_v2  ;;  %v1749_v12 = vunpack.c.l.bf16 %v1909_v63  ;;  %v1750_v13 = vunpack.c.h.bf16 %v1909_v63  ;;  %v373_v14 = vmul.f32 %v1741_v5, %v2116_v1  ;;  %v374_v15 = vmul.f32 %v1742_v6, %v2116_v1 }
  0x82   :  { %v375_v16 = vmul.f32 %v1745_v8, %v2116_v1  ;;  %v376_v17 = vmul.f32 %v1746_v9, %v2116_v1  ;;  %v506_v18 = vadd.f32 %v2118_v7, %v371_v10  ;;  %v507_v19 = vadd.f32 %v2118_v7, %v372_v11 }
  0x83   :  { %v377_v20 = vmul.f32 %v1749_v12, %v2116_v1  ;;  %v378_v21 = vmul.f32 %v1750_v13, %v2116_v1  ;;  %v508_v22 = vadd.f32 %v2118_v7, %v373_v14  ;;  %v509_v23 = vadd.f32 %v2118_v7, %v374_v15 }
  0x84   :  { %v510_v24 = vadd.f32 %v2118_v7, %v375_v16  ;;  %v511_v25 = vadd.f32 %v2118_v7, %v376_v17  ;;  %v634_v26 = vmax.f32 %v506_v18, 0.0  ;;  %v635_v27 = vmax.f32 %v507_v19, 0.0  ;;  %v1914_v16 = vld [vmem:[#allocation2 + $0x120] sm:$0xff]  }
  0x85   :  { %v512_v28 = vadd.f32 %v2118_v7, %v377_v20  ;;  %v513_v29 = vadd.f32 %v2118_v7, %v378_v21  ;;  %v636_v30 = vmax.f32 %v508_v22, 0.0  ;;  %v637_v31 = vmax.f32 %v509_v23, 0.0  ;;  %v1915_v21 = vld [vmem:[#allocation2 + $0x128] sm:$0xff]   ;;  %v1916_v22 = vld [vmem:[#allocation2 + $0x130] sm:$0xff]  }
  0x86   :  { %v638_v32 = vmax.f32 %v510_v24, 0.0  ;;  %v639_v33 = vmax.f32 %v511_v25, 0.0  ;;  %v1551_v35 = vpack.c.bf16 %v634_v26, %v634_v26  ;;  %v1552_v36 = vpack.c.bf16 %v635_v27, %v635_v27  ;;  %v1917_v27 = vld [vmem:[#allocation2 + $0x138] sm:$0xff]  }
  0x87   :  { %v640_v37 = vmax.f32 %v512_v28, 0.0  ;;  %v641_v38 = vmax.f32 %v513_v29, 0.0  ;;  %v1553_v41 = vpack.c.bf16 %v636_v30, %v636_v30  ;;  %v1554_v42 = vpack.c.bf16 %v637_v31, %v637_v31 }
  0x88   :  { %v1555_v43 = vpack.c.bf16 %v638_v32, %v638_v32  ;;  %v1556_v44 = vpack.c.bf16 %v639_v33, %v639_v33  ;;  %1275 = vst.msk [vmem:[#allocation8 + $0xe0] sm:$0xf] %vm1218_vm0, %v1551_v35  ;;  %1276 = vst.msk [vmem:[#allocation8 + $0xe4] sm:$0xf] %vm1218_vm0, %v1552_v36  ;;  %v1753_v48 = vunpack.c.l.bf16 %v1910_v34  ;;  %v1754_v49 = vunpack.c.h.bf16 %v1910_v34 }
  0x89   :  { %v1557_v46 = vpack.c.bf16 %v640_v37, %v640_v37  ;;  %v1558_v47 = vpack.c.bf16 %v641_v38, %v641_v38  ;;  %1277 = vst.msk [vmem:[#allocation8 + $0xe8] sm:$0xf] %vm1218_vm0, %v1553_v41  ;;  %1278 = vst.msk [vmem:[#allocation8 + $0xec] sm:$0xf] %vm1218_vm0, %v1554_v42  ;;  %v1757_v50 = vunpack.c.l.bf16 %v1911_v39  ;;  %v1758_v51 = vunpack.c.h.bf16 %v1911_v39 }
  0x8a   :  { %1279 = vst.msk [vmem:[#allocation8 + $0xf0] sm:$0xf] %vm1218_vm0, %v1555_v43  ;;  %1280 = vst.msk [vmem:[#allocation8 + $0xf4] sm:$0xf] %vm1218_vm0, %v1556_v44  ;;  %v1761_v52 = vunpack.c.l.bf16 %v1912_v40  ;;  %v1762_v53 = vunpack.c.h.bf16 %v1912_v40  ;;  %v379_v54 = vmul.f32 %v1753_v48, %v2116_v1  ;;  %v380_v55 = vmul.f32 %v1754_v49, %v2116_v1 }
  0x8b   :  { %1281 = vst.msk [vmem:[#allocation8 + $0xf8] sm:$0xf] %vm1218_vm0, %v1557_v46  ;;  %1282 = vst.msk [vmem:[#allocation8 + $0xfc] sm:$0xf] %vm1218_vm0, %v1558_v47  ;;  %v1765_v56 = vunpack.c.l.bf16 %v1913_v45  ;;  %v1766_v57 = vunpack.c.h.bf16 %v1913_v45  ;;  %v381_v58 = vmul.f32 %v1757_v50, %v2116_v1  ;;  %v382_v59 = vmul.f32 %v1758_v51, %v2116_v1 }
  0x8c   :  { %v383_v60 = vmul.f32 %v1761_v52, %v2116_v1  ;;  %v384_v61 = vmul.f32 %v1762_v53, %v2116_v1  ;;  %v514_v62 = vadd.f32 %v2118_v7, %v379_v54  ;;  %v515_v63 = vadd.f32 %v2118_v7, %v380_v55 }
  0x8d   :  { %v385_v0 = vmul.f32 %v1765_v56, %v2116_v1  ;;  %v386_v2 = vmul.f32 %v1766_v57, %v2116_v1  ;;  %v516_v3 = vadd.f32 %v2118_v7, %v381_v58  ;;  %v517_v4 = vadd.f32 %v2118_v7, %v382_v59 }
  0x8e   :  { %v518_v5 = vadd.f32 %v2118_v7, %v383_v60  ;;  %v519_v6 = vadd.f32 %v2118_v7, %v384_v61  ;;  %v642_v8 = vmax.f32 %v514_v62, 0.0  ;;  %v643_v9 = vmax.f32 %v515_v63, 0.0  ;;  %v1918_v60 = vld [vmem:[#allocation2 + $0x140] sm:$0xff]  }
  0x8f   :  { %v520_v10 = vadd.f32 %v2118_v7, %v385_v0  ;;  %v521_v11 = vadd.f32 %v2118_v7, %v386_v2  ;;  %v644_v12 = vmax.f32 %v516_v3, 0.0  ;;  %v645_v13 = vmax.f32 %v517_v4, 0.0  ;;  %v1919_v0 = vld [vmem:[#allocation2 + $0x148] sm:$0xff]   ;;  %v1920_v2 = vld [vmem:[#allocation2 + $0x150] sm:$0xff]  }
  0x90   :  { %v646_v14 = vmax.f32 %v518_v5, 0.0  ;;  %v647_v15 = vmax.f32 %v519_v6, 0.0  ;;  %v1559_v17 = vpack.c.bf16 %v642_v8, %v642_v8  ;;  %v1560_v18 = vpack.c.bf16 %v643_v9, %v643_v9  ;;  %v1921_v8 = vld [vmem:[#allocation2 + $0x158] sm:$0xff]  }
  0x91   :  { %v648_v19 = vmax.f32 %v520_v10, 0.0  ;;  %v649_v20 = vmax.f32 %v521_v11, 0.0  ;;  %v1561_v23 = vpack.c.bf16 %v644_v12, %v644_v12  ;;  %v1562_v24 = vpack.c.bf16 %v645_v13, %v645_v13 }
  0x92   :  { %v1563_v25 = vpack.c.bf16 %v646_v14, %v646_v14  ;;  %v1564_v26 = vpack.c.bf16 %v647_v15, %v647_v15  ;;  %1283 = vst.msk [vmem:[#allocation8 + $0x100] sm:$0xf] %vm1218_vm0, %v1559_v17  ;;  %1284 = vst.msk [vmem:[#allocation8 + $0x104] sm:$0xf] %vm1218_vm0, %v1560_v18  ;;  %v1769_v30 = vunpack.c.l.bf16 %v1914_v16  ;;  %v1770_v31 = vunpack.c.h.bf16 %v1914_v16  ;;  %v2360_v16 = vld [vmem:[#allocation5] ss:$0 sm:$0xff] }
  0x93   :  { %v1565_v28 = vpack.c.bf16 %v648_v19, %v648_v19  ;;  %v1566_v29 = vpack.c.bf16 %v649_v20, %v649_v20  ;;  %1285 = vst.msk [vmem:[#allocation8 + $0x108] sm:$0xf] %vm1218_vm0, %v1561_v23  ;;  %1286 = vst.msk [vmem:[#allocation8 + $0x10c] sm:$0xf] %vm1218_vm0, %v1562_v24  ;;  %v1773_v32 = vunpack.c.l.bf16 %v1915_v21  ;;  %v1774_v33 = vunpack.c.h.bf16 %v1915_v21 }
  0x94   :  { %1287 = vst.msk [vmem:[#allocation8 + $0x110] sm:$0xf] %vm1218_vm0, %v1563_v25  ;;  %1288 = vst.msk [vmem:[#allocation8 + $0x114] sm:$0xf] %vm1218_vm0, %v1564_v26  ;;  %v1777_v34 = vunpack.c.l.bf16 %v1916_v22  ;;  %v1778_v35 = vunpack.c.h.bf16 %v1916_v22  ;;  %v387_v36 = vmul.f32 %v1769_v30, %v2116_v1  ;;  %v388_v37 = vmul.f32 %v1770_v31, %v2116_v1  ;;  %v2368_v25 = vld [vmem:[#allocation7] ss:$0 sm:$0xff] }
  0x95   :  { %1289 = vst.msk [vmem:[#allocation8 + $0x118] sm:$0xf] %vm1218_vm0, %v1565_v28  ;;  %1290 = vst.msk [vmem:[#allocation8 + $0x11c] sm:$0xf] %vm1218_vm0, %v1566_v29  ;;  %v1781_v38 = vunpack.c.l.bf16 %v1917_v27  ;;  %v1782_v39 = vunpack.c.h.bf16 %v1917_v27  ;;  %v389_v40 = vmul.f32 %v1773_v32, %v2116_v1  ;;  %v390_v41 = vmul.f32 %v1774_v33, %v2116_v1 }
  0x96   :  { %v391_v42 = vmul.f32 %v1777_v34, %v2116_v1  ;;  %v392_v43 = vmul.f32 %v1778_v35, %v2116_v1  ;;  %v522_v44 = vadd.f32 %v2118_v7, %v387_v36  ;;  %v523_v45 = vadd.f32 %v2118_v7, %v388_v37 }
  0x97   :  { %v393_v46 = vmul.f32 %v1781_v38, %v2116_v1  ;;  %v394_v47 = vmul.f32 %v1782_v39, %v2116_v1  ;;  %v524_v48 = vadd.f32 %v2118_v7, %v389_v40  ;;  %v525_v49 = vadd.f32 %v2118_v7, %v390_v41 }
  0x98   :  { %v526_v50 = vadd.f32 %v2118_v7, %v391_v42  ;;  %v527_v51 = vadd.f32 %v2118_v7, %v392_v43  ;;  %v650_v52 = vmax.f32 %v522_v44, 0.0  ;;  %v651_v53 = vmax.f32 %v523_v45, 0.0  ;;  %v1922_v42 = vld [vmem:[#allocation2 + $0x160] sm:$0xff]  }
  0x99   :  { %v528_v54 = vadd.f32 %v2118_v7, %v393_v46  ;;  %v529_v55 = vadd.f32 %v2118_v7, %v394_v47  ;;  %v652_v56 = vmax.f32 %v524_v48, 0.0  ;;  %v653_v57 = vmax.f32 %v525_v49, 0.0  ;;  %v1923_v47 = vld [vmem:[#allocation2 + $0x168] sm:$0xff]   ;;  %v1924_v48 = vld [vmem:[#allocation2 + $0x170] sm:$0xff]  }
  0x9a   :  { %v654_v58 = vmax.f32 %v526_v50, 0.0  ;;  %v655_v59 = vmax.f32 %v527_v51, 0.0  ;;  %v1567_v1 = vpack.c.bf16 %v650_v52, %v650_v52  ;;  %v1568_v61 = vpack.c.bf16 %v651_v53, %v651_v53  ;;  %v1925_v53 = vld [vmem:[#allocation2 + $0x178] sm:$0xff]  }
  0x9b   :  { %v656_v62 = vmax.f32 %v528_v54, 0.0  ;;  %v657_v63 = vmax.f32 %v529_v55, 0.0  ;;  %v1569_v3 = vpack.c.bf16 %v652_v56, %v652_v56  ;;  %v1570_v4 = vpack.c.bf16 %v653_v57, %v653_v57 }
  0x9c   :  { %v1571_v5 = vpack.c.bf16 %v654_v58, %v654_v58  ;;  %v1572_v6 = vpack.c.bf16 %v655_v59, %v655_v59  ;;  %1291 = vst.msk [vmem:[#allocation8 + $0x120] sm:$0xf] %vm1218_vm0, %v1567_v1  ;;  %1292 = vst.msk [vmem:[#allocation8 + $0x124] sm:$0xf] %vm1218_vm0, %v1568_v61  ;;  %v1785_v10 = vunpack.c.l.bf16 %v1918_v60  ;;  %v1786_v11 = vunpack.c.h.bf16 %v1918_v60 }
  0x9d   :  { %v1573_v7 = vpack.c.bf16 %v656_v62, %v656_v62  ;;  %v1574_v9 = vpack.c.bf16 %v657_v63, %v657_v63  ;;  %1293 = vst.msk [vmem:[#allocation8 + $0x128] sm:$0xf] %vm1218_vm0, %v1569_v3  ;;  %1294 = vst.msk [vmem:[#allocation8 + $0x12c] sm:$0xf] %vm1218_vm0, %v1570_v4  ;;  %v1789_v12 = vunpack.c.l.bf16 %v1919_v0  ;;  %v1790_v13 = vunpack.c.h.bf16 %v1919_v0 }
  0x9e   :  { %1295 = vst.msk [vmem:[#allocation8 + $0x130] sm:$0xf] %vm1218_vm0, %v1571_v5  ;;  %1296 = vst.msk [vmem:[#allocation8 + $0x134] sm:$0xf] %vm1218_vm0, %v1572_v6  ;;  %v1793_v14 = vunpack.c.l.bf16 %v1920_v2  ;;  %v1794_v15 = vunpack.c.h.bf16 %v1920_v2  ;;  %v395_v17 = vmul.f32 %v2360_v16, %v1785_v10  ;;  %v396_v18 = vmul.f32 %v2360_v16, %v1786_v11 }
  0x9f   :  { %1297 = vst.msk [vmem:[#allocation8 + $0x138] sm:$0xf] %vm1218_vm0, %v1573_v7  ;;  %1298 = vst.msk [vmem:[#allocation8 + $0x13c] sm:$0xf] %vm1218_vm0, %v1574_v9  ;;  %v1797_v19 = vunpack.c.l.bf16 %v1921_v8  ;;  %v1798_v20 = vunpack.c.h.bf16 %v1921_v8  ;;  %v397_v21 = vmul.f32 %v2360_v16, %v1789_v12  ;;  %v398_v22 = vmul.f32 %v2360_v16, %v1790_v13 }
  0xa0   :  { %v399_v23 = vmul.f32 %v2360_v16, %v1793_v14  ;;  %v400_v24 = vmul.f32 %v2360_v16, %v1794_v15  ;;  %v530_v26 = vadd.f32 %v2368_v25, %v395_v17  ;;  %v531_v27 = vadd.f32 %v2368_v25, %v396_v18 }
  0xa1   :  { %v401_v28 = vmul.f32 %v2360_v16, %v1797_v19  ;;  %v402_v29 = vmul.f32 %v2360_v16, %v1798_v20  ;;  %v532_v30 = vadd.f32 %v2368_v25, %v397_v21  ;;  %v533_v31 = vadd.f32 %v2368_v25, %v398_v22 }
  0xa2   :  { %v534_v32 = vadd.f32 %v2368_v25, %v399_v23  ;;  %v535_v33 = vadd.f32 %v2368_v25, %v400_v24  ;;  %v658_v34 = vmax.f32 %v530_v26, 0.0  ;;  %v659_v35 = vmax.f32 %v531_v27, 0.0  ;;  %v1926_v23 = vld [vmem:[#allocation2 + $0x180] sm:$0xff]  }
  0xa3   :  { %v536_v36 = vadd.f32 %v2368_v25, %v401_v28  ;;  %v537_v37 = vadd.f32 %v2368_v25, %v402_v29  ;;  %v660_v38 = vmax.f32 %v532_v30, 0.0  ;;  %v661_v39 = vmax.f32 %v533_v31, 0.0  ;;  %v1927_v29 = vld [vmem:[#allocation2 + $0x188] sm:$0xff]   ;;  %v1928_v30 = vld [vmem:[#allocation2 + $0x190] sm:$0xff]  }
  0xa4   :  { %v662_v40 = vmax.f32 %v534_v32, 0.0  ;;  %v663_v41 = vmax.f32 %v535_v33, 0.0  ;;  %v1575_v43 = vpack.c.bf16 %v658_v34, %v658_v34  ;;  %v1576_v44 = vpack.c.bf16 %v659_v35, %v659_v35  ;;  %v1929_v35 = vld [vmem:[#allocation2 + $0x198] sm:$0xff]  }
  0xa5   :  { %v664_v45 = vmax.f32 %v536_v36, 0.0  ;;  %v665_v46 = vmax.f32 %v537_v37, 0.0  ;;  %v1577_v49 = vpack.c.bf16 %v660_v38, %v660_v38  ;;  %v1578_v50 = vpack.c.bf16 %v661_v39, %v661_v39 }
  0xa6   :  { %v1579_v51 = vpack.c.bf16 %v662_v40, %v662_v40  ;;  %v1580_v52 = vpack.c.bf16 %v663_v41, %v663_v41  ;;  %1299 = vst.msk [vmem:[#allocation8 + $0x140] sm:$0xf] %vm1218_vm0, %v1575_v43  ;;  %1300 = vst.msk [vmem:[#allocation8 + $0x144] sm:$0xf] %vm1218_vm0, %v1576_v44  ;;  %v1801_v56 = vunpack.c.l.bf16 %v1922_v42  ;;  %v1802_v57 = vunpack.c.h.bf16 %v1922_v42 }
  0xa7   :  { %v1581_v54 = vpack.c.bf16 %v664_v45, %v664_v45  ;;  %v1582_v55 = vpack.c.bf16 %v665_v46, %v665_v46  ;;  %1301 = vst.msk [vmem:[#allocation8 + $0x148] sm:$0xf] %vm1218_vm0, %v1577_v49  ;;  %1302 = vst.msk [vmem:[#allocation8 + $0x14c] sm:$0xf] %vm1218_vm0, %v1578_v50  ;;  %v1805_v58 = vunpack.c.l.bf16 %v1923_v47  ;;  %v1806_v59 = vunpack.c.h.bf16 %v1923_v47 }
  0xa8   :  { %1303 = vst.msk [vmem:[#allocation8 + $0x150] sm:$0xf] %vm1218_vm0, %v1579_v51  ;;  %1304 = vst.msk [vmem:[#allocation8 + $0x154] sm:$0xf] %vm1218_vm0, %v1580_v52  ;;  %v1809_v60 = vunpack.c.l.bf16 %v1924_v48  ;;  %v1810_v1 = vunpack.c.h.bf16 %v1924_v48  ;;  %v403_v61 = vmul.f32 %v2360_v16, %v1801_v56  ;;  %v404_v62 = vmul.f32 %v2360_v16, %v1802_v57 }
  0xa9   :  { %1305 = vst.msk [vmem:[#allocation8 + $0x158] sm:$0xf] %vm1218_vm0, %v1581_v54  ;;  %1306 = vst.msk [vmem:[#allocation8 + $0x15c] sm:$0xf] %vm1218_vm0, %v1582_v55  ;;  %v1813_v63 = vunpack.c.l.bf16 %v1925_v53  ;;  %v1814_v0 = vunpack.c.h.bf16 %v1925_v53  ;;  %v405_v2 = vmul.f32 %v2360_v16, %v1805_v58  ;;  %v406_v3 = vmul.f32 %v2360_v16, %v1806_v59 }
  0xaa   :  { %v407_v4 = vmul.f32 %v2360_v16, %v1809_v60  ;;  %v408_v5 = vmul.f32 %v2360_v16, %v1810_v1  ;;  %v538_v6 = vadd.f32 %v2368_v25, %v403_v61  ;;  %v539_v8 = vadd.f32 %v2368_v25, %v404_v62 }
  0xab   :  { %v409_v7 = vmul.f32 %v2360_v16, %v1813_v63  ;;  %v410_v9 = vmul.f32 %v2360_v16, %v1814_v0  ;;  %v540_v10 = vadd.f32 %v2368_v25, %v405_v2  ;;  %v541_v11 = vadd.f32 %v2368_v25, %v406_v3 }
  0xac   :  { %v542_v12 = vadd.f32 %v2368_v25, %v407_v4  ;;  %v543_v13 = vadd.f32 %v2368_v25, %v408_v5  ;;  %v666_v14 = vmax.f32 %v538_v6, 0.0  ;;  %v667_v15 = vmax.f32 %v539_v8, 0.0  ;;  %v1930_v4 = vld [vmem:[#allocation2 + $0x1a0] sm:$0xff]  }
  0xad   :  { %v544_v17 = vadd.f32 %v2368_v25, %v409_v7  ;;  %v545_v18 = vadd.f32 %v2368_v25, %v410_v9  ;;  %v668_v19 = vmax.f32 %v540_v10, 0.0  ;;  %v669_v20 = vmax.f32 %v541_v11, 0.0  ;;  %v1931_v9 = vld [vmem:[#allocation2 + $0x1a8] sm:$0xff]   ;;  %v1932_v10 = vld [vmem:[#allocation2 + $0x1b0] sm:$0xff]  }
  0xae   :  { %v670_v21 = vmax.f32 %v542_v12, 0.0  ;;  %v671_v22 = vmax.f32 %v543_v13, 0.0  ;;  %v1583_v24 = vpack.c.bf16 %v666_v14, %v666_v14  ;;  %v1584_v26 = vpack.c.bf16 %v667_v15, %v667_v15  ;;  %v1933_v15 = vld [vmem:[#allocation2 + $0x1b8] sm:$0xff]  }
  0xaf   :  { %v672_v27 = vmax.f32 %v544_v17, 0.0  ;;  %v673_v28 = vmax.f32 %v545_v18, 0.0  ;;  %v1585_v31 = vpack.c.bf16 %v668_v19, %v668_v19  ;;  %v1586_v32 = vpack.c.bf16 %v669_v20, %v669_v20 }
  0xb0   :  { %v1587_v33 = vpack.c.bf16 %v670_v21, %v670_v21  ;;  %v1588_v34 = vpack.c.bf16 %v671_v22, %v671_v22  ;;  %1307 = vst.msk [vmem:[#allocation8 + $0x160] sm:$0xf] %vm1218_vm0, %v1583_v24  ;;  %1308 = vst.msk [vmem:[#allocation8 + $0x164] sm:$0xf] %vm1218_vm0, %v1584_v26  ;;  %v1817_v38 = vunpack.c.l.bf16 %v1926_v23  ;;  %v1818_v39 = vunpack.c.h.bf16 %v1926_v23 }
  0xb1   :  { %v1589_v36 = vpack.c.bf16 %v672_v27, %v672_v27  ;;  %v1590_v37 = vpack.c.bf16 %v673_v28, %v673_v28  ;;  %1309 = vst.msk [vmem:[#allocation8 + $0x168] sm:$0xf] %vm1218_vm0, %v1585_v31  ;;  %1310 = vst.msk [vmem:[#allocation8 + $0x16c] sm:$0xf] %vm1218_vm0, %v1586_v32  ;;  %v1821_v40 = vunpack.c.l.bf16 %v1927_v29  ;;  %v1822_v41 = vunpack.c.h.bf16 %v1927_v29 }
  0xb2   :  { %1311 = vst.msk [vmem:[#allocation8 + $0x170] sm:$0xf] %vm1218_vm0, %v1587_v33  ;;  %1312 = vst.msk [vmem:[#allocation8 + $0x174] sm:$0xf] %vm1218_vm0, %v1588_v34  ;;  %v1825_v42 = vunpack.c.l.bf16 %v1928_v30  ;;  %v1826_v43 = vunpack.c.h.bf16 %v1928_v30  ;;  %v411_v44 = vmul.f32 %v2360_v16, %v1817_v38  ;;  %v412_v45 = vmul.f32 %v2360_v16, %v1818_v39 }
  0xb3   :  { %1313 = vst.msk [vmem:[#allocation8 + $0x178] sm:$0xf] %vm1218_vm0, %v1589_v36  ;;  %1314 = vst.msk [vmem:[#allocation8 + $0x17c] sm:$0xf] %vm1218_vm0, %v1590_v37  ;;  %v1829_v46 = vunpack.c.l.bf16 %v1929_v35  ;;  %v1830_v47 = vunpack.c.h.bf16 %v1929_v35  ;;  %v413_v48 = vmul.f32 %v2360_v16, %v1821_v40  ;;  %v414_v49 = vmul.f32 %v2360_v16, %v1822_v41 }
  0xb4   :  { %v415_v50 = vmul.f32 %v2360_v16, %v1825_v42  ;;  %v416_v51 = vmul.f32 %v2360_v16, %v1826_v43  ;;  %v546_v52 = vadd.f32 %v2368_v25, %v411_v44  ;;  %v547_v53 = vadd.f32 %v2368_v25, %v412_v45 }
  0xb5   :  { %v417_v54 = vmul.f32 %v2360_v16, %v1829_v46  ;;  %v418_v55 = vmul.f32 %v2360_v16, %v1830_v47  ;;  %v548_v56 = vadd.f32 %v2368_v25, %v413_v48  ;;  %v549_v57 = vadd.f32 %v2368_v25, %v414_v49 }
  0xb6   :  { %v550_v58 = vadd.f32 %v2368_v25, %v415_v50  ;;  %v551_v59 = vadd.f32 %v2368_v25, %v416_v51  ;;  %v674_v60 = vmax.f32 %v546_v52, 0.0  ;;  %v675_v1 = vmax.f32 %v547_v53, 0.0  ;;  %v1934_v50 = vld [vmem:[#allocation2 + $0x1c0] sm:$0xff]  }
  0xb7   :  { %v552_v61 = vadd.f32 %v2368_v25, %v417_v54  ;;  %v553_v62 = vadd.f32 %v2368_v25, %v418_v55  ;;  %v676_v63 = vmax.f32 %v548_v56, 0.0  ;;  %v677_v0 = vmax.f32 %v549_v57, 0.0  ;;  %v1935_v55 = vld [vmem:[#allocation2 + $0x1c8] sm:$0xff]   ;;  %v1936_v56 = vld [vmem:[#allocation2 + $0x1d0] sm:$0xff]  }
  0xb8   :  { %v678_v2 = vmax.f32 %v550_v58, 0.0  ;;  %v679_v3 = vmax.f32 %v551_v59, 0.0  ;;  %v1591_v5 = vpack.c.bf16 %v674_v60, %v674_v60  ;;  %v1592_v6 = vpack.c.bf16 %v675_v1, %v675_v1  ;;  %v1937_v1 = vld [vmem:[#allocation2 + $0x1d8] sm:$0xff]  }
  0xb9   :  { %v680_v8 = vmax.f32 %v552_v61, 0.0  ;;  %v681_v7 = vmax.f32 %v553_v62, 0.0  ;;  %v1593_v11 = vpack.c.bf16 %v676_v63, %v676_v63  ;;  %v1594_v12 = vpack.c.bf16 %v677_v0, %v677_v0 }
  0xba   :  { %v1595_v13 = vpack.c.bf16 %v678_v2, %v678_v2  ;;  %v1596_v14 = vpack.c.bf16 %v679_v3, %v679_v3  ;;  %1315 = vst.msk [vmem:[#allocation8 + $0x180] sm:$0xf] %vm1218_vm0, %v1591_v5  ;;  %1316 = vst.msk [vmem:[#allocation8 + $0x184] sm:$0xf] %vm1218_vm0, %v1592_v6  ;;  %v1833_v19 = vunpack.c.l.bf16 %v1930_v4  ;;  %v1834_v20 = vunpack.c.h.bf16 %v1930_v4 }
  0xbb   :  { %v1597_v17 = vpack.c.bf16 %v680_v8, %v680_v8  ;;  %v1598_v18 = vpack.c.bf16 %v681_v7, %v681_v7  ;;  %1317 = vst.msk [vmem:[#allocation8 + $0x188] sm:$0xf] %vm1218_vm0, %v1593_v11  ;;  %1318 = vst.msk [vmem:[#allocation8 + $0x18c] sm:$0xf] %vm1218_vm0, %v1594_v12  ;;  %v1837_v21 = vunpack.c.l.bf16 %v1931_v9  ;;  %v1838_v22 = vunpack.c.h.bf16 %v1931_v9 }
  0xbc   :  { %1319 = vst.msk [vmem:[#allocation8 + $0x190] sm:$0xf] %vm1218_vm0, %v1595_v13  ;;  %1320 = vst.msk [vmem:[#allocation8 + $0x194] sm:$0xf] %vm1218_vm0, %v1596_v14  ;;  %v1841_v23 = vunpack.c.l.bf16 %v1932_v10  ;;  %v1842_v24 = vunpack.c.h.bf16 %v1932_v10  ;;  %v419_v26 = vmul.f32 %v2360_v16, %v1833_v19  ;;  %v420_v27 = vmul.f32 %v2360_v16, %v1834_v20 }
  0xbd   :  { %1321 = vst.msk [vmem:[#allocation8 + $0x198] sm:$0xf] %vm1218_vm0, %v1597_v17  ;;  %1322 = vst.msk [vmem:[#allocation8 + $0x19c] sm:$0xf] %vm1218_vm0, %v1598_v18  ;;  %v1845_v28 = vunpack.c.l.bf16 %v1933_v15  ;;  %v1846_v29 = vunpack.c.h.bf16 %v1933_v15  ;;  %v421_v30 = vmul.f32 %v2360_v16, %v1837_v21  ;;  %v422_v31 = vmul.f32 %v2360_v16, %v1838_v22 }
  0xbe   :  { %v423_v32 = vmul.f32 %v2360_v16, %v1841_v23  ;;  %v424_v33 = vmul.f32 %v2360_v16, %v1842_v24  ;;  %v554_v34 = vadd.f32 %v2368_v25, %v419_v26  ;;  %v555_v35 = vadd.f32 %v2368_v25, %v420_v27 }
  0xbf   :  { %v425_v36 = vmul.f32 %v2360_v16, %v1845_v28  ;;  %v426_v37 = vmul.f32 %v2360_v16, %v1846_v29  ;;  %v556_v38 = vadd.f32 %v2368_v25, %v421_v30  ;;  %v557_v39 = vadd.f32 %v2368_v25, %v422_v31 }
  0xc0   :  { %v558_v40 = vadd.f32 %v2368_v25, %v423_v32  ;;  %v559_v41 = vadd.f32 %v2368_v25, %v424_v33  ;;  %v682_v42 = vmax.f32 %v554_v34, 0.0  ;;  %v683_v43 = vmax.f32 %v555_v35, 0.0  ;;  %v1938_v32 = vld [vmem:[#allocation2 + $0x1e0] sm:$0xff]  }
  0xc1   :  { %v560_v44 = vadd.f32 %v2368_v25, %v425_v36  ;;  %v561_v45 = vadd.f32 %v2368_v25, %v426_v37  ;;  %v684_v46 = vmax.f32 %v556_v38, 0.0  ;;  %v685_v47 = vmax.f32 %v557_v39, 0.0  ;;  %v1939_v37 = vld [vmem:[#allocation2 + $0x1e8] sm:$0xff]   ;;  %v1940_v38 = vld [vmem:[#allocation2 + $0x1f0] sm:$0xff]  }
  0xc2   :  { %v686_v48 = vmax.f32 %v558_v40, 0.0  ;;  %v687_v49 = vmax.f32 %v559_v41, 0.0  ;;  %v1599_v51 = vpack.c.bf16 %v682_v42, %v682_v42  ;;  %v1600_v52 = vpack.c.bf16 %v683_v43, %v683_v43  ;;  %v1941_v43 = vld [vmem:[#allocation2 + $0x1f8] sm:$0xff]  }
  0xc3   :  { %v688_v53 = vmax.f32 %v560_v44, 0.0  ;;  %v689_v54 = vmax.f32 %v561_v45, 0.0  ;;  %v1601_v57 = vpack.c.bf16 %v684_v46, %v684_v46  ;;  %v1602_v58 = vpack.c.bf16 %v685_v47, %v685_v47 }
  0xc4   :  { %v1603_v59 = vpack.c.bf16 %v686_v48, %v686_v48  ;;  %v1604_v60 = vpack.c.bf16 %v687_v49, %v687_v49  ;;  %1323 = vst.msk [vmem:[#allocation8 + $0x1a0] sm:$0xf] %vm1218_vm0, %v1599_v51  ;;  %1324 = vst.msk [vmem:[#allocation8 + $0x1a4] sm:$0xf] %vm1218_vm0, %v1600_v52  ;;  %v1849_v63 = vunpack.c.l.bf16 %v1934_v50  ;;  %v1850_v0 = vunpack.c.h.bf16 %v1934_v50 }
  0xc5   :  { %v1605_v61 = vpack.c.bf16 %v688_v53, %v688_v53  ;;  %v1606_v62 = vpack.c.bf16 %v689_v54, %v689_v54  ;;  %1325 = vst.msk [vmem:[#allocation8 + $0x1a8] sm:$0xf] %vm1218_vm0, %v1601_v57  ;;  %1326 = vst.msk [vmem:[#allocation8 + $0x1ac] sm:$0xf] %vm1218_vm0, %v1602_v58  ;;  %v1853_v2 = vunpack.c.l.bf16 %v1935_v55  ;;  %v1854_v3 = vunpack.c.h.bf16 %v1935_v55 }
  0xc6   :  { %1327 = vst.msk [vmem:[#allocation8 + $0x1b0] sm:$0xf] %vm1218_vm0, %v1603_v59  ;;  %1328 = vst.msk [vmem:[#allocation8 + $0x1b4] sm:$0xf] %vm1218_vm0, %v1604_v60  ;;  %v1857_v4 = vunpack.c.l.bf16 %v1936_v56  ;;  %v1858_v5 = vunpack.c.h.bf16 %v1936_v56  ;;  %v427_v6 = vmul.f32 %v2360_v16, %v1849_v63  ;;  %v428_v8 = vmul.f32 %v2360_v16, %v1850_v0 }
  0xc7   :  { %1329 = vst.msk [vmem:[#allocation8 + $0x1b8] sm:$0xf] %vm1218_vm0, %v1605_v61  ;;  %1330 = vst.msk [vmem:[#allocation8 + $0x1bc] sm:$0xf] %vm1218_vm0, %v1606_v62  ;;  %v1861_v7 = vunpack.c.l.bf16 %v1937_v1  ;;  %v1862_v9 = vunpack.c.h.bf16 %v1937_v1  ;;  %v429_v10 = vmul.f32 %v2360_v16, %v1853_v2  ;;  %v430_v11 = vmul.f32 %v2360_v16, %v1854_v3 }
  0xc8   :  { %v431_v12 = vmul.f32 %v2360_v16, %v1857_v4  ;;  %v432_v13 = vmul.f32 %v2360_v16, %v1858_v5  ;;  %v562_v14 = vadd.f32 %v2368_v25, %v427_v6  ;;  %v563_v15 = vadd.f32 %v2368_v25, %v428_v8 }
  0xc9   :  { %v433_v17 = vmul.f32 %v2360_v16, %v1861_v7  ;;  %v434_v18 = vmul.f32 %v2360_v16, %v1862_v9  ;;  %v564_v19 = vadd.f32 %v2368_v25, %v429_v10  ;;  %v565_v20 = vadd.f32 %v2368_v25, %v430_v11 }
  0xca   :  { %v566_v21 = vadd.f32 %v2368_v25, %v431_v12  ;;  %v567_v22 = vadd.f32 %v2368_v25, %v432_v13  ;;  %v690_v23 = vmax.f32 %v562_v14, 0.0  ;;  %v691_v24 = vmax.f32 %v563_v15, 0.0 }
  0xcb   :  { %v568_v26 = vadd.f32 %v2368_v25, %v433_v17  ;;  %v569_v27 = vadd.f32 %v2368_v25, %v434_v18  ;;  %v692_v28 = vmax.f32 %v564_v19, 0.0  ;;  %v693_v29 = vmax.f32 %v565_v20, 0.0 }
  0xcc   :  { %v694_v30 = vmax.f32 %v566_v21, 0.0  ;;  %v695_v31 = vmax.f32 %v567_v22, 0.0  ;;  %v1607_v33 = vpack.c.bf16 %v690_v23, %v690_v23  ;;  %v1608_v34 = vpack.c.bf16 %v691_v24, %v691_v24 }
  0xcd   :  { %v696_v35 = vmax.f32 %v568_v26, 0.0  ;;  %v697_v36 = vmax.f32 %v569_v27, 0.0  ;;  %v1609_v39 = vpack.c.bf16 %v692_v28, %v692_v28  ;;  %v1610_v40 = vpack.c.bf16 %v693_v29, %v693_v29 }
  0xce   :  { %v1611_v41 = vpack.c.bf16 %v694_v30, %v694_v30  ;;  %v1612_v42 = vpack.c.bf16 %v695_v31, %v695_v31  ;;  %1331 = vst.msk [vmem:[#allocation8 + $0x1c0] sm:$0xf] %vm1218_vm0, %v1607_v33  ;;  %1332 = vst.msk [vmem:[#allocation8 + $0x1c4] sm:$0xf] %vm1218_vm0, %v1608_v34  ;;  %v1865_v46 = vunpack.c.l.bf16 %v1938_v32  ;;  %v1866_v47 = vunpack.c.h.bf16 %v1938_v32 }
  0xcf   :  { %v1613_v44 = vpack.c.bf16 %v696_v35, %v696_v35  ;;  %v1614_v45 = vpack.c.bf16 %v697_v36, %v697_v36  ;;  %1333 = vst.msk [vmem:[#allocation8 + $0x1c8] sm:$0xf] %vm1218_vm0, %v1609_v39  ;;  %1334 = vst.msk [vmem:[#allocation8 + $0x1cc] sm:$0xf] %vm1218_vm0, %v1610_v40  ;;  %v1869_v48 = vunpack.c.l.bf16 %v1939_v37  ;;  %v1870_v49 = vunpack.c.h.bf16 %v1939_v37 }
  0xd0   :  { %1335 = vst.msk [vmem:[#allocation8 + $0x1d0] sm:$0xf] %vm1218_vm0, %v1611_v41  ;;  %1336 = vst.msk [vmem:[#allocation8 + $0x1d4] sm:$0xf] %vm1218_vm0, %v1612_v42  ;;  %v1873_v50 = vunpack.c.l.bf16 %v1940_v38  ;;  %v1874_v51 = vunpack.c.h.bf16 %v1940_v38  ;;  %v435_v52 = vmul.f32 %v2360_v16, %v1865_v46  ;;  %v436_v53 = vmul.f32 %v2360_v16, %v1866_v47 }
  0xd1   :  { %1337 = vst.msk [vmem:[#allocation8 + $0x1d8] sm:$0xf] %vm1218_vm0, %v1613_v44  ;;  %1338 = vst.msk [vmem:[#allocation8 + $0x1dc] sm:$0xf] %vm1218_vm0, %v1614_v45  ;;  %v1877_v54 = vunpack.c.l.bf16 %v1941_v43  ;;  %v1878_v55 = vunpack.c.h.bf16 %v1941_v43  ;;  %v437_v56 = vmul.f32 %v2360_v16, %v1869_v48  ;;  %v438_v57 = vmul.f32 %v2360_v16, %v1870_v49 }
  0xd2   :  { %v439_v58 = vmul.f32 %v2360_v16, %v1873_v50  ;;  %v440_v59 = vmul.f32 %v2360_v16, %v1874_v51  ;;  %v570_v60 = vadd.f32 %v2368_v25, %v435_v52  ;;  %v571_v1 = vadd.f32 %v2368_v25, %v436_v53 }
  0xd3   :  { %v441_v61 = vmul.f32 %v2360_v16, %v1877_v54  ;;  %v442_v62 = vmul.f32 %v2360_v16, %v1878_v55  ;;  %v572_v63 = vadd.f32 %v2368_v25, %v437_v56  ;;  %v573_v0 = vadd.f32 %v2368_v25, %v438_v57 }
  0xd4   :  { %v574_v2 = vadd.f32 %v2368_v25, %v439_v58  ;;  %v575_v3 = vadd.f32 %v2368_v25, %v440_v59  ;;  %v698_v4 = vmax.f32 %v570_v60, 0.0  ;;  %v699_v5 = vmax.f32 %v571_v1, 0.0 }
  0xd5   :  { %v576_v6 = vadd.f32 %v2368_v25, %v441_v61  ;;  %v577_v8 = vadd.f32 %v2368_v25, %v442_v62  ;;  %v700_v7 = vmax.f32 %v572_v63, 0.0  ;;  %v701_v9 = vmax.f32 %v573_v0, 0.0 }
  0xd6   :  { %v702_v10 = vmax.f32 %v574_v2, 0.0  ;;  %v703_v11 = vmax.f32 %v575_v3, 0.0  ;;  %v1615_v16 = vpack.c.bf16 %v698_v4, %v698_v4  ;;  %v1616_v12 = vpack.c.bf16 %v699_v5, %v699_v5 }
  0xd7   :  { %v704_v13 = vmax.f32 %v576_v6, 0.0  ;;  %v705_v14 = vmax.f32 %v577_v8, 0.0  ;;  %v1617_v15 = vpack.c.bf16 %v700_v7, %v700_v7  ;;  %v1618_v17 = vpack.c.bf16 %v701_v9, %v701_v9 }
  0xd8   :  { %v1619_v18 = vpack.c.bf16 %v702_v10, %v702_v10  ;;  %v1620_v19 = vpack.c.bf16 %v703_v11, %v703_v11  ;;  %1339 = vst.msk [vmem:[#allocation8 + $0x1e0] sm:$0xf] %vm1218_vm0, %v1615_v16  ;;  %1340 = vst.msk [vmem:[#allocation8 + $0x1e4] sm:$0xf] %vm1218_vm0, %v1616_v12 }
  0xd9   :  { %v1621_v20 = vpack.c.bf16 %v704_v13, %v704_v13  ;;  %v1622_v25 = vpack.c.bf16 %v705_v14, %v705_v14  ;;  %1341 = vst.msk [vmem:[#allocation8 + $0x1e8] sm:$0xf] %vm1218_vm0, %v1617_v15  ;;  %1342 = vst.msk [vmem:[#allocation8 + $0x1ec] sm:$0xf] %vm1218_vm0, %v1618_v17 }
  0xda   :  { %1343 = vst.msk [vmem:[#allocation8 + $0x1f0] sm:$0xf] %vm1218_vm0, %v1619_v18  ;;  %1344 = vst.msk [vmem:[#allocation8 + $0x1f4] sm:$0xf] %vm1218_vm0, %v1620_v19 }
  0xdb   :  { %1345 = vst.msk [vmem:[#allocation8 + $0x1f8] sm:$0xf] %vm1218_vm0, %v1621_v20  ;;  %1346 = vst.msk [vmem:[#allocation8 + $0x1fc] sm:$0xf] %vm1218_vm0, %v1622_v25 }
  0xdc   :  { %2027 = shalt.err (!%p2024_p0)
}
  0xdd   :  { %s2028_s27 = scalar_lea.hbm %s2526_s3, 8192 }
  0xde   :  { %p2029_p1 = scmp.ne.s32.totalorder %s2526_s3, %s2028_s27  ;;  %p2032_p2 = scmp.lt.u32.totalorder %s2028_s27, %s2526_s3 }
  0xe0   :  { %p2034_p3 = pnand %p2032_p2, %p2029_p1 }
  0xe2   :  { %2037 = shalt.err (!%p2034_p3)
}
  0xe3   :  { %1358 = dma.vmem_to_hbm [thread:$0]  %s1353_s23, 8192, %s2526_s3, [#allocation4], %s2046_s1, %s2046_s1, %s2047_s8  }
  0xe4   :  { %2042 = dma.done.wait [#allocation4], 8192  }
  0xe5   :  { %2043 = vsyncadd [#allocation4], 4294959104 }
  0xe6   :  { %1362 = vsyncpa [#allocation3], 1 }
  0xe7   :  { %1363 = vsyncpa [#allocation6], 1 }
  0xe8   :  { %1364 = vsyncpa [#allocation4], 1 }

// kernel: generator_forward.9
= control target key start
LH: loop header
LB: loop body
LE: loop exit
PB: predicated region body
PF: predicated region fallthrough
CT: control target
= control target key end

     0   :  { %10 = vsyncpa [#allocation3], 0  ;;  %s4288_s0 = inlined_call_operand.hbm [shape: bf16[1024,512], index: 0, kind: input, shape index: {}]   ;;  %s4289_s1 = inlined_call_operand.hbm [shape: bf16[512,64], index: 1, kind: input, shape index: {}]   ;;  %s4290_s2 = inlined_call_operand.hbm [shape: bf16[1024,64], index: 2, kind: output, shape index: {0}]   ;;  %s4291_s3 = inlined_call_operand.hbm [shape: f32[2,1,64], index: 3, kind: output, shape index: {1}]   ;;  %s4292_s4 = inlined_call_operand.hbm [shape: f32[2,1,64], index: 4, kind: output, shape index: {2}]  }
   0x1   :  { %12 = vsyncpa [#allocation3 + $0x1], 0 }
   0x2   :  { %13 = vsyncpa [#allocation6], 0 }
   0x3   :  { %14 = vsyncpa [#allocation4], 0 }
   0x4   :  { %16 = vsyncpa [#allocation4 + $0x1], 0 }
   0x5   :  { %17 = vsyncpa [#allocation9], 0 }
   0x6   :  { %19 = vsyncpa [#allocation9 + $0x1], 0  ;;  %s3591_s15 = smov 0   ;;  %s3593_s16 = smov 0  }
   0x7   :  { %s3595_s17 = smov 0   ;;  %s3597_s18 = smov 0  }
   0x8 LB: > { %s3612_s19 = sadd.s32 4294967295, %s3552_s18   ;;  %s2692_s20 = sadd.s32 4294967294, %s3552_s18   ;;  %s3552_s18 = sphi %s3597_s18, %s4312_s18   ;;  %s3548_s17 = sphi %s3595_s17, %s4311_s17   ;;  %s3544_s16 = sphi %s3593_s16, %s4310_s16   ;;  %s3540_s15 = sphi %s3591_s15, %s4309_s15  }
   0x9   : > { %p45_p0 = scmp.ne.s32.totalorder %s3544_s16, %s3540_s15  ;;  %p4293_p1 = scmp.eq.s32.totalorder %s3612_s19, 0 }
   0xa   : > { %p96_p3 = scmp.eq.s32.totalorder %s2692_s20, 1  ;;  %p2693_p5 = scmp.ge.s32.totalorder %s3552_s18, 1 }
   0xb   : > { %p3623_p4 = por %p4293_p1, %p45_p0  ;;  %p155_p7 = scmp.lt.s32.totalorder %s3552_s18, 3 }
   0xc   : > { %p3628_p6 = por %p96_p3, %p45_p0  ;;  %s3554_s24 = smov [#allocation5]  }
   0xd   : > { %s4296_s21 = scalar_select %p3623_p4, 1, 0 }
   0xe   : > { %s4297_s22 = scalar_select %p3628_p6, 1, 0 }
   0xf   : > { %p3633_p8 = pnand %p2693_p5, %p155_p7  ;;  %s167_s25 = sshll.u32 %s3554_s24, 4  ;;  %s3637_s25 = int_to_ptr.vmem [resolvable:$true] %s167_s25 }
  0x10   : > { %s3649_s27 = sadd.s32 1, %s3552_s18   ;;  %s32_s28 = sadd.s32 1, %s3548_s17 }
  0x11   : > { %s4298_s23 = scalar_select %p3633_p8, 1, 0 }
  0x12   : > { %p3078_p9 = pneg %p3633_p8  ;;  %s29_s29 = ssub.s32 %s3552_s18, %s3649_s27 }
  0x13   : > { %s3364_s6 = scalar_lea.hbm %s4289_s1, 4096 }
  0x14   : > { %p3644_p11 = pnand %p3078_p9, %p4293_p1  ;;  %p3365_p12 = scmp.ne.s32.totalorder %s4289_s1, %s3364_s6 }
  0x15   : > { %p3371_p5 = scmp.lt.u32.totalorder %s3364_s6, %s4289_s1 }
  0x16   : > { %p3366_p13 = pneg %p3644_p11 }
  0x18   : > { %p3367_p0 = pnand %p3366_p13, %p3365_p12 }
  0x1a   : > { %p3368_p3 = pneg %p3367_p0 }
  0x1c   : > { %p3373_p7 = pnand %p3371_p5, %p3368_p3 }
  0x1e   : > { %3376 = shalt.err (!%p3373_p7)
}
  0x1f   : > { %s3377_s11 = scalar_lea.vmem %s3637_s25, 4096  ;;  %p3385_p2 = scmp.lt.s32.totalorder %s3637_s25, %s3637_s25 }
  0x20   : > { %p3378_p9 = scmp.ne.s32.totalorder %s3637_s25, %s3377_s11  ;;  %p3386_p6 = scmp.lt.s32.totalorder %s3377_s11, %s3377_s11 }
  0x22   : > { %p3380_p10 = pnand %p3378_p9, %p3366_p13  ;;  %p3387_p4 = por %p3386_p6, %p3385_p2 }
  0x24   : > { %p3381_p1 = pneg %p3380_p10 }
  0x26   : > { %p3388_p8 = pnand %p3387_p4, %p3381_p1 }
  0x28   : > { %3391 = shalt.err (!%p3388_p8)
}
  0x29   : > { %s3555_s12 = smov 64   ;;  %s3556_s13 = smov 4  }
  0x2a   : > { %3081 = dma.hbm_to_vmem [thread:$0]  (!%p3644_p11), %s4289_s1, 4096, %s3637_s25, [#allocation6], %s3555_s12, %s3555_s12, %s3556_s13  }
  0x2b   : > { %p30_p2 = scmp.eq.s32.totalorder %s29_s29, 0  ;;  %p39_p1 = scmp.ne.s32.totalorder %s3548_s17, %s3544_s16 }
  0x2c   : > { %p40_p4 = scmp.eq.s32.totalorder %s3552_s18, 0  ;;  %p3097_p6 = scmp.lt.s32.totalorder %s3552_s18, 2 }
  0x2d   : > { %s3680_s30 = scalar_select %p30_p2, %s3548_s17, %s32_s28  }
  0x2e   : > { %p41_p8 = por %p40_p4, %p39_p1  ;;  %p4300_p10 = scmp.eq.s32.totalorder %s3612_s19, 1 }
  0x2f   : > { %s181_s6 = sand.u32 1, %s3548_s17   ;;  %s2936_s7 = sshll.u32 %s3552_s18, 14 }
  0x30   : > { %p3684_p12 = por %p4300_p10, %p39_p1  ;;  %s2696_s8 = sshll.u32 %s181_s6, 10 }
  0x31   : > { %s3693_s10 = scalar_lea.hbm %s4288_s0, %s2936_s7  ;;  %s185_s25 = scalar_lea.vmem [#allocation2], %s2696_s8 }
  0x32   : > { %s193_s28 = sshll.u32 %s185_s25, 4  ;;  %p3695_p11 = pnand %p3097_p6, %p41_p8  ;;  %s3699_s28 = int_to_ptr.vmem [resolvable:$true] %s193_s28 }
  0x33   : > { %s3701_s11 = scalar_lea.sflag [#allocation3], %s181_s6  ;;  %s3392_s12 = scalar_lea.hbm %s3693_s10, 16384 }
  0x34   : > { %p3393_p13 = scmp.ne.s32.totalorder %s3693_s10, %s3392_s12  ;;  %p3394_p0 = pneg %p3695_p11 }
  0x35   : > { %s3397_s24 = scalar_lea.hbm %s4288_s0, 32768  ;;  %p3398_p7 = scmp.lt.u32.totalorder %s3693_s10, %s4288_s0 }
  0x36   : > { %p3395_p3 = pnand %p3394_p0, %p3393_p13  ;;  %p3399_p9 = scmp.lt.u32.totalorder %s3397_s24, %s3392_s12 }
  0x37   : > { %p3401_p1 = scmp.lt.u32.totalorder %s3392_s12, %s3693_s10 }
  0x38   : > { %p3396_p5 = pneg %p3395_p3  ;;  %p3400_p2 = por %p3399_p9, %p3398_p7 }
  0x3a   : > { %p3402_p4 = por %p3401_p1, %p3400_p2 }
  0x3c   : > { %p3403_p6 = pnand %p3402_p4, %p3396_p5 }
  0x3e   : > { %3406 = shalt.err (!%p3403_p6)
}
  0x3f   : > { %s3407_s6 = scalar_lea.vmem %s3699_s28, 16384  ;;  %s3557_s26 = smov [#allocation2]  }
  0x40   : > { %p3408_p8 = scmp.ne.s32.totalorder %s3699_s28, %s3407_s6  ;;  %s3412_s9 = sshll.u32 %s3557_s26, 4  ;;  %s3413_s9 = int_to_ptr.vmem [resolvable:$false] %s3412_s9 }
  0x41   : > { %s3414_s25 = scalar_lea.vmem %s3413_s9, 32768  ;;  %p3415_p3 = scmp.lt.s32.totalorder %s3699_s28, %s3413_s9 }
  0x42   : > { %p3410_p10 = pnand %p3408_p8, %p3394_p0  ;;  %p3416_p7 = scmp.lt.s32.totalorder %s3414_s25, %s3407_s6 }
  0x44   : > { %p3411_p13 = pneg %p3410_p10  ;;  %p3417_p9 = por %p3416_p7, %p3415_p3 }
  0x46   : > { %p3418_p2 = pnand %p3417_p9, %p3411_p13 }
  0x48   : > { %3421 = shalt.err (!%p3418_p2)
}
  0x49   : > { %s3558_s12 = smov 256   ;;  %s3559_s13 = smov 16  }
  0x4a   : > { %3085 = dma.hbm_to_vmem [thread:$0]  (!%p3695_p11), %s3693_s10, 16384, %s3699_s28, %s3701_s11, %s3558_s12, %s3558_s12, %s3559_s13  }
  0x4b   : > { %p4303_p0 = scmp.ne.s32.totalorder %s4298_s23, 0 }
  0x4c   : > { %s3732_s14 = sand.u32 (!%p4303_p0), 1, %s3544_s16   ;;  %p4304_p5 = scmp.ne.s32.totalorder (!%p4303_p0), %s4296_s21, 0 }
  0x4d   : > { %205 = sbr.rel (%p4303_p0) target bundleno = 684 (0x2ac), region = 28  ;;  %s2701_s24 = sshll.u32 (!%p4303_p0), %s3732_s14, 10 }
  0x4e   : > { %s208_s7 = scalar_lea.sflag (!%p4303_p0), [#allocation3], %s3732_s14  ;;  %s3736_s8 = scalar_lea.vmem (!%p4303_p0), [#allocation2], %s2701_s24 }
  0x54   : > { %3523 = dma.done.wait (%p4304_p5), %s208_s7, 16384  }
  0x55   : > { %3525 = vsyncadd (%p4304_p5), %s208_s7, 4294950912  ;;  %p4305_p11 = scmp.eq.s32.totalorder %s3612_s19, 0 }
  0x57   : > { %3527 = dma.done.wait (%p4305_p11), [#allocation6], 4096   ;;  %p4306_p1 = pmov %p4305_p11 }
  0x58   : > { %v3560_v0 = vmov 0   ;;  %v3140_v1 = vld [vmem:[#allocation5] sm:$0xff]   ;;  %v3142_v3 = vld [vmem:[#allocation5 + $0x8] sm:$0xff]   ;;  %v3144_v5 = vld [vmem:[#allocation5 + $0x10] sm:$0xff]   ;;  %s2703_s21 = sshll.u32 %s3732_s14, 8  ;;  %vm2109_vm0 = vcmask 519168  }
  0x59   : > { %3529 = vsyncadd (%p4306_p1), [#allocation6], 4294963200  ;;  %1275 = vmatprep.subr.bf16.mxu1 %v3560_v0  ;;  %1564 = vmatprep.subr.bf16.mxu0 %v3560_v0  ;;  %v3141_v2 = vld [vmem:[#allocation5 + $0x80] sm:$0xff]   ;;  %v3143_v4 = vld [vmem:[#allocation5 + $0x88] sm:$0xff]   ;;  %vm2174_vm1 = vcmask 523264   ;;  %s3893_s23 = scalar_lea.vmem [#allocation7], %s2703_s21 }
  0x5a   : > { %1276 = vmatpush1.bf16.msra.mxu1 %v3140_v1  ;;  %1565 = vmatpush1.bf16.msra.mxu0 %v3141_v2  ;;  %v3145_v6 = vld [vmem:[#allocation5 + $0x90] sm:$0xff]   ;;  %v3146_v7 = vld [vmem:[#allocation5 + $0x18] sm:$0xff]   ;;  %v3148_v9 = vld [vmem:[#allocation5 + $0x20] sm:$0xff]   ;;  %s3001_s10 = sshll.u32 %s3612_s19, 12  ;;  %s2530_s28 = sshll.u32 %s3893_s23, 4  ;;  %s4165_s28 = int_to_ptr.vmem [resolvable:$true] %s2530_s28 }
  0x5b   : > { %1277 = vmatprep.subr.bf16.mxu1 %v3560_v0  ;;  %1566 = vmatprep.subr.bf16.mxu0 %v3560_v0  ;;  %v3147_v8 = vld [vmem:[#allocation5 + $0x98] sm:$0xff]   ;;  %v3149_v10 = vld [vmem:[#allocation5 + $0xa0] sm:$0xff]   ;;  %v3150_v11 = vld [vmem:[#allocation5 + $0x28] sm:$0xff]   ;;  %s4163_s6 = scalar_lea.hbm %s4290_s2, %s3001_s10  ;;  %s2509_s26 = scalar_lea.sflag [#allocation4], %s3732_s14 }
  0x5c   : > { %v3151_v12 = vld [vmem:[#allocation5 + $0xa8] sm:$0xff]   ;;  %v3152_v13 = vld [vmem:[#allocation5 + $0x30] sm:$0xff]   ;;  %v3154_v15 = vld [vmem:[#allocation5 + $0x38] sm:$0xff]   ;;  %s3422_s9 = scalar_lea.vmem %s4165_s28, 4096  ;;  %s3561_s25 = smov [#allocation7]  }
  0x5d   : > { %v3153_v14 = vld [vmem:[#allocation5 + $0xb0] sm:$0xff]   ;;  %v3155_v16 = vld [vmem:[#allocation5 + $0xb8] sm:$0xff]   ;;  %v3156_v17 = vld [vmem:[#allocation5 + $0x40] sm:$0xff]   ;;  %p3423_p4 = scmp.ne.s32.totalorder %s4165_s28, %s3422_s9  ;;  %s3426_s12 = sshll.u32 %s3561_s25, 4  ;;  %s3427_s12 = int_to_ptr.vmem [resolvable:$false] %s3426_s12 }
  0x5e   : > { %1278 = vmatpush1.bf16.msra.mxu1 %v3142_v3  ;;  %1567 = vmatpush1.bf16.msra.mxu0 %v3143_v4  ;;  %v3157_v18 = vld [vmem:[#allocation5 + $0xc0] sm:$0xff]   ;;  %v3158_v20 = vld [vmem:[#allocation5 + $0x48] sm:$0xff]   ;;  %v3160_v23 = vld [vmem:[#allocation5 + $0x50] sm:$0xff]   ;;  %s3428_s13 = scalar_lea.vmem %s3427_s12, 8192  ;;  %p3429_p10 = scmp.lt.s32.totalorder %s4165_s28, %s3427_s12 }
  0x5f   : > { %1279 = vmatprep.subr.bf16.mxu1 %v3560_v0  ;;  %1568 = vmatprep.subr.bf16.mxu0 %v3560_v0  ;;  %v3174_v19 = vld [vmem:[%s3736_s8 + $0x4] ss:$16 sps:$4 sm:$0xff]   ;;  %v3177_v21 = vld [vmem:[%s3736_s8 + $0xc] ss:$16 sps:$4 sm:$0xff]   ;;  %v3172_v35 = vld [vmem:[%s3736_s8] ss:$16 sps:$4 sm:$0xff]   ;;  %p3424_p6 = pnand %p3423_p4, %p3684_p12  ;;  %p3430_p13 = scmp.lt.s32.totalorder %s3428_s13, %s3422_s9 }
  0x60   : > { %v3159_v22 = vld [vmem:[#allocation5 + $0xc8] sm:$0xff]   ;;  %1307 = vmatprep.mubr.bf16.mxu1 %v3174_v19  ;;  %1596 = vmatprep.mubr.bf16.mxu0 %v3177_v21  ;;  %v3161_v24 = vld [vmem:[#allocation5 + $0xd0] sm:$0xff]   ;;  %v3162_v25 = vld [vmem:[#allocation5 + $0x58] sm:$0xff]  }
  0x61   : > { %v3163_v26 = vld [vmem:[#allocation5 + $0xd8] sm:$0xff]   ;;  %v3164_v27 = vld [vmem:[#allocation5 + $0x60] sm:$0xff]   ;;  %v3166_v29 = vld [vmem:[#allocation5 + $0x68] sm:$0xff]   ;;  %p3425_p8 = pneg %p3424_p6  ;;  %p3431_p3 = por %p3430_p13, %p3429_p10 }
  0x62   : > { %1280 = vmatpush1.bf16.msra.mxu1 %v3144_v5  ;;  %1569 = vmatpush1.bf16.msra.mxu0 %v3145_v6  ;;  %v3165_v28 = vld [vmem:[#allocation5 + $0xe0] sm:$0xff]   ;;  %v3167_v30 = vld [vmem:[#allocation5 + $0xe8] sm:$0xff]   ;;  %v3168_v31 = vld [vmem:[#allocation5 + $0x70] sm:$0xff]  }
  0x63   : > { %1281 = vmatprep.subr.bf16.mxu1 %v3560_v0  ;;  %1570 = vmatprep.subr.bf16.mxu0 %v3560_v0  ;;  %v3169_v32 = vld [vmem:[#allocation5 + $0xf0] sm:$0xff]   ;;  %v3170_v33 = vld [vmem:[#allocation5 + $0x78] sm:$0xff]   ;;  %p3432_p7 = pnand %p3431_p3, %p3425_p8 }
  0x64   : > { %v3171_v34 = vld [vmem:[#allocation5 + $0xf8] sm:$0xff]   ;;  %v3178_v37 = vld [vmem:[%s3736_s8 + $0x24] ss:$16 sps:$4 sm:$0xff]   ;;  %v3182_v39 = vld [vmem:[%s3736_s8 + $0x20] ss:$16 sps:$4 sm:$0xff]  }
  0x65   : > { %v3175_v36 = vld [vmem:[%s3736_s8 + $0x8] ss:$16 sps:$4 sm:$0xff]   ;;  %v3180_v38 = vld [vmem:[%s3736_s8 + $0x2c] ss:$16 sps:$4 sm:$0xff]   ;;  %v3184_v41 = vld [vmem:[%s3736_s8 + $0x44] ss:$16 sps:$4 sm:$0xff]  }
  0x66   : > { %1282 = vmatpush1.bf16.msra.mxu1 %v3146_v7  ;;  %1571 = vmatpush1.bf16.msra.mxu0 %v3147_v8  ;;  %v3183_v40 = vld [vmem:[%s3736_s8 + $0x28] ss:$16 sps:$4 sm:$0xff]   ;;  %v3186_v42 = vld [vmem:[%s3736_s8 + $0x4c] ss:$16 sps:$4 sm:$0xff]   ;;  %v3188_v43 = vld [vmem:[%s3736_s8 + $0x40] ss:$16 sps:$4 sm:$0xff]  }
  0x67   : > { %1283 = vmatprep.subr.bf16.mxu1 %v3560_v0  ;;  %1572 = vmatprep.subr.bf16.mxu0 %v3560_v0  ;;  %v3189_v44 = vld [vmem:[%s3736_s8 + $0x48] ss:$16 sps:$4 sm:$0xff]   ;;  %v3190_v45 = vld [vmem:[%s3736_s8 + $0x64] ss:$16 sps:$4 sm:$0xff]   ;;  %v3192_v46 = vld [vmem:[%s3736_s8 + $0x6c] ss:$16 sps:$4 sm:$0xff]  }
  0x68   : > { %v3194_v47 = vld [vmem:[%s3736_s8 + $0x60] ss:$16 sps:$4 sm:$0xff]   ;;  %v3195_v48 = vld [vmem:[%s3736_s8 + $0x68] ss:$16 sps:$4 sm:$0xff]   ;;  %v3196_v49 = vld [vmem:[%s3736_s8 + $0x84] ss:$16 sps:$4 sm:$0xff]  }
  0x69   : > { %v3198_v50 = vld [vmem:[%s3736_s8 + $0x8c] ss:$16 sps:$4 sm:$0xff]   ;;  %v3200_v51 = vld [vmem:[%s3736_s8 + $0x80] ss:$16 sps:$4 sm:$0xff]   ;;  %v3201_v52 = vld [vmem:[%s3736_s8 + $0x88] ss:$16 sps:$4 sm:$0xff]  }
  0x6a   : > { %1284 = vmatpush1.bf16.msra.mxu1 %v3148_v9  ;;  %1573 = vmatpush1.bf16.msra.mxu0 %v3149_v10  ;;  %v3202_v53 = vld [vmem:[%s3736_s8 + $0xa4] ss:$16 sps:$4 sm:$0xff]   ;;  %v3204_v54 = vld [vmem:[%s3736_s8 + $0xac] ss:$16 sps:$4 sm:$0xff]   ;;  %v3206_v55 = vld [vmem:[%s3736_s8 + $0xa0] ss:$16 sps:$4 sm:$0xff]  }
  0x6b   : > { %1285 = vmatprep.subr.bf16.mxu1 %v3560_v0  ;;  %1574 = vmatprep.subr.bf16.mxu0 %v3560_v0  ;;  %v3207_v56 = vld [vmem:[%s3736_s8 + $0xa8] ss:$16 sps:$4 sm:$0xff]   ;;  %v3208_v57 = vld [vmem:[%s3736_s8 + $0xc4] ss:$16 sps:$4 sm:$0xff]   ;;  %v3210_v58 = vld [vmem:[%s3736_s8 + $0xcc] ss:$16 sps:$4 sm:$0xff]  }
  0x6c   : > { %v3212_v59 = vld [vmem:[%s3736_s8 + $0xc0] ss:$16 sps:$4 sm:$0xff]   ;;  %v3213_v60 = vld [vmem:[%s3736_s8 + $0xc8] ss:$16 sps:$4 sm:$0xff]   ;;  %v3214_v61 = vld [vmem:[%s3736_s8 + $0xe4] ss:$16 sps:$4 sm:$0xff]  }
  0x6d   : > { %v3216_v62 = vld [vmem:[%s3736_s8 + $0xec] ss:$16 sps:$4 sm:$0xff]   ;;  %v3218_v63 = vld [vmem:[%s3736_s8 + $0xe0] ss:$16 sps:$4 sm:$0xff]   ;;  %v3220_v1 = vld [vmem:[%s3736_s8 + $0x104] ss:$16 sps:$4 sm:$0xff]  }
  0x6e   : > { %1286 = vmatpush1.bf16.msra.mxu1 %v3150_v11  ;;  %1575 = vmatpush1.bf16.msra.mxu0 %v3151_v12  ;;  %v3222_v2 = vld [vmem:[%s3736_s8 + $0x10c] ss:$16 sps:$4 sm:$0xff]   ;;  %v3224_v3 = vld [vmem:[%s3736_s8 + $0x100] ss:$16 sps:$4 sm:$0xff]   ;;  %v3225_v4 = vld [vmem:[%s3736_s8 + $0x108] ss:$16 sps:$4 sm:$0xff]  }
  0x6f   : > { %1287 = vmatprep.subr.bf16.mxu1 %v3560_v0  ;;  %1576 = vmatprep.subr.bf16.mxu0 %v3560_v0  ;;  %v3226_v5 = vld [vmem:[%s3736_s8 + $0x124] ss:$16 sps:$4 sm:$0xff]   ;;  %v3228_v6 = vld [vmem:[%s3736_s8 + $0x12c] ss:$16 sps:$4 sm:$0xff]   ;;  %v3230_v7 = vld [vmem:[%s3736_s8 + $0x120] ss:$16 sps:$4 sm:$0xff]  }
  0x70   : > { %v3231_v8 = vld [vmem:[%s3736_s8 + $0x128] ss:$16 sps:$4 sm:$0xff]   ;;  %v3232_v9 = vld [vmem:[%s3736_s8 + $0x144] ss:$16 sps:$4 sm:$0xff]   ;;  %v3234_v10 = vld [vmem:[%s3736_s8 + $0x14c] ss:$16 sps:$4 sm:$0xff]  }
  0x71   : > { %v3236_v11 = vld [vmem:[%s3736_s8 + $0x140] ss:$16 sps:$4 sm:$0xff]   ;;  %v3237_v12 = vld [vmem:[%s3736_s8 + $0x148] ss:$16 sps:$4 sm:$0xff]   ;;  %v3250_v21 = vld [vmem:[%s3736_s8 + $0x1a4] ss:$16 sps:$4 sm:$0xff]  }
  0x72   : > { %1288 = vmatpush1.bf16.msra.mxu1 %v3152_v13  ;;  %1577 = vmatpush1.bf16.msra.mxu0 %v3153_v14  ;;  %v3238_v13 = vld [vmem:[%s3736_s8 + $0x164] ss:$16 sps:$4 sm:$0xff]   ;;  %v3240_v14 = vld [vmem:[%s3736_s8 + $0x16c] ss:$16 sps:$4 sm:$0xff]   ;;  %v3248_v19 = vld [vmem:[%s3736_s8 + $0x180] ss:$16 sps:$4 sm:$0xff]  }
  0x73   : > { %1289 = vmatprep.subr.bf16.mxu1 %v3560_v0  ;;  %1578 = vmatprep.subr.bf16.mxu0 %v3560_v0 }
  0x76   : > { %1290 = vmatpush1.bf16.msra.mxu1 %v3154_v15  ;;  %1579 = vmatpush1.bf16.msra.mxu0 %v3155_v16  ;;  %v3242_v15 = vld [vmem:[%s3736_s8 + $0x160] ss:$16 sps:$4 sm:$0xff]   ;;  %v3243_v16 = vld [vmem:[%s3736_s8 + $0x168] ss:$16 sps:$4 sm:$0xff]  }
  0x77   : > { %1291 = vmatprep.subr.bf16.mxu1 %v3560_v0  ;;  %1580 = vmatprep.subr.bf16.mxu0 %v3560_v0 }
  0x7a   : > { %1292 = vmatpush1.bf16.msra.mxu1 %v3156_v17  ;;  %1581 = vmatpush1.bf16.msra.mxu0 %v3157_v18  ;;  %v3244_v17 = vld [vmem:[%s3736_s8 + $0x184] ss:$16 sps:$4 sm:$0xff]   ;;  %v3246_v18 = vld [vmem:[%s3736_s8 + $0x18c] ss:$16 sps:$4 sm:$0xff]  }
  0x7b   : > { %1293 = vmatprep.subr.bf16.mxu1 %v3560_v0  ;;  %1582 = vmatprep.subr.bf16.mxu0 %v3560_v0 }
  0x7e   : > { %1294 = vmatpush1.bf16.msra.mxu1 %v3158_v20  ;;  %1583 = vmatpush1.bf16.msra.mxu0 %v3159_v22  ;;  %v3249_v20 = vld [vmem:[%s3736_s8 + $0x188] ss:$16 sps:$4 sm:$0xff]   ;;  %v3252_v22 = vld [vmem:[%s3736_s8 + $0x1ac] ss:$16 sps:$4 sm:$0xff]  }
  0x7f   : > { %1295 = vmatprep.subr.bf16.mxu1 %v3560_v0  ;;  %1584 = vmatprep.subr.bf16.mxu0 %v3560_v0 }
  0x82   : > { %1296 = vmatpush1.bf16.msra.mxu1 %v3160_v23  ;;  %1585 = vmatpush1.bf16.msra.mxu0 %v3161_v24  ;;  %v3254_v23 = vld [vmem:[%s3736_s8 + $0x1a0] ss:$16 sps:$4 sm:$0xff]   ;;  %v3255_v24 = vld [vmem:[%s3736_s8 + $0x1a8] ss:$16 sps:$4 sm:$0xff]  }
  0x83   : > { %1297 = vmatprep.subr.bf16.mxu1 %v3560_v0  ;;  %1586 = vmatprep.subr.bf16.mxu0 %v3560_v0 }
  0x86   : > { %1298 = vmatpush1.bf16.msra.mxu1 %v3162_v25  ;;  %1587 = vmatpush1.bf16.msra.mxu0 %v3163_v26  ;;  %v3256_v25 = vld [vmem:[%s3736_s8 + $0x1c4] ss:$16 sps:$4 sm:$0xff]   ;;  %v3258_v26 = vld [vmem:[%s3736_s8 + $0x1cc] ss:$16 sps:$4 sm:$0xff]  }
  0x87   : > { %1299 = vmatprep.subr.bf16.mxu1 %v3560_v0  ;;  %1588 = vmatprep.subr.bf16.mxu0 %v3560_v0 }
  0x8a   : > { %1300 = vmatpush1.bf16.msra.mxu1 %v3164_v27  ;;  %1589 = vmatpush1.bf16.msra.mxu0 %v3165_v28  ;;  %v3260_v27 = vld [vmem:[%s3736_s8 + $0x1c0] ss:$16 sps:$4 sm:$0xff]   ;;  %v3261_v28 = vld [vmem:[%s3736_s8 + $0x1c8] ss:$16 sps:$4 sm:$0xff]  }
  0x8b   : > { %1301 = vmatprep.subr.bf16.mxu1 %v3560_v0  ;;  %1590 = vmatprep.subr.bf16.mxu0 %v3560_v0 }
  0x8e   : > { %1302 = vmatpush1.bf16.msra.mxu1 %v3166_v29  ;;  %1591 = vmatpush1.bf16.msra.mxu0 %v3167_v30  ;;  %v3262_v29 = vld [vmem:[%s3736_s8 + $0x1e4] ss:$16 sps:$4 sm:$0xff]   ;;  %v3264_v30 = vld [vmem:[%s3736_s8 + $0x1ec] ss:$16 sps:$4 sm:$0xff]  }
  0x8f   : > { %1303 = vmatprep.subr.bf16.mxu1 %v3560_v0  ;;  %1592 = vmatprep.subr.bf16.mxu0 %v3560_v0 }
  0x92   : > { %1304 = vmatpush1.bf16.msra.mxu1 %v3168_v31  ;;  %1593 = vmatpush1.bf16.msra.mxu0 %v3169_v32  ;;  %v3266_v31 = vld [vmem:[%s3736_s8 + $0x1e0] ss:$16 sps:$4 sm:$0xff]   ;;  %v3267_v32 = vld [vmem:[%s3736_s8 + $0x1e8] ss:$16 sps:$4 sm:$0xff]  }
  0x93   : > { %1305 = vmatprep.subr.bf16.mxu1 %v3560_v0  ;;  %1594 = vmatprep.subr.bf16.mxu0 %v3560_v0  ;;  %v3219_v0 = vld [vmem:[%s3736_s8 + $0xe8] ss:$16 sps:$4 sm:$0xff]  }
  0x96   : > { %1306 = vmatpush1.bf16.msra.mxu1 %v3170_v33  ;;  %1595 = vmatpush1.bf16.msra.mxu0 %v3171_v34  ;;  %v3268_v33 = vld [vmem:[%s3736_s8 + $0x204] ss:$16 sps:$4 sm:$0xff]   ;;  %v3270_v34 = vld [vmem:[%s3736_s8 + $0x20c] ss:$16 sps:$4 sm:$0xff]  }
  0x99   : > { %1308 = vmatmul.mubr.bf16.vlgmr.msra.gmra.mrb[0].mxu1 %v3172_v35  ;;  %1597 = vmatmul.mubr.bf16.vlgmr.msra.gmra.mrb[0].mxu0 %v3175_v36  ;;  %v3272_v35 = vld [vmem:[%s3736_s8 + $0x200] ss:$16 sps:$4 sm:$0xff]   ;;  %v3273_v36 = vld [vmem:[%s3736_s8 + $0x208] ss:$16 sps:$4 sm:$0xff]  }
  0x9a   : > { %1315 = vmatprep.mubr.bf16.mxu1 %v3178_v37  ;;  %1604 = vmatprep.mubr.bf16.mxu0 %v3180_v38  ;;  %v3274_v37 = vld [vmem:[%s3736_s8 + $0x224] ss:$16 sps:$4 sm:$0xff]   ;;  %v3276_v38 = vld [vmem:[%s3736_s8 + $0x22c] ss:$16 sps:$4 sm:$0xff]  }
  0xa1   : > { %1316 = vmatmul.mubr.bf16.gmra.mrb[4].mxu1 %v3182_v39  ;;  %1605 = vmatmul.mubr.bf16.gmra.mrb[4].mxu0 %v3183_v40  ;;  %v3278_v39 = vld [vmem:[%s3736_s8 + $0x220] ss:$16 sps:$4 sm:$0xff]   ;;  %v3279_v40 = vld [vmem:[%s3736_s8 + $0x228] ss:$16 sps:$4 sm:$0xff]  }
  0xa2   : > { %1323 = vmatprep.mubr.bf16.mxu1 %v3184_v41  ;;  %1612 = vmatprep.mubr.bf16.mxu0 %v3186_v42  ;;  %v3280_v41 = vld [vmem:[%s3736_s8 + $0x244] ss:$16 sps:$4 sm:$0xff]   ;;  %v3282_v42 = vld [vmem:[%s3736_s8 + $0x24c] ss:$16 sps:$4 sm:$0xff]  }
  0xa9   : > { %1324 = vmatmul.mubr.bf16.gmra.mrb[8].mxu1 %v3188_v43  ;;  %1613 = vmatmul.mubr.bf16.gmra.mrb[8].mxu0 %v3189_v44  ;;  %v3284_v43 = vld [vmem:[%s3736_s8 + $0x240] ss:$16 sps:$4 sm:$0xff]   ;;  %v3285_v44 = vld [vmem:[%s3736_s8 + $0x248] ss:$16 sps:$4 sm:$0xff]  }
  0xaa   : > { %1331 = vmatprep.mubr.bf16.mxu1 %v3190_v45  ;;  %1620 = vmatprep.mubr.bf16.mxu0 %v3192_v46  ;;  %v3286_v45 = vld [vmem:[%s3736_s8 + $0x264] ss:$16 sps:$4 sm:$0xff]   ;;  %v3288_v46 = vld [vmem:[%s3736_s8 + $0x26c] ss:$16 sps:$4 sm:$0xff]  }
  0xb1   : > { %1332 = vmatmul.mubr.bf16.gmra.mrb[12].mxu1 %v3194_v47  ;;  %1621 = vmatmul.mubr.bf16.gmra.mrb[12].mxu0 %v3195_v48  ;;  %v3290_v47 = vld [vmem:[%s3736_s8 + $0x260] ss:$16 sps:$4 sm:$0xff]   ;;  %v3291_v48 = vld [vmem:[%s3736_s8 + $0x268] ss:$16 sps:$4 sm:$0xff]  }
  0xb2   : > { %1339 = vmatprep.mubr.bf16.mxu1 %v3196_v49  ;;  %1628 = vmatprep.mubr.bf16.mxu0 %v3198_v50  ;;  %v3292_v49 = vld [vmem:[%s3736_s8 + $0x284] ss:$16 sps:$4 sm:$0xff]   ;;  %v3294_v50 = vld [vmem:[%s3736_s8 + $0x28c] ss:$16 sps:$4 sm:$0xff]  }
  0xb9   : > { %1340 = vmatmul.mubr.bf16.gmra.mrb[16].mxu1 %v3200_v51  ;;  %1629 = vmatmul.mubr.bf16.gmra.mrb[16].mxu0 %v3201_v52  ;;  %v3296_v51 = vld [vmem:[%s3736_s8 + $0x280] ss:$16 sps:$4 sm:$0xff]   ;;  %v3297_v52 = vld [vmem:[%s3736_s8 + $0x288] ss:$16 sps:$4 sm:$0xff]  }
  0xba   : > { %1347 = vmatprep.mubr.bf16.mxu1 %v3202_v53  ;;  %1636 = vmatprep.mubr.bf16.mxu0 %v3204_v54  ;;  %v3298_v53 = vld [vmem:[%s3736_s8 + $0x2a4] ss:$16 sps:$4 sm:$0xff]   ;;  %v3300_v54 = vld [vmem:[%s3736_s8 + $0x2ac] ss:$16 sps:$4 sm:$0xff]  }
  0xc1   : > { %1348 = vmatmul.mubr.bf16.gmra.mrb[20].mxu1 %v3206_v55  ;;  %1637 = vmatmul.mubr.bf16.gmra.mrb[20].mxu0 %v3207_v56  ;;  %v3302_v55 = vld [vmem:[%s3736_s8 + $0x2a0] ss:$16 sps:$4 sm:$0xff]   ;;  %v3303_v56 = vld [vmem:[%s3736_s8 + $0x2a8] ss:$16 sps:$4 sm:$0xff]  }
  0xc2   : > { %1355 = vmatprep.mubr.bf16.mxu1 %v3208_v57  ;;  %1644 = vmatprep.mubr.bf16.mxu0 %v3210_v58  ;;  %v3304_v57 = vld [vmem:[%s3736_s8 + $0x2c4] ss:$16 sps:$4 sm:$0xff]   ;;  %v3306_v58 = vld [vmem:[%s3736_s8 + $0x2cc] ss:$16 sps:$4 sm:$0xff]  }
  0xc9   : > { %1356 = vmatmul.mubr.bf16.gmra.mrb[24].mxu1 %v3212_v59  ;;  %1645 = vmatmul.mubr.bf16.gmra.mrb[24].mxu0 %v3213_v60  ;;  %v3308_v59 = vld [vmem:[%s3736_s8 + $0x2c0] ss:$16 sps:$4 sm:$0xff]   ;;  %v3309_v60 = vld [vmem:[%s3736_s8 + $0x2c8] ss:$16 sps:$4 sm:$0xff]  }
  0xca   : > { %1363 = vmatprep.mubr.bf16.mxu1 %v3214_v61  ;;  %1652 = vmatprep.mubr.bf16.mxu0 %v3216_v62  ;;  %v3310_v61 = vld [vmem:[%s3736_s8 + $0x2e4] ss:$16 sps:$4 sm:$0xff]   ;;  %v3312_v62 = vld [vmem:[%s3736_s8 + $0x2ec] ss:$16 sps:$4 sm:$0xff]  }
  0xd1   : > { %1364 = vmatmul.mubr.bf16.gmra.mrb[28].mxu1 %v3218_v63  ;;  %1653 = vmatmul.mubr.bf16.gmra.mrb[28].mxu0 %v3219_v0  ;;  %v3314_v63 = vld [vmem:[%s3736_s8 + $0x2e0] ss:$16 sps:$4 sm:$0xff]   ;;  %v3315_v0 = vld [vmem:[%s3736_s8 + $0x2e8] ss:$16 sps:$4 sm:$0xff]  }
  0xd2   : > { %1371 = vmatprep.mubr.bf16.mxu1 %v3220_v1  ;;  %1660 = vmatprep.mubr.bf16.mxu0 %v3222_v2  ;;  %v3316_v1 = vld [vmem:[%s3736_s8 + $0x304] ss:$16 sps:$4 sm:$0xff]   ;;  %v3318_v2 = vld [vmem:[%s3736_s8 + $0x30c] ss:$16 sps:$4 sm:$0xff]  }
  0xd9   : > { %1372 = vmatmul.mubr.bf16.gmra.mrb[32].mxu1 %v3224_v3  ;;  %1661 = vmatmul.mubr.bf16.gmra.mrb[32].mxu0 %v3225_v4  ;;  %v3320_v3 = vld [vmem:[%s3736_s8 + $0x300] ss:$16 sps:$4 sm:$0xff]   ;;  %v3321_v4 = vld [vmem:[%s3736_s8 + $0x308] ss:$16 sps:$4 sm:$0xff]  }
  0xda   : > { %1379 = vmatprep.mubr.bf16.mxu1 %v3226_v5  ;;  %1668 = vmatprep.mubr.bf16.mxu0 %v3228_v6  ;;  %v3322_v5 = vld [vmem:[%s3736_s8 + $0x324] ss:$16 sps:$4 sm:$0xff]   ;;  %v3324_v6 = vld [vmem:[%s3736_s8 + $0x32c] ss:$16 sps:$4 sm:$0xff]  }
  0xe1   : > { %1380 = vmatmul.mubr.bf16.gmra.mrb[36].mxu1 %v3230_v7  ;;  %1669 = vmatmul.mubr.bf16.gmra.mrb[36].mxu0 %v3231_v8  ;;  %v3326_v7 = vld [vmem:[%s3736_s8 + $0x320] ss:$16 sps:$4 sm:$0xff]   ;;  %v3327_v8 = vld [vmem:[%s3736_s8 + $0x328] ss:$16 sps:$4 sm:$0xff]  }
  0xe2   : > { %1387 = vmatprep.mubr.bf16.mxu1 %v3232_v9  ;;  %1676 = vmatprep.mubr.bf16.mxu0 %v3234_v10  ;;  %v3328_v9 = vld [vmem:[%s3736_s8 + $0x344] ss:$16 sps:$4 sm:$0xff]   ;;  %v3330_v10 = vld [vmem:[%s3736_s8 + $0x34c] ss:$16 sps:$4 sm:$0xff]  }
  0xe9   : > { %1388 = vmatmul.mubr.bf16.gmra.mrb[40].mxu1 %v3236_v11  ;;  %1677 = vmatmul.mubr.bf16.gmra.mrb[40].mxu0 %v3237_v12  ;;  %v3332_v11 = vld [vmem:[%s3736_s8 + $0x340] ss:$16 sps:$4 sm:$0xff]   ;;  %v3333_v12 = vld [vmem:[%s3736_s8 + $0x348] ss:$16 sps:$4 sm:$0xff]  }
  0xea   : > { %1395 = vmatprep.mubr.bf16.mxu1 %v3238_v13  ;;  %1684 = vmatprep.mubr.bf16.mxu0 %v3240_v14  ;;  %v3334_v13 = vld [vmem:[%s3736_s8 + $0x364] ss:$16 sps:$4 sm:$0xff]   ;;  %v3336_v14 = vld [vmem:[%s3736_s8 + $0x36c] ss:$16 sps:$4 sm:$0xff]  }
  0xf1   : > { %1396 = vmatmul.mubr.bf16.gmra.mrb[44].mxu1 %v3242_v15  ;;  %1685 = vmatmul.mubr.bf16.gmra.mrb[44].mxu0 %v3243_v16 }
  0xf2   : > { %1403 = vmatprep.mubr.bf16.mxu1 %v3244_v17  ;;  %1692 = vmatprep.mubr.bf16.mxu0 %v3246_v18  ;;  %v3338_v18 = vld [vmem:[%s3736_s8 + $0x360] ss:$16 sps:$4 sm:$0xff]  }
  0xf9   : > { %1404 = vmatmul.mubr.bf16.gmra.mrb[48].mxu1 %v3248_v19  ;;  %1693 = vmatmul.mubr.bf16.gmra.mrb[48].mxu0 %v3249_v20 }
  0xfa   : > { %1411 = vmatprep.mubr.bf16.mxu1 %v3250_v21  ;;  %1700 = vmatprep.mubr.bf16.mxu0 %v3252_v22  ;;  %v3339_v22 = vld [vmem:[%s3736_s8 + $0x368] ss:$16 sps:$4 sm:$0xff]  }
 0x101   : > { %1412 = vmatmul.mubr.bf16.gmra.mrb[52].mxu1 %v3254_v23  ;;  %1701 = vmatmul.mubr.bf16.gmra.mrb[52].mxu0 %v3255_v24  ;;  %v3340_v23 = vld [vmem:[%s3736_s8 + $0x384] ss:$16 sps:$4 sm:$0xff]  }
 0x102   : > { %1419 = vmatprep.mubr.bf16.mxu1 %v3256_v25  ;;  %1708 = vmatprep.mubr.bf16.mxu0 %v3258_v26  ;;  %v3342_v26 = vld [vmem:[%s3736_s8 + $0x38c] ss:$16 sps:$4 sm:$0xff]  }
 0x109   : > { %1420 = vmatmul.mubr.bf16.gmra.mrb[56].mxu1 %v3260_v27  ;;  %1709 = vmatmul.mubr.bf16.gmra.mrb[56].mxu0 %v3261_v28 }
 0x10a   : > { %1427 = vmatprep.mubr.bf16.mxu1 %v3262_v29  ;;  %1716 = vmatprep.mubr.bf16.mxu0 %v3264_v30 }
 0x111   : > { %1428 = vmatmul.mubr.bf16.gmra.mrb[60].mxu1 %v3266_v31  ;;  %1717 = vmatmul.mubr.bf16.gmra.mrb[60].mxu0 %v3267_v32 }
 0x112   : > { %1435 = vmatprep.mubr.bf16.mxu1 %v3268_v33  ;;  %1724 = vmatprep.mubr.bf16.mxu0 %v3270_v34 }
 0x119   : > { %1436 = vmatmul.mubr.bf16.gmra.mrb[64].mxu1 %v3272_v35  ;;  %1725 = vmatmul.mubr.bf16.gmra.mrb[64].mxu0 %v3273_v36 }
 0x11a   : > { %1443 = vmatprep.mubr.bf16.mxu1 %v3274_v37  ;;  %1732 = vmatprep.mubr.bf16.mxu0 %v3276_v38 }
 0x121   : > { %1444 = vmatmul.mubr.bf16.gmra.mrb[68].mxu1 %v3278_v39  ;;  %1733 = vmatmul.mubr.bf16.gmra.mrb[68].mxu0 %v3279_v40 }
 0x122   : > { %1451 = vmatprep.mubr.bf16.mxu1 %v3280_v41  ;;  %1740 = vmatprep.mubr.bf16.mxu0 %v3282_v42  ;;  %v3344_v42 = vld [vmem:[%s3736_s8 + $0x380] ss:$16 sps:$4 sm:$0xff]  }
 0x129   : > { %1452 = vmatmul.mubr.bf16.gmra.mrb[72].mxu1 %v3284_v43  ;;  %1741 = vmatmul.mubr.bf16.gmra.mrb[72].mxu0 %v3285_v44 }
 0x12a   : > { %1459 = vmatprep.mubr.bf16.mxu1 %v3286_v45  ;;  %1748 = vmatprep.mubr.bf16.mxu0 %v3288_v46  ;;  %v3345_v46 = vld [vmem:[%s3736_s8 + $0x388] ss:$16 sps:$4 sm:$0xff]  }
 0x131   : > { %1460 = vmatmul.mubr.bf16.gmra.mrb[76].mxu1 %v3290_v47  ;;  %1749 = vmatmul.mubr.bf16.gmra.mrb[76].mxu0 %v3291_v48  ;;  %v3346_v47 = vld [vmem:[%s3736_s8 + $0x3a4] ss:$16 sps:$4 sm:$0xff]  }
 0x132   : > { %1467 = vmatprep.mubr.bf16.mxu1 %v3292_v49  ;;  %1756 = vmatprep.mubr.bf16.mxu0 %v3294_v50  ;;  %v3348_v50 = vld [vmem:[%s3736_s8 + $0x3ac] ss:$16 sps:$4 sm:$0xff]  }
 0x139   : > { %1468 = vmatmul.mubr.bf16.gmra.mrb[80].mxu1 %v3296_v51  ;;  %1757 = vmatmul.mubr.bf16.gmra.mrb[80].mxu0 %v3297_v52 }
 0x13a   : > { %1475 = vmatprep.mubr.bf16.mxu1 %v3298_v53  ;;  %1764 = vmatprep.mubr.bf16.mxu0 %v3300_v54 }
 0x141   : > { %1476 = vmatmul.mubr.bf16.gmra.mrb[84].mxu1 %v3302_v55  ;;  %1765 = vmatmul.mubr.bf16.gmra.mrb[84].mxu0 %v3303_v56 }
 0x142   : > { %1483 = vmatprep.mubr.bf16.mxu1 %v3304_v57  ;;  %1772 = vmatprep.mubr.bf16.mxu0 %v3306_v58 }
 0x149   : > { %1484 = vmatmul.mubr.bf16.gmra.mrb[88].mxu1 %v3308_v59  ;;  %1773 = vmatmul.mubr.bf16.gmra.mrb[88].mxu0 %v3309_v60 }
 0x14a   : > { %1491 = vmatprep.mubr.bf16.mxu1 %v3310_v61  ;;  %1780 = vmatprep.mubr.bf16.mxu0 %v3312_v62 }
 0x151   : > { %1492 = vmatmul.mubr.bf16.gmra.mrb[92].mxu1 %v3314_v63  ;;  %1781 = vmatmul.mubr.bf16.gmra.mrb[92].mxu0 %v3315_v0 }
 0x152   : > { %1499 = vmatprep.mubr.bf16.mxu1 %v3316_v1  ;;  %1788 = vmatprep.mubr.bf16.mxu0 %v3318_v2 }
 0x159   : > { %1500 = vmatmul.mubr.bf16.gmra.mrb[96].mxu1 %v3320_v3  ;;  %1789 = vmatmul.mubr.bf16.gmra.mrb[96].mxu0 %v3321_v4  ;;  %v3350_v4 = vld [vmem:[%s3736_s8 + $0x3a0] ss:$16 sps:$4 sm:$0xff]  }
 0x15a   : > { %1507 = vmatprep.mubr.bf16.mxu1 %v3322_v5  ;;  %1796 = vmatprep.mubr.bf16.mxu0 %v3324_v6 }
 0x161   : > { %1508 = vmatmul.mubr.bf16.gmra.mrb[100].mxu1 %v3326_v7  ;;  %1797 = vmatmul.mubr.bf16.gmra.mrb[100].mxu0 %v3327_v8  ;;  %v3351_v8 = vld [vmem:[%s3736_s8 + $0x3a8] ss:$16 sps:$4 sm:$0xff]  }
 0x162   : > { %1515 = vmatprep.mubr.bf16.mxu1 %v3328_v9  ;;  %1804 = vmatprep.mubr.bf16.mxu0 %v3330_v10  ;;  %v3352_v9 = vld [vmem:[%s3736_s8 + $0x3c4] ss:$16 sps:$4 sm:$0xff]  }
 0x169   : > { %1516 = vmatmul.mubr.bf16.gmra.mrb[104].mxu1 %v3332_v11  ;;  %1805 = vmatmul.mubr.bf16.gmra.mrb[104].mxu0 %v3333_v12  ;;  %v3354_v12 = vld [vmem:[%s3736_s8 + $0x3cc] ss:$16 sps:$4 sm:$0xff]  }
 0x16a   : > { %1523 = vmatprep.mubr.bf16.mxu1 %v3334_v13  ;;  %1812 = vmatprep.mubr.bf16.mxu0 %v3336_v14 }
 0x16c   : > { %v1309_v15 = vpop.f32.mrb[0].mxu1  ;;  %v1598_v16 = vpop.f32.mrb[0].mxu0 }
 0x16d   : > { %v1311_v17 = vpop.f32.mrb[1].mxu1  ;;  %v1599_v19 = vadd.f32 %v1598_v16, %v1309_v15  ;;  %v1600_v20 = vpop.f32.mrb[1].mxu0 }
 0x16e   : > { %v1312_v21 = vpop.f32.mrb[2].mxu1  ;;  %v1601_v24 = vpop.f32.mrb[2].mxu0 }
 0x16f   : > { %v1314_v25 = vpop.f32.mrb[3].mxu1  ;;  %v2937_v27 = vpack.c.bf16 %v1599_v19, %v1599_v19  ;;  %v2310_v28 = vmul.f32 %v1599_v19, %v1599_v19  ;;  %v1602_v29 = vadd.f32 %v1601_v24, %v1312_v21  ;;  %v1603_v30 = vpop.f32.mrb[3].mxu0  ;;  %v2175_v31 = vsel %vm2174_vm1, %v1599_v19, 0.0 }
 0x170   : > { %v3356_v30 = vld [vmem:[%s3736_s8 + $0x3c0] ss:$16 sps:$4 sm:$0xff]  }
 0x171   : > { %1524 = vmatmul.mubr.bf16.gmra.mrb[108].mxu1 %v3338_v18  ;;  %2110 = vst.msk [vmem:[%s3893_s23] sm:$0xf] %vm2109_vm0, %v2937_v27  ;;  %v2938_v32 = vpack.c.bf16 %v1602_v29, %v1602_v29  ;;  %v2176_v33 = vsel %vm2174_vm1, %v1602_v29, 0.0  ;;  %v2311_v34 = vmul.f32 %v1602_v29, %v1602_v29  ;;  %1813 = vmatmul.mubr.bf16.gmra.mrb[108].mxu0 %v3339_v22  ;;  %v2374_v36 = vsel %vm2174_vm1, %v2310_v28, 0.0 }
 0x172   : > { %1531 = vmatprep.mubr.bf16.mxu1 %v3340_v23  ;;  %v2177_v35 = vadd.f32 %v2176_v33, %v2175_v31  ;;  %1820 = vmatprep.mubr.bf16.mxu0 %v3342_v26 }
 0x173   : > { %2111 = vst.msk [vmem:[%s3893_s23 + $0x4] sm:$0xf] %vm2109_vm0, %v2938_v32  ;;  %v2375_v37 = vsel %vm2174_vm1, %v2311_v34, 0.0  ;;  %v3357_v34 = vld [vmem:[%s3736_s8 + $0x3c8] ss:$16 sps:$4 sm:$0xff]  }
 0x174   : > { %v1317_v38 = vpop.f32.mrb[4].mxu1  ;;  %v2376_v39 = vadd.f32 %v2375_v37, %v2374_v36  ;;  %v1606_v40 = vpop.f32.mrb[4].mxu0 }
 0x175   : > { %v1319_v41 = vpop.f32.mrb[5].mxu1  ;;  %v1607_v43 = vadd.f32 %v1606_v40, %v1317_v38  ;;  %v1608_v44 = vpop.f32.mrb[5].mxu0  ;;  %v3360_v38 = vld [vmem:[%s3736_s8 + $0x3ec] ss:$16 sps:$4 sm:$0xff]  }
 0x176   : > { %v1320_v45 = vpop.f32.mrb[6].mxu1  ;;  %v1609_v48 = vpop.f32.mrb[6].mxu0 }
 0x177   : > { %v1322_v49 = vpop.f32.mrb[7].mxu1  ;;  %v2939_v51 = vpack.c.bf16 %v1607_v43, %v1607_v43  ;;  %v2178_v52 = vsel %vm2174_vm1, %v1607_v43, 0.0  ;;  %v2312_v53 = vmul.f32 %v1607_v43, %v1607_v43  ;;  %v1610_v54 = vadd.f32 %v1609_v48, %v1320_v45  ;;  %v1611_v55 = vpop.f32.mrb[7].mxu0 }
 0x178   : > { %v2179_v56 = vadd.f32 %v2178_v52, %v2177_v35  ;;  %v3358_v35 = vld [vmem:[%s3736_s8 + $0x3e4] ss:$16 sps:$4 sm:$0xff]  }
 0x179   : > { %1532 = vmatmul.mubr.bf16.gmra.mrb[112].mxu1 %v3344_v42  ;;  %2112 = vst.msk [vmem:[%s3893_s23 + $0x8] sm:$0xf] %vm2109_vm0, %v2939_v51  ;;  %v2377_v57 = vsel %vm2174_vm1, %v2312_v53, 0.0  ;;  %v2940_v58 = vpack.c.bf16 %v1610_v54, %v1610_v54  ;;  %v2180_v59 = vsel %vm2174_vm1, %v1610_v54, 0.0  ;;  %v2313_v60 = vmul.f32 %v1610_v54, %v1610_v54  ;;  %1821 = vmatmul.mubr.bf16.gmra.mrb[112].mxu0 %v3345_v46 }
 0x17a   : > { %1539 = vmatprep.mubr.bf16.mxu1 %v3346_v47  ;;  %v2378_v61 = vadd.f32 %v2377_v57, %v2376_v39  ;;  %v2181_v62 = vadd.f32 %v2180_v59, %v2179_v56  ;;  %1828 = vmatprep.mubr.bf16.mxu0 %v3348_v50  ;;  %v3362_v56 = vld [vmem:[%s3736_s8 + $0x3e0] ss:$16 sps:$4 sm:$0xff]  }
 0x17b   : > { %2113 = vst.msk [vmem:[%s3893_s23 + $0xc] sm:$0xf] %vm2109_vm0, %v2940_v58  ;;  %v2379_v63 = vsel %vm2174_vm1, %v2313_v60, 0.0  ;;  %v3363_v60 = vld [vmem:[%s3736_s8 + $0x3e8] ss:$16 sps:$4 sm:$0xff]  }
 0x17c   : > { %v1325_v0 = vpop.f32.mrb[8].mxu1  ;;  %v2380_v1 = vadd.f32 %v2379_v63, %v2378_v61  ;;  %v1614_v2 = vpop.f32.mrb[8].mxu0 }
 0x17d   : > { %v1327_v3 = vpop.f32.mrb[9].mxu1  ;;  %v1615_v5 = vadd.f32 %v1614_v2, %v1325_v0  ;;  %v1616_v6 = vpop.f32.mrb[9].mxu0 }
 0x17e   : > { %v1328_v7 = vpop.f32.mrb[10].mxu1  ;;  %v1617_v10 = vpop.f32.mrb[10].mxu0 }
 0x17f   : > { %v1330_v11 = vpop.f32.mrb[11].mxu1  ;;  %v2941_v13 = vpack.c.bf16 %v1615_v5, %v1615_v5  ;;  %v2182_v14 = vsel %vm2174_vm1, %v1615_v5, 0.0  ;;  %v2314_v15 = vmul.f32 %v1615_v5, %v1615_v5  ;;  %v1618_v16 = vadd.f32 %v1617_v10, %v1328_v7  ;;  %v1619_v17 = vpop.f32.mrb[11].mxu0 }
 0x180   : > { %v2183_v18 = vadd.f32 %v2182_v14, %v2181_v62 }
 0x181   : > { %1540 = vmatmul.mubr.bf16.gmra.mrb[116].mxu1 %v3350_v4  ;;  %2114 = vst.msk [vmem:[%s3893_s23 + $0x10] sm:$0xf] %vm2109_vm0, %v2941_v13  ;;  %v2381_v19 = vsel %vm2174_vm1, %v2314_v15, 0.0  ;;  %v2942_v20 = vpack.c.bf16 %v1618_v16, %v1618_v16  ;;  %v2184_v21 = vsel %vm2174_vm1, %v1618_v16, 0.0  ;;  %v2315_v22 = vmul.f32 %v1618_v16, %v1618_v16  ;;  %1829 = vmatmul.mubr.bf16.gmra.mrb[116].mxu0 %v3351_v8 }
 0x182   : > { %1547 = vmatprep.mubr.bf16.mxu1 %v3352_v9  ;;  %v2382_v23 = vadd.f32 %v2381_v19, %v2380_v1  ;;  %v2185_v24 = vadd.f32 %v2184_v21, %v2183_v18  ;;  %1836 = vmatprep.mubr.bf16.mxu0 %v3354_v12 }
 0x183   : > { %2115 = vst.msk [vmem:[%s3893_s23 + $0x14] sm:$0xf] %vm2109_vm0, %v2942_v20  ;;  %v2383_v25 = vsel %vm2174_vm1, %v2315_v22, 0.0 }
 0x184   : > { %v1333_v26 = vpop.f32.mrb[12].mxu1  ;;  %v2384_v27 = vadd.f32 %v2383_v25, %v2382_v23  ;;  %v1622_v28 = vpop.f32.mrb[12].mxu0 }
 0x185   : > { %v1335_v29 = vpop.f32.mrb[13].mxu1  ;;  %v1623_v31 = vadd.f32 %v1622_v28, %v1333_v26  ;;  %v1624_v32 = vpop.f32.mrb[13].mxu0 }
 0x186   : > { %v1336_v33 = vpop.f32.mrb[14].mxu1  ;;  %v1625_v36 = vpop.f32.mrb[14].mxu0 }
 0x187   : > { %v1338_v37 = vpop.f32.mrb[15].mxu1  ;;  %v2943_v39 = vpack.c.bf16 %v1623_v31, %v1623_v31  ;;  %v2186_v40 = vsel %vm2174_vm1, %v1623_v31, 0.0  ;;  %v2316_v41 = vmul.f32 %v1623_v31, %v1623_v31  ;;  %v1626_v42 = vadd.f32 %v1625_v36, %v1336_v33  ;;  %v1627_v43 = vpop.f32.mrb[15].mxu0 }
 0x188   : > { %v2187_v44 = vadd.f32 %v2186_v40, %v2185_v24 }
 0x189   : > { %1548 = vmatmul.mubr.bf16.gmra.mrb[120].mxu1 %v3356_v30  ;;  %2116 = vst.msk [vmem:[%s3893_s23 + $0x18] sm:$0xf] %vm2109_vm0, %v2943_v39  ;;  %v2385_v45 = vsel %vm2174_vm1, %v2316_v41, 0.0  ;;  %v2944_v46 = vpack.c.bf16 %v1626_v42, %v1626_v42  ;;  %v2188_v47 = vsel %vm2174_vm1, %v1626_v42, 0.0  ;;  %v2317_v48 = vmul.f32 %v1626_v42, %v1626_v42  ;;  %1837 = vmatmul.mubr.bf16.gmra.mrb[120].mxu0 %v3357_v34 }
 0x18a   : > { %1555 = vmatprep.mubr.bf16.mxu1 %v3358_v35  ;;  %v2386_v49 = vadd.f32 %v2385_v45, %v2384_v27  ;;  %v2189_v50 = vadd.f32 %v2188_v47, %v2187_v44  ;;  %1844 = vmatprep.mubr.bf16.mxu0 %v3360_v38 }
 0x18b   : > { %2117 = vst.msk [vmem:[%s3893_s23 + $0x1c] sm:$0xf] %vm2109_vm0, %v2944_v46  ;;  %v2387_v51 = vsel %vm2174_vm1, %v2317_v48, 0.0 }
 0x18c   : > { %v1341_v52 = vpop.f32.mrb[16].mxu1  ;;  %v2388_v53 = vadd.f32 %v2387_v51, %v2386_v49  ;;  %v1630_v54 = vpop.f32.mrb[16].mxu0 }
 0x18d   : > { %v1343_v55 = vpop.f32.mrb[17].mxu1  ;;  %v1631_v57 = vadd.f32 %v1630_v54, %v1341_v52  ;;  %v1632_v58 = vpop.f32.mrb[17].mxu0 }
 0x18e   : > { %v1344_v59 = vpop.f32.mrb[18].mxu1  ;;  %v1633_v61 = vpop.f32.mrb[18].mxu0 }
 0x18f   : > { %v1346_v62 = vpop.f32.mrb[19].mxu1  ;;  %v2945_v63 = vpack.c.bf16 %v1631_v57, %v1631_v57  ;;  %v2190_v0 = vsel %vm2174_vm1, %v1631_v57, 0.0  ;;  %v2318_v1 = vmul.f32 %v1631_v57, %v1631_v57  ;;  %v1634_v2 = vadd.f32 %v1633_v61, %v1344_v59  ;;  %v1635_v3 = vpop.f32.mrb[19].mxu0 }
 0x190   : > { %v2191_v4 = vadd.f32 %v2190_v0, %v2189_v50 }
 0x191   : > { %1556 = vmatmul.mubr.bf16.gmra.mrb[124].mxu1 %v3362_v56  ;;  %2118 = vst.msk [vmem:[%s3893_s23 + $0x20] sm:$0xf] %vm2109_vm0, %v2945_v63  ;;  %v2389_v5 = vsel %vm2174_vm1, %v2318_v1, 0.0  ;;  %v2946_v6 = vpack.c.bf16 %v1634_v2, %v1634_v2  ;;  %v2192_v7 = vsel %vm2174_vm1, %v1634_v2, 0.0  ;;  %v2319_v8 = vmul.f32 %v1634_v2, %v1634_v2  ;;  %1845 = vmatmul.mubr.bf16.gmra.mrb[124].mxu0 %v3363_v60 }
 0x192   : > { %v2390_v9 = vadd.f32 %v2389_v5, %v2388_v53  ;;  %v2193_v10 = vadd.f32 %v2192_v7, %v2191_v4 }
 0x193   : > { %2119 = vst.msk [vmem:[%s3893_s23 + $0x24] sm:$0xf] %vm2109_vm0, %v2946_v6  ;;  %v2391_v11 = vsel %vm2174_vm1, %v2319_v8, 0.0 }
 0x194   : > { %v1349_v12 = vpop.f32.mrb[20].mxu1  ;;  %v2392_v13 = vadd.f32 %v2391_v11, %v2390_v9  ;;  %v1638_v14 = vpop.f32.mrb[20].mxu0 }
 0x195   : > { %v1351_v15 = vpop.f32.mrb[21].mxu1  ;;  %v1639_v16 = vadd.f32 %v1638_v14, %v1349_v12  ;;  %v1640_v17 = vpop.f32.mrb[21].mxu0 }
 0x196   : > { %v1352_v18 = vpop.f32.mrb[22].mxu1  ;;  %v1641_v19 = vpop.f32.mrb[22].mxu0 }
 0x197   : > { %v1354_v20 = vpop.f32.mrb[23].mxu1  ;;  %v2947_v21 = vpack.c.bf16 %v1639_v16, %v1639_v16  ;;  %v2194_v22 = vsel %vm2174_vm1, %v1639_v16, 0.0  ;;  %v2320_v23 = vmul.f32 %v1639_v16, %v1639_v16  ;;  %v1642_v24 = vadd.f32 %v1641_v19, %v1352_v18  ;;  %v1643_v25 = vpop.f32.mrb[23].mxu0 }
 0x198   : > { %v2195_v26 = vadd.f32 %v2194_v22, %v2193_v10 }
 0x199   : > { %2120 = vst.msk [vmem:[%s3893_s23 + $0x28] sm:$0xf] %vm2109_vm0, %v2947_v21  ;;  %v2393_v27 = vsel %vm2174_vm1, %v2320_v23, 0.0  ;;  %v2948_v28 = vpack.c.bf16 %v1642_v24, %v1642_v24  ;;  %v2196_v29 = vsel %vm2174_vm1, %v1642_v24, 0.0  ;;  %v2321_v30 = vmul.f32 %v1642_v24, %v1642_v24 }
 0x19a   : > { %v2394_v31 = vadd.f32 %v2393_v27, %v2392_v13  ;;  %v2197_v32 = vadd.f32 %v2196_v29, %v2195_v26 }
 0x19b   : > { %2121 = vst.msk [vmem:[%s3893_s23 + $0x2c] sm:$0xf] %vm2109_vm0, %v2948_v28  ;;  %v2395_v33 = vsel %vm2174_vm1, %v2321_v30, 0.0 }
 0x19c   : > { %v1357_v34 = vpop.f32.mrb[24].mxu1  ;;  %v2396_v35 = vadd.f32 %v2395_v33, %v2394_v31  ;;  %v1646_v36 = vpop.f32.mrb[24].mxu0 }
 0x19d   : > { %v1359_v37 = vpop.f32.mrb[25].mxu1  ;;  %v1647_v38 = vadd.f32 %v1646_v36, %v1357_v34  ;;  %v1648_v39 = vpop.f32.mrb[25].mxu0 }
 0x19e   : > { %v1360_v40 = vpop.f32.mrb[26].mxu1  ;;  %v1649_v41 = vpop.f32.mrb[26].mxu0 }
 0x19f   : > { %v1362_v42 = vpop.f32.mrb[27].mxu1  ;;  %v2949_v43 = vpack.c.bf16 %v1647_v38, %v1647_v38  ;;  %v2198_v44 = vsel %vm2174_vm1, %v1647_v38, 0.0  ;;  %v2322_v45 = vmul.f32 %v1647_v38, %v1647_v38  ;;  %v1650_v46 = vadd.f32 %v1649_v41, %v1360_v40  ;;  %v1651_v47 = vpop.f32.mrb[27].mxu0 }
 0x1a0   : > { %v2199_v48 = vadd.f32 %v2198_v44, %v2197_v32 }
 0x1a1   : > { %2122 = vst.msk [vmem:[%s3893_s23 + $0x30] sm:$0xf] %vm2109_vm0, %v2949_v43  ;;  %v2397_v49 = vsel %vm2174_vm1, %v2322_v45, 0.0  ;;  %v2950_v50 = vpack.c.bf16 %v1650_v46, %v1650_v46  ;;  %v2200_v51 = vsel %vm2174_vm1, %v1650_v46, 0.0  ;;  %v2323_v52 = vmul.f32 %v1650_v46, %v1650_v46 }
 0x1a2   : > { %v2398_v53 = vadd.f32 %v2397_v49, %v2396_v35  ;;  %v2201_v54 = vadd.f32 %v2200_v51, %v2199_v48 }
 0x1a3   : > { %2123 = vst.msk [vmem:[%s3893_s23 + $0x34] sm:$0xf] %vm2109_vm0, %v2950_v50  ;;  %v2399_v55 = vsel %vm2174_vm1, %v2323_v52, 0.0 }
 0x1a4   : > { %v1365_v56 = vpop.f32.mrb[28].mxu1  ;;  %v2400_v57 = vadd.f32 %v2399_v55, %v2398_v53  ;;  %v1654_v58 = vpop.f32.mrb[28].mxu0 }
 0x1a5   : > { %v1367_v59 = vpop.f32.mrb[29].mxu1  ;;  %v1655_v60 = vadd.f32 %v1654_v58, %v1365_v56  ;;  %v1656_v61 = vpop.f32.mrb[29].mxu0 }
 0x1a6   : > { %v1368_v62 = vpop.f32.mrb[30].mxu1  ;;  %v1657_v63 = vpop.f32.mrb[30].mxu0 }
 0x1a7   : > { %v1370_v0 = vpop.f32.mrb[31].mxu1  ;;  %v2951_v1 = vpack.c.bf16 %v1655_v60, %v1655_v60  ;;  %v2202_v2 = vsel %vm2174_vm1, %v1655_v60, 0.0  ;;  %v2324_v3 = vmul.f32 %v1655_v60, %v1655_v60  ;;  %v1658_v4 = vadd.f32 %v1657_v63, %v1368_v62  ;;  %v1659_v5 = vpop.f32.mrb[31].mxu0 }
 0x1a8   : > { %v2203_v6 = vadd.f32 %v2202_v2, %v2201_v54 }
 0x1a9   : > { %2124 = vst.msk [vmem:[%s3893_s23 + $0x38] sm:$0xf] %vm2109_vm0, %v2951_v1  ;;  %v2401_v7 = vsel %vm2174_vm1, %v2324_v3, 0.0  ;;  %v2952_v8 = vpack.c.bf16 %v1658_v4, %v1658_v4  ;;  %v2204_v9 = vsel %vm2174_vm1, %v1658_v4, 0.0  ;;  %v2325_v10 = vmul.f32 %v1658_v4, %v1658_v4 }
 0x1aa   : > { %v2402_v11 = vadd.f32 %v2401_v7, %v2400_v57  ;;  %v2205_v12 = vadd.f32 %v2204_v9, %v2203_v6 }
 0x1ab   : > { %2125 = vst.msk [vmem:[%s3893_s23 + $0x3c] sm:$0xf] %vm2109_vm0, %v2952_v8  ;;  %v2403_v13 = vsel %vm2174_vm1, %v2325_v10, 0.0 }
 0x1ac   : > { %v1373_v14 = vpop.f32.mrb[32].mxu1  ;;  %v2404_v15 = vadd.f32 %v2403_v13, %v2402_v11  ;;  %v1662_v16 = vpop.f32.mrb[32].mxu0 }
 0x1ad   : > { %v1375_v17 = vpop.f32.mrb[33].mxu1  ;;  %v1663_v18 = vadd.f32 %v1662_v16, %v1373_v14  ;;  %v1664_v19 = vpop.f32.mrb[33].mxu0 }
 0x1ae   : > { %v1376_v20 = vpop.f32.mrb[34].mxu1  ;;  %v1665_v21 = vpop.f32.mrb[34].mxu0 }
 0x1af   : > { %v1378_v22 = vpop.f32.mrb[35].mxu1  ;;  %v2953_v23 = vpack.c.bf16 %v1663_v18, %v1663_v18  ;;  %v2206_v24 = vsel %vm2174_vm1, %v1663_v18, 0.0  ;;  %v2326_v25 = vmul.f32 %v1663_v18, %v1663_v18  ;;  %v1666_v26 = vadd.f32 %v1665_v21, %v1376_v20  ;;  %v1667_v27 = vpop.f32.mrb[35].mxu0 }
 0x1b0   : > { %v2207_v28 = vadd.f32 %v2206_v24, %v2205_v12 }
 0x1b1   : > { %2126 = vst.msk [vmem:[%s3893_s23 + $0x40] sm:$0xf] %vm2109_vm0, %v2953_v23  ;;  %v2405_v29 = vsel %vm2174_vm1, %v2326_v25, 0.0  ;;  %v2954_v30 = vpack.c.bf16 %v1666_v26, %v1666_v26  ;;  %v2208_v31 = vsel %vm2174_vm1, %v1666_v26, 0.0  ;;  %v2327_v32 = vmul.f32 %v1666_v26, %v1666_v26 }
 0x1b2   : > { %v2406_v33 = vadd.f32 %v2405_v29, %v2404_v15  ;;  %v2209_v34 = vadd.f32 %v2208_v31, %v2207_v28 }
 0x1b3   : > { %2127 = vst.msk [vmem:[%s3893_s23 + $0x44] sm:$0xf] %vm2109_vm0, %v2954_v30  ;;  %v2407_v35 = vsel %vm2174_vm1, %v2327_v32, 0.0 }
 0x1b4   : > { %v1381_v36 = vpop.f32.mrb[36].mxu1  ;;  %v2408_v37 = vadd.f32 %v2407_v35, %v2406_v33  ;;  %v1670_v38 = vpop.f32.mrb[36].mxu0 }
 0x1b5   : > { %v1383_v39 = vpop.f32.mrb[37].mxu1  ;;  %v1671_v40 = vadd.f32 %v1670_v38, %v1381_v36  ;;  %v1672_v41 = vpop.f32.mrb[37].mxu0 }
 0x1b6   : > { %v1384_v42 = vpop.f32.mrb[38].mxu1  ;;  %v1673_v43 = vpop.f32.mrb[38].mxu0 }
 0x1b7   : > { %v1386_v44 = vpop.f32.mrb[39].mxu1  ;;  %v2955_v45 = vpack.c.bf16 %v1671_v40, %v1671_v40  ;;  %v2210_v46 = vsel %vm2174_vm1, %v1671_v40, 0.0  ;;  %v2328_v47 = vmul.f32 %v1671_v40, %v1671_v40  ;;  %v1674_v48 = vadd.f32 %v1673_v43, %v1384_v42  ;;  %v1675_v49 = vpop.f32.mrb[39].mxu0 }
 0x1b8   : > { %v2211_v50 = vadd.f32 %v2210_v46, %v2209_v34 }
 0x1b9   : > { %2128 = vst.msk [vmem:[%s3893_s23 + $0x48] sm:$0xf] %vm2109_vm0, %v2955_v45  ;;  %v2409_v51 = vsel %vm2174_vm1, %v2328_v47, 0.0  ;;  %v2956_v52 = vpack.c.bf16 %v1674_v48, %v1674_v48  ;;  %v2212_v53 = vsel %vm2174_vm1, %v1674_v48, 0.0  ;;  %v2329_v54 = vmul.f32 %v1674_v48, %v1674_v48 }
 0x1ba   : > { %v2410_v55 = vadd.f32 %v2409_v51, %v2408_v37  ;;  %v2213_v56 = vadd.f32 %v2212_v53, %v2211_v50 }
 0x1bb   : > { %2129 = vst.msk [vmem:[%s3893_s23 + $0x4c] sm:$0xf] %vm2109_vm0, %v2956_v52  ;;  %v2411_v57 = vsel %vm2174_vm1, %v2329_v54, 0.0 }
 0x1bc   : > { %v1389_v58 = vpop.f32.mrb[40].mxu1  ;;  %v2412_v59 = vadd.f32 %v2411_v57, %v2410_v55  ;;  %v1678_v60 = vpop.f32.mrb[40].mxu0 }
 0x1bd   : > { %v1391_v61 = vpop.f32.mrb[41].mxu1  ;;  %v1679_v62 = vadd.f32 %v1678_v60, %v1389_v58  ;;  %v1680_v63 = vpop.f32.mrb[41].mxu0 }
 0x1be   : > { %v1392_v0 = vpop.f32.mrb[42].mxu1  ;;  %v1681_v1 = vpop.f32.mrb[42].mxu0 }
 0x1bf   : > { %v1394_v2 = vpop.f32.mrb[43].mxu1  ;;  %v2957_v3 = vpack.c.bf16 %v1679_v62, %v1679_v62  ;;  %v2214_v4 = vsel %vm2174_vm1, %v1679_v62, 0.0  ;;  %v2330_v5 = vmul.f32 %v1679_v62, %v1679_v62  ;;  %v1682_v6 = vadd.f32 %v1681_v1, %v1392_v0  ;;  %v1683_v7 = vpop.f32.mrb[43].mxu0 }
 0x1c0   : > { %v2215_v8 = vadd.f32 %v2214_v4, %v2213_v56 }
 0x1c1   : > { %2130 = vst.msk [vmem:[%s3893_s23 + $0x50] sm:$0xf] %vm2109_vm0, %v2957_v3  ;;  %v2413_v9 = vsel %vm2174_vm1, %v2330_v5, 0.0  ;;  %v2958_v10 = vpack.c.bf16 %v1682_v6, %v1682_v6  ;;  %v2216_v11 = vsel %vm2174_vm1, %v1682_v6, 0.0  ;;  %v2331_v12 = vmul.f32 %v1682_v6, %v1682_v6 }
 0x1c2   : > { %v2414_v13 = vadd.f32 %v2413_v9, %v2412_v59  ;;  %v2217_v14 = vadd.f32 %v2216_v11, %v2215_v8 }
 0x1c3   : > { %2131 = vst.msk [vmem:[%s3893_s23 + $0x54] sm:$0xf] %vm2109_vm0, %v2958_v10  ;;  %v2415_v15 = vsel %vm2174_vm1, %v2331_v12, 0.0 }
 0x1c4   : > { %v1397_v16 = vpop.f32.mrb[44].mxu1  ;;  %v2416_v17 = vadd.f32 %v2415_v15, %v2414_v13  ;;  %v1686_v18 = vpop.f32.mrb[44].mxu0 }
 0x1c5   : > { %v1399_v19 = vpop.f32.mrb[45].mxu1  ;;  %v1687_v20 = vadd.f32 %v1686_v18, %v1397_v16  ;;  %v1688_v21 = vpop.f32.mrb[45].mxu0 }
 0x1c6   : > { %v1400_v22 = vpop.f32.mrb[46].mxu1  ;;  %v1689_v23 = vpop.f32.mrb[46].mxu0 }
 0x1c7   : > { %v1402_v24 = vpop.f32.mrb[47].mxu1  ;;  %v2959_v25 = vpack.c.bf16 %v1687_v20, %v1687_v20  ;;  %v2218_v26 = vsel %vm2174_vm1, %v1687_v20, 0.0  ;;  %v2332_v27 = vmul.f32 %v1687_v20, %v1687_v20  ;;  %v1690_v28 = vadd.f32 %v1689_v23, %v1400_v22  ;;  %v1691_v29 = vpop.f32.mrb[47].mxu0 }
 0x1c8   : > { %v2219_v30 = vadd.f32 %v2218_v26, %v2217_v14 }
 0x1c9   : > { %2132 = vst.msk [vmem:[%s3893_s23 + $0x58] sm:$0xf] %vm2109_vm0, %v2959_v25  ;;  %v2417_v31 = vsel %vm2174_vm1, %v2332_v27, 0.0  ;;  %v2960_v32 = vpack.c.bf16 %v1690_v28, %v1690_v28  ;;  %v2220_v33 = vsel %vm2174_vm1, %v1690_v28, 0.0  ;;  %v2333_v34 = vmul.f32 %v1690_v28, %v1690_v28 }
 0x1ca   : > { %v2418_v35 = vadd.f32 %v2417_v31, %v2416_v17  ;;  %v2221_v36 = vadd.f32 %v2220_v33, %v2219_v30 }
 0x1cb   : > { %2133 = vst.msk [vmem:[%s3893_s23 + $0x5c] sm:$0xf] %vm2109_vm0, %v2960_v32  ;;  %v2419_v37 = vsel %vm2174_vm1, %v2333_v34, 0.0 }
 0x1cc   : > { %v1405_v38 = vpop.f32.mrb[48].mxu1  ;;  %v2420_v39 = vadd.f32 %v2419_v37, %v2418_v35  ;;  %v1694_v40 = vpop.f32.mrb[48].mxu0 }
 0x1cd   : > { %v1407_v41 = vpop.f32.mrb[49].mxu1  ;;  %v1695_v42 = vadd.f32 %v1694_v40, %v1405_v38  ;;  %v1696_v43 = vpop.f32.mrb[49].mxu0 }
 0x1ce   : > { %v1408_v44 = vpop.f32.mrb[50].mxu1  ;;  %v1697_v45 = vpop.f32.mrb[50].mxu0 }
 0x1cf   : > { %v1410_v46 = vpop.f32.mrb[51].mxu1  ;;  %v2961_v47 = vpack.c.bf16 %v1695_v42, %v1695_v42  ;;  %v2222_v48 = vsel %vm2174_vm1, %v1695_v42, 0.0  ;;  %v2334_v49 = vmul.f32 %v1695_v42, %v1695_v42  ;;  %v1698_v50 = vadd.f32 %v1697_v45, %v1408_v44  ;;  %v1699_v51 = vpop.f32.mrb[51].mxu0 }
 0x1d0   : > { %v2223_v52 = vadd.f32 %v2222_v48, %v2221_v36 }
 0x1d1   : > { %2134 = vst.msk [vmem:[%s3893_s23 + $0x60] sm:$0xf] %vm2109_vm0, %v2961_v47  ;;  %v2421_v53 = vsel %vm2174_vm1, %v2334_v49, 0.0  ;;  %v2962_v54 = vpack.c.bf16 %v1698_v50, %v1698_v50  ;;  %v2224_v55 = vsel %vm2174_vm1, %v1698_v50, 0.0  ;;  %v2335_v56 = vmul.f32 %v1698_v50, %v1698_v50 }
 0x1d2   : > { %v2422_v57 = vadd.f32 %v2421_v53, %v2420_v39  ;;  %v2225_v58 = vadd.f32 %v2224_v55, %v2223_v52 }
 0x1d3   : > { %2135 = vst.msk [vmem:[%s3893_s23 + $0x64] sm:$0xf] %vm2109_vm0, %v2962_v54  ;;  %v2423_v59 = vsel %vm2174_vm1, %v2335_v56, 0.0 }
 0x1d4   : > { %v1413_v60 = vpop.f32.mrb[52].mxu1  ;;  %v2424_v61 = vadd.f32 %v2423_v59, %v2422_v57  ;;  %v1702_v62 = vpop.f32.mrb[52].mxu0 }
 0x1d5   : > { %v1415_v63 = vpop.f32.mrb[53].mxu1  ;;  %v1703_v0 = vadd.f32 %v1702_v62, %v1413_v60  ;;  %v1704_v1 = vpop.f32.mrb[53].mxu0 }
 0x1d6   : > { %v1416_v2 = vpop.f32.mrb[54].mxu1  ;;  %v1705_v3 = vpop.f32.mrb[54].mxu0 }
 0x1d7   : > { %v1418_v4 = vpop.f32.mrb[55].mxu1  ;;  %v2963_v5 = vpack.c.bf16 %v1703_v0, %v1703_v0  ;;  %v2226_v6 = vsel %vm2174_vm1, %v1703_v0, 0.0  ;;  %v2336_v7 = vmul.f32 %v1703_v0, %v1703_v0  ;;  %v1706_v8 = vadd.f32 %v1705_v3, %v1416_v2  ;;  %v1707_v9 = vpop.f32.mrb[55].mxu0 }
 0x1d8   : > { %v2227_v10 = vadd.f32 %v2226_v6, %v2225_v58 }
 0x1d9   : > { %2136 = vst.msk [vmem:[%s3893_s23 + $0x68] sm:$0xf] %vm2109_vm0, %v2963_v5  ;;  %v2425_v11 = vsel %vm2174_vm1, %v2336_v7, 0.0  ;;  %v2964_v12 = vpack.c.bf16 %v1706_v8, %v1706_v8  ;;  %v2228_v13 = vsel %vm2174_vm1, %v1706_v8, 0.0  ;;  %v2337_v14 = vmul.f32 %v1706_v8, %v1706_v8 }
 0x1da   : > { %v2426_v15 = vadd.f32 %v2425_v11, %v2424_v61  ;;  %v2229_v16 = vadd.f32 %v2228_v13, %v2227_v10 }
 0x1db   : > { %2137 = vst.msk [vmem:[%s3893_s23 + $0x6c] sm:$0xf] %vm2109_vm0, %v2964_v12  ;;  %v2427_v17 = vsel %vm2174_vm1, %v2337_v14, 0.0 }
 0x1dc   : > { %v1421_v18 = vpop.f32.mrb[56].mxu1  ;;  %v2428_v19 = vadd.f32 %v2427_v17, %v2426_v15  ;;  %v1710_v20 = vpop.f32.mrb[56].mxu0 }
 0x1dd   : > { %v1423_v21 = vpop.f32.mrb[57].mxu1  ;;  %v1711_v22 = vadd.f32 %v1710_v20, %v1421_v18  ;;  %v1712_v23 = vpop.f32.mrb[57].mxu0 }
 0x1de   : > { %v1424_v24 = vpop.f32.mrb[58].mxu1  ;;  %v1713_v25 = vpop.f32.mrb[58].mxu0 }
 0x1df   : > { %v1426_v26 = vpop.f32.mrb[59].mxu1  ;;  %v2965_v27 = vpack.c.bf16 %v1711_v22, %v1711_v22  ;;  %v2230_v28 = vsel %vm2174_vm1, %v1711_v22, 0.0  ;;  %v2338_v29 = vmul.f32 %v1711_v22, %v1711_v22  ;;  %v1714_v30 = vadd.f32 %v1713_v25, %v1424_v24  ;;  %v1715_v31 = vpop.f32.mrb[59].mxu0 }
 0x1e0   : > { %v2231_v32 = vadd.f32 %v2230_v28, %v2229_v16 }
 0x1e1   : > { %2138 = vst.msk [vmem:[%s3893_s23 + $0x70] sm:$0xf] %vm2109_vm0, %v2965_v27  ;;  %v2429_v33 = vsel %vm2174_vm1, %v2338_v29, 0.0  ;;  %v2966_v34 = vpack.c.bf16 %v1714_v30, %v1714_v30  ;;  %v2232_v35 = vsel %vm2174_vm1, %v1714_v30, 0.0  ;;  %v2339_v36 = vmul.f32 %v1714_v30, %v1714_v30 }
 0x1e2   : > { %v2430_v37 = vadd.f32 %v2429_v33, %v2428_v19  ;;  %v2233_v38 = vadd.f32 %v2232_v35, %v2231_v32 }
 0x1e3   : > { %2139 = vst.msk [vmem:[%s3893_s23 + $0x74] sm:$0xf] %vm2109_vm0, %v2966_v34  ;;  %v2431_v39 = vsel %vm2174_vm1, %v2339_v36, 0.0 }
 0x1e4   : > { %v1429_v40 = vpop.f32.mrb[60].mxu1  ;;  %v2432_v41 = vadd.f32 %v2431_v39, %v2430_v37  ;;  %v1718_v42 = vpop.f32.mrb[60].mxu0 }
 0x1e5   : > { %v1431_v43 = vpop.f32.mrb[61].mxu1  ;;  %v1719_v44 = vadd.f32 %v1718_v42, %v1429_v40  ;;  %v1720_v45 = vpop.f32.mrb[61].mxu0 }
 0x1e6   : > { %v1432_v46 = vpop.f32.mrb[62].mxu1  ;;  %v1721_v47 = vpop.f32.mrb[62].mxu0 }
 0x1e7   : > { %v1434_v48 = vpop.f32.mrb[63].mxu1  ;;  %v2967_v49 = vpack.c.bf16 %v1719_v44, %v1719_v44  ;;  %v2234_v50 = vsel %vm2174_vm1, %v1719_v44, 0.0  ;;  %v2340_v51 = vmul.f32 %v1719_v44, %v1719_v44  ;;  %v1722_v52 = vadd.f32 %v1721_v47, %v1432_v46  ;;  %v1723_v53 = vpop.f32.mrb[63].mxu0 }
 0x1e8   : > { %v2235_v54 = vadd.f32 %v2234_v50, %v2233_v38 }
 0x1e9   : > { %2140 = vst.msk [vmem:[%s3893_s23 + $0x78] sm:$0xf] %vm2109_vm0, %v2967_v49  ;;  %v2433_v55 = vsel %vm2174_vm1, %v2340_v51, 0.0  ;;  %v2968_v56 = vpack.c.bf16 %v1722_v52, %v1722_v52  ;;  %v2236_v57 = vsel %vm2174_vm1, %v1722_v52, 0.0  ;;  %v2341_v58 = vmul.f32 %v1722_v52, %v1722_v52 }
 0x1ea   : > { %v2434_v59 = vadd.f32 %v2433_v55, %v2432_v41  ;;  %v2237_v60 = vadd.f32 %v2236_v57, %v2235_v54 }
 0x1eb   : > { %2141 = vst.msk [vmem:[%s3893_s23 + $0x7c] sm:$0xf] %vm2109_vm0, %v2968_v56  ;;  %v2435_v61 = vsel %vm2174_vm1, %v2341_v58, 0.0 }
 0x1ec   : > { %v1437_v62 = vpop.f32.mrb[64].mxu1  ;;  %v2436_v63 = vadd.f32 %v2435_v61, %v2434_v59  ;;  %v1726_v0 = vpop.f32.mrb[64].mxu0 }
 0x1ed   : > { %v1439_v1 = vpop.f32.mrb[65].mxu1  ;;  %v1727_v2 = vadd.f32 %v1726_v0, %v1437_v62  ;;  %v1728_v3 = vpop.f32.mrb[65].mxu0 }
 0x1ee   : > { %v1440_v4 = vpop.f32.mrb[66].mxu1  ;;  %v1729_v5 = vpop.f32.mrb[66].mxu0 }
 0x1ef   : > { %v1442_v6 = vpop.f32.mrb[67].mxu1  ;;  %v2969_v7 = vpack.c.bf16 %v1727_v2, %v1727_v2  ;;  %v2238_v8 = vsel %vm2174_vm1, %v1727_v2, 0.0  ;;  %v2342_v9 = vmul.f32 %v1727_v2, %v1727_v2  ;;  %v1730_v10 = vadd.f32 %v1729_v5, %v1440_v4  ;;  %v1731_v11 = vpop.f32.mrb[67].mxu0 }
 0x1f0   : > { %v2239_v12 = vadd.f32 %v2238_v8, %v2237_v60 }
 0x1f1   : > { %2142 = vst.msk [vmem:[%s3893_s23 + $0x80] sm:$0xf] %vm2109_vm0, %v2969_v7  ;;  %v2437_v13 = vsel %vm2174_vm1, %v2342_v9, 0.0  ;;  %v2970_v14 = vpack.c.bf16 %v1730_v10, %v1730_v10  ;;  %v2240_v15 = vsel %vm2174_vm1, %v1730_v10, 0.0  ;;  %v2343_v16 = vmul.f32 %v1730_v10, %v1730_v10 }
 0x1f2   : > { %v2438_v17 = vadd.f32 %v2437_v13, %v2436_v63  ;;  %v2241_v18 = vadd.f32 %v2240_v15, %v2239_v12 }
 0x1f3   : > { %2143 = vst.msk [vmem:[%s3893_s23 + $0x84] sm:$0xf] %vm2109_vm0, %v2970_v14  ;;  %v2439_v19 = vsel %vm2174_vm1, %v2343_v16, 0.0 }
 0x1f4   : > { %v1445_v20 = vpop.f32.mrb[68].mxu1  ;;  %v2440_v21 = vadd.f32 %v2439_v19, %v2438_v17  ;;  %v1734_v22 = vpop.f32.mrb[68].mxu0 }
 0x1f5   : > { %v1447_v23 = vpop.f32.mrb[69].mxu1  ;;  %v1735_v24 = vadd.f32 %v1734_v22, %v1445_v20  ;;  %v1736_v25 = vpop.f32.mrb[69].mxu0 }
 0x1f6   : > { %v1448_v26 = vpop.f32.mrb[70].mxu1  ;;  %v1737_v27 = vpop.f32.mrb[70].mxu0 }
 0x1f7   : > { %v1450_v28 = vpop.f32.mrb[71].mxu1  ;;  %v2971_v29 = vpack.c.bf16 %v1735_v24, %v1735_v24  ;;  %v2242_v30 = vsel %vm2174_vm1, %v1735_v24, 0.0  ;;  %v2344_v31 = vmul.f32 %v1735_v24, %v1735_v24  ;;  %v1738_v32 = vadd.f32 %v1737_v27, %v1448_v26  ;;  %v1739_v33 = vpop.f32.mrb[71].mxu0 }
 0x1f8   : > { %v2243_v34 = vadd.f32 %v2242_v30, %v2241_v18 }
 0x1f9   : > { %2144 = vst.msk [vmem:[%s3893_s23 + $0x88] sm:$0xf] %vm2109_vm0, %v2971_v29  ;;  %v2441_v35 = vsel %vm2174_vm1, %v2344_v31, 0.0  ;;  %v2972_v36 = vpack.c.bf16 %v1738_v32, %v1738_v32  ;;  %v2244_v37 = vsel %vm2174_vm1, %v1738_v32, 0.0  ;;  %v2345_v38 = vmul.f32 %v1738_v32, %v1738_v32 }
 0x1fa   : > { %v2442_v39 = vadd.f32 %v2441_v35, %v2440_v21  ;;  %v2245_v40 = vadd.f32 %v2244_v37, %v2243_v34 }
 0x1fb   : > { %2145 = vst.msk [vmem:[%s3893_s23 + $0x8c] sm:$0xf] %vm2109_vm0, %v2972_v36  ;;  %v2443_v41 = vsel %vm2174_vm1, %v2345_v38, 0.0 }
 0x1fc   : > { %v1453_v42 = vpop.f32.mrb[72].mxu1  ;;  %v2444_v43 = vadd.f32 %v2443_v41, %v2442_v39  ;;  %v1742_v44 = vpop.f32.mrb[72].mxu0 }
 0x1fd   : > { %v1455_v45 = vpop.f32.mrb[73].mxu1  ;;  %v1743_v46 = vadd.f32 %v1742_v44, %v1453_v42  ;;  %v1744_v47 = vpop.f32.mrb[73].mxu0 }
 0x1fe   : > { %v1456_v48 = vpop.f32.mrb[74].mxu1  ;;  %v1745_v49 = vpop.f32.mrb[74].mxu0 }
 0x1ff   : > { %v1458_v50 = vpop.f32.mrb[75].mxu1  ;;  %v2973_v51 = vpack.c.bf16 %v1743_v46, %v1743_v46  ;;  %v2246_v52 = vsel %vm2174_vm1, %v1743_v46, 0.0  ;;  %v2346_v53 = vmul.f32 %v1743_v46, %v1743_v46  ;;  %v1746_v54 = vadd.f32 %v1745_v49, %v1456_v48  ;;  %v1747_v55 = vpop.f32.mrb[75].mxu0 }
 0x200   : > { %v2247_v56 = vadd.f32 %v2246_v52, %v2245_v40 }
 0x201   : > { %2146 = vst.msk [vmem:[%s3893_s23 + $0x90] sm:$0xf] %vm2109_vm0, %v2973_v51  ;;  %v2445_v57 = vsel %vm2174_vm1, %v2346_v53, 0.0  ;;  %v2974_v58 = vpack.c.bf16 %v1746_v54, %v1746_v54  ;;  %v2248_v59 = vsel %vm2174_vm1, %v1746_v54, 0.0  ;;  %v2347_v60 = vmul.f32 %v1746_v54, %v1746_v54 }
 0x202   : > { %v2446_v61 = vadd.f32 %v2445_v57, %v2444_v43  ;;  %v2249_v62 = vadd.f32 %v2248_v59, %v2247_v56 }
 0x203   : > { %2147 = vst.msk [vmem:[%s3893_s23 + $0x94] sm:$0xf] %vm2109_vm0, %v2974_v58  ;;  %v2447_v63 = vsel %vm2174_vm1, %v2347_v60, 0.0 }
 0x204   : > { %v1461_v0 = vpop.f32.mrb[76].mxu1  ;;  %v2448_v1 = vadd.f32 %v2447_v63, %v2446_v61  ;;  %v1750_v2 = vpop.f32.mrb[76].mxu0 }
 0x205   : > { %v1463_v3 = vpop.f32.mrb[77].mxu1  ;;  %v1751_v4 = vadd.f32 %v1750_v2, %v1461_v0  ;;  %v1752_v5 = vpop.f32.mrb[77].mxu0 }
 0x206   : > { %v1464_v6 = vpop.f32.mrb[78].mxu1  ;;  %v1753_v7 = vpop.f32.mrb[78].mxu0 }
 0x207   : > { %v1466_v8 = vpop.f32.mrb[79].mxu1  ;;  %v2975_v9 = vpack.c.bf16 %v1751_v4, %v1751_v4  ;;  %v2250_v10 = vsel %vm2174_vm1, %v1751_v4, 0.0  ;;  %v2348_v11 = vmul.f32 %v1751_v4, %v1751_v4  ;;  %v1754_v12 = vadd.f32 %v1753_v7, %v1464_v6  ;;  %v1755_v13 = vpop.f32.mrb[79].mxu0 }
 0x208   : > { %v2251_v14 = vadd.f32 %v2250_v10, %v2249_v62 }
 0x209   : > { %2148 = vst.msk [vmem:[%s3893_s23 + $0x98] sm:$0xf] %vm2109_vm0, %v2975_v9  ;;  %v2449_v15 = vsel %vm2174_vm1, %v2348_v11, 0.0  ;;  %v2976_v16 = vpack.c.bf16 %v1754_v12, %v1754_v12  ;;  %v2252_v17 = vsel %vm2174_vm1, %v1754_v12, 0.0  ;;  %v2349_v18 = vmul.f32 %v1754_v12, %v1754_v12 }
 0x20a   : > { %v2450_v19 = vadd.f32 %v2449_v15, %v2448_v1  ;;  %v2253_v20 = vadd.f32 %v2252_v17, %v2251_v14 }
 0x20b   : > { %2149 = vst.msk [vmem:[%s3893_s23 + $0x9c] sm:$0xf] %vm2109_vm0, %v2976_v16  ;;  %v2451_v21 = vsel %vm2174_vm1, %v2349_v18, 0.0 }
 0x20c   : > { %v1469_v22 = vpop.f32.mrb[80].mxu1  ;;  %v2452_v23 = vadd.f32 %v2451_v21, %v2450_v19  ;;  %v1758_v24 = vpop.f32.mrb[80].mxu0 }
 0x20d   : > { %v1471_v25 = vpop.f32.mrb[81].mxu1  ;;  %v1759_v26 = vadd.f32 %v1758_v24, %v1469_v22  ;;  %v1760_v27 = vpop.f32.mrb[81].mxu0 }
 0x20e   : > { %v1472_v28 = vpop.f32.mrb[82].mxu1  ;;  %v1761_v29 = vpop.f32.mrb[82].mxu0 }
 0x20f   : > { %v1474_v30 = vpop.f32.mrb[83].mxu1  ;;  %v2977_v31 = vpack.c.bf16 %v1759_v26, %v1759_v26  ;;  %v2254_v32 = vsel %vm2174_vm1, %v1759_v26, 0.0  ;;  %v2350_v33 = vmul.f32 %v1759_v26, %v1759_v26  ;;  %v1762_v34 = vadd.f32 %v1761_v29, %v1472_v28  ;;  %v1763_v35 = vpop.f32.mrb[83].mxu0 }
 0x210   : > { %v2255_v36 = vadd.f32 %v2254_v32, %v2253_v20 }
 0x211   : > { %2150 = vst.msk [vmem:[%s3893_s23 + $0xa0] sm:$0xf] %vm2109_vm0, %v2977_v31  ;;  %v2453_v37 = vsel %vm2174_vm1, %v2350_v33, 0.0  ;;  %v2978_v38 = vpack.c.bf16 %v1762_v34, %v1762_v34  ;;  %v2256_v39 = vsel %vm2174_vm1, %v1762_v34, 0.0  ;;  %v2351_v40 = vmul.f32 %v1762_v34, %v1762_v34 }
 0x212   : > { %v2454_v41 = vadd.f32 %v2453_v37, %v2452_v23  ;;  %v2257_v42 = vadd.f32 %v2256_v39, %v2255_v36 }
 0x213   : > { %2151 = vst.msk [vmem:[%s3893_s23 + $0xa4] sm:$0xf] %vm2109_vm0, %v2978_v38  ;;  %v2455_v43 = vsel %vm2174_vm1, %v2351_v40, 0.0 }
 0x214   : > { %v1477_v44 = vpop.f32.mrb[84].mxu1  ;;  %v2456_v45 = vadd.f32 %v2455_v43, %v2454_v41  ;;  %v1766_v46 = vpop.f32.mrb[84].mxu0 }
 0x215   : > { %v1479_v47 = vpop.f32.mrb[85].mxu1  ;;  %v1767_v48 = vadd.f32 %v1766_v46, %v1477_v44  ;;  %v1768_v49 = vpop.f32.mrb[85].mxu0 }
 0x216   : > { %v1480_v50 = vpop.f32.mrb[86].mxu1  ;;  %v1769_v51 = vpop.f32.mrb[86].mxu0 }
 0x217   : > { %v1482_v52 = vpop.f32.mrb[87].mxu1  ;;  %v2979_v53 = vpack.c.bf16 %v1767_v48, %v1767_v48  ;;  %v2258_v54 = vsel %vm2174_vm1, %v1767_v48, 0.0  ;;  %v2352_v55 = vmul.f32 %v1767_v48, %v1767_v48  ;;  %v1770_v56 = vadd.f32 %v1769_v51, %v1480_v50  ;;  %v1771_v57 = vpop.f32.mrb[87].mxu0 }
 0x218   : > { %v2259_v58 = vadd.f32 %v2258_v54, %v2257_v42 }
 0x219   : > { %2152 = vst.msk [vmem:[%s3893_s23 + $0xa8] sm:$0xf] %vm2109_vm0, %v2979_v53  ;;  %v2457_v59 = vsel %vm2174_vm1, %v2352_v55, 0.0  ;;  %v2980_v60 = vpack.c.bf16 %v1770_v56, %v1770_v56  ;;  %v2260_v61 = vsel %vm2174_vm1, %v1770_v56, 0.0  ;;  %v2353_v62 = vmul.f32 %v1770_v56, %v1770_v56 }
 0x21a   : > { %v2458_v63 = vadd.f32 %v2457_v59, %v2456_v45  ;;  %v2261_v0 = vadd.f32 %v2260_v61, %v2259_v58 }
 0x21b   : > { %2153 = vst.msk [vmem:[%s3893_s23 + $0xac] sm:$0xf] %vm2109_vm0, %v2980_v60  ;;  %v2459_v1 = vsel %vm2174_vm1, %v2353_v62, 0.0 }
 0x21c   : > { %v1485_v2 = vpop.f32.mrb[88].mxu1  ;;  %v2460_v3 = vadd.f32 %v2459_v1, %v2458_v63  ;;  %v1774_v4 = vpop.f32.mrb[88].mxu0 }
 0x21d   : > { %v1487_v5 = vpop.f32.mrb[89].mxu1  ;;  %v1775_v6 = vadd.f32 %v1774_v4, %v1485_v2  ;;  %v1776_v7 = vpop.f32.mrb[89].mxu0 }
 0x21e   : > { %v1488_v8 = vpop.f32.mrb[90].mxu1  ;;  %v1777_v9 = vpop.f32.mrb[90].mxu0 }
 0x21f   : > { %v1490_v10 = vpop.f32.mrb[91].mxu1  ;;  %v2981_v11 = vpack.c.bf16 %v1775_v6, %v1775_v6  ;;  %v2262_v12 = vsel %vm2174_vm1, %v1775_v6, 0.0  ;;  %v2354_v13 = vmul.f32 %v1775_v6, %v1775_v6  ;;  %v1778_v14 = vadd.f32 %v1777_v9, %v1488_v8  ;;  %v1779_v15 = vpop.f32.mrb[91].mxu0 }
 0x220   : > { %v2263_v16 = vadd.f32 %v2262_v12, %v2261_v0 }
 0x221   : > { %2154 = vst.msk [vmem:[%s3893_s23 + $0xb0] sm:$0xf] %vm2109_vm0, %v2981_v11  ;;  %v2461_v17 = vsel %vm2174_vm1, %v2354_v13, 0.0  ;;  %v2982_v18 = vpack.c.bf16 %v1778_v14, %v1778_v14  ;;  %v2264_v19 = vsel %vm2174_vm1, %v1778_v14, 0.0  ;;  %v2355_v20 = vmul.f32 %v1778_v14, %v1778_v14 }
 0x222   : > { %v2462_v21 = vadd.f32 %v2461_v17, %v2460_v3  ;;  %v2265_v22 = vadd.f32 %v2264_v19, %v2263_v16 }
 0x223   : > { %2155 = vst.msk [vmem:[%s3893_s23 + $0xb4] sm:$0xf] %vm2109_vm0, %v2982_v18  ;;  %v2463_v23 = vsel %vm2174_vm1, %v2355_v20, 0.0 }
 0x224   : > { %v1493_v24 = vpop.f32.mrb[92].mxu1  ;;  %v2464_v25 = vadd.f32 %v2463_v23, %v2462_v21  ;;  %v1782_v26 = vpop.f32.mrb[92].mxu0 }
 0x225   : > { %v1495_v27 = vpop.f32.mrb[93].mxu1  ;;  %v1783_v28 = vadd.f32 %v1782_v26, %v1493_v24  ;;  %v1784_v29 = vpop.f32.mrb[93].mxu0 }
 0x226   : > { %v1496_v30 = vpop.f32.mrb[94].mxu1  ;;  %v1785_v31 = vpop.f32.mrb[94].mxu0 }
 0x227   : > { %v1498_v32 = vpop.f32.mrb[95].mxu1  ;;  %v2983_v33 = vpack.c.bf16 %v1783_v28, %v1783_v28  ;;  %v2266_v34 = vsel %vm2174_vm1, %v1783_v28, 0.0  ;;  %v2356_v35 = vmul.f32 %v1783_v28, %v1783_v28  ;;  %v1786_v36 = vadd.f32 %v1785_v31, %v1496_v30  ;;  %v1787_v37 = vpop.f32.mrb[95].mxu0 }
 0x228   : > { %v2267_v38 = vadd.f32 %v2266_v34, %v2265_v22 }
 0x229   : > { %2156 = vst.msk [vmem:[%s3893_s23 + $0xb8] sm:$0xf] %vm2109_vm0, %v2983_v33  ;;  %v2465_v39 = vsel %vm2174_vm1, %v2356_v35, 0.0  ;;  %v2984_v40 = vpack.c.bf16 %v1786_v36, %v1786_v36  ;;  %v2268_v41 = vsel %vm2174_vm1, %v1786_v36, 0.0  ;;  %v2357_v42 = vmul.f32 %v1786_v36, %v1786_v36 }
 0x22a   : > { %v2466_v43 = vadd.f32 %v2465_v39, %v2464_v25  ;;  %v2269_v44 = vadd.f32 %v2268_v41, %v2267_v38 }
 0x22b   : > { %2157 = vst.msk [vmem:[%s3893_s23 + $0xbc] sm:$0xf] %vm2109_vm0, %v2984_v40  ;;  %v2467_v45 = vsel %vm2174_vm1, %v2357_v42, 0.0 }
 0x22c   : > { %v1501_v46 = vpop.f32.mrb[96].mxu1  ;;  %v2468_v47 = vadd.f32 %v2467_v45, %v2466_v43  ;;  %v1790_v48 = vpop.f32.mrb[96].mxu0 }
 0x22d   : > { %v1503_v49 = vpop.f32.mrb[97].mxu1  ;;  %v1791_v50 = vadd.f32 %v1790_v48, %v1501_v46  ;;  %v1792_v51 = vpop.f32.mrb[97].mxu0 }
 0x22e   : > { %v1504_v52 = vpop.f32.mrb[98].mxu1  ;;  %v1793_v53 = vpop.f32.mrb[98].mxu0 }
 0x22f   : > { %v1506_v54 = vpop.f32.mrb[99].mxu1  ;;  %v2985_v55 = vpack.c.bf16 %v1791_v50, %v1791_v50  ;;  %v2270_v56 = vsel %vm2174_vm1, %v1791_v50, 0.0  ;;  %v2358_v57 = vmul.f32 %v1791_v50, %v1791_v50  ;;  %v1794_v58 = vadd.f32 %v1793_v53, %v1504_v52  ;;  %v1795_v59 = vpop.f32.mrb[99].mxu0 }
 0x230   : > { %v2271_v60 = vadd.f32 %v2270_v56, %v2269_v44 }
 0x231   : > { %2158 = vst.msk [vmem:[%s3893_s23 + $0xc0] sm:$0xf] %vm2109_vm0, %v2985_v55  ;;  %v2469_v61 = vsel %vm2174_vm1, %v2358_v57, 0.0  ;;  %v2986_v62 = vpack.c.bf16 %v1794_v58, %v1794_v58  ;;  %v2272_v63 = vsel %vm2174_vm1, %v1794_v58, 0.0  ;;  %v2359_v0 = vmul.f32 %v1794_v58, %v1794_v58 }
 0x232   : > { %v2470_v1 = vadd.f32 %v2469_v61, %v2468_v47  ;;  %v2273_v2 = vadd.f32 %v2272_v63, %v2271_v60 }
 0x233   : > { %2159 = vst.msk [vmem:[%s3893_s23 + $0xc4] sm:$0xf] %vm2109_vm0, %v2986_v62  ;;  %v2471_v3 = vsel %vm2174_vm1, %v2359_v0, 0.0 }
 0x234   : > { %v1509_v4 = vpop.f32.mrb[100].mxu1  ;;  %v2472_v5 = vadd.f32 %v2471_v3, %v2470_v1  ;;  %v1798_v6 = vpop.f32.mrb[100].mxu0 }
 0x235   : > { %v1511_v7 = vpop.f32.mrb[101].mxu1  ;;  %v1799_v8 = vadd.f32 %v1798_v6, %v1509_v4  ;;  %v1800_v9 = vpop.f32.mrb[101].mxu0 }
 0x236   : > { %v1512_v10 = vpop.f32.mrb[102].mxu1  ;;  %v1801_v11 = vpop.f32.mrb[102].mxu0 }
 0x237   : > { %v1514_v12 = vpop.f32.mrb[103].mxu1  ;;  %v2987_v13 = vpack.c.bf16 %v1799_v8, %v1799_v8  ;;  %v2274_v14 = vsel %vm2174_vm1, %v1799_v8, 0.0  ;;  %v2360_v15 = vmul.f32 %v1799_v8, %v1799_v8  ;;  %v1802_v16 = vadd.f32 %v1801_v11, %v1512_v10  ;;  %v1803_v17 = vpop.f32.mrb[103].mxu0 }
 0x238   : > { %v2275_v18 = vadd.f32 %v2274_v14, %v2273_v2 }
 0x239   : > { %2160 = vst.msk [vmem:[%s3893_s23 + $0xc8] sm:$0xf] %vm2109_vm0, %v2987_v13  ;;  %v2473_v19 = vsel %vm2174_vm1, %v2360_v15, 0.0  ;;  %v2988_v20 = vpack.c.bf16 %v1802_v16, %v1802_v16  ;;  %v2276_v21 = vsel %vm2174_vm1, %v1802_v16, 0.0  ;;  %v2361_v22 = vmul.f32 %v1802_v16, %v1802_v16 }
 0x23a   : > { %v2474_v23 = vadd.f32 %v2473_v19, %v2472_v5  ;;  %v2277_v24 = vadd.f32 %v2276_v21, %v2275_v18 }
 0x23b   : > { %2161 = vst.msk [vmem:[%s3893_s23 + $0xcc] sm:$0xf] %vm2109_vm0, %v2988_v20  ;;  %v2475_v25 = vsel %vm2174_vm1, %v2361_v22, 0.0 }
 0x23c   : > { %v1517_v26 = vpop.f32.mrb[104].mxu1  ;;  %v2476_v27 = vadd.f32 %v2475_v25, %v2474_v23  ;;  %v1806_v28 = vpop.f32.mrb[104].mxu0 }
 0x23d   : > { %v1519_v29 = vpop.f32.mrb[105].mxu1  ;;  %v1807_v30 = vadd.f32 %v1806_v28, %v1517_v26  ;;  %v1808_v31 = vpop.f32.mrb[105].mxu0 }
 0x23e   : > { %v1520_v32 = vpop.f32.mrb[106].mxu1  ;;  %v1809_v33 = vpop.f32.mrb[106].mxu0 }
 0x23f   : > { %v1522_v34 = vpop.f32.mrb[107].mxu1  ;;  %v2989_v35 = vpack.c.bf16 %v1807_v30, %v1807_v30  ;;  %v2278_v36 = vsel %vm2174_vm1, %v1807_v30, 0.0  ;;  %v2362_v37 = vmul.f32 %v1807_v30, %v1807_v30  ;;  %v1810_v38 = vadd.f32 %v1809_v33, %v1520_v32  ;;  %v1811_v39 = vpop.f32.mrb[107].mxu0 }
 0x240   : > { %v2279_v40 = vadd.f32 %v2278_v36, %v2277_v24 }
 0x241   : > { %2162 = vst.msk [vmem:[%s3893_s23 + $0xd0] sm:$0xf] %vm2109_vm0, %v2989_v35  ;;  %v2477_v41 = vsel %vm2174_vm1, %v2362_v37, 0.0  ;;  %v2990_v42 = vpack.c.bf16 %v1810_v38, %v1810_v38  ;;  %v2280_v43 = vsel %vm2174_vm1, %v1810_v38, 0.0  ;;  %v2363_v44 = vmul.f32 %v1810_v38, %v1810_v38 }
 0x242   : > { %v2478_v45 = vadd.f32 %v2477_v41, %v2476_v27  ;;  %v2281_v46 = vadd.f32 %v2280_v43, %v2279_v40 }
 0x243   : > { %2163 = vst.msk [vmem:[%s3893_s23 + $0xd4] sm:$0xf] %vm2109_vm0, %v2990_v42  ;;  %v2479_v47 = vsel %vm2174_vm1, %v2363_v44, 0.0 }
 0x244   : > { %v1525_v48 = vpop.f32.mrb[108].mxu1  ;;  %v2480_v49 = vadd.f32 %v2479_v47, %v2478_v45  ;;  %v1814_v50 = vpop.f32.mrb[108].mxu0 }
 0x245   : > { %v1527_v51 = vpop.f32.mrb[109].mxu1  ;;  %v1815_v52 = vadd.f32 %v1814_v50, %v1525_v48  ;;  %v1816_v53 = vpop.f32.mrb[109].mxu0 }
 0x246   : > { %v1528_v54 = vpop.f32.mrb[110].mxu1  ;;  %v1817_v55 = vpop.f32.mrb[110].mxu0 }
 0x247   : > { %v1530_v56 = vpop.f32.mrb[111].mxu1  ;;  %v2991_v57 = vpack.c.bf16 %v1815_v52, %v1815_v52  ;;  %v2282_v58 = vsel %vm2174_vm1, %v1815_v52, 0.0  ;;  %v2364_v59 = vmul.f32 %v1815_v52, %v1815_v52  ;;  %v1818_v60 = vadd.f32 %v1817_v55, %v1528_v54  ;;  %v1819_v61 = vpop.f32.mrb[111].mxu0 }
 0x248   : > { %v2283_v62 = vadd.f32 %v2282_v58, %v2281_v46 }
 0x249   : > { %2164 = vst.msk [vmem:[%s3893_s23 + $0xd8] sm:$0xf] %vm2109_vm0, %v2991_v57  ;;  %v2481_v63 = vsel %vm2174_vm1, %v2364_v59, 0.0  ;;  %v2992_v0 = vpack.c.bf16 %v1818_v60, %v1818_v60  ;;  %v2284_v1 = vsel %vm2174_vm1, %v1818_v60, 0.0  ;;  %v2365_v2 = vmul.f32 %v1818_v60, %v1818_v60 }
 0x24a   : > { %v2482_v3 = vadd.f32 %v2481_v63, %v2480_v49  ;;  %v2285_v4 = vadd.f32 %v2284_v1, %v2283_v62 }
 0x24b   : > { %2165 = vst.msk [vmem:[%s3893_s23 + $0xdc] sm:$0xf] %vm2109_vm0, %v2992_v0  ;;  %v2483_v5 = vsel %vm2174_vm1, %v2365_v2, 0.0 }
 0x24c   : > { %v1533_v6 = vpop.f32.mrb[112].mxu1  ;;  %v2484_v7 = vadd.f32 %v2483_v5, %v2482_v3  ;;  %v1822_v8 = vpop.f32.mrb[112].mxu0 }
 0x24d   : > { %v1535_v9 = vpop.f32.mrb[113].mxu1  ;;  %v1823_v10 = vadd.f32 %v1822_v8, %v1533_v6  ;;  %v1824_v11 = vpop.f32.mrb[113].mxu0 }
 0x24e   : > { %v1536_v12 = vpop.f32.mrb[114].mxu1  ;;  %v1825_v13 = vpop.f32.mrb[114].mxu0 }
 0x24f   : > { %v1538_v14 = vpop.f32.mrb[115].mxu1  ;;  %v2993_v15 = vpack.c.bf16 %v1823_v10, %v1823_v10  ;;  %v2286_v16 = vsel %vm2174_vm1, %v1823_v10, 0.0  ;;  %v2366_v17 = vmul.f32 %v1823_v10, %v1823_v10  ;;  %v1826_v18 = vadd.f32 %v1825_v13, %v1536_v12  ;;  %v1827_v19 = vpop.f32.mrb[115].mxu0 }
 0x250   : > { %v2287_v20 = vadd.f32 %v2286_v16, %v2285_v4 }
 0x251   : > { %2166 = vst.msk [vmem:[%s3893_s23 + $0xe0] sm:$0xf] %vm2109_vm0, %v2993_v15  ;;  %v2485_v21 = vsel %vm2174_vm1, %v2366_v17, 0.0  ;;  %v2994_v22 = vpack.c.bf16 %v1826_v18, %v1826_v18  ;;  %v2288_v23 = vsel %vm2174_vm1, %v1826_v18, 0.0  ;;  %v2367_v24 = vmul.f32 %v1826_v18, %v1826_v18 }
 0x252   : > { %v2486_v25 = vadd.f32 %v2485_v21, %v2484_v7  ;;  %v2289_v26 = vadd.f32 %v2288_v23, %v2287_v20 }
 0x253   : > { %2167 = vst.msk [vmem:[%s3893_s23 + $0xe4] sm:$0xf] %vm2109_vm0, %v2994_v22  ;;  %v2487_v27 = vsel %vm2174_vm1, %v2367_v24, 0.0 }
 0x254   : > { %v1541_v28 = vpop.f32.mrb[116].mxu1  ;;  %v2488_v29 = vadd.f32 %v2487_v27, %v2486_v25  ;;  %v1830_v30 = vpop.f32.mrb[116].mxu0 }
 0x255   : > { %v1543_v31 = vpop.f32.mrb[117].mxu1  ;;  %v1831_v32 = vadd.f32 %v1830_v30, %v1541_v28  ;;  %v1832_v33 = vpop.f32.mrb[117].mxu0 }
 0x256   : > { %v1544_v34 = vpop.f32.mrb[118].mxu1  ;;  %v1833_v35 = vpop.f32.mrb[118].mxu0 }
 0x257   : > { %v1546_v36 = vpop.f32.mrb[119].mxu1  ;;  %v2995_v37 = vpack.c.bf16 %v1831_v32, %v1831_v32  ;;  %v2290_v38 = vsel %vm2174_vm1, %v1831_v32, 0.0  ;;  %v2368_v39 = vmul.f32 %v1831_v32, %v1831_v32  ;;  %v1834_v40 = vadd.f32 %v1833_v35, %v1544_v34  ;;  %v1835_v41 = vpop.f32.mrb[119].mxu0 }
 0x258   : > { %v2291_v42 = vadd.f32 %v2290_v38, %v2289_v26 }
 0x259   : > { %2168 = vst.msk [vmem:[%s3893_s23 + $0xe8] sm:$0xf] %vm2109_vm0, %v2995_v37  ;;  %v2489_v43 = vsel %vm2174_vm1, %v2368_v39, 0.0  ;;  %v2996_v44 = vpack.c.bf16 %v1834_v40, %v1834_v40  ;;  %v2292_v45 = vsel %vm2174_vm1, %v1834_v40, 0.0  ;;  %v2369_v46 = vmul.f32 %v1834_v40, %v1834_v40 }
 0x25a   : > { %v2490_v47 = vadd.f32 %v2489_v43, %v2488_v29  ;;  %v2293_v48 = vadd.f32 %v2292_v45, %v2291_v42 }
 0x25b   : > { %2169 = vst.msk [vmem:[%s3893_s23 + $0xec] sm:$0xf] %vm2109_vm0, %v2996_v44  ;;  %v2491_v49 = vsel %vm2174_vm1, %v2369_v46, 0.0 }
 0x25c   : > { %v1549_v50 = vpop.f32.mrb[120].mxu1  ;;  %v2492_v51 = vadd.f32 %v2491_v49, %v2490_v47  ;;  %v1838_v52 = vpop.f32.mrb[120].mxu0 }
 0x25d   : > { %v1551_v53 = vpop.f32.mrb[121].mxu1  ;;  %v1839_v54 = vadd.f32 %v1838_v52, %v1549_v50  ;;  %v1840_v55 = vpop.f32.mrb[121].mxu0 }
 0x25e   : > { %v1552_v56 = vpop.f32.mrb[122].mxu1  ;;  %v1841_v57 = vpop.f32.mrb[122].mxu0 }
 0x25f   : > { %v1554_v58 = vpop.f32.mrb[123].mxu1  ;;  %v2997_v59 = vpack.c.bf16 %v1839_v54, %v1839_v54  ;;  %v2294_v60 = vsel %vm2174_vm1, %v1839_v54, 0.0  ;;  %v2370_v61 = vmul.f32 %v1839_v54, %v1839_v54  ;;  %v1842_v62 = vadd.f32 %v1841_v57, %v1552_v56  ;;  %v1843_v63 = vpop.f32.mrb[123].mxu0 }
 0x260   : > { %v2295_v0 = vadd.f32 %v2294_v60, %v2293_v48 }
 0x261   : > { %2170 = vst.msk [vmem:[%s3893_s23 + $0xf0] sm:$0xf] %vm2109_vm0, %v2997_v59  ;;  %v2493_v1 = vsel %vm2174_vm1, %v2370_v61, 0.0  ;;  %v2998_v2 = vpack.c.bf16 %v1842_v62, %v1842_v62  ;;  %v2296_v3 = vsel %vm2174_vm1, %v1842_v62, 0.0  ;;  %v2371_v4 = vmul.f32 %v1842_v62, %v1842_v62 }
 0x262   : > { %v2494_v5 = vadd.f32 %v2493_v1, %v2492_v51  ;;  %v2297_v6 = vadd.f32 %v2296_v3, %v2295_v0 }
 0x263   : > { %2171 = vst.msk [vmem:[%s3893_s23 + $0xf4] sm:$0xf] %vm2109_vm0, %v2998_v2  ;;  %v2495_v7 = vsel %vm2174_vm1, %v2371_v4, 0.0 }
 0x264   : > { %v1557_v8 = vpop.f32.mrb[124].mxu1  ;;  %v2496_v9 = vadd.f32 %v2495_v7, %v2494_v5  ;;  %v1846_v10 = vpop.f32.mrb[124].mxu0 }
 0x265   : > { %v1559_v11 = vpop.f32.mrb[125].mxu1  ;;  %v1847_v12 = vadd.f32 %v1846_v10, %v1557_v8  ;;  %v1848_v13 = vpop.f32.mrb[125].mxu0 }
 0x266   : > { %v1560_v14 = vpop.f32.mrb[126].mxu1  ;;  %v1849_v15 = vpop.f32.mrb[126].mxu0 }
 0x267   : > { %v1562_v16 = vpop.f32.mrb[127].mxu1  ;;  %v2999_v17 = vpack.c.bf16 %v1847_v12, %v1847_v12  ;;  %v2298_v18 = vsel %vm2174_vm1, %v1847_v12, 0.0  ;;  %v2372_v19 = vmul.f32 %v1847_v12, %v1847_v12  ;;  %v1850_v20 = vadd.f32 %v1849_v15, %v1560_v14  ;;  %v1851_v21 = vpop.f32.mrb[127].mxu0 }
 0x268   : > { %v2299_v22 = vadd.f32 %v2298_v18, %v2297_v6 }
 0x269   : > { %2172 = vst.msk [vmem:[%s3893_s23 + $0xf8] sm:$0xf] %vm2109_vm0, %v2999_v17  ;;  %v2497_v23 = vsel %vm2174_vm1, %v2372_v19, 0.0  ;;  %v3000_v24 = vpack.c.bf16 %v1850_v20, %v1850_v20  ;;  %v2300_v25 = vsel %vm2174_vm1, %v1850_v20, 0.0  ;;  %v2373_v26 = vmul.f32 %v1850_v20, %v1850_v20 }
 0x26a   : > { %v2498_v27 = vadd.f32 %v2497_v23, %v2496_v9  ;;  %v2301_v28 = vadd.f32 %v2300_v25, %v2299_v22 }
 0x26b   : > { %2173 = vst.msk [vmem:[%s3893_s23 + $0xfc] sm:$0xf] %vm2109_vm0, %v3000_v24  ;;  %v2499_v29 = vsel %vm2174_vm1, %v2373_v26, 0.0 }
 0x26c   : > { %v2302_v30 = vrot.slane %v2301_v28, 4  ;;  %v2500_v31 = vadd.f32 %v2499_v29, %v2498_v27 }
 0x26d   : > { %3435 = shalt.err (!%p3432_p7)
}
 0x26e   : > { %s3436_s24 = scalar_lea.hbm %s4163_s6, 4096  ;;  %s3440_s21 = scalar_lea.hbm %s4290_s2, 8192 }
 0x26f   : > { %p3437_p9 = scmp.ne.s32.totalorder %s4163_s6, %s3436_s24  ;;  %p3441_p5 = scmp.lt.u32.totalorder %s4163_s6, %s4290_s2 }
 0x270   : > { %p3442_p11 = scmp.lt.u32.totalorder %s3440_s21, %s3436_s24  ;;  %p3444_p4 = scmp.lt.u32.totalorder %s3436_s24, %s4163_s6 }
 0x271   : > { %p3438_p2 = pnand %p3437_p9, %p3684_p12 }
 0x272   : > { %p3443_p1 = por %p3442_p11, %p3441_p5 }
 0x273   : > { %p3439_p0 = pneg %p3438_p2 }
 0x274   : > { %p3445_p6 = por %p3444_p4, %p3443_p1 }
 0x276   : > { %p3446_p8 = pnand %p3445_p6, %p3439_p0 }
 0x278   : > { %3449 = shalt.err (!%p3446_p8)
}
 0x279   : > { %s3562_s29 = smov 64   ;;  %s3563_s11 = smov 4   ;;  %v2303_v32 = vadd.f32 %v2302_v30, %v2301_v28  ;;  %v2501_v33 = vrot.slane %v2500_v31, 4  ;;  %vm2308_vm2 = vcmask 516096  }
 0x27a   : > { %3072 = dma.vmem_to_hbm [thread:$0]  (%p3684_p12), %s4165_s28, 4096, %s4163_s6, %s2509_s26, %s3562_s29, %s3562_s29, %s3563_s11  }
 0x27b   : > { %v2304_v34 = vrot.slane %v2303_v32, 2  ;;  %v2502_v35 = vadd.f32 %v2501_v33, %v2500_v31  ;;  %s2513_s9 = sand.u32 1, %s3612_s19   ;;  %s2931_s25 = sshll.u32 %s3612_s19, 4 }
 0x27c   : > { %s241_s12 = scalar_lea.vmem [#allocation8], %s3732_s14  ;;  %s247_s24 = scalar_lea.vmem [#allocation10], %s3732_s14 }
 0x27d   : > { %v2305_v36 = vadd.f32 %v2304_v34, %v2303_v32  ;;  %v2503_v37 = vrot.slane %v2502_v35, 2  ;;  %s2546_s13 = sshll.u32 %s241_s12, 4  ;;  %s2559_s7 = sshll.u32 %s247_s24, 4  ;;  %s4209_s13 = int_to_ptr.vmem [resolvable:$true] %s2546_s13  ;;  %s4217_s7 = int_to_ptr.vmem [resolvable:$true] %s2559_s7 }
 0x27e   : > { %s4207_s26 = scalar_lea.hbm %s4291_s3, %s2931_s25  ;;  %s4215_s21 = scalar_lea.hbm %s4292_s4, %s2931_s25 }
 0x27f   : > { %v2306_v38 = vrot.slane %v2305_v36, 1  ;;  %v2504_v39 = vadd.f32 %v2503_v37, %v2502_v35  ;;  %s4219_s23 = scalar_lea.sflag [#allocation9], %s2513_s9  ;;  %s3450_s10 = scalar_lea.vmem %s4209_s13, 16 }
 0x280   : > { %p3451_p10 = scmp.ne.s32.totalorder %s4209_s13, %s3450_s10  ;;  %s3564_s29 = smov [#allocation8]  }
 0x281   : > { %v2307_v40 = vadd.f32 %v2306_v38, %v2305_v36  ;;  %v2505_v41 = vrot.slane %v2504_v39, 1  ;;  %s3454_s11 = sshll.u32 %s3564_s29, 4  ;;  %s3455_s11 = int_to_ptr.vmem [resolvable:$false] %s3454_s11 }
 0x282   : > { %p3452_p13 = pnand %p3451_p10, %p3684_p12  ;;  %s3456_s28 = scalar_lea.vmem %s3455_s11, 32 }
 0x283   : > { %v2506_v42 = vadd.f32 %v2505_v41, %v2504_v39  ;;  %2309 = vst.msk [vmem:[%s241_s12] sm:$0x1] %vm2308_vm2, %v2307_v40  ;;  %p3457_p7 = scmp.lt.s32.totalorder %s4209_s13, %s3455_s11  ;;  %p3458_p9 = scmp.lt.s32.totalorder %s3456_s28, %s3450_s10 }
 0x284   : > { %p3453_p3 = pneg %p3452_p13 }
 0x285   : > { %p3459_p2 = por %p3458_p9, %p3457_p7 }
 0x287   : > { %p3460_p0 = pnand %p3459_p2, %p3453_p3 }
 0x289   : > { %3463 = shalt.err (!%p3460_p0)
}
 0x28a   : > { %s3464_s9 = scalar_lea.hbm %s4207_s26, 16  ;;  %s3468_s6 = scalar_lea.hbm %s4291_s3, 32 }
 0x28b   : > { %p3465_p5 = scmp.ne.s32.totalorder %s4207_s26, %s3464_s9  ;;  %p3469_p4 = scmp.lt.u32.totalorder %s4207_s26, %s4291_s3 }
 0x28c   : > { %p3470_p6 = scmp.lt.u32.totalorder %s3468_s6, %s3464_s9  ;;  %p3472_p10 = scmp.lt.u32.totalorder %s3464_s9, %s4207_s26 }
 0x28d   : > { %p3466_p11 = pnand %p3465_p5, %p3684_p12 }
 0x28e   : > { %p3471_p8 = por %p3470_p6, %p3469_p4 }
 0x28f   : > { %p3467_p1 = pneg %p3466_p11 }
 0x290   : > { %p3473_p13 = por %p3472_p10, %p3471_p8 }
 0x292   : > { %p3474_p3 = pnand %p3473_p13, %p3467_p1 }
 0x294   : > { %3477 = shalt.err (!%p3474_p3)
}
 0x295   : > { %3073 = dma.vmem_to_hbm [thread:$0]  (%p3684_p12), %s4209_s13, 16, %s4207_s26, %s4219_s23   ;;  %2507 = vst.msk [vmem:[%s247_s24] sm:$0x1] %vm2308_vm2, %v2506_v42 }
 0x296   : > { %s3478_s10 = scalar_lea.vmem %s4217_s7, 16  ;;  %s3565_s29 = smov [#allocation10]  }
 0x297   : > { %p3479_p7 = scmp.ne.s32.totalorder %s4217_s7, %s3478_s10  ;;  %s3482_s11 = sshll.u32 %s3565_s29, 4  ;;  %s3483_s11 = int_to_ptr.vmem [resolvable:$false] %s3482_s11 }
 0x298   : > { %s3484_s28 = scalar_lea.vmem %s3483_s11, 32  ;;  %p3485_p0 = scmp.lt.s32.totalorder %s4217_s7, %s3483_s11 }
 0x299   : > { %p3480_p9 = pnand %p3479_p7, %p3684_p12  ;;  %p3486_p5 = scmp.lt.s32.totalorder %s3484_s28, %s3478_s10 }
 0x29b   : > { %p3481_p2 = pneg %p3480_p9  ;;  %p3487_p11 = por %p3486_p5, %p3485_p0 }
 0x29d   : > { %p3488_p1 = pnand %p3487_p11, %p3481_p2 }
 0x29f   : > { %3491 = shalt.err (!%p3488_p1)
}
 0x2a0   : > { %s3492_s14 = scalar_lea.hbm %s4215_s21, 16  ;;  %s3496_s26 = scalar_lea.hbm %s4292_s4, 32 }
 0x2a1   : > { %p3493_p4 = scmp.ne.s32.totalorder %s4215_s21, %s3492_s14  ;;  %p3497_p10 = scmp.lt.u32.totalorder %s4215_s21, %s4292_s4 }
 0x2a2   : > { %p3498_p13 = scmp.lt.u32.totalorder %s3496_s26, %s3492_s14  ;;  %p3500_p7 = scmp.lt.u32.totalorder %s3492_s14, %s4215_s21 }
 0x2a3   : > { %p3494_p6 = pnand %p3493_p4, %p3684_p12 }
 0x2a4   : > { %p3499_p3 = por %p3498_p13, %p3497_p10 }
 0x2a5   : > { %p3495_p8 = pneg %p3494_p6 }
 0x2a6   : > { %p3501_p9 = por %p3500_p7, %p3499_p3 }
 0x2a8   : > { %p3502_p2 = pnand %p3501_p9, %p3495_p8 }
 0x2aa   : > { %3505 = shalt.err (!%p3502_p2)
}
 0x2ab   : > { %3074 = dma.vmem_to_hbm [thread:$0]  (%p3684_p12), %s4217_s7, 16, %s4215_s21, %s4219_s23  }
 0x2ac PF: > { %s2571_s12 = sand.u32 1, %s3540_s15   ;;  %p4307_p0 = scmp.ne.s32.totalorder %s4297_s22, 0 }
 0x2ad   : > { %p4308_p5 = scmp.ge.s32.totalorder %s3552_s18, 2  ;;  %s2572_s6 = scalar_lea.sflag [#allocation4], %s2571_s12 }
 0x2af   : > { %p3087_p11 = pnand %p4308_p5, %p4307_p0 }
 0x2b1   : > { %3531 = dma.done.wait (!%p3087_p11), %s2572_s6, 4096  }
 0x2b2   : > { %3533 = vsyncadd (!%p3087_p11), %s2572_s6, 4294963200  ;;  %s2580_s19 = sand.u32 1, %s2692_s20  }
 0x2b3   : > { %s2581_s8 = scalar_lea.sflag [#allocation9], %s2580_s19 }
 0x2b4   : > { %3535 = dma.done.wait (!%p3087_p11), %s2581_s8, 32  }
 0x2b5   : > { %3537 = vsyncadd (!%p3087_p11), %s2581_s8, 4294967264  ;;  %p22_p12 = scmp.ge.s32.totalorder %s3649_s27, 4   ;;  %s4309_s15 = smov %s3544_s16 }
 0x2b6   : > { %s4310_s16 = smov %s3548_s17  ;;  %s4311_s17 = smov %s3680_s30 }
 0x2b7   : > { %s4312_s18 = smov %s3649_s27  ;;  %24 = sbr.rel (!%p22_p12) target bundleno = 8 (0x8), region = 109 }
 0x2be   :  { %2593 = vsyncpa [#allocation3], 1 }
 0x2bf   :  { %2595 = vsyncpa [#allocation3 + $0x1], 1 }
 0x2c0   :  { %2596 = vsyncpa [#allocation6], 1 }
 0x2c1   :  { %2597 = vsyncpa [#allocation4], 1 }
 0x2c2   :  { %2599 = vsyncpa [#allocation4 + $0x1], 1 }
 0x2c3   :  { %2600 = vsyncpa [#allocation9], 1 }
 0x2c4   :  { %2602 = vsyncpa [#allocation9 + $0x1], 1 }

// kernel: generator_forward.11
= control target key start
LH: loop header
LB: loop body
LE: loop exit
PB: predicated region body
PF: predicated region fallthrough
CT: control target
= control target key end

     0   :  { %7 = vsyncpa [#allocation3], 0  ;;  %s3309_s0 = inlined_call_operand.hbm [shape: bf16[8,256], index: 0, kind: input, shape index: {}]   ;;  %s3310_s1 = inlined_call_operand.hbm [shape: bf16[256,8192], index: 1, kind: input, shape index: {}]   ;;  %s3311_s2 = inlined_call_operand.hbm [shape: f32[8,8192], index: 2, kind: output, shape index: {}]  }
   0x1   :  { %8 = vsyncpa [#allocation6], 0 }
   0x2   :  { %10 = vsyncpa [#allocation6 + $0x1], 0 }
   0x3   :  { %11 = vsyncpa [#allocation4], 0 }
   0x4   :  { %13 = vsyncpa [#allocation4 + $0x1], 0  ;;  %s2811_s9 = smov 0   ;;  %s2813_s10 = smov 0  }
   0x5   :  { %s2815_s11 = smov 0   ;;  %s2817_s12 = smov 0  }
   0x6 LB: > { %s2832_s13 = sadd.s32 4294967295, %s2788_s12   ;;  %s2258_s14 = sadd.s32 4294967294, %s2788_s12   ;;  %s2788_s12 = sphi %s2817_s12, %s3334_s12   ;;  %s2784_s11 = sphi %s2815_s11, %s3333_s11   ;;  %s2780_s10 = sphi %s2813_s10, %s3332_s10   ;;  %s2776_s9 = sphi %s2811_s9, %s3331_s9  }
   0x7   : > { %s2836_s15 = sadd.s32 1, %s2788_s12   ;;  %s47_s16 = sadd.s32 1, %s2784_s11 }
   0x8   : > { %s44_s17 = ssub.s32 %s2788_s12, %s2836_s15  ;;  %p54_p0 = scmp.ne.s32.totalorder %s2784_s11, %s2780_s10 }
   0x9   : > { %p45_p1 = scmp.eq.s32.totalorder %s44_s17, 0  ;;  %p55_p2 = scmp.eq.s32.totalorder %s2788_s12, 0 }
   0xa   : > { %p60_p3 = scmp.ne.s32.totalorder %s2780_s10, %s2776_s9  ;;  %p3312_p4 = scmp.eq.s32.totalorder %s2832_s13, 0 }
   0xb   : > { %s2848_s18 = scalar_select %p45_p1, %s2784_s11, %s47_s16  }
   0xc   : > { %p2850_p5 = por %p55_p2, %p54_p0  ;;  %p2856_p6 = por %p3312_p4, %p60_p3 }
   0xd   : > { %p84_p7 = scmp.eq.s32.totalorder %s2832_s13, 3  ;;  %p90_p8 = scmp.eq.s32.totalorder %s2258_s14, 3 }
   0xe   : > { %s3318_s20 = scalar_select %p2856_p6, 1, 0 }
   0xf   : > { %p2259_p9 = scmp.ge.s32.totalorder %s2788_s12, 1  ;;  %p97_p10 = scmp.lt.s32.totalorder %s2788_s12, 5 }
  0x10   : > { %p2863_p11 = por %p84_p7, %p54_p0  ;;  %p2867_p12 = por %p90_p8, %p60_p3 }
  0x11   : > { %p2871_p13 = pnand %p2259_p9, %p97_p10  ;;  %s2790_s24 = smov [#allocation2]  }
  0x12   : > { %s3319_s21 = scalar_select %p2863_p11, 1, 0 }
  0x13   : > { %s3320_s22 = scalar_select %p2867_p12, 1, 0 }
  0x14   : > { %s3321_s23 = scalar_select %p2871_p13, 1, 0 }
  0x15   : > { %p2542_p1 = pneg %p2871_p13  ;;  %s110_s25 = sshll.u32 %s2790_s24, 4  ;;  %s111_s25 = int_to_ptr.vmem [resolvable:$true] %s110_s25 }
  0x16   : > { %p2555_p2 = scmp.lt.s32.totalorder %s2788_s12, 4  ;;  %s121_s27 = sand.u32 1, %s2784_s11  }
  0x17   : > { %p2880_p0 = pnand %p2542_p1, %p3312_p4  ;;  %s2262_s29 = sshll.u32 %s121_s27, 11 }
  0x18   : > { %p2887_p3 = pnand %p2555_p2, %p2850_p5  ;;  %s2660_s4 = scalar_lea.hbm %s3309_s0, 128 }
  0x19   : > { %p2661_p7 = scmp.ne.s32.totalorder %s3309_s0, %s2660_s4  ;;  %p2662_p8 = pneg %p2880_p0 }
  0x1a   : > { %s3323_s28 = scalar_select %p2887_p3, 1, 0 }
  0x1b   : > { %p2663_p9 = pnand %p2662_p8, %p2661_p7  ;;  %p2667_p5 = scmp.lt.u32.totalorder %s2660_s4, %s3309_s0 }
  0x1d   : > { %p2664_p10 = pneg %p2663_p9 }
  0x1f   : > { %p2669_p1 = pnand %p2667_p5, %p2664_p10 }
  0x21   : > { %2672 = shalt.err (!%p2669_p1)
}
  0x22   : > { %s2673_s14 = scalar_lea.vmem %s111_s25, 128  ;;  %p2681_p11 = scmp.lt.s32.totalorder %s111_s25, %s111_s25 }
  0x23   : > { %p2674_p2 = scmp.ne.s32.totalorder %s111_s25, %s2673_s14  ;;  %p2682_p6 = scmp.lt.s32.totalorder %s2673_s14, %s2673_s14 }
  0x25   : > { %p2676_p4 = pnand %p2674_p2, %p2662_p8  ;;  %p2683_p13 = por %p2682_p6, %p2681_p11 }
  0x27   : > { %p2677_p12 = pneg %p2676_p4 }
  0x29   : > { %p2684_p3 = pnand %p2683_p13, %p2677_p12 }
  0x2b   : > { %2687 = shalt.err (!%p2684_p3)
}
  0x2c   : > { %2545 = dma.hbm_to_vmem [thread:$0]  (!%p2880_p0), %s3309_s0, 128, %s111_s25, [#allocation3]  }
  0x2d   : > { %s2532_s19 = sshll.u32 %s2788_s12, 10  ;;  %s125_s24 = scalar_lea.vmem [#allocation5], %s2262_s29 }
  0x2e   : > { %s132_s30 = sshll.u32 %s125_s24, 4  ;;  %s2911_s5 = scalar_lea.hbm %s3310_s1, %s2532_s19  ;;  %s2913_s30 = int_to_ptr.vmem [resolvable:$true] %s132_s30 }
  0x2f   : > { %s2915_s26 = scalar_lea.sflag [#allocation6], %s121_s27  ;;  %s2688_s6 = scalar_lea.hbm %s2911_s5, 32768 }
  0x30   : > { %p2689_p4 = scmp.ne.s32.totalorder %s2911_s5, %s2688_s6  ;;  %p3324_p6 = scmp.ne.s32.totalorder %s3323_s28, 0 }
  0x31   : > { %s2693_s7 = scalar_lea.hbm %s3310_s1, 131072  ;;  %p2694_p0 = scmp.lt.u32.totalorder %s2911_s5, %s3310_s1 }
  0x32   : > { %p2690_p11 = pneg %p3324_p6  ;;  %p2695_p3 = scmp.lt.u32.totalorder %s2693_s7, %s2688_s6 }
  0x33   : > { %p2697_p8 = scmp.lt.u32.totalorder %s2688_s6, %s2911_s5 }
  0x34   : > { %p2691_p12 = pnand %p2690_p11, %p2689_p4  ;;  %p2696_p7 = por %p2695_p3, %p2694_p0 }
  0x36   : > { %p2692_p13 = pneg %p2691_p12  ;;  %p2698_p9 = por %p2697_p8, %p2696_p7 }
  0x38   : > { %p2699_p10 = pnand %p2698_p9, %p2692_p13 }
  0x3a   : > { %2702 = shalt.err (!%p2699_p10)
}
  0x3b   : > { %s2703_s27 = scalar_lea.vmem %s2913_s30, 32768  ;;  %s2791_s16 = smov [#allocation5]  }
  0x3c   : > { %p2704_p5 = scmp.ne.s32.totalorder %s2913_s30, %s2703_s27  ;;  %s2708_s17 = sshll.u32 %s2791_s16, 4  ;;  %s2709_s17 = int_to_ptr.vmem [resolvable:$false] %s2708_s17 }
  0x3d   : > { %s2710_s19 = scalar_lea.vmem %s2709_s17, 65536  ;;  %p2711_p4 = scmp.lt.s32.totalorder %s2913_s30, %s2709_s17 }
  0x3e   : > { %p2706_p1 = pnand %p2704_p5, %p2690_p11  ;;  %p2712_p12 = scmp.lt.s32.totalorder %s2710_s19, %s2703_s27 }
  0x40   : > { %p2707_p2 = pneg %p2706_p1  ;;  %p2713_p0 = por %p2712_p12, %p2711_p4 }
  0x42   : > { %p2714_p3 = pnand %p2713_p0, %p2707_p2 }
  0x44   : > { %2717 = shalt.err (!%p2714_p3)
}
  0x45   : > { %s2792_s24 = smov 4096   ;;  %s2793_s3 = smov 1024  }
  0x46   : > { %s2794_s4 = smov 64   ;;  %p3325_p11 = scmp.ne.s32.totalorder %s3321_s23, 0 }
  0x47   : > { %2549 = dma.hbm_to_vmem [thread:$0]  (!%p3324_p6), %s2911_s5, 32768, %s2913_s30, %s2915_s26, %s2792_s24, %s2793_s3, %s2794_s4  }
  0x48   : > { %144 = sbr.rel (%p3325_p11) target bundleno = 601 (0x259), region = 28  ;;  %p3326_p13 = scmp.eq.s32.totalorder (!%p3325_p11), %s2832_s13, 0 }
  0x4f   : > { %2763 = dma.done.wait (%p3326_p13), [#allocation3], 128   ;;  %p3327_p7 = pmov %p3326_p13 }
  0x50   : > { %s2950_s6 = sand.u32 1, %s2780_s10   ;;  %p3328_p6 = scmp.ne.s32.totalorder %s3318_s20, 0 }
  0x51   : > { %2765 = vsyncadd (%p3327_p7), [#allocation3], 4294967168  ;;  %s2267_s25 = sshll.u32 %s2950_s6, 11  ;;  %s151_s29 = scalar_lea.sflag [#allocation6], %s2950_s6 }
  0x52   : > { %s2954_s7 = scalar_lea.vmem [#allocation5], %s2267_s25 }
  0x53   : > { %2767 = dma.done.wait (%p3328_p6), %s151_s29, 32768  }
  0x54   : > { %2769 = vsyncadd (%p3328_p6), %s151_s29, 4294934528  ;;  %v178_v0 = vld [vmem:[%s2954_s7] sm:$0xff]  ;;  %v179_v2 = vld [vmem:[%s2954_s7 + $0x8] sm:$0xff]  ;;  %s2268_s20 = sshll.u32 %s2950_s6, 7  ;;  %s2533_s28 = sshll.u32 %s2832_s13, 11 }
  0x55   : > { %v186_v1 = vld [vmem:[%s2954_s7 + $0x40] sm:$0xff]  ;;  %v187_v4 = vld [vmem:[%s2954_s7 + $0x48] sm:$0xff]  ;;  %v2988_v53 = vld [vmem:[#allocation2] sm:$0xff]  ;;  %s3243_s23 = scalar_lea.vmem [#allocation7], %s2268_s20  ;;  %s3264_s8 = scalar_lea.hbm %s3311_s2, %s2533_s28 }
  0x56   : > { %v2272_v3 = vcombine.high %v178_v0, %v186_v1  ;;  %v2271_v5 = vcombine.low %v178_v0, %v186_v1  ;;  %v194_v6 = vld [vmem:[%s2954_s7 + $0x80] sm:$0xff]  ;;  %v2274_v8 = vcombine.high %v179_v2, %v187_v4  ;;  %v2273_v9 = vcombine.low %v179_v2, %v187_v4  ;;  %v195_v11 = vld [vmem:[%s2954_s7 + $0x88] sm:$0xff]  ;;  %s2176_s30 = sshll.u32 %s3243_s23, 4  ;;  %s2162_s13 = scalar_lea.sflag [#allocation4], %s2950_s6  ;;  %s3266_s30 = int_to_ptr.vmem [resolvable:$true] %s2176_s30 }
  0x57   : > { %v202_v7 = vld [vmem:[%s2954_s7 + $0xc0] sm:$0xff]  ;;  %v203_v12 = vld [vmem:[%s2954_s7 + $0xc8] sm:$0xff]  ;;  %v2994_v57 = vcombine.high %v2988_v53, %v2988_v53  ;;  %s2718_s14 = scalar_lea.vmem %s3266_s30, 2048  ;;  %p3329_p9 = scmp.ne.s32.totalorder %s3319_s21, 0 }
  0x58   : > { %v2288_v10 = vcombine.high %v194_v6, %v202_v7  ;;  %v210_v13 = vld [vmem:[%s2954_s7 + $0x100] sm:$0xff]  ;;  %1721 = vmatprep.subr.bf16.mxu0 %v2272_v3  ;;  %v2290_v14 = vcombine.high %v195_v11, %v203_v12  ;;  %v211_v16 = vld [vmem:[%s2954_s7 + $0x108] sm:$0xff]  ;;  %1762 = vmatprep.subr.bf16.mxu1 %v2274_v8  ;;  %v2287_v18 = vcombine.low %v194_v6, %v202_v7  ;;  %p2719_p8 = scmp.ne.s32.totalorder %s3266_s30, %s2718_s14  ;;  %s2795_s27 = smov [#allocation7]  }
  0x59   : > { %v218_v15 = vld [vmem:[%s2954_s7 + $0x140] sm:$0xff]  ;;  %v219_v17 = vld [vmem:[%s2954_s7 + $0x148] sm:$0xff]  ;;  %1722 = vmatpush1.bf16.msra.mxu0 %v2271_v5  ;;  %1763 = vmatpush1.bf16.msra.mxu1 %v2273_v9  ;;  %v2289_v19 = vcombine.low %v195_v11, %v203_v12  ;;  %s2722_s16 = sshll.u32 %s2795_s27, 4  ;;  %s2723_s16 = int_to_ptr.vmem [resolvable:$false] %s2722_s16 }
  0x5a   : > { %1723 = vmatprep.subr.bf16.mxu0 %v2288_v10  ;;  %v2304_v20 = vcombine.high %v210_v13, %v218_v15  ;;  %1764 = vmatprep.subr.bf16.mxu1 %v2290_v14  ;;  %v2306_v21 = vcombine.high %v211_v16, %v219_v17  ;;  %v226_v22 = vld [vmem:[%s2954_s7 + $0x180] sm:$0xff]  ;;  %v227_v24 = vld [vmem:[%s2954_s7 + $0x188] sm:$0xff]  ;;  %v2303_v26 = vcombine.low %v210_v13, %v218_v15  ;;  %p2720_p10 = pnand %p2719_p8, %p3329_p9  ;;  %s2724_s17 = scalar_lea.vmem %s2723_s16, 4096 }
  0x5b   : > { %v234_v23 = vld [vmem:[%s2954_s7 + $0x1c0] sm:$0xff]  ;;  %v235_v25 = vld [vmem:[%s2954_s7 + $0x1c8] sm:$0xff]  ;;  %v2305_v27 = vcombine.low %v211_v16, %v219_v17  ;;  %1753 = vmatprep.mubr.bf16.mxu0 %v2994_v57  ;;  %1794 = vmatprep.mubr.bf16.mxu1 %v2994_v57  ;;  %p2725_p1 = scmp.lt.s32.totalorder %s3266_s30, %s2723_s16  ;;  %p2726_p2 = scmp.lt.s32.totalorder %s2724_s17, %s2718_s14 }
  0x5c   : > { %v2320_v28 = vcombine.high %v226_v22, %v234_v23  ;;  %v2322_v29 = vcombine.high %v227_v24, %v235_v25  ;;  %v242_v30 = vld [vmem:[%s2954_s7 + $0x200] sm:$0xff]  ;;  %v243_v32 = vld [vmem:[%s2954_s7 + $0x208] sm:$0xff]  ;;  %v2319_v34 = vcombine.low %v226_v22, %v234_v23  ;;  %v2321_v35 = vcombine.low %v227_v24, %v235_v25  ;;  %p2721_p5 = pneg %p2720_p10 }
  0x5d   : > { %1724 = vmatpush1.bf16.msra.mxu0 %v2287_v18  ;;  %1765 = vmatpush1.bf16.msra.mxu1 %v2289_v19  ;;  %v250_v31 = vld [vmem:[%s2954_s7 + $0x240] sm:$0xff]  ;;  %v251_v33 = vld [vmem:[%s2954_s7 + $0x248] sm:$0xff]  ;;  %p2727_p4 = por %p2726_p2, %p2725_p1 }
  0x5e   : > { %1725 = vmatprep.subr.bf16.mxu0 %v2304_v20  ;;  %1766 = vmatprep.subr.bf16.mxu1 %v2306_v21  ;;  %v2336_v36 = vcombine.high %v242_v30, %v250_v31  ;;  %v2338_v37 = vcombine.high %v243_v32, %v251_v33  ;;  %v258_v38 = vld [vmem:[%s2954_s7 + $0x280] sm:$0xff]  ;;  %v259_v40 = vld [vmem:[%s2954_s7 + $0x288] sm:$0xff]  ;;  %v2335_v42 = vcombine.low %v242_v30, %v250_v31 }
  0x5f   : > { %v266_v39 = vld [vmem:[%s2954_s7 + $0x2c0] sm:$0xff]  ;;  %v267_v41 = vld [vmem:[%s2954_s7 + $0x2c8] sm:$0xff]  ;;  %v2337_v43 = vcombine.low %v243_v32, %v251_v33  ;;  %p2728_p12 = pnand %p2727_p4, %p2721_p5 }
  0x60   : > { %v2352_v44 = vcombine.high %v258_v38, %v266_v39  ;;  %v2354_v45 = vcombine.high %v259_v40, %v267_v41  ;;  %v274_v46 = vld [vmem:[%s2954_s7 + $0x300] sm:$0xff]  ;;  %v275_v48 = vld [vmem:[%s2954_s7 + $0x308] sm:$0xff]  ;;  %v2351_v50 = vcombine.low %v258_v38, %v266_v39  ;;  %v2353_v51 = vcombine.low %v259_v40, %v267_v41 }
  0x61   : > { %1726 = vmatpush1.bf16.msra.mxu0 %v2303_v26  ;;  %1767 = vmatpush1.bf16.msra.mxu1 %v2305_v27  ;;  %v282_v47 = vld [vmem:[%s2954_s7 + $0x340] sm:$0xff]  ;;  %v283_v49 = vld [vmem:[%s2954_s7 + $0x348] sm:$0xff] }
  0x62   : > { %1727 = vmatprep.subr.bf16.mxu0 %v2320_v28  ;;  %1768 = vmatprep.subr.bf16.mxu1 %v2322_v29  ;;  %v2368_v52 = vcombine.high %v274_v46, %v282_v47  ;;  %v2370_v54 = vcombine.high %v275_v48, %v283_v49  ;;  %v290_v55 = vld [vmem:[%s2954_s7 + $0x380] sm:$0xff]  ;;  %v291_v58 = vld [vmem:[%s2954_s7 + $0x388] sm:$0xff]  ;;  %v2367_v60 = vcombine.low %v274_v46, %v282_v47 }
  0x63   : > { %v298_v56 = vld [vmem:[%s2954_s7 + $0x3c0] sm:$0xff]  ;;  %v299_v59 = vld [vmem:[%s2954_s7 + $0x3c8] sm:$0xff]  ;;  %v2369_v61 = vcombine.low %v275_v48, %v283_v49 }
  0x64   : > { %v2384_v62 = vcombine.high %v290_v55, %v298_v56  ;;  %v2386_v63 = vcombine.high %v291_v58, %v299_v59  ;;  %v306_v0 = vld [vmem:[%s2954_s7 + $0x400] sm:$0xff]  ;;  %v307_v2 = vld [vmem:[%s2954_s7 + $0x408] sm:$0xff]  ;;  %v2383_v4 = vcombine.low %v290_v55, %v298_v56  ;;  %v2385_v5 = vcombine.low %v291_v58, %v299_v59 }
  0x65   : > { %1728 = vmatpush1.bf16.msra.mxu0 %v2319_v34  ;;  %1769 = vmatpush1.bf16.msra.mxu1 %v2321_v35  ;;  %v314_v1 = vld [vmem:[%s2954_s7 + $0x440] sm:$0xff]  ;;  %v315_v3 = vld [vmem:[%s2954_s7 + $0x448] sm:$0xff] }
  0x66   : > { %1729 = vmatprep.subr.bf16.mxu0 %v2336_v36  ;;  %1770 = vmatprep.subr.bf16.mxu1 %v2338_v37  ;;  %v2400_v6 = vcombine.high %v306_v0, %v314_v1  ;;  %v2402_v7 = vcombine.high %v307_v2, %v315_v3  ;;  %v322_v8 = vld [vmem:[%s2954_s7 + $0x480] sm:$0xff]  ;;  %v323_v10 = vld [vmem:[%s2954_s7 + $0x488] sm:$0xff]  ;;  %v2399_v12 = vcombine.low %v306_v0, %v314_v1 }
  0x67   : > { %v330_v9 = vld [vmem:[%s2954_s7 + $0x4c0] sm:$0xff]  ;;  %v331_v11 = vld [vmem:[%s2954_s7 + $0x4c8] sm:$0xff]  ;;  %v2401_v13 = vcombine.low %v307_v2, %v315_v3  ;;  %v180_v2 = vld [vmem:[%s2954_s7 + $0x10] sm:$0xff] }
  0x68   : > { %v2416_v14 = vcombine.high %v322_v8, %v330_v9  ;;  %v2418_v15 = vcombine.high %v323_v10, %v331_v11  ;;  %v338_v16 = vld [vmem:[%s2954_s7 + $0x500] sm:$0xff]  ;;  %v339_v18 = vld [vmem:[%s2954_s7 + $0x508] sm:$0xff]  ;;  %v2415_v20 = vcombine.low %v322_v8, %v330_v9  ;;  %v2417_v21 = vcombine.low %v323_v10, %v331_v11  ;;  %v188_v3 = vld [vmem:[%s2954_s7 + $0x50] sm:$0xff] }
  0x69   : > { %1730 = vmatpush1.bf16.msra.mxu0 %v2335_v42  ;;  %1771 = vmatpush1.bf16.msra.mxu1 %v2337_v43  ;;  %v346_v17 = vld [vmem:[%s2954_s7 + $0x540] sm:$0xff]  ;;  %v347_v19 = vld [vmem:[%s2954_s7 + $0x548] sm:$0xff]  ;;  %v2276_v8 = vcombine.high %v180_v2, %v188_v3  ;;  %v196_v10 = vld [vmem:[%s2954_s7 + $0x90] sm:$0xff] }
  0x6a   : > { %1731 = vmatprep.subr.bf16.mxu0 %v2352_v44  ;;  %1772 = vmatprep.subr.bf16.mxu1 %v2354_v45  ;;  %v2432_v22 = vcombine.high %v338_v16, %v346_v17  ;;  %v2434_v23 = vcombine.high %v339_v18, %v347_v19  ;;  %v354_v24 = vld [vmem:[%s2954_s7 + $0x580] sm:$0xff]  ;;  %v355_v26 = vld [vmem:[%s2954_s7 + $0x588] sm:$0xff]  ;;  %v2431_v28 = vcombine.low %v338_v16, %v346_v17  ;;  %v204_v11 = vld [vmem:[%s2954_s7 + $0xd0] sm:$0xff] }
  0x6b   : > { %v362_v25 = vld [vmem:[%s2954_s7 + $0x5c0] sm:$0xff]  ;;  %v363_v27 = vld [vmem:[%s2954_s7 + $0x5c8] sm:$0xff]  ;;  %v2433_v29 = vcombine.low %v339_v18, %v347_v19  ;;  %v2292_v17 = vcombine.high %v196_v10, %v204_v11  ;;  %v212_v19 = vld [vmem:[%s2954_s7 + $0x110] sm:$0xff] }
  0x6c   : > { %v2448_v30 = vcombine.high %v354_v24, %v362_v25  ;;  %v2450_v31 = vcombine.high %v355_v26, %v363_v27  ;;  %v370_v32 = vld [vmem:[%s2954_s7 + $0x600] sm:$0xff]  ;;  %v371_v34 = vld [vmem:[%s2954_s7 + $0x608] sm:$0xff]  ;;  %v2447_v36 = vcombine.low %v354_v24, %v362_v25  ;;  %v2449_v37 = vcombine.low %v355_v26, %v363_v27  ;;  %v228_v26 = vld [vmem:[%s2954_s7 + $0x190] sm:$0xff] }
  0x6d   : > { %1732 = vmatpush1.bf16.msra.mxu0 %v2351_v50  ;;  %1773 = vmatpush1.bf16.msra.mxu1 %v2353_v51  ;;  %v378_v33 = vld [vmem:[%s2954_s7 + $0x640] sm:$0xff]  ;;  %v379_v35 = vld [vmem:[%s2954_s7 + $0x648] sm:$0xff]  ;;  %v236_v27 = vld [vmem:[%s2954_s7 + $0x1d0] sm:$0xff] }
  0x6e   : > { %1733 = vmatprep.subr.bf16.mxu0 %v2368_v52  ;;  %1774 = vmatprep.subr.bf16.mxu1 %v2370_v54  ;;  %v2464_v38 = vcombine.high %v370_v32, %v378_v33  ;;  %v2466_v39 = vcombine.high %v371_v34, %v379_v35  ;;  %v386_v40 = vld [vmem:[%s2954_s7 + $0x680] sm:$0xff]  ;;  %v387_v42 = vld [vmem:[%s2954_s7 + $0x688] sm:$0xff]  ;;  %v2463_v44 = vcombine.low %v370_v32, %v378_v33 }
  0x6f   : > { %v394_v41 = vld [vmem:[%s2954_s7 + $0x6c0] sm:$0xff]  ;;  %v395_v43 = vld [vmem:[%s2954_s7 + $0x6c8] sm:$0xff]  ;;  %v2465_v45 = vcombine.low %v371_v34, %v379_v35  ;;  %v2324_v32 = vcombine.high %v228_v26, %v236_v27  ;;  %v244_v34 = vld [vmem:[%s2954_s7 + $0x210] sm:$0xff] }
  0x70   : > { %v2480_v46 = vcombine.high %v386_v40, %v394_v41  ;;  %v2482_v47 = vcombine.high %v387_v42, %v395_v43  ;;  %v402_v48 = vld [vmem:[%s2954_s7 + $0x700] sm:$0xff]  ;;  %v403_v50 = vld [vmem:[%s2954_s7 + $0x708] sm:$0xff]  ;;  %v2479_v52 = vcombine.low %v386_v40, %v394_v41  ;;  %v2481_v54 = vcombine.low %v387_v42, %v395_v43  ;;  %v252_v35 = vld [vmem:[%s2954_s7 + $0x250] sm:$0xff] }
  0x71   : > { %1734 = vmatpush1.bf16.msra.mxu0 %v2367_v60  ;;  %1775 = vmatpush1.bf16.msra.mxu1 %v2369_v61  ;;  %v410_v49 = vld [vmem:[%s2954_s7 + $0x740] sm:$0xff]  ;;  %v411_v51 = vld [vmem:[%s2954_s7 + $0x748] sm:$0xff]  ;;  %v2340_v40 = vcombine.high %v244_v34, %v252_v35  ;;  %v260_v42 = vld [vmem:[%s2954_s7 + $0x290] sm:$0xff] }
  0x72   : > { %1735 = vmatprep.subr.bf16.mxu0 %v2384_v62  ;;  %1776 = vmatprep.subr.bf16.mxu1 %v2386_v63  ;;  %v2496_v55 = vcombine.high %v402_v48, %v410_v49  ;;  %v2498_v56 = vcombine.high %v403_v50, %v411_v51  ;;  %v418_v58 = vld [vmem:[%s2954_s7 + $0x780] sm:$0xff]  ;;  %v419_v60 = vld [vmem:[%s2954_s7 + $0x788] sm:$0xff]  ;;  %v2495_v62 = vcombine.low %v402_v48, %v410_v49  ;;  %v268_v43 = vld [vmem:[%s2954_s7 + $0x2d0] sm:$0xff] }
  0x73   : > { %v426_v59 = vld [vmem:[%s2954_s7 + $0x7c0] sm:$0xff]  ;;  %v427_v61 = vld [vmem:[%s2954_s7 + $0x7c8] sm:$0xff]  ;;  %v2497_v63 = vcombine.low %v403_v50, %v411_v51  ;;  %v2356_v48 = vcombine.high %v260_v42, %v268_v43  ;;  %v276_v50 = vld [vmem:[%s2954_s7 + $0x310] sm:$0xff] }
  0x74   : > { %v2512_v0 = vcombine.high %v418_v58, %v426_v59  ;;  %v2514_v1 = vcombine.high %v419_v60, %v427_v61  ;;  %v284_v51 = vld [vmem:[%s2954_s7 + $0x350] sm:$0xff] }
  0x75   : > { %1736 = vmatpush1.bf16.msra.mxu0 %v2383_v4  ;;  %1777 = vmatpush1.bf16.msra.mxu1 %v2385_v5  ;;  %v181_v4 = vld [vmem:[%s2954_s7 + $0x18] sm:$0xff] }
  0x76   : > { %1737 = vmatprep.subr.bf16.mxu0 %v2400_v6  ;;  %1778 = vmatprep.subr.bf16.mxu1 %v2402_v7  ;;  %v189_v5 = vld [vmem:[%s2954_s7 + $0x58] sm:$0xff]  ;;  %v2511_v6 = vcombine.low %v418_v58, %v426_v59  ;;  %v2513_v7 = vcombine.low %v419_v60, %v427_v61  ;;  %v2372_v58 = vcombine.high %v276_v50, %v284_v51  ;;  %v292_v60 = vld [vmem:[%s2954_s7 + $0x390] sm:$0xff] }
  0x77   : > { %v2278_v9 = vcombine.high %v181_v4, %v189_v5  ;;  %v2277_v16 = vcombine.low %v181_v4, %v189_v5  ;;  %v300_v61 = vld [vmem:[%s2954_s7 + $0x3d0] sm:$0xff] }
  0x78   : > { %v308_v4 = vld [vmem:[%s2954_s7 + $0x410] sm:$0xff] }
  0x79   : > { %1738 = vmatpush1.bf16.msra.mxu0 %v2399_v12  ;;  %1779 = vmatpush1.bf16.msra.mxu1 %v2401_v13  ;;  %v3040_v12 = vcombine.low %v2988_v53, %v2988_v53  ;;  %v197_v13 = vld [vmem:[%s2954_s7 + $0x98] sm:$0xff]  ;;  %v316_v5 = vld [vmem:[%s2954_s7 + $0x450] sm:$0xff] }
  0x7a   : > { %1739 = vmatprep.subr.bf16.mxu0 %v2416_v14  ;;  %1780 = vmatprep.subr.bf16.mxu1 %v2418_v15  ;;  %v205_v14 = vld [vmem:[%s2954_s7 + $0xd8] sm:$0xff]  ;;  %v2275_v15 = vcombine.low %v180_v2, %v188_v3  ;;  %v2388_v2 = vcombine.high %v292_v60, %v300_v61 }
  0x7b   : > { %v2294_v18 = vcombine.high %v197_v13, %v205_v14  ;;  %v213_v53 = vld [vmem:[%s2954_s7 + $0x118] sm:$0xff] }
  0x7d   : > { %1740 = vmatpush1.bf16.msra.mxu0 %v2415_v20  ;;  %1781 = vmatpush1.bf16.msra.mxu1 %v2417_v21  ;;  %v220_v20 = vld [vmem:[%s2954_s7 + $0x150] sm:$0xff]  ;;  %v221_v21 = vld [vmem:[%s2954_s7 + $0x158] sm:$0xff] }
  0x7e   : > { %1741 = vmatprep.subr.bf16.mxu0 %v2432_v22  ;;  %1782 = vmatprep.subr.bf16.mxu1 %v2434_v23  ;;  %v2291_v22 = vcombine.low %v196_v10, %v204_v11  ;;  %v2293_v23 = vcombine.low %v197_v13, %v205_v14  ;;  %v2308_v24 = vcombine.high %v212_v19, %v220_v20  ;;  %v324_v13 = vld [vmem:[%s2954_s7 + $0x490] sm:$0xff] }
  0x7f   : > { %v2310_v25 = vcombine.high %v213_v53, %v221_v21  ;;  %v2404_v10 = vcombine.high %v308_v4, %v316_v5  ;;  %v332_v14 = vld [vmem:[%s2954_s7 + $0x4d0] sm:$0xff] }
  0x81   : > { %1742 = vmatpush1.bf16.msra.mxu0 %v2431_v28  ;;  %1783 = vmatpush1.bf16.msra.mxu1 %v2433_v29  ;;  %v229_v28 = vld [vmem:[%s2954_s7 + $0x198] sm:$0xff] }
  0x82   : > { %1743 = vmatprep.subr.bf16.mxu0 %v2448_v30  ;;  %1784 = vmatprep.subr.bf16.mxu1 %v2450_v31  ;;  %v237_v29 = vld [vmem:[%s2954_s7 + $0x1d8] sm:$0xff]  ;;  %v2307_v30 = vcombine.low %v212_v19, %v220_v20  ;;  %v2309_v31 = vcombine.low %v213_v53, %v221_v21  ;;  %v2420_v19 = vcombine.high %v324_v13, %v332_v14  ;;  %v340_v53 = vld [vmem:[%s2954_s7 + $0x510] sm:$0xff] }
  0x83   : > { %v2326_v33 = vcombine.high %v229_v28, %v237_v29  ;;  %v348_v21 = vld [vmem:[%s2954_s7 + $0x550] sm:$0xff] }
  0x85   : > { %1744 = vmatpush1.bf16.msra.mxu0 %v2447_v36  ;;  %1785 = vmatpush1.bf16.msra.mxu1 %v2449_v37  ;;  %v245_v36 = vld [vmem:[%s2954_s7 + $0x218] sm:$0xff] }
  0x86   : > { %1745 = vmatprep.subr.bf16.mxu0 %v2464_v38  ;;  %1786 = vmatprep.subr.bf16.mxu1 %v2466_v39  ;;  %v253_v37 = vld [vmem:[%s2954_s7 + $0x258] sm:$0xff]  ;;  %v2323_v38 = vcombine.low %v228_v26, %v236_v27  ;;  %v2325_v39 = vcombine.low %v229_v28, %v237_v29  ;;  %v2436_v26 = vcombine.high %v340_v53, %v348_v21  ;;  %v356_v28 = vld [vmem:[%s2954_s7 + $0x590] sm:$0xff] }
  0x87   : > { %v2342_v41 = vcombine.high %v245_v36, %v253_v37  ;;  %v364_v29 = vld [vmem:[%s2954_s7 + $0x5d0] sm:$0xff] }
  0x89   : > { %1746 = vmatpush1.bf16.msra.mxu0 %v2463_v44  ;;  %1787 = vmatpush1.bf16.msra.mxu1 %v2465_v45  ;;  %v261_v44 = vld [vmem:[%s2954_s7 + $0x298] sm:$0xff] }
  0x8a   : > { %1747 = vmatprep.subr.bf16.mxu0 %v2480_v46  ;;  %1788 = vmatprep.subr.bf16.mxu1 %v2482_v47  ;;  %v269_v45 = vld [vmem:[%s2954_s7 + $0x2d8] sm:$0xff]  ;;  %v2339_v46 = vcombine.low %v244_v34, %v252_v35  ;;  %v2341_v47 = vcombine.low %v245_v36, %v253_v37  ;;  %v2452_v34 = vcombine.high %v356_v28, %v364_v29  ;;  %v372_v36 = vld [vmem:[%s2954_s7 + $0x610] sm:$0xff] }
  0x8b   : > { %v2358_v49 = vcombine.high %v261_v44, %v269_v45  ;;  %v380_v37 = vld [vmem:[%s2954_s7 + $0x650] sm:$0xff] }
  0x8d   : > { %1748 = vmatpush1.bf16.msra.mxu0 %v2479_v52  ;;  %1789 = vmatpush1.bf16.msra.mxu1 %v2481_v54  ;;  %v277_v52 = vld [vmem:[%s2954_s7 + $0x318] sm:$0xff] }
  0x8e   : > { %1749 = vmatprep.subr.bf16.mxu0 %v2496_v55  ;;  %1790 = vmatprep.subr.bf16.mxu1 %v2498_v56  ;;  %v285_v54 = vld [vmem:[%s2954_s7 + $0x358] sm:$0xff]  ;;  %v2355_v55 = vcombine.low %v260_v42, %v268_v43  ;;  %v2357_v56 = vcombine.low %v261_v44, %v269_v45  ;;  %v2468_v42 = vcombine.high %v372_v36, %v380_v37  ;;  %v388_v44 = vld [vmem:[%s2954_s7 + $0x690] sm:$0xff] }
  0x8f   : > { %v2374_v59 = vcombine.high %v277_v52, %v285_v54  ;;  %v396_v45 = vld [vmem:[%s2954_s7 + $0x6d0] sm:$0xff] }
  0x91   : > { %1750 = vmatpush1.bf16.msra.mxu0 %v2495_v62  ;;  %1791 = vmatpush1.bf16.msra.mxu1 %v2497_v63  ;;  %v293_v62 = vld [vmem:[%s2954_s7 + $0x398] sm:$0xff] }
  0x92   : > { %1751 = vmatprep.subr.bf16.mxu0 %v2512_v0  ;;  %1792 = vmatprep.subr.bf16.mxu1 %v2514_v1  ;;  %v301_v63 = vld [vmem:[%s2954_s7 + $0x3d8] sm:$0xff]  ;;  %v2371_v0 = vcombine.low %v276_v50, %v284_v51  ;;  %v2373_v1 = vcombine.low %v277_v52, %v285_v54  ;;  %v2484_v50 = vcombine.high %v388_v44, %v396_v45  ;;  %v404_v52 = vld [vmem:[%s2954_s7 + $0x710] sm:$0xff] }
  0x93   : > { %v2390_v3 = vcombine.high %v293_v62, %v301_v63  ;;  %v412_v54 = vld [vmem:[%s2954_s7 + $0x750] sm:$0xff] }
  0x95   : > { %1752 = vmatpush1.bf16.msra.mxu0 %v2511_v6  ;;  %1793 = vmatpush1.bf16.msra.mxu1 %v2513_v7  ;;  %v309_v6 = vld [vmem:[%s2954_s7 + $0x418] sm:$0xff] }
  0x96   : > { %1803 = vmatprep.subr.bf16.mxu0 %v2276_v8  ;;  %1844 = vmatprep.subr.bf16.mxu1 %v2278_v9  ;;  %v317_v7 = vld [vmem:[%s2954_s7 + $0x458] sm:$0xff]  ;;  %v2387_v8 = vcombine.low %v292_v60, %v300_v61  ;;  %v2389_v9 = vcombine.low %v293_v62, %v301_v63  ;;  %v2500_v60 = vcombine.high %v404_v52, %v412_v54  ;;  %v420_v62 = vld [vmem:[%s2954_s7 + $0x790] sm:$0xff] }
  0x97   : > { %v2406_v11 = vcombine.high %v309_v6, %v317_v7  ;;  %v428_v63 = vld [vmem:[%s2954_s7 + $0x7d0] sm:$0xff] }
  0x98   : > { %1754 = vmatmul.mubr.bf16.vlgmr.msra.gmra.mrb[0].mxu0 %v3040_v12  ;;  %1795 = vmatmul.mubr.bf16.vlgmr.msra.gmra.mrb[0].mxu1 %v3040_v12 }
  0x99   : > { %1804 = vmatpush1.bf16.msra.mxu0 %v2275_v15  ;;  %1845 = vmatpush1.bf16.msra.mxu1 %v2277_v16  ;;  %v325_v15 = vld [vmem:[%s2954_s7 + $0x498] sm:$0xff] }
  0x9a   : > { %1805 = vmatprep.subr.bf16.mxu0 %v2292_v17  ;;  %1846 = vmatprep.subr.bf16.mxu1 %v2294_v18  ;;  %v333_v16 = vld [vmem:[%s2954_s7 + $0x4d8] sm:$0xff]  ;;  %v2403_v17 = vcombine.low %v308_v4, %v316_v5  ;;  %v2405_v18 = vcombine.low %v309_v6, %v317_v7  ;;  %v2516_v4 = vcombine.high %v420_v62, %v428_v63  ;;  %v182_v6 = vld [vmem:[%s2954_s7 + $0x20] sm:$0xff] }
  0x9b   : > { %1835 = vmatprep.mubr.bf16.mxu0 %v2994_v57  ;;  %1876 = vmatprep.mubr.bf16.mxu1 %v2994_v57  ;;  %v2422_v20 = vcombine.high %v325_v15, %v333_v16  ;;  %v190_v7 = vld [vmem:[%s2954_s7 + $0x60] sm:$0xff] }
  0x9d   : > { %1806 = vmatpush1.bf16.msra.mxu0 %v2291_v22  ;;  %1847 = vmatpush1.bf16.msra.mxu1 %v2293_v23  ;;  %v341_v22 = vld [vmem:[%s2954_s7 + $0x518] sm:$0xff] }
  0x9e   : > { %1807 = vmatprep.subr.bf16.mxu0 %v2308_v24  ;;  %1848 = vmatprep.subr.bf16.mxu1 %v2310_v25  ;;  %v349_v23 = vld [vmem:[%s2954_s7 + $0x558] sm:$0xff]  ;;  %v2419_v24 = vcombine.low %v324_v13, %v332_v14  ;;  %v2421_v25 = vcombine.low %v325_v15, %v333_v16  ;;  %v2280_v13 = vcombine.high %v182_v6, %v190_v7  ;;  %v198_v15 = vld [vmem:[%s2954_s7 + $0xa0] sm:$0xff] }
  0x9f   : > { %v2438_v27 = vcombine.high %v341_v22, %v349_v23  ;;  %v206_v16 = vld [vmem:[%s2954_s7 + $0xe0] sm:$0xff] }
  0xa1   : > { %1808 = vmatpush1.bf16.msra.mxu0 %v2307_v30  ;;  %1849 = vmatpush1.bf16.msra.mxu1 %v2309_v31  ;;  %v357_v30 = vld [vmem:[%s2954_s7 + $0x598] sm:$0xff] }
  0xa2   : > { %1809 = vmatprep.subr.bf16.mxu0 %v2324_v32  ;;  %1850 = vmatprep.subr.bf16.mxu1 %v2326_v33  ;;  %v365_v31 = vld [vmem:[%s2954_s7 + $0x5d8] sm:$0xff]  ;;  %v2435_v32 = vcombine.low %v340_v53, %v348_v21  ;;  %v2437_v33 = vcombine.low %v341_v22, %v349_v23  ;;  %v2296_v53 = vcombine.high %v198_v15, %v206_v16  ;;  %v214_v22 = vld [vmem:[%s2954_s7 + $0x120] sm:$0xff] }
  0xa3   : > { %v2454_v35 = vcombine.high %v357_v30, %v365_v31  ;;  %v222_v23 = vld [vmem:[%s2954_s7 + $0x160] sm:$0xff] }
  0xa5   : > { %1810 = vmatpush1.bf16.msra.mxu0 %v2323_v38  ;;  %1851 = vmatpush1.bf16.msra.mxu1 %v2325_v39  ;;  %v373_v38 = vld [vmem:[%s2954_s7 + $0x618] sm:$0xff] }
  0xa6   : > { %1811 = vmatprep.subr.bf16.mxu0 %v2340_v40  ;;  %1852 = vmatprep.subr.bf16.mxu1 %v2342_v41  ;;  %v381_v39 = vld [vmem:[%s2954_s7 + $0x658] sm:$0xff]  ;;  %v2451_v40 = vcombine.low %v356_v28, %v364_v29  ;;  %v2453_v41 = vcombine.low %v357_v30, %v365_v31  ;;  %v2312_v28 = vcombine.high %v214_v22, %v222_v23  ;;  %v230_v30 = vld [vmem:[%s2954_s7 + $0x1a0] sm:$0xff] }
  0xa7   : > { %v2470_v43 = vcombine.high %v373_v38, %v381_v39  ;;  %v238_v31 = vld [vmem:[%s2954_s7 + $0x1e0] sm:$0xff] }
  0xa9   : > { %1812 = vmatpush1.bf16.msra.mxu0 %v2339_v46  ;;  %1853 = vmatpush1.bf16.msra.mxu1 %v2341_v47  ;;  %v389_v46 = vld [vmem:[%s2954_s7 + $0x698] sm:$0xff] }
  0xaa   : > { %1813 = vmatprep.subr.bf16.mxu0 %v2356_v48  ;;  %1854 = vmatprep.subr.bf16.mxu1 %v2358_v49  ;;  %v397_v47 = vld [vmem:[%s2954_s7 + $0x6d8] sm:$0xff]  ;;  %v2467_v48 = vcombine.low %v372_v36, %v380_v37  ;;  %v2469_v49 = vcombine.low %v373_v38, %v381_v39  ;;  %v2328_v36 = vcombine.high %v230_v30, %v238_v31  ;;  %v246_v38 = vld [vmem:[%s2954_s7 + $0x220] sm:$0xff] }
  0xab   : > { %v2486_v51 = vcombine.high %v389_v46, %v397_v47  ;;  %v254_v39 = vld [vmem:[%s2954_s7 + $0x260] sm:$0xff] }
  0xad   : > { %1814 = vmatpush1.bf16.msra.mxu0 %v2355_v55  ;;  %1855 = vmatpush1.bf16.msra.mxu1 %v2357_v56  ;;  %v405_v55 = vld [vmem:[%s2954_s7 + $0x718] sm:$0xff] }
  0xae   : > { %1815 = vmatprep.subr.bf16.mxu0 %v2372_v58  ;;  %1856 = vmatprep.subr.bf16.mxu1 %v2374_v59  ;;  %v413_v56 = vld [vmem:[%s2954_s7 + $0x758] sm:$0xff]  ;;  %v2483_v58 = vcombine.low %v388_v44, %v396_v45  ;;  %v2485_v59 = vcombine.low %v389_v46, %v397_v47  ;;  %v2344_v44 = vcombine.high %v246_v38, %v254_v39  ;;  %v262_v46 = vld [vmem:[%s2954_s7 + $0x2a0] sm:$0xff] }
  0xaf   : > { %v2502_v61 = vcombine.high %v405_v55, %v413_v56  ;;  %v270_v47 = vld [vmem:[%s2954_s7 + $0x2e0] sm:$0xff] }
  0xb1   : > { %1816 = vmatpush1.bf16.msra.mxu0 %v2371_v0  ;;  %1857 = vmatpush1.bf16.msra.mxu1 %v2373_v1  ;;  %v421_v0 = vld [vmem:[%s2954_s7 + $0x798] sm:$0xff] }
  0xb2   : > { %1817 = vmatprep.subr.bf16.mxu0 %v2388_v2  ;;  %1858 = vmatprep.subr.bf16.mxu1 %v2390_v3  ;;  %v429_v1 = vld [vmem:[%s2954_s7 + $0x7d8] sm:$0xff]  ;;  %v2499_v2 = vcombine.low %v404_v52, %v412_v54  ;;  %v2501_v3 = vcombine.low %v405_v55, %v413_v56  ;;  %v2360_v52 = vcombine.high %v262_v46, %v270_v47  ;;  %v278_v55 = vld [vmem:[%s2954_s7 + $0x320] sm:$0xff] }
  0xb3   : > { %v2518_v5 = vcombine.high %v421_v0, %v429_v1  ;;  %v286_v56 = vld [vmem:[%s2954_s7 + $0x360] sm:$0xff] }
  0xb5   : > { %1818 = vmatpush1.bf16.msra.mxu0 %v2387_v8  ;;  %1859 = vmatpush1.bf16.msra.mxu1 %v2389_v9  ;;  %v183_v8 = vld [vmem:[%s2954_s7 + $0x28] sm:$0xff] }
  0xb6   : > { %1819 = vmatprep.subr.bf16.mxu0 %v2404_v10  ;;  %1860 = vmatprep.subr.bf16.mxu1 %v2406_v11  ;;  %v191_v9 = vld [vmem:[%s2954_s7 + $0x68] sm:$0xff]  ;;  %v2515_v10 = vcombine.low %v420_v62, %v428_v63  ;;  %v2517_v11 = vcombine.low %v421_v0, %v429_v1  ;;  %v2376_v62 = vcombine.high %v278_v55, %v286_v56  ;;  %v294_v0 = vld [vmem:[%s2954_s7 + $0x3a0] sm:$0xff] }
  0xb7   : > { %v2282_v14 = vcombine.high %v183_v8, %v191_v9  ;;  %v302_v1 = vld [vmem:[%s2954_s7 + $0x3e0] sm:$0xff] }
  0xb9   : > { %1820 = vmatpush1.bf16.msra.mxu0 %v2403_v17  ;;  %1861 = vmatpush1.bf16.msra.mxu1 %v2405_v18  ;;  %v199_v17 = vld [vmem:[%s2954_s7 + $0xa8] sm:$0xff] }
  0xba   : > { %1821 = vmatprep.subr.bf16.mxu0 %v2420_v19  ;;  %1862 = vmatprep.subr.bf16.mxu1 %v2422_v20  ;;  %v207_v18 = vld [vmem:[%s2954_s7 + $0xe8] sm:$0xff]  ;;  %v2279_v19 = vcombine.low %v182_v6, %v190_v7  ;;  %v2281_v20 = vcombine.low %v183_v8, %v191_v9  ;;  %v2392_v6 = vcombine.high %v294_v0, %v302_v1  ;;  %v310_v8 = vld [vmem:[%s2954_s7 + $0x420] sm:$0xff] }
  0xbb   : > { %v2298_v21 = vcombine.high %v199_v17, %v207_v18  ;;  %v318_v9 = vld [vmem:[%s2954_s7 + $0x460] sm:$0xff] }
  0xbd   : > { %1822 = vmatpush1.bf16.msra.mxu0 %v2419_v24  ;;  %1863 = vmatpush1.bf16.msra.mxu1 %v2421_v25  ;;  %v215_v24 = vld [vmem:[%s2954_s7 + $0x128] sm:$0xff] }
  0xbe   : > { %1823 = vmatprep.subr.bf16.mxu0 %v2436_v26  ;;  %1864 = vmatprep.subr.bf16.mxu1 %v2438_v27  ;;  %v223_v25 = vld [vmem:[%s2954_s7 + $0x168] sm:$0xff]  ;;  %v2295_v26 = vcombine.low %v198_v15, %v206_v16  ;;  %v2297_v27 = vcombine.low %v199_v17, %v207_v18  ;;  %v2408_v15 = vcombine.high %v310_v8, %v318_v9  ;;  %v326_v17 = vld [vmem:[%s2954_s7 + $0x4a0] sm:$0xff] }
  0xbf   : > { %v2314_v29 = vcombine.high %v215_v24, %v223_v25  ;;  %v334_v18 = vld [vmem:[%s2954_s7 + $0x4e0] sm:$0xff] }
  0xc1   : > { %1824 = vmatpush1.bf16.msra.mxu0 %v2435_v32  ;;  %1865 = vmatpush1.bf16.msra.mxu1 %v2437_v33  ;;  %v231_v32 = vld [vmem:[%s2954_s7 + $0x1a8] sm:$0xff] }
  0xc2   : > { %1825 = vmatprep.subr.bf16.mxu0 %v2452_v34  ;;  %1866 = vmatprep.subr.bf16.mxu1 %v2454_v35  ;;  %v239_v33 = vld [vmem:[%s2954_s7 + $0x1e8] sm:$0xff]  ;;  %v2311_v34 = vcombine.low %v214_v22, %v222_v23  ;;  %v2313_v35 = vcombine.low %v215_v24, %v223_v25  ;;  %v2424_v22 = vcombine.high %v326_v17, %v334_v18  ;;  %v342_v24 = vld [vmem:[%s2954_s7 + $0x520] sm:$0xff] }
  0xc3   : > { %v2330_v37 = vcombine.high %v231_v32, %v239_v33  ;;  %v350_v25 = vld [vmem:[%s2954_s7 + $0x560] sm:$0xff] }
  0xc5   : > { %1826 = vmatpush1.bf16.msra.mxu0 %v2451_v40  ;;  %1867 = vmatpush1.bf16.msra.mxu1 %v2453_v41  ;;  %v247_v40 = vld [vmem:[%s2954_s7 + $0x228] sm:$0xff] }
  0xc6   : > { %1827 = vmatprep.subr.bf16.mxu0 %v2468_v42  ;;  %1868 = vmatprep.subr.bf16.mxu1 %v2470_v43  ;;  %v255_v41 = vld [vmem:[%s2954_s7 + $0x268] sm:$0xff]  ;;  %v2327_v42 = vcombine.low %v230_v30, %v238_v31  ;;  %v2329_v43 = vcombine.low %v231_v32, %v239_v33  ;;  %v2440_v30 = vcombine.high %v342_v24, %v350_v25  ;;  %v358_v32 = vld [vmem:[%s2954_s7 + $0x5a0] sm:$0xff] }
  0xc7   : > { %v2346_v45 = vcombine.high %v247_v40, %v255_v41  ;;  %v366_v33 = vld [vmem:[%s2954_s7 + $0x5e0] sm:$0xff] }
  0xc9   : > { %1828 = vmatpush1.bf16.msra.mxu0 %v2467_v48  ;;  %1869 = vmatpush1.bf16.msra.mxu1 %v2469_v49  ;;  %v263_v48 = vld [vmem:[%s2954_s7 + $0x2a8] sm:$0xff] }
  0xca   : > { %1829 = vmatprep.subr.bf16.mxu0 %v2484_v50  ;;  %1870 = vmatprep.subr.bf16.mxu1 %v2486_v51  ;;  %v271_v49 = vld [vmem:[%s2954_s7 + $0x2e8] sm:$0xff]  ;;  %v2343_v50 = vcombine.low %v246_v38, %v254_v39  ;;  %v2345_v51 = vcombine.low %v247_v40, %v255_v41  ;;  %v2456_v38 = vcombine.high %v358_v32, %v366_v33  ;;  %v374_v40 = vld [vmem:[%s2954_s7 + $0x620] sm:$0xff] }
  0xcb   : > { %v2362_v54 = vcombine.high %v263_v48, %v271_v49  ;;  %v382_v41 = vld [vmem:[%s2954_s7 + $0x660] sm:$0xff] }
  0xcd   : > { %1830 = vmatpush1.bf16.msra.mxu0 %v2483_v58  ;;  %1871 = vmatpush1.bf16.msra.mxu1 %v2485_v59  ;;  %v279_v58 = vld [vmem:[%s2954_s7 + $0x328] sm:$0xff] }
  0xce   : > { %1831 = vmatprep.subr.bf16.mxu0 %v2500_v60  ;;  %1872 = vmatprep.subr.bf16.mxu1 %v2502_v61  ;;  %v287_v59 = vld [vmem:[%s2954_s7 + $0x368] sm:$0xff]  ;;  %v2359_v60 = vcombine.low %v262_v46, %v270_v47  ;;  %v2361_v61 = vcombine.low %v263_v48, %v271_v49  ;;  %v2472_v46 = vcombine.high %v374_v40, %v382_v41  ;;  %v390_v48 = vld [vmem:[%s2954_s7 + $0x6a0] sm:$0xff] }
  0xcf   : > { %v2378_v63 = vcombine.high %v279_v58, %v287_v59  ;;  %v398_v49 = vld [vmem:[%s2954_s7 + $0x6e0] sm:$0xff] }
  0xd1   : > { %1832 = vmatpush1.bf16.msra.mxu0 %v2499_v2  ;;  %1873 = vmatpush1.bf16.msra.mxu1 %v2501_v3  ;;  %v295_v2 = vld [vmem:[%s2954_s7 + $0x3a8] sm:$0xff] }
  0xd2   : > { %1833 = vmatprep.subr.bf16.mxu0 %v2516_v4  ;;  %1874 = vmatprep.subr.bf16.mxu1 %v2518_v5  ;;  %v303_v3 = vld [vmem:[%s2954_s7 + $0x3e8] sm:$0xff]  ;;  %v2375_v4 = vcombine.low %v278_v55, %v286_v56  ;;  %v2377_v5 = vcombine.low %v279_v58, %v287_v59  ;;  %v2488_v55 = vcombine.high %v390_v48, %v398_v49  ;;  %v406_v58 = vld [vmem:[%s2954_s7 + $0x720] sm:$0xff] }
  0xd3   : > { %v2394_v7 = vcombine.high %v295_v2, %v303_v3  ;;  %v414_v59 = vld [vmem:[%s2954_s7 + $0x760] sm:$0xff] }
  0xd5   : > { %1834 = vmatpush1.bf16.msra.mxu0 %v2515_v10  ;;  %1875 = vmatpush1.bf16.msra.mxu1 %v2517_v11  ;;  %v311_v10 = vld [vmem:[%s2954_s7 + $0x428] sm:$0xff] }
  0xd6   : > { %1885 = vmatprep.subr.bf16.mxu0 %v2280_v13  ;;  %1926 = vmatprep.subr.bf16.mxu1 %v2282_v14  ;;  %v319_v11 = vld [vmem:[%s2954_s7 + $0x468] sm:$0xff]  ;;  %v2391_v13 = vcombine.low %v294_v0, %v302_v1  ;;  %v2393_v14 = vcombine.low %v295_v2, %v303_v3  ;;  %v2504_v0 = vcombine.high %v406_v58, %v414_v59  ;;  %v422_v2 = vld [vmem:[%s2954_s7 + $0x7a0] sm:$0xff] }
  0xd7   : > { %v2410_v16 = vcombine.high %v311_v10, %v319_v11  ;;  %v430_v3 = vld [vmem:[%s2954_s7 + $0x7e0] sm:$0xff] }
  0xd8   : > { %1836 = vmatmul.mubr.bf16.vlgmr.msra.gmra.mrb[4].mxu0 %v3040_v12  ;;  %1877 = vmatmul.mubr.bf16.vlgmr.msra.gmra.mrb[4].mxu1 %v3040_v12 }
  0xd9   : > { %1886 = vmatpush1.bf16.msra.mxu0 %v2279_v19  ;;  %1927 = vmatpush1.bf16.msra.mxu1 %v2281_v20  ;;  %v327_v19 = vld [vmem:[%s2954_s7 + $0x4a8] sm:$0xff] }
  0xda   : > { %1887 = vmatprep.subr.bf16.mxu0 %v2296_v53  ;;  %1928 = vmatprep.subr.bf16.mxu1 %v2298_v21  ;;  %v335_v20 = vld [vmem:[%s2954_s7 + $0x4e8] sm:$0xff]  ;;  %v2407_v53 = vcombine.low %v310_v8, %v318_v9  ;;  %v2409_v21 = vcombine.low %v311_v10, %v319_v11  ;;  %v2520_v8 = vcombine.high %v422_v2, %v430_v3  ;;  %v184_v10 = vld [vmem:[%s2954_s7 + $0x30] sm:$0xff] }
  0xdb   : > { %1917 = vmatprep.mubr.bf16.mxu0 %v2994_v57  ;;  %1958 = vmatprep.mubr.bf16.mxu1 %v2994_v57  ;;  %v2426_v23 = vcombine.high %v327_v19, %v335_v20  ;;  %v192_v11 = vld [vmem:[%s2954_s7 + $0x70] sm:$0xff] }
  0xdd   : > { %1888 = vmatpush1.bf16.msra.mxu0 %v2295_v26  ;;  %1929 = vmatpush1.bf16.msra.mxu1 %v2297_v27  ;;  %v343_v26 = vld [vmem:[%s2954_s7 + $0x528] sm:$0xff] }
  0xde   : > { %1889 = vmatprep.subr.bf16.mxu0 %v2312_v28  ;;  %1930 = vmatprep.subr.bf16.mxu1 %v2314_v29  ;;  %v351_v27 = vld [vmem:[%s2954_s7 + $0x568] sm:$0xff]  ;;  %v2423_v28 = vcombine.low %v326_v17, %v334_v18  ;;  %v2425_v29 = vcombine.low %v327_v19, %v335_v20  ;;  %v2284_v17 = vcombine.high %v184_v10, %v192_v11  ;;  %v200_v19 = vld [vmem:[%s2954_s7 + $0xb0] sm:$0xff] }
  0xdf   : > { %v2442_v31 = vcombine.high %v343_v26, %v351_v27  ;;  %v208_v20 = vld [vmem:[%s2954_s7 + $0xf0] sm:$0xff] }
  0xe1   : > { %1890 = vmatpush1.bf16.msra.mxu0 %v2311_v34  ;;  %1931 = vmatpush1.bf16.msra.mxu1 %v2313_v35  ;;  %v359_v34 = vld [vmem:[%s2954_s7 + $0x5a8] sm:$0xff] }
  0xe2   : > { %1891 = vmatprep.subr.bf16.mxu0 %v2328_v36  ;;  %1932 = vmatprep.subr.bf16.mxu1 %v2330_v37  ;;  %v367_v35 = vld [vmem:[%s2954_s7 + $0x5e8] sm:$0xff]  ;;  %v2439_v36 = vcombine.low %v342_v24, %v350_v25  ;;  %v2441_v37 = vcombine.low %v343_v26, %v351_v27  ;;  %v2300_v24 = vcombine.high %v200_v19, %v208_v20  ;;  %v216_v26 = vld [vmem:[%s2954_s7 + $0x130] sm:$0xff] }
  0xe3   : > { %v2458_v39 = vcombine.high %v359_v34, %v367_v35  ;;  %v224_v27 = vld [vmem:[%s2954_s7 + $0x170] sm:$0xff] }
  0xe5   : > { %1892 = vmatpush1.bf16.msra.mxu0 %v2327_v42  ;;  %1933 = vmatpush1.bf16.msra.mxu1 %v2329_v43  ;;  %v375_v42 = vld [vmem:[%s2954_s7 + $0x628] sm:$0xff] }
  0xe6   : > { %1893 = vmatprep.subr.bf16.mxu0 %v2344_v44  ;;  %1934 = vmatprep.subr.bf16.mxu1 %v2346_v45  ;;  %v383_v43 = vld [vmem:[%s2954_s7 + $0x668] sm:$0xff]  ;;  %v2455_v44 = vcombine.low %v358_v32, %v366_v33  ;;  %v2457_v45 = vcombine.low %v359_v34, %v367_v35  ;;  %v2316_v32 = vcombine.high %v216_v26, %v224_v27  ;;  %v232_v34 = vld [vmem:[%s2954_s7 + $0x1b0] sm:$0xff] }
  0xe7   : > { %v2474_v47 = vcombine.high %v375_v42, %v383_v43  ;;  %v240_v35 = vld [vmem:[%s2954_s7 + $0x1f0] sm:$0xff] }
  0xe9   : > { %1894 = vmatpush1.bf16.msra.mxu0 %v2343_v50  ;;  %1935 = vmatpush1.bf16.msra.mxu1 %v2345_v51  ;;  %v391_v50 = vld [vmem:[%s2954_s7 + $0x6a8] sm:$0xff] }
  0xea   : > { %1895 = vmatprep.subr.bf16.mxu0 %v2360_v52  ;;  %1936 = vmatprep.subr.bf16.mxu1 %v2362_v54  ;;  %v399_v51 = vld [vmem:[%s2954_s7 + $0x6e8] sm:$0xff]  ;;  %v2471_v52 = vcombine.low %v374_v40, %v382_v41  ;;  %v2473_v54 = vcombine.low %v375_v42, %v383_v43  ;;  %v2332_v40 = vcombine.high %v232_v34, %v240_v35  ;;  %v248_v42 = vld [vmem:[%s2954_s7 + $0x230] sm:$0xff] }
  0xeb   : > { %v2490_v56 = vcombine.high %v391_v50, %v399_v51  ;;  %v256_v43 = vld [vmem:[%s2954_s7 + $0x270] sm:$0xff] }
  0xed   : > { %1896 = vmatpush1.bf16.msra.mxu0 %v2359_v60  ;;  %1937 = vmatpush1.bf16.msra.mxu1 %v2361_v61  ;;  %v407_v60 = vld [vmem:[%s2954_s7 + $0x728] sm:$0xff] }
  0xee   : > { %1897 = vmatprep.subr.bf16.mxu0 %v2376_v62  ;;  %1938 = vmatprep.subr.bf16.mxu1 %v2378_v63  ;;  %v415_v61 = vld [vmem:[%s2954_s7 + $0x768] sm:$0xff]  ;;  %v2487_v62 = vcombine.low %v390_v48, %v398_v49  ;;  %v2489_v63 = vcombine.low %v391_v50, %v399_v51  ;;  %v264_v49 = vld [vmem:[%s2954_s7 + $0x2b0] sm:$0xff]  ;;  %v265_v51 = vld [vmem:[%s2954_s7 + $0x2b8] sm:$0xff] }
  0xef   : > { %v2506_v1 = vcombine.high %v407_v60, %v415_v61  ;;  %v272_v50 = vld [vmem:[%s2954_s7 + $0x2f0] sm:$0xff] }
  0xf1   : > { %1898 = vmatpush1.bf16.msra.mxu0 %v2375_v4  ;;  %1939 = vmatpush1.bf16.msra.mxu1 %v2377_v5  ;;  %v423_v4 = vld [vmem:[%s2954_s7 + $0x7a8] sm:$0xff] }
  0xf2   : > { %1899 = vmatprep.subr.bf16.mxu0 %v2392_v6  ;;  %1940 = vmatprep.subr.bf16.mxu1 %v2394_v7  ;;  %v431_v5 = vld [vmem:[%s2954_s7 + $0x7e8] sm:$0xff]  ;;  %v2503_v6 = vcombine.low %v406_v58, %v414_v59  ;;  %v2505_v7 = vcombine.low %v407_v60, %v415_v61  ;;  %v280_v59 = vld [vmem:[%s2954_s7 + $0x330] sm:$0xff]  ;;  %v281_v61 = vld [vmem:[%s2954_s7 + $0x338] sm:$0xff] }
  0xf3   : > { %v2522_v9 = vcombine.high %v423_v4, %v431_v5  ;;  %v288_v60 = vld [vmem:[%s2954_s7 + $0x370] sm:$0xff] }
  0xf5   : > { %1900 = vmatpush1.bf16.msra.mxu0 %v2391_v13  ;;  %1941 = vmatpush1.bf16.msra.mxu1 %v2393_v14  ;;  %v185_v13 = vld [vmem:[%s2954_s7 + $0x38] sm:$0xff] }
  0xf6   : > { %1901 = vmatprep.subr.bf16.mxu0 %v2408_v15  ;;  %1942 = vmatprep.subr.bf16.mxu1 %v2410_v16  ;;  %v193_v14 = vld [vmem:[%s2954_s7 + $0x78] sm:$0xff]  ;;  %v2519_v15 = vcombine.low %v422_v2, %v430_v3  ;;  %v2521_v16 = vcombine.low %v423_v4, %v431_v5  ;;  %v296_v3 = vld [vmem:[%s2954_s7 + $0x3b0] sm:$0xff] }
  0xf7   : > { %v2286_v18 = vcombine.high %v185_v13, %v193_v14  ;;  %v304_v4 = vld [vmem:[%s2954_s7 + $0x3f0] sm:$0xff]  ;;  %v297_v5 = vld [vmem:[%s2954_s7 + $0x3b8] sm:$0xff] }
  0xf9   : > { %1902 = vmatpush1.bf16.msra.mxu0 %v2407_v53  ;;  %1943 = vmatpush1.bf16.msra.mxu1 %v2409_v21  ;;  %v201_v53 = vld [vmem:[%s2954_s7 + $0xb8] sm:$0xff] }
  0xfa   : > { %1903 = vmatprep.subr.bf16.mxu0 %v2424_v22  ;;  %1944 = vmatprep.subr.bf16.mxu1 %v2426_v23  ;;  %v209_v21 = vld [vmem:[%s2954_s7 + $0xf8] sm:$0xff]  ;;  %v2283_v22 = vcombine.low %v184_v10, %v192_v11  ;;  %v2285_v23 = vcombine.low %v185_v13, %v193_v14  ;;  %v312_v11 = vld [vmem:[%s2954_s7 + $0x430] sm:$0xff] }
  0xfb   : > { %v2302_v25 = vcombine.high %v201_v53, %v209_v21  ;;  %v320_v13 = vld [vmem:[%s2954_s7 + $0x470] sm:$0xff]  ;;  %v313_v14 = vld [vmem:[%s2954_s7 + $0x438] sm:$0xff] }
  0xfd   : > { %1904 = vmatpush1.bf16.msra.mxu0 %v2423_v28  ;;  %1945 = vmatpush1.bf16.msra.mxu1 %v2425_v29  ;;  %v217_v28 = vld [vmem:[%s2954_s7 + $0x138] sm:$0xff] }
  0xfe   : > { %1905 = vmatprep.subr.bf16.mxu0 %v2440_v30  ;;  %1946 = vmatprep.subr.bf16.mxu1 %v2442_v31  ;;  %v225_v29 = vld [vmem:[%s2954_s7 + $0x178] sm:$0xff]  ;;  %v2299_v30 = vcombine.low %v200_v19, %v208_v20  ;;  %v2301_v31 = vcombine.low %v201_v53, %v209_v21  ;;  %v328_v20 = vld [vmem:[%s2954_s7 + $0x4b0] sm:$0xff] }
  0xff   : > { %v2318_v33 = vcombine.high %v217_v28, %v225_v29  ;;  %v336_v53 = vld [vmem:[%s2954_s7 + $0x4f0] sm:$0xff]  ;;  %v329_v21 = vld [vmem:[%s2954_s7 + $0x4b8] sm:$0xff] }
 0x101   : > { %1906 = vmatpush1.bf16.msra.mxu0 %v2439_v36  ;;  %1947 = vmatpush1.bf16.msra.mxu1 %v2441_v37  ;;  %v233_v36 = vld [vmem:[%s2954_s7 + $0x1b8] sm:$0xff] }
 0x102   : > { %1907 = vmatprep.subr.bf16.mxu0 %v2456_v38  ;;  %1948 = vmatprep.subr.bf16.mxu1 %v2458_v39  ;;  %v241_v37 = vld [vmem:[%s2954_s7 + $0x1f8] sm:$0xff]  ;;  %v2315_v38 = vcombine.low %v216_v26, %v224_v27  ;;  %v2317_v39 = vcombine.low %v217_v28, %v225_v29  ;;  %v344_v27 = vld [vmem:[%s2954_s7 + $0x530] sm:$0xff] }
 0x103   : > { %v2334_v41 = vcombine.high %v233_v36, %v241_v37  ;;  %v352_v28 = vld [vmem:[%s2954_s7 + $0x570] sm:$0xff]  ;;  %v345_v29 = vld [vmem:[%s2954_s7 + $0x538] sm:$0xff] }
 0x105   : > { %1908 = vmatpush1.bf16.msra.mxu0 %v2455_v44  ;;  %1949 = vmatpush1.bf16.msra.mxu1 %v2457_v45  ;;  %v249_v44 = vld [vmem:[%s2954_s7 + $0x238] sm:$0xff] }
 0x106   : > { %1909 = vmatprep.subr.bf16.mxu0 %v2472_v46  ;;  %1950 = vmatprep.subr.bf16.mxu1 %v2474_v47  ;;  %v257_v45 = vld [vmem:[%s2954_s7 + $0x278] sm:$0xff]  ;;  %v2331_v46 = vcombine.low %v232_v34, %v240_v35  ;;  %v2348_v47 = vcombine.high %v248_v42, %v256_v43  ;;  %v360_v35 = vld [vmem:[%s2954_s7 + $0x5b0] sm:$0xff] }
 0x107   : > { %v2350_v48 = vcombine.high %v249_v44, %v257_v45 }
 0x109   : > { %1910 = vmatpush1.bf16.msra.mxu0 %v2471_v52  ;;  %1951 = vmatpush1.bf16.msra.mxu1 %v2473_v54  ;;  %v273_v52 = vld [vmem:[%s2954_s7 + $0x2f8] sm:$0xff]  ;;  %v2347_v54 = vcombine.low %v248_v42, %v256_v43  ;;  %v376_v43 = vld [vmem:[%s2954_s7 + $0x630] sm:$0xff] }
 0x10a   : > { %1911 = vmatprep.subr.bf16.mxu0 %v2488_v55  ;;  %1952 = vmatprep.subr.bf16.mxu1 %v2490_v56  ;;  %v2349_v55 = vcombine.low %v249_v44, %v257_v45  ;;  %v2364_v56 = vcombine.high %v264_v49, %v272_v50  ;;  %v2366_v58 = vcombine.high %v265_v51, %v273_v52  ;;  %v384_v44 = vld [vmem:[%s2954_s7 + $0x670] sm:$0xff]  ;;  %v377_v45 = vld [vmem:[%s2954_s7 + $0x638] sm:$0xff] }
 0x10d   : > { %1912 = vmatpush1.bf16.msra.mxu0 %v2487_v62  ;;  %1953 = vmatpush1.bf16.msra.mxu1 %v2489_v63  ;;  %v289_v62 = vld [vmem:[%s2954_s7 + $0x378] sm:$0xff]  ;;  %v2363_v63 = vcombine.low %v264_v49, %v272_v50  ;;  %v392_v50 = vld [vmem:[%s2954_s7 + $0x6b0] sm:$0xff] }
 0x10e   : > { %1913 = vmatprep.subr.bf16.mxu0 %v2504_v0  ;;  %1954 = vmatprep.subr.bf16.mxu1 %v2506_v1  ;;  %v2365_v0 = vcombine.low %v265_v51, %v273_v52  ;;  %v2380_v1 = vcombine.high %v280_v59, %v288_v60  ;;  %v2382_v2 = vcombine.high %v281_v61, %v289_v62  ;;  %v400_v51 = vld [vmem:[%s2954_s7 + $0x6f0] sm:$0xff]  ;;  %v393_v52 = vld [vmem:[%s2954_s7 + $0x6b8] sm:$0xff] }
 0x111   : > { %1914 = vmatpush1.bf16.msra.mxu0 %v2503_v6  ;;  %1955 = vmatpush1.bf16.msra.mxu1 %v2505_v7  ;;  %v305_v6 = vld [vmem:[%s2954_s7 + $0x3f8] sm:$0xff]  ;;  %v2379_v7 = vcombine.low %v280_v59, %v288_v60  ;;  %v408_v60 = vld [vmem:[%s2954_s7 + $0x730] sm:$0xff] }
 0x112   : > { %1915 = vmatprep.subr.bf16.mxu0 %v2520_v8  ;;  %1956 = vmatprep.subr.bf16.mxu1 %v2522_v9  ;;  %v2381_v8 = vcombine.low %v281_v61, %v289_v62  ;;  %v2396_v9 = vcombine.high %v296_v3, %v304_v4  ;;  %v2398_v10 = vcombine.high %v297_v5, %v305_v6  ;;  %v416_v61 = vld [vmem:[%s2954_s7 + $0x770] sm:$0xff]  ;;  %v409_v62 = vld [vmem:[%s2954_s7 + $0x738] sm:$0xff] }
 0x115   : > { %1916 = vmatpush1.bf16.msra.mxu0 %v2519_v15  ;;  %1957 = vmatpush1.bf16.msra.mxu1 %v2521_v16  ;;  %v321_v15 = vld [vmem:[%s2954_s7 + $0x478] sm:$0xff]  ;;  %v2395_v16 = vcombine.low %v296_v3, %v304_v4  ;;  %v424_v4 = vld [vmem:[%s2954_s7 + $0x7b0] sm:$0xff] }
 0x116   : > { %1967 = vmatprep.subr.bf16.mxu0 %v2284_v17  ;;  %2008 = vmatprep.subr.bf16.mxu1 %v2286_v18  ;;  %v2397_v17 = vcombine.low %v297_v5, %v305_v6  ;;  %v2412_v18 = vcombine.high %v312_v11, %v320_v13  ;;  %v2414_v19 = vcombine.high %v313_v14, %v321_v15  ;;  %v432_v5 = vld [vmem:[%s2954_s7 + $0x7f0] sm:$0xff]  ;;  %v425_v6 = vld [vmem:[%s2954_s7 + $0x7b8] sm:$0xff] }
 0x118   : > { %1918 = vmatmul.mubr.bf16.vlgmr.msra.gmra.mrb[8].mxu0 %v3040_v12  ;;  %1959 = vmatmul.mubr.bf16.vlgmr.msra.gmra.mrb[8].mxu1 %v3040_v12 }
 0x119   : > { %1968 = vmatpush1.bf16.msra.mxu0 %v2283_v22  ;;  %2009 = vmatpush1.bf16.msra.mxu1 %v2285_v23  ;;  %v337_v22 = vld [vmem:[%s2954_s7 + $0x4f8] sm:$0xff]  ;;  %v2411_v23 = vcombine.low %v312_v11, %v320_v13  ;;  %v2523_v13 = vcombine.low %v424_v4, %v432_v5 }
 0x11a   : > { %1969 = vmatprep.subr.bf16.mxu0 %v2300_v24  ;;  %2010 = vmatprep.subr.bf16.mxu1 %v2302_v25  ;;  %v2413_v24 = vcombine.low %v313_v14, %v321_v15  ;;  %v2428_v25 = vcombine.high %v328_v20, %v336_v53  ;;  %v2430_v26 = vcombine.high %v329_v21, %v337_v22 }
 0x11b   : > { %1999 = vmatprep.mubr.bf16.mxu0 %v2994_v57  ;;  %2040 = vmatprep.mubr.bf16.mxu1 %v2994_v57  ;;  %v2333_v57 = vcombine.low %v233_v36, %v241_v37  ;;  %v368_v36 = vld [vmem:[%s2954_s7 + $0x5f0] sm:$0xff]  ;;  %v361_v37 = vld [vmem:[%s2954_s7 + $0x5b8] sm:$0xff] }
 0x11d   : > { %1970 = vmatpush1.bf16.msra.mxu0 %v2299_v30  ;;  %2011 = vmatpush1.bf16.msra.mxu1 %v2301_v31  ;;  %v353_v30 = vld [vmem:[%s2954_s7 + $0x578] sm:$0xff]  ;;  %v2427_v31 = vcombine.low %v328_v20, %v336_v53 }
 0x11e   : > { %1971 = vmatprep.subr.bf16.mxu0 %v2316_v32  ;;  %2012 = vmatprep.subr.bf16.mxu1 %v2318_v33  ;;  %v2429_v32 = vcombine.low %v329_v21, %v337_v22  ;;  %v2444_v33 = vcombine.high %v344_v27, %v352_v28  ;;  %v2446_v34 = vcombine.high %v345_v29, %v353_v30 }
 0x121   : > { %1972 = vmatpush1.bf16.msra.mxu0 %v2315_v38  ;;  %2013 = vmatpush1.bf16.msra.mxu1 %v2317_v39  ;;  %v369_v38 = vld [vmem:[%s2954_s7 + $0x5f8] sm:$0xff]  ;;  %v2443_v39 = vcombine.low %v344_v27, %v352_v28 }
 0x122   : > { %1973 = vmatprep.subr.bf16.mxu0 %v2332_v40  ;;  %2014 = vmatprep.subr.bf16.mxu1 %v2334_v41  ;;  %v2445_v40 = vcombine.low %v345_v29, %v353_v30  ;;  %v2460_v41 = vcombine.high %v360_v35, %v368_v36  ;;  %v2462_v42 = vcombine.high %v361_v37, %v369_v38 }
 0x125   : > { %1974 = vmatpush1.bf16.msra.mxu0 %v2331_v46  ;;  %2015 = vmatpush1.bf16.msra.mxu1 %v2333_v57  ;;  %v385_v46 = vld [vmem:[%s2954_s7 + $0x678] sm:$0xff]  ;;  %v2459_v57 = vcombine.low %v360_v35, %v368_v36 }
 0x126   : > { %1975 = vmatprep.subr.bf16.mxu0 %v2348_v47  ;;  %2016 = vmatprep.subr.bf16.mxu1 %v2350_v48  ;;  %v2461_v47 = vcombine.low %v361_v37, %v369_v38  ;;  %v2476_v48 = vcombine.high %v376_v43, %v384_v44  ;;  %v2478_v49 = vcombine.high %v377_v45, %v385_v46 }
 0x129   : > { %1976 = vmatpush1.bf16.msra.mxu0 %v2347_v54  ;;  %2017 = vmatpush1.bf16.msra.mxu1 %v2349_v55  ;;  %v401_v54 = vld [vmem:[%s2954_s7 + $0x6f8] sm:$0xff]  ;;  %v2475_v55 = vcombine.low %v376_v43, %v384_v44 }
 0x12a   : > { %1977 = vmatprep.subr.bf16.mxu0 %v2364_v56  ;;  %2018 = vmatprep.subr.bf16.mxu1 %v2366_v58  ;;  %v2477_v56 = vcombine.low %v377_v45, %v385_v46  ;;  %v2492_v58 = vcombine.high %v392_v50, %v400_v51  ;;  %v2494_v59 = vcombine.high %v393_v52, %v401_v54 }
 0x12d   : > { %1978 = vmatpush1.bf16.msra.mxu0 %v2363_v63  ;;  %2019 = vmatpush1.bf16.msra.mxu1 %v2365_v0  ;;  %v417_v63 = vld [vmem:[%s2954_s7 + $0x778] sm:$0xff]  ;;  %v2491_v0 = vcombine.low %v392_v50, %v400_v51 }
 0x12e   : > { %1979 = vmatprep.subr.bf16.mxu0 %v2380_v1  ;;  %2020 = vmatprep.subr.bf16.mxu1 %v2382_v2  ;;  %v2493_v1 = vcombine.low %v393_v52, %v401_v54  ;;  %v2508_v2 = vcombine.high %v408_v60, %v416_v61  ;;  %v2510_v3 = vcombine.high %v409_v62, %v417_v63 }
 0x131   : > { %1980 = vmatpush1.bf16.msra.mxu0 %v2379_v7  ;;  %2021 = vmatpush1.bf16.msra.mxu1 %v2381_v8  ;;  %v433_v7 = vld [vmem:[%s2954_s7 + $0x7f8] sm:$0xff]  ;;  %v2507_v8 = vcombine.low %v408_v60, %v416_v61 }
 0x132   : > { %1981 = vmatprep.subr.bf16.mxu0 %v2396_v9  ;;  %2022 = vmatprep.subr.bf16.mxu1 %v2398_v10  ;;  %v2509_v9 = vcombine.low %v409_v62, %v417_v63  ;;  %v2524_v10 = vcombine.high %v424_v4, %v432_v5  ;;  %v2526_v11 = vcombine.high %v425_v6, %v433_v7 }
 0x133   : > { %v2525_v14 = vcombine.low %v425_v6, %v433_v7 }
 0x135   : > { %1982 = vmatpush1.bf16.msra.mxu0 %v2395_v16  ;;  %2023 = vmatpush1.bf16.msra.mxu1 %v2397_v17 }
 0x136   : > { %1983 = vmatprep.subr.bf16.mxu0 %v2412_v18  ;;  %2024 = vmatprep.subr.bf16.mxu1 %v2414_v19 }
 0x139   : > { %1984 = vmatpush1.bf16.msra.mxu0 %v2411_v23  ;;  %2025 = vmatpush1.bf16.msra.mxu1 %v2413_v24 }
 0x13a   : > { %1985 = vmatprep.subr.bf16.mxu0 %v2428_v25  ;;  %2026 = vmatprep.subr.bf16.mxu1 %v2430_v26 }
 0x13d   : > { %1986 = vmatpush1.bf16.msra.mxu0 %v2427_v31  ;;  %2027 = vmatpush1.bf16.msra.mxu1 %v2429_v32 }
 0x13e   : > { %1987 = vmatprep.subr.bf16.mxu0 %v2444_v33  ;;  %2028 = vmatprep.subr.bf16.mxu1 %v2446_v34 }
 0x141   : > { %1988 = vmatpush1.bf16.msra.mxu0 %v2443_v39  ;;  %2029 = vmatpush1.bf16.msra.mxu1 %v2445_v40 }
 0x142   : > { %1989 = vmatprep.subr.bf16.mxu0 %v2460_v41  ;;  %2030 = vmatprep.subr.bf16.mxu1 %v2462_v42 }
 0x145   : > { %1990 = vmatpush1.bf16.msra.mxu0 %v2459_v57  ;;  %2031 = vmatpush1.bf16.msra.mxu1 %v2461_v47 }
 0x146   : > { %1991 = vmatprep.subr.bf16.mxu0 %v2476_v48  ;;  %2032 = vmatprep.subr.bf16.mxu1 %v2478_v49 }
 0x149   : > { %1992 = vmatpush1.bf16.msra.mxu0 %v2475_v55  ;;  %2033 = vmatpush1.bf16.msra.mxu1 %v2477_v56 }
 0x14a   : > { %1993 = vmatprep.subr.bf16.mxu0 %v2492_v58  ;;  %2034 = vmatprep.subr.bf16.mxu1 %v2494_v59 }
 0x14d   : > { %1994 = vmatpush1.bf16.msra.mxu0 %v2491_v0  ;;  %2035 = vmatpush1.bf16.msra.mxu1 %v2493_v1 }
 0x14e   : > { %1995 = vmatprep.subr.bf16.mxu0 %v2508_v2  ;;  %2036 = vmatprep.subr.bf16.mxu1 %v2510_v3 }
 0x151   : > { %1996 = vmatpush1.bf16.msra.mxu0 %v2507_v8  ;;  %2037 = vmatpush1.bf16.msra.mxu1 %v2509_v9 }
 0x152   : > { %1997 = vmatprep.subr.bf16.mxu0 %v2524_v10  ;;  %2038 = vmatprep.subr.bf16.mxu1 %v2526_v11 }
 0x155   : > { %1998 = vmatpush1.bf16.msra.mxu0 %v2523_v13  ;;  %2039 = vmatpush1.bf16.msra.mxu1 %v2525_v14 }
 0x158   : > { %2000 = vmatmul.mubr.bf16.vlgmr.msra.gmra.mrb[12].mxu0 %v3040_v12  ;;  %2041 = vmatmul.mubr.bf16.vlgmr.msra.gmra.mrb[12].mxu1 %v3040_v12 }
 0x16b   : > { %v1755_v15 = vpop.f32.mrb[0].mxu0  ;;  %v1796_v17 = vpop.f32.mrb[0].mxu1 }
 0x16c   : > { %v2049_v16 = vsub.f32 0.0, %v1755_v15  ;;  %v1757_v18 = vpop.f32.mrb[1].mxu0  ;;  %v2051_v19 = vsub.f32 0.0, %v1796_v17  ;;  %v1798_v53 = vpop.f32.mrb[1].mxu1 }
 0x16d   : > { %v2050_v20 = vsub.f32 0.0, %v1757_v18  ;;  %v1759_v21 = vpop.f32.mrb[2].mxu0  ;;  %v2052_v23 = vsub.f32 0.0, %v1798_v53  ;;  %v1800_v24 = vpop.f32.mrb[2].mxu1 }
 0x16e   : > { %v2065_v22 = vmul.f32 1.442695, %v2049_v16  ;;  %v1760_v25 = vpop.f32.mrb[3].mxu0  ;;  %v2069_v26 = vmul.f32 1.442695, %v2051_v19  ;;  %v1801_v28 = vpop.f32.mrb[3].mxu1 }
 0x16f   : > { %v2067_v27 = vmul.f32 1.442695, %v2050_v20  ;;  %v2071_v29 = vmul.f32 1.442695, %v2052_v23 }
 0x170   : > { %2596 = vpow2.f32 %v2065_v22 }
 0x171   : > { %2598 = vpow2.f32 %v2069_v26 }
 0x172   : > { %2600 = vpow2.f32 %v2067_v27 }
 0x173   : > { %2602 = vpow2.f32 %v2071_v29 }
 0x17a   : > { %v2597_v12 = vpop.eup %2596 }
 0x17b   : > { %v2599_v30 = vpop.eup %2598  ;;  %v2097_v31 = vadd.f32 1.0, %v2597_v12 }
 0x17c   : > { %v2601_v32 = vpop.eup %2600  ;;  %v2099_v33 = vadd.f32 1.0, %v2599_v30 }
 0x17d   : > { %v2603_v34 = vpop.eup %2602  ;;  %2604 = vrcp.f32 %v2097_v31  ;;  %v2098_v35 = vadd.f32 1.0, %v2601_v32 }
 0x17e   : > { %2606 = vrcp.f32 %v2099_v33  ;;  %v2100_v36 = vadd.f32 1.0, %v2603_v34 }
 0x17f   : > { %2608 = vrcp.f32 %v2098_v35 }
 0x180   : > { %2610 = vrcp.f32 %v2100_v36 }
 0x187   : > { %v2605_v37 = vpop.eup %2604 }
 0x188   : > { %v2607_v38 = vpop.eup %2606  ;;  %2145 = vst [vmem:[%s3243_s23] sm:$0xff] %v2605_v37 }
 0x189   : > { %v2609_v39 = vpop.eup %2608  ;;  %2147 = vst [vmem:[%s3243_s23 + $0x10] sm:$0xff] %v2607_v38 }
 0x18a   : > { %v2611_v40 = vpop.eup %2610  ;;  %2146 = vst [vmem:[%s3243_s23 + $0x8] sm:$0xff] %v2609_v39 }
 0x18b   : > { %2148 = vst [vmem:[%s3243_s23 + $0x18] sm:$0xff] %v2611_v40 }
 0x1ab   : > { %v1837_v41 = vpop.f32.mrb[4].mxu0  ;;  %v1878_v43 = vpop.f32.mrb[4].mxu1 }
 0x1ac   : > { %v2053_v42 = vsub.f32 0.0, %v1837_v41  ;;  %v1839_v44 = vpop.f32.mrb[5].mxu0  ;;  %v2055_v45 = vsub.f32 0.0, %v1878_v43  ;;  %v1880_v57 = vpop.f32.mrb[5].mxu1 }
 0x1ad   : > { %v2054_v46 = vsub.f32 0.0, %v1839_v44  ;;  %v1841_v47 = vpop.f32.mrb[6].mxu0  ;;  %v2056_v49 = vsub.f32 0.0, %v1880_v57  ;;  %v1882_v50 = vpop.f32.mrb[6].mxu1 }
 0x1ae   : > { %v2073_v48 = vmul.f32 1.442695, %v2053_v42  ;;  %v1842_v51 = vpop.f32.mrb[7].mxu0  ;;  %v2077_v52 = vmul.f32 1.442695, %v2055_v45  ;;  %v1883_v55 = vpop.f32.mrb[7].mxu1 }
 0x1af   : > { %v2075_v54 = vmul.f32 1.442695, %v2054_v46  ;;  %v2079_v56 = vmul.f32 1.442695, %v2056_v49 }
 0x1b0   : > { %2612 = vpow2.f32 %v2073_v48 }
 0x1b1   : > { %2614 = vpow2.f32 %v2077_v52 }
 0x1b2   : > { %2616 = vpow2.f32 %v2075_v54 }
 0x1b3   : > { %2618 = vpow2.f32 %v2079_v56 }
 0x1ba   : > { %v2613_v58 = vpop.eup %2612 }
 0x1bb   : > { %v2615_v59 = vpop.eup %2614  ;;  %v2101_v60 = vadd.f32 1.0, %v2613_v58 }
 0x1bc   : > { %v2617_v61 = vpop.eup %2616  ;;  %v2103_v62 = vadd.f32 1.0, %v2615_v59 }
 0x1bd   : > { %v2619_v63 = vpop.eup %2618  ;;  %2620 = vrcp.f32 %v2101_v60  ;;  %v2102_v0 = vadd.f32 1.0, %v2617_v61 }
 0x1be   : > { %2622 = vrcp.f32 %v2103_v62  ;;  %v2104_v1 = vadd.f32 1.0, %v2619_v63 }
 0x1bf   : > { %2624 = vrcp.f32 %v2102_v0 }
 0x1c0   : > { %2626 = vrcp.f32 %v2104_v1 }
 0x1c7   : > { %v2621_v2 = vpop.eup %2620 }
 0x1c8   : > { %v2623_v3 = vpop.eup %2622  ;;  %2149 = vst [vmem:[%s3243_s23 + $0x20] sm:$0xff] %v2621_v2 }
 0x1c9   : > { %v2625_v4 = vpop.eup %2624  ;;  %2151 = vst [vmem:[%s3243_s23 + $0x30] sm:$0xff] %v2623_v3 }
 0x1ca   : > { %v2627_v5 = vpop.eup %2626  ;;  %2150 = vst [vmem:[%s3243_s23 + $0x28] sm:$0xff] %v2625_v4 }
 0x1cb   : > { %2152 = vst [vmem:[%s3243_s23 + $0x38] sm:$0xff] %v2627_v5 }
 0x1eb   : > { %v1919_v6 = vpop.f32.mrb[8].mxu0  ;;  %v1960_v8 = vpop.f32.mrb[8].mxu1 }
 0x1ec   : > { %v2057_v7 = vsub.f32 0.0, %v1919_v6  ;;  %v1921_v9 = vpop.f32.mrb[9].mxu0  ;;  %v2059_v10 = vsub.f32 0.0, %v1960_v8  ;;  %v1962_v13 = vpop.f32.mrb[9].mxu1 }
 0x1ed   : > { %v2058_v11 = vsub.f32 0.0, %v1921_v9  ;;  %v1923_v14 = vpop.f32.mrb[10].mxu0  ;;  %v2060_v16 = vsub.f32 0.0, %v1962_v13  ;;  %v1964_v17 = vpop.f32.mrb[10].mxu1 }
 0x1ee   : > { %v2081_v15 = vmul.f32 1.442695, %v2057_v7  ;;  %v1924_v18 = vpop.f32.mrb[11].mxu0  ;;  %v2085_v19 = vmul.f32 1.442695, %v2059_v10  ;;  %v1965_v53 = vpop.f32.mrb[11].mxu1 }
 0x1ef   : > { %v2083_v20 = vmul.f32 1.442695, %v2058_v11  ;;  %v2087_v21 = vmul.f32 1.442695, %v2060_v16 }
 0x1f0   : > { %2628 = vpow2.f32 %v2081_v15 }
 0x1f1   : > { %2630 = vpow2.f32 %v2085_v19 }
 0x1f2   : > { %2632 = vpow2.f32 %v2083_v20 }
 0x1f3   : > { %2634 = vpow2.f32 %v2087_v21 }
 0x1fa   : > { %v2629_v22 = vpop.eup %2628 }
 0x1fb   : > { %v2631_v23 = vpop.eup %2630  ;;  %v2105_v24 = vadd.f32 1.0, %v2629_v22 }
 0x1fc   : > { %v2633_v25 = vpop.eup %2632  ;;  %v2107_v26 = vadd.f32 1.0, %v2631_v23 }
 0x1fd   : > { %v2635_v27 = vpop.eup %2634  ;;  %2636 = vrcp.f32 %v2105_v24  ;;  %v2106_v28 = vadd.f32 1.0, %v2633_v25 }
 0x1fe   : > { %2638 = vrcp.f32 %v2107_v26  ;;  %v2108_v29 = vadd.f32 1.0, %v2635_v27 }
 0x1ff   : > { %2640 = vrcp.f32 %v2106_v28 }
 0x200   : > { %2642 = vrcp.f32 %v2108_v29 }
 0x207   : > { %v2637_v12 = vpop.eup %2636 }
 0x208   : > { %v2639_v30 = vpop.eup %2638  ;;  %2153 = vst [vmem:[%s3243_s23 + $0x40] sm:$0xff] %v2637_v12 }
 0x209   : > { %v2641_v31 = vpop.eup %2640  ;;  %2155 = vst [vmem:[%s3243_s23 + $0x50] sm:$0xff] %v2639_v30 }
 0x20a   : > { %v2643_v32 = vpop.eup %2642  ;;  %2154 = vst [vmem:[%s3243_s23 + $0x48] sm:$0xff] %v2641_v31 }
 0x20b   : > { %2156 = vst [vmem:[%s3243_s23 + $0x58] sm:$0xff] %v2643_v32 }
 0x22b   : > { %v2001_v33 = vpop.f32.mrb[12].mxu0  ;;  %v2042_v35 = vpop.f32.mrb[12].mxu1 }
 0x22c   : > { %v2061_v34 = vsub.f32 0.0, %v2001_v33  ;;  %v2003_v36 = vpop.f32.mrb[13].mxu0  ;;  %v2063_v37 = vsub.f32 0.0, %v2042_v35  ;;  %v2044_v39 = vpop.f32.mrb[13].mxu1 }
 0x22d   : > { %v2062_v38 = vsub.f32 0.0, %v2003_v36  ;;  %v2005_v40 = vpop.f32.mrb[14].mxu0  ;;  %v2064_v42 = vsub.f32 0.0, %v2044_v39  ;;  %v2046_v43 = vpop.f32.mrb[14].mxu1 }
 0x22e   : > { %v2089_v41 = vmul.f32 1.442695, %v2061_v34  ;;  %v2006_v44 = vpop.f32.mrb[15].mxu0  ;;  %v2093_v45 = vmul.f32 1.442695, %v2063_v37  ;;  %v2047_v57 = vpop.f32.mrb[15].mxu1 }
 0x22f   : > { %v2091_v46 = vmul.f32 1.442695, %v2062_v38  ;;  %v2095_v47 = vmul.f32 1.442695, %v2064_v42 }
 0x230   : > { %2644 = vpow2.f32 %v2089_v41 }
 0x231   : > { %2646 = vpow2.f32 %v2093_v45 }
 0x232   : > { %2648 = vpow2.f32 %v2091_v46 }
 0x233   : > { %2650 = vpow2.f32 %v2095_v47 }
 0x23a   : > { %v2645_v48 = vpop.eup %2644 }
 0x23b   : > { %v2647_v49 = vpop.eup %2646  ;;  %v2109_v50 = vadd.f32 1.0, %v2645_v48 }
 0x23c   : > { %v2649_v51 = vpop.eup %2648  ;;  %v2111_v52 = vadd.f32 1.0, %v2647_v49 }
 0x23d   : > { %v2651_v54 = vpop.eup %2650  ;;  %2652 = vrcp.f32 %v2109_v50  ;;  %v2110_v55 = vadd.f32 1.0, %v2649_v51 }
 0x23e   : > { %2654 = vrcp.f32 %v2111_v52  ;;  %v2112_v56 = vadd.f32 1.0, %v2651_v54 }
 0x23f   : > { %2656 = vrcp.f32 %v2110_v55 }
 0x240   : > { %2658 = vrcp.f32 %v2112_v56 }
 0x247   : > { %v2653_v58 = vpop.eup %2652 }
 0x248   : > { %v2655_v59 = vpop.eup %2654  ;;  %2157 = vst [vmem:[%s3243_s23 + $0x60] sm:$0xff] %v2653_v58 }
 0x249   : > { %v2657_v60 = vpop.eup %2656  ;;  %2159 = vst [vmem:[%s3243_s23 + $0x70] sm:$0xff] %v2655_v59 }
 0x24a   : > { %v2659_v61 = vpop.eup %2658  ;;  %2158 = vst [vmem:[%s3243_s23 + $0x68] sm:$0xff] %v2657_v60 }
 0x24b   : > { %2160 = vst [vmem:[%s3243_s23 + $0x78] sm:$0xff] %v2659_v61 }
 0x24c   : > { %2731 = shalt.err (!%p2728_p12)
}
 0x24d   : > { %s2732_s19 = scalar_lea.hbm %s3264_s8, 2048  ;;  %s2736_s4 = scalar_lea.hbm %s3311_s2, 8192 }
 0x24e   : > { %p2733_p0 = scmp.ne.s32.totalorder %s3264_s8, %s2732_s19  ;;  %p2737_p13 = scmp.lt.u32.totalorder %s3264_s8, %s3311_s2 }
 0x24f   : > { %p2738_p7 = scmp.lt.u32.totalorder %s2736_s4, %s2732_s19  ;;  %p2740_p8 = scmp.lt.u32.totalorder %s2732_s19, %s3264_s8 }
 0x250   : > { %p2734_p3 = pnand %p2733_p0, %p3329_p9 }
 0x251   : > { %p2739_p6 = por %p2738_p7, %p2737_p13 }
 0x252   : > { %p2735_p11 = pneg %p2734_p3 }
 0x253   : > { %p2741_p10 = por %p2740_p8, %p2739_p6 }
 0x255   : > { %p2742_p5 = pnand %p2741_p10, %p2735_p11 }
 0x257   : > { %2745 = shalt.err (!%p2742_p5)
}
 0x258   : > { %2540 = dma.vmem_to_hbm [thread:$0]  (%p3329_p9), %s3266_s30, 2048, %s3264_s8, %s2162_s13  }
 0x259 PF: > { %p2557_p1 = scmp.ge.s32.totalorder %s2788_s12, 2  ;;  %s2188_s29 = sand.u32 1, %s2776_s9  }
 0x25a   : > { %p3330_p2 = scmp.ne.s32.totalorder %s3320_s22, 0  ;;  %s2189_s7 = scalar_lea.sflag [#allocation4], %s2188_s29 }
 0x25c   : > { %p2551_p4 = pnand %p2557_p1, %p3330_p2 }
 0x25e   : > { %2771 = dma.done.wait (!%p2551_p4), %s2189_s7, 2048  }
 0x25f   : > { %2773 = vsyncadd (!%p2551_p4), %s2189_s7, 4294965248  ;;  %p16_p12 = scmp.ge.s32.totalorder %s2836_s15, 6   ;;  %s3331_s9 = smov %s2780_s10 }
 0x260   : > { %s3332_s10 = smov %s2784_s11  ;;  %s3333_s11 = smov %s2848_s18 }
 0x261   : > { %s3334_s12 = smov %s2836_s15  ;;  %18 = sbr.rel (!%p16_p12) target bundleno = 6 (0x6), region = 78 }
 0x268   :  { %2194 = vsyncpa [#allocation3], 1 }
 0x269   :  { %2196 = vsyncpa [#allocation3 + $0x1], 1 }
 0x26a   :  { %2197 = vsyncpa [#allocation6], 1 }
 0x26b   :  { %2199 = vsyncpa [#allocation6 + $0x1], 1 }
 0x26c   :  { %2200 = vsyncpa [#allocation4], 1 }
 0x26d   :  { %2202 = vsyncpa [#allocation4 + $0x1], 1 }

</bundles_post_ra>
